<compile_context>
chip_gen: v7x
topology: tpu7x:2x2x1
jax: 0.10.0
libtpu: 0.0.40
codegen_flags: <defaults>
</compile_context>

<pallas_src>
import functools

import jax
import jax.numpy as jnp
import numpy as np
from jax.experimental import pallas as pl
from jax.experimental.pallas import tpu as pltpu


def _round_up(x, m):
    return ((x + m - 1) // m) * m


# ------------------------------ fused kernel --------------------------------


def _masker_fused_kernel(x_ref, w_ref, b_ref, wout_ref, bout_ref,
                         ph_ref, q_ref, mask_ref, o_ref,
                         buf0, buf1, col_ref,
                         *, H, W, C, num_layers, lead, lflat, act_dtype):
    """One image per grid step; whole conv stack + adaptive pool fused.

    x_ref:    (1, C, lflat)   bf16 pre-padded channel-major flattened image
    w_ref:    (L, C, 9C)      bf16 transposed im2col conv weights
    b_ref:    (L, C, 1)       f32 biases
    wout_ref: (1, 9C)         bf16 output-conv weight (Cout=1)
    bout_ref: (1, 1)          f32
    ph_ref:   (h_out, H*Wp)   f32 row-pooling weights over the padded-flat axis
    q_ref:    (H*Wp, w_out)   f32 col-pooling weights (0 on wrap columns)
    mask_ref: (1, H*Wp)       f32 1.0 on valid columns, 0.0 on wrap columns
    o_ref:    (1, h_out, w_out) f32
    buf0/1:   (C, lflat)      bf16 ping-pong activation buffers
    col_ref:  (9C, H*Wp)      bf16 im2col slab scratch
    """
    Wp = W + 2
    TM = H * Wp                       # flat spatial extent of one layer output
    IST = lead + Wp + 1               # 128-lane-aligned interior start

    # Zero only the head/tail strips that the per-layer masked stores never
    # touch (the interior + wrap-halo columns are fully rewritten each layer).
    zero_head = jnp.zeros((C, IST), act_dtype)
    zero_tail = jnp.zeros((C, lflat - IST - TM), act_dtype)
    for b in (buf0, buf1):
        b[:, 0:IST] = zero_head
        b[:, IST + TM:lflat] = zero_tail

    def build_cols(src):
        # Transposed im2col: 9 contiguous (C, TM) slabs stacked along sublanes.
        for k in range(9):
            dy, dx = k // 3, k % 3
            off = lead + dy * Wp + dx
            col_ref[k * C:(k + 1) * C, :] = src[:, off:off + TM]

    def conv_layer(src, dst, w_l, b_l):
        build_cols(src)
        acc = jnp.dot(w_l, col_ref[...],
                      preferred_element_type=jnp.float32)         # (C, TM) f32
        # bias + ReLU in f32; mask zeroes the wrap-halo columns so the SAME
        # zero padding of the next layer is rewritten for free.
        act = jnp.maximum(acc + b_l, 0.0) * mask_ref[...]
        dst[:, IST:IST + TM] = act.astype(act_dtype)

    bufs = (buf0, buf1)
    conv_layer(x_ref.at[0], bufs[0], w_ref[0], b_ref[0])
    for l in range(1, num_layers):
        conv_layer(bufs[(l - 1) % 2], bufs[l % 2], w_ref[l], b_ref[l])

    # ---- output conv (Cout=1) + exact AdaptiveAvgPool2d --------------------
    build_cols(bufs[(num_layers - 1) % 2])
    lf = jnp.dot(wout_ref[...], col_ref[...],
                 preferred_element_type=jnp.float32)              # (1, TM) f32
    weighted = ph_ref[...] * lf                                   # (h_out, TM)
    pooled = jnp.dot(weighted, q_ref[...],
                     preferred_element_type=jnp.float32)          # (h_out, w_out)
    # bias commutes with the pooling (pool weights are row-stochastic).
    o_ref[0] = pooled + bout_ref[...]


# ------------------------------ wrapper / glue -------------------------------


def adaptive_pool_matrix(in_size, out_size):
    """Row-stochastic (out_size, in_size) matrix matching AdaptiveAvgPool bins."""
    P = np.zeros((out_size, in_size), np.float32)
    for i in range(out_size):
        s = (i * in_size) // out_size
        e = -((-(i + 1) * in_size) // out_size)   # ceil
        P[i, s:e] = 1.0 / (e - s)
    return P


def masker_forward(x_nchw, params, output_patch_size=16,
                   mxu_dtype=jnp.bfloat16):
    """Pallas implementation of Masker.forward (output_channels = 1).

    x_nchw: (N, C_in, H, W).  Returns (N, 1, h_out, w_out) coarse logits.
    """
    x_nchw = x_nchw.astype(jnp.float32)
    N, Cin, H, W = x_nchw.shape
    C = params["w_in"].shape[-1]
    assert Cin <= C
    h_out = max(1, H // output_patch_size)
    w_out = max(1, W // output_patch_size)

    Hp, Wp = H + 2, W + 2
    TM = H * Wp                                   # flat per-layer output extent
    lead = (-(Wp + 1)) % 128                      # interior start lane-aligned
    core = Hp * Wp
    lflat = _round_up(lead + core + 2, 128)       # +2: dy=dx=2 im2col over-read

    # ---- input prep: channels padded to C, SAME spatial halo, channel-major,
    #      flattened spatial axis with 128-aligned interior, bf16 -------------
    xp = jnp.pad(x_nchw, ((0, 0), (0, C - Cin), (1, 1), (1, 1)))   # (N,C,Hp,Wp)
    xf = xp.reshape(N, C, core)
    xf = jnp.pad(xf, ((0, 0), (0, 0), (lead, lflat - lead - core)))
    x_prep = xf.astype(mxu_dtype)                                   # (N,C,lflat)

    # ---- weights: transposed im2col form (C_out rows x 9*C_in cols) ---------
    w_in = jnp.pad(params["w_in"], ((0, 0), (0, 0), (0, C - Cin), (0, 0)))
    w_list = [w_in] + [w for (w, _) in params["blocks"]]
    b_list = [params["b_in"]] + [b for (_, b) in params["blocks"]]
    L = len(w_list)
    w_stack = jnp.stack([w.reshape(9 * C, C).T
                         for w in w_list]).astype(mxu_dtype)        # (L, C, 9C)
    b_stack = jnp.stack([b.reshape(C, 1)
                         for b in b_list]).astype(jnp.float32)      # (L, C, 1)
    w_out_t = params["w_out"].reshape(9 * C, 1).T.astype(mxu_dtype)  # (1, 9C)
    b_out = params["b_out"].reshape(1, 1).astype(jnp.float32)

    # ---- exact AdaptiveAvgPool2d over the padded-flat spatial axis ----------
    ph = adaptive_pool_matrix(H, h_out)                   # (h_out, H)
    pw = adaptive_pool_matrix(W, w_out)                   # (w_out, W)
    ph_flat = np.repeat(ph, Wp, axis=1)                   # (h_out, H*Wp)
    cols = np.tile(np.arange(Wp), H)                      # flat pos -> column
    valid = cols < W
    q_pad = np.zeros((TM, w_out), np.float32)
    q_pad[valid, :] = pw.T[cols[valid], :]                # 0 on wrap columns
    mask = valid.astype(np.float32)[None, :]              # (1, H*Wp)

    kern = functools.partial(
        _masker_fused_kernel, H=H, W=W, C=C, num_layers=L,
        lead=lead, lflat=lflat, act_dtype=mxu_dtype)

    coarse = pl.pallas_call(
        kern,
        out_shape=jax.ShapeDtypeStruct((N, h_out, w_out), jnp.float32),
        grid=(N,),
        in_specs=[
            pl.BlockSpec((1, C, lflat), lambda n: (n, 0, 0)),
            pl.BlockSpec((L, C, 9 * C), lambda n: (0, 0, 0)),
            pl.BlockSpec((L, C, 1), lambda n: (0, 0, 0)),
            pl.BlockSpec((1, 9 * C), lambda n: (0, 0)),
            pl.BlockSpec((1, 1), lambda n: (0, 0)),
            pl.BlockSpec((h_out, TM), lambda n: (0, 0)),
            pl.BlockSpec((TM, w_out), lambda n: (0, 0)),
            pl.BlockSpec((1, TM), lambda n: (0, 0)),
        ],
        out_specs=pl.BlockSpec((1, h_out, w_out), lambda n: (n, 0, 0)),
        scratch_shapes=[
            pltpu.VMEM((C, lflat), mxu_dtype),            # ping
            pltpu.VMEM((C, lflat), mxu_dtype),            # pong
            pltpu.VMEM((9 * C, TM), mxu_dtype),           # im2col slab
        ],
        compiler_params=pltpu.CompilerParams(
            dimension_semantics=("parallel",)),
    )(x_prep, w_stack, b_stack, w_out_t, b_out,
      jnp.asarray(ph_flat), jnp.asarray(q_pad), jnp.asarray(mask))

    return coarse[:, None, :, :]                  # NCHW: (N, 1, h_out, w_out)


# ------------------------------ reference (JAX) ------------------------------


def ref_forward(x_nchw, params, output_patch_size=16, mxu_dtype=jnp.float32):
    """Reference forward.  mxu_dtype=bf16 reproduces the kernel's bf16 operand
    rounding (f32 accumulation); mxu_dtype=f32 is the full-precision model."""
    x = jnp.transpose(x_nchw, (0, 2, 3, 1)).astype(jnp.float32)
    hi_prec = (mxu_dtype == jnp.float32)

    def conv(x, w, b):
        y = jax.lax.conv_general_dilated(
            x.astype(mxu_dtype), w.astype(mxu_dtype),
            window_strides=(1, 1), padding="SAME",
            dimension_numbers=("NHWC", "HWIO", "NHWC"),
            preferred_element_type=jnp.float32,
            precision=jax.lax.Precision.HIGHEST if hi_prec else None)
        return y + b

    x = jax.nn.relu(conv(x, params["w_in"], params["b_in"]))
    for w, b in params["blocks"]:
        x = jax.nn.relu(conv(x, w, b))
    logits = conv(x, params["w_out"], params["b_out"])          # (N,H,W,1)

    N, H, W, _ = logits.shape
    h_out = max(1, H // output_patch_size)
    w_out = max(1, W // output_patch_size)
    ph = jnp.asarray(adaptive_pool_matrix(H, h_out))
    pw = jnp.asarray(adaptive_pool_matrix(W, w_out))
    pooled = jnp.einsum("oh,nhwc,pw->nopc", ph, logits, pw,
                        precision=jax.lax.Precision.HIGHEST)
    return jnp.transpose(pooled, (0, 3, 1, 2))                  # NCHW


# ---------------------------------- params -----------------------------------


def init_params(key, in_channels=3, base_channels=32, num_blocks=4,
                output_channels=1):
    n_convs = num_blocks + 2
    keys = jax.random.split(key, 2 * n_convs)

    def conv_init(kw, kb, cin, cout):
        fan_in = 9.0 * cin
        w = jax.random.normal(kw, (3, 3, cin, cout), jnp.float32) / jnp.sqrt(fan_in)
        b = 0.01 * jax.random.normal(kb, (cout,), jnp.float32)
        return w, b

    params = {}
    params["w_in"], params["b_in"] = conv_init(keys[0], keys[1],
                                               in_channels, base_channels)
    blocks = []
    for i in range(num_blocks):
        w, b = conv_init(keys[2 + 2 * i], keys[3 + 2 * i],
                         base_channels, base_channels)
        blocks.append((w, b))
    params["blocks"] = blocks
    params["w_out"], params["b_out"] = conv_init(keys[-2], keys[-1],
                                                 base_channels, output_channels)
    return params


# ----------------------------------- main -------------------------------------


if __name__ == "__main__":
    key = jax.random.PRNGKey(0)
    k_x, k_p = jax.random.split(key)

    N, C_in, H, W = 2, 3, 32, 32          # coarse mask: (2, 1, 2, 2)
    patch = 16
    x = jax.random.normal(k_x, (N, C_in, H, W), jnp.float32)
    params = init_params(k_p, in_channels=C_in, base_channels=32, num_blocks=4,
                         output_channels=1)

    out = masker_forward(x, params, output_patch_size=patch)   # bf16 MXU/act
    out = jax.block_until_ready(out)
    assert out.shape == (N, 1, H // patch, W // patch), out.shape

    # Dtype-matched check (bf16 operand rounding, f32 accumulation) -- validates
    # the kernel math; small residual from accumulation-order differences.
    ref_m = ref_forward(x, params, output_patch_size=patch,
                        mxu_dtype=jnp.bfloat16)
    err_m = float(jnp.max(jnp.abs(out - ref_m)))
    assert jnp.allclose(out, ref_m, atol=1e-2, rtol=1e-2), (
        f"dtype-matched max abs err {err_m}")

    # Loose end-to-end check vs. the full f32 reference (bf16 error budget).
    ref_f = ref_forward(x, params, output_patch_size=patch,
                        mxu_dtype=jnp.float32)
    err_f = float(jnp.max(jnp.abs(out - ref_f)))
    assert jnp.allclose(out, ref_f, atol=8e-2, rtol=8e-2), (
        f"f32-reference max abs err {err_f}")

    print("KERNEL_OK")
</pallas_src>

<mosaic_0001>
module attributes {stable_mosaic.version = 11 : i64} {
  func.func @_masker_fused_kernel(%arg0: i32, %arg1: memref<1x32x1280xbf16, #tpu.memory_space<vmem>>, %arg2: memref<5x32x288xbf16, #tpu.memory_space<vmem>>, %arg3: memref<5x32x1xf32, #tpu.memory_space<vmem>>, %arg4: memref<1x288xbf16, #tpu.memory_space<vmem>>, %arg5: memref<1x1xf32, #tpu.memory_space<vmem>>, %arg6: memref<2x1088xf32, #tpu.memory_space<vmem>>, %arg7: memref<1088x2xf32, #tpu.memory_space<vmem>>, %arg8: memref<1x1088xf32, #tpu.memory_space<vmem>>, %arg9: memref<1x2x2xf32, #tpu.memory_space<vmem>>, %arg10: memref<32x1280xbf16, #tpu.memory_space<vmem>>, %arg11: memref<32x1280xbf16, #tpu.memory_space<vmem>>, %arg12: memref<288x1088xbf16, #tpu.memory_space<vmem>>) attributes {dimension_semantics = [#tpu.dimension_semantics<parallel>], iteration_bounds = array<i64: 2>, scalar_prefetch = 0 : i64, scratch_operands = 3 : i64, tpu.core_type = #tpu.core_type<tc>, window_params = [{transform_indices = @transform_0, window_bounds = array<i64: 1, 32, 1280>}, {pipeline_mode = #tpu.pipeline_mode<synchronous>, transform_indices = @transform_1, window_bounds = array<i64: 5, 32, 288>}, {pipeline_mode = #tpu.pipeline_mode<synchronous>, transform_indices = @transform_2, window_bounds = array<i64: 5, 32, 1>}, {pipeline_mode = #tpu.pipeline_mode<synchronous>, transform_indices = @transform_3, window_bounds = array<i64: 1, 288>}, {pipeline_mode = #tpu.pipeline_mode<synchronous>, transform_indices = @transform_4, window_bounds = array<i64: 1, 1>}, {pipeline_mode = #tpu.pipeline_mode<synchronous>, transform_indices = @transform_5, window_bounds = array<i64: 2, 1088>}, {pipeline_mode = #tpu.pipeline_mode<synchronous>, transform_indices = @transform_6, window_bounds = array<i64: 1088, 2>}, {pipeline_mode = #tpu.pipeline_mode<synchronous>, transform_indices = @transform_7, window_bounds = array<i64: 1, 1088>}, {transform_indices = @transform_8, window_bounds = array<i64: 1, 2, 2>}]} {
    %cst = arith.constant 0.000000e+00 : bf16
    %0 = vector.broadcast %cst : bf16 to vector<32x128xbf16>
    %cst_0 = arith.constant 0.000000e+00 : bf16
    %1 = vector.broadcast %cst_0 : bf16 to vector<32x64xbf16>
    %c0 = arith.constant 0 : index
    %c0_1 = arith.constant 0 : index
    %2 = vector.load %arg10[%c0, %c0_1] : memref<32x1280xbf16, #tpu.memory_space<vmem>>, vector<32x128xbf16>
    tpu.vector_store %arg10[%c0, %c0_1], %0 {strides = array<i32>} : memref<32x1280xbf16, #tpu.memory_space<vmem>>, vector<32x128xbf16>,
    %c0_2 = arith.constant 0 : index
    %c1216 = arith.constant 1216 : index
    %3 = vector.load %arg10[%c0_2, %c1216] : memref<32x1280xbf16, #tpu.memory_space<vmem>>, vector<32x64xbf16>
    tpu.vector_store %arg10[%c0_2, %c1216], %1 {strides = array<i32>} : memref<32x1280xbf16, #tpu.memory_space<vmem>>, vector<32x64xbf16>,
    %c0_3 = arith.constant 0 : index
    %c0_4 = arith.constant 0 : index
    %4 = vector.load %arg11[%c0_3, %c0_4] : memref<32x1280xbf16, #tpu.memory_space<vmem>>, vector<32x128xbf16>
    tpu.vector_store %arg11[%c0_3, %c0_4], %0 {strides = array<i32>} : memref<32x1280xbf16, #tpu.memory_space<vmem>>, vector<32x128xbf16>,
    %c0_5 = arith.constant 0 : index
    %c1216_6 = arith.constant 1216 : index
    %5 = vector.load %arg11[%c0_5, %c1216_6] : memref<32x1280xbf16, #tpu.memory_space<vmem>>, vector<32x64xbf16>
    tpu.vector_store %arg11[%c0_5, %c1216_6], %1 {strides = array<i32>} : memref<32x1280xbf16, #tpu.memory_space<vmem>>, vector<32x64xbf16>,
    %c0_7 = arith.constant 0 : index
    %c0_8 = arith.constant 0 : index
    %c0_9 = arith.constant 0 : index
    %6 = vector.load %arg2[%c0_7, %c0_8, %c0_9] : memref<5x32x288xbf16, #tpu.memory_space<vmem>>, vector<1x32x288xbf16>
    %7 = vector.shape_cast %6 : vector<1x32x288xbf16> to vector<32x288xbf16>
    %c0_10 = arith.constant 0 : index
    %c0_11 = arith.constant 0 : index
    %c0_12 = arith.constant 0 : index
    %8 = vector.load %arg3[%c0_10, %c0_11, %c0_12] : memref<5x32x1xf32, #tpu.memory_space<vmem>>, vector<1x32x1xf32>
    %9 = vector.shape_cast %8 : vector<1x32x1xf32> to vector<32x1xf32>
    %c0_i32 = arith.constant 0 : i32
    %c0_i32_13 = arith.constant 0 : i32
    %c0_i32_14 = arith.constant 0 : i32
    %10 = tpu.memref_slice %arg1[%c0_i32, %c0_i32_13, %c0_i32_14] : memref<1x32x1280xbf16, #tpu.memory_space<vmem>> -> memref<1x32x1280xbf16, #tpu.memory_space<vmem>>
    %11 = tpu.memref_squeeze %10 : memref<1x32x1280xbf16, #tpu.memory_space<vmem>> -> memref<32x1280xbf16, #tpu.memory_space<vmem>>
    %c0_15 = arith.constant 0 : index
    %c93 = arith.constant 93 : index
    %12 = vector.load %11[%c0_15, %c93] : memref<32x1280xbf16, #tpu.memory_space<vmem>>, vector<32x1088xbf16>
    %c0_16 = arith.constant 0 : index
    %c0_17 = arith.constant 0 : index
    %13 = vector.load %arg12[%c0_16, %c0_17] : memref<288x1088xbf16, #tpu.memory_space<vmem>>, vector<32x1088xbf16>
    tpu.vector_store %arg12[%c0_16, %c0_17], %12 {strides = array<i32>} : memref<288x1088xbf16, #tpu.memory_space<vmem>>, vector<32x1088xbf16>,
    %c0_i32_18 = arith.constant 0 : i32
    %c0_i32_19 = arith.constant 0 : i32
    %c0_i32_20 = arith.constant 0 : i32
    %14 = tpu.memref_slice %arg1[%c0_i32_18, %c0_i32_19, %c0_i32_20] : memref<1x32x1280xbf16, #tpu.memory_space<vmem>> -> memref<1x32x1280xbf16, #tpu.memory_space<vmem>>
    %15 = tpu.memref_squeeze %14 : memref<1x32x1280xbf16, #tpu.memory_space<vmem>> -> memref<32x1280xbf16, #tpu.memory_space<vmem>>
    %c0_21 = arith.constant 0 : index
    %c94 = arith.constant 94 : index
    %16 = vector.load %15[%c0_21, %c94] : memref<32x1280xbf16, #tpu.memory_space<vmem>>, vector<32x1088xbf16>
    %c32 = arith.constant 32 : index
    %c0_22 = arith.constant 0 : index
    %17 = vector.load %arg12[%c32, %c0_22] : memref<288x1088xbf16, #tpu.memory_space<vmem>>, vector<32x1088xbf16>
    tpu.vector_store %arg12[%c32, %c0_22], %16 {strides = array<i32>} : memref<288x1088xbf16, #tpu.memory_space<vmem>>, vector<32x1088xbf16>,
    %c0_i32_23 = arith.constant 0 : i32
    %c0_i32_24 = arith.constant 0 : i32
    %c0_i32_25 = arith.constant 0 : i32
    %18 = tpu.memref_slice %arg1[%c0_i32_23, %c0_i32_24, %c0_i32_25] : memref<1x32x1280xbf16, #tpu.memory_space<vmem>> -> memref<1x32x1280xbf16, #tpu.memory_space<vmem>>
    %19 = tpu.memref_squeeze %18 : memref<1x32x1280xbf16, #tpu.memory_space<vmem>> -> memref<32x1280xbf16, #tpu.memory_space<vmem>>
    %c0_26 = arith.constant 0 : index
    %c95 = arith.constant 95 : index
    %20 = vector.load %19[%c0_26, %c95] : memref<32x1280xbf16, #tpu.memory_space<vmem>>, vector<32x1088xbf16>
    %c64 = arith.constant 64 : index
    %c0_27 = arith.constant 0 : index
    %21 = vector.load %arg12[%c64, %c0_27] : memref<288x1088xbf16, #tpu.memory_space<vmem>>, vector<32x1088xbf16>
    tpu.vector_store %arg12[%c64, %c0_27], %20 {strides = array<i32>} : memref<288x1088xbf16, #tpu.memory_space<vmem>>, vector<32x1088xbf16>,
    %c0_i32_28 = arith.constant 0 : i32
    %c0_i32_29 = arith.constant 0 : i32
    %c0_i32_30 = arith.constant 0 : i32
    %22 = tpu.memref_slice %arg1[%c0_i32_28, %c0_i32_29, %c0_i32_30] : memref<1x32x1280xbf16, #tpu.memory_space<vmem>> -> memref<1x32x1280xbf16, #tpu.memory_space<vmem>>
    %23 = tpu.memref_squeeze %22 : memref<1x32x1280xbf16, #tpu.memory_space<vmem>> -> memref<32x1280xbf16, #tpu.memory_space<vmem>>
    %c0_31 = arith.constant 0 : index
    %c127 = arith.constant 127 : index
    %24 = vector.load %23[%c0_31, %c127] : memref<32x1280xbf16, #tpu.memory_space<vmem>>, vector<32x1088xbf16>
    %c96 = arith.constant 96 : index
    %c0_32 = arith.constant 0 : index
    %25 = vector.load %arg12[%c96, %c0_32] : memref<288x1088xbf16, #tpu.memory_space<vmem>>, vector<32x1088xbf16>
    tpu.vector_store %arg12[%c96, %c0_32], %24 {strides = array<i32>} : memref<288x1088xbf16, #tpu.memory_space<vmem>>, vector<32x1088xbf16>,
    %c0_i32_33 = arith.constant 0 : i32
    %c0_i32_34 = arith.constant 0 : i32
    %c0_i32_35 = arith.constant 0 : i32
    %26 = tpu.memref_slice %arg1[%c0_i32_33, %c0_i32_34, %c0_i32_35] : memref<1x32x1280xbf16, #tpu.memory_space<vmem>> -> memref<1x32x1280xbf16, #tpu.memory_space<vmem>>
    %27 = tpu.memref_squeeze %26 : memref<1x32x1280xbf16, #tpu.memory_space<vmem>> -> memref<32x1280xbf16, #tpu.memory_space<vmem>>
    %c0_36 = arith.constant 0 : index
    %c128 = arith.constant 128 : index
    %28 = vector.load %27[%c0_36, %c128] : memref<32x1280xbf16, #tpu.memory_space<vmem>>, vector<32x1088xbf16>
    %c128_37 = arith.constant 128 : index
    %c0_38 = arith.constant 0 : index
    %29 = vector.load %arg12[%c128_37, %c0_38] : memref<288x1088xbf16, #tpu.memory_space<vmem>>, vector<32x1088xbf16>
    tpu.vector_store %arg12[%c128_37, %c0_38], %28 {strides = array<i32>} : memref<288x1088xbf16, #tpu.memory_space<vmem>>, vector<32x1088xbf16>,
    %c0_i32_39 = arith.constant 0 : i32
    %c0_i32_40 = arith.constant 0 : i32
    %c0_i32_41 = arith.constant 0 : i32
    %30 = tpu.memref_slice %arg1[%c0_i32_39, %c0_i32_40, %c0_i32_41] : memref<1x32x1280xbf16, #tpu.memory_space<vmem>> -> memref<1x32x1280xbf16, #tpu.memory_space<vmem>>
    %31 = tpu.memref_squeeze %30 : memref<1x32x1280xbf16, #tpu.memory_space<vmem>> -> memref<32x1280xbf16, #tpu.memory_space<vmem>>
    %c0_42 = arith.constant 0 : index
    %c129 = arith.constant 129 : index
    %32 = vector.load %31[%c0_42, %c129] : memref<32x1280xbf16, #tpu.memory_space<vmem>>, vector<32x1088xbf16>
    %c160 = arith.constant 160 : index
    %c0_43 = arith.constant 0 : index
    %33 = vector.load %arg12[%c160, %c0_43] : memref<288x1088xbf16, #tpu.memory_space<vmem>>, vector<32x1088xbf16>
    tpu.vector_store %arg12[%c160, %c0_43], %32 {strides = array<i32>} : memref<288x1088xbf16, #tpu.memory_space<vmem>>, vector<32x1088xbf16>,
    %c0_i32_44 = arith.constant 0 : i32
    %c0_i32_45 = arith.constant 0 : i32
    %c0_i32_46 = arith.constant 0 : i32
    %34 = tpu.memref_slice %arg1[%c0_i32_44, %c0_i32_45, %c0_i32_46] : memref<1x32x1280xbf16, #tpu.memory_space<vmem>> -> memref<1x32x1280xbf16, #tpu.memory_space<vmem>>
    %35 = tpu.memref_squeeze %34 : memref<1x32x1280xbf16, #tpu.memory_space<vmem>> -> memref<32x1280xbf16, #tpu.memory_space<vmem>>
    %c0_47 = arith.constant 0 : index
    %c161 = arith.constant 161 : index
    %36 = vector.load %35[%c0_47, %c161] : memref<32x1280xbf16, #tpu.memory_space<vmem>>, vector<32x1088xbf16>
    %c192 = arith.constant 192 : index
    %c0_48 = arith.constant 0 : index
    %37 = vector.load %arg12[%c192, %c0_48] : memref<288x1088xbf16, #tpu.memory_space<vmem>>, vector<32x1088xbf16>
    tpu.vector_store %arg12[%c192, %c0_48], %36 {strides = array<i32>} : memref<288x1088xbf16, #tpu.memory_space<vmem>>, vector<32x1088xbf16>,
    %c0_i32_49 = arith.constant 0 : i32
    %c0_i32_50 = arith.constant 0 : i32
    %c0_i32_51 = arith.constant 0 : i32
    %38 = tpu.memref_slice %arg1[%c0_i32_49, %c0_i32_50, %c0_i32_51] : memref<1x32x1280xbf16, #tpu.memory_space<vmem>> -> memref<1x32x1280xbf16, #tpu.memory_space<vmem>>
    %39 = tpu.memref_squeeze %38 : memref<1x32x1280xbf16, #tpu.memory_space<vmem>> -> memref<32x1280xbf16, #tpu.memory_space<vmem>>
    %c0_52 = arith.constant 0 : index
    %c162 = arith.constant 162 : index
    %40 = vector.load %39[%c0_52, %c162] : memref<32x1280xbf16, #tpu.memory_space<vmem>>, vector<32x1088xbf16>
    %c224 = arith.constant 224 : index
    %c0_53 = arith.constant 0 : index
    %41 = vector.load %arg12[%c224, %c0_53] : memref<288x1088xbf16, #tpu.memory_space<vmem>>, vector<32x1088xbf16>
    tpu.vector_store %arg12[%c224, %c0_53], %40 {strides = array<i32>} : memref<288x1088xbf16, #tpu.memory_space<vmem>>, vector<32x1088xbf16>,
    %c0_i32_54 = arith.constant 0 : i32
    %c0_i32_55 = arith.constant 0 : i32
    %c0_i32_56 = arith.constant 0 : i32
    %42 = tpu.memref_slice %arg1[%c0_i32_54, %c0_i32_55, %c0_i32_56] : memref<1x32x1280xbf16, #tpu.memory_space<vmem>> -> memref<1x32x1280xbf16, #tpu.memory_space<vmem>>
    %43 = tpu.memref_squeeze %42 : memref<1x32x1280xbf16, #tpu.memory_space<vmem>> -> memref<32x1280xbf16, #tpu.memory_space<vmem>>
    %c0_57 = arith.constant 0 : index
    %c163 = arith.constant 163 : index
    %44 = vector.load %43[%c0_57, %c163] : memref<32x1280xbf16, #tpu.memory_space<vmem>>, vector<32x1088xbf16>
    %c256 = arith.constant 256 : index
    %c0_58 = arith.constant 0 : index
    %45 = vector.load %arg12[%c256, %c0_58] : memref<288x1088xbf16, #tpu.memory_space<vmem>>, vector<32x1088xbf16>
    tpu.vector_store %arg12[%c256, %c0_58], %44 {strides = array<i32>} : memref<288x1088xbf16, #tpu.memory_space<vmem>>, vector<32x1088xbf16>,
    %c0_59 = arith.constant 0 : index
    %c0_60 = arith.constant 0 : index
    %46 = vector.load %arg12[%c0_59, %c0_60] : memref<288x1088xbf16, #tpu.memory_space<vmem>>, vector<288x1088xbf16>
    %cst_61 = arith.constant dense<0.000000e+00> : vector<32x1088xf32>
    %47 = tpu.matmul %7, %46, %cst_61 {dimension_numbers = #tpu.dot_dimension_numbers<[1], [0], [0], [1], [0, 0, 1, 1], [], []>} : vector<32x288xbf16>, vector<288x1088xbf16>, vector<32x1088xf32> -> vector<32x1088xf32>
    %48 = vector.broadcast %9 : vector<32x1xf32> to vector<32x1088xf32>
    %49 = arith.addf %47, %48 : vector<32x1088xf32>
    %cst_62 = arith.constant 0.000000e+00 : f32
    %50 = vector.broadcast %cst_62 : f32 to vector<32x1088xf32>
    %51 = arith.maximumf %49, %50 : vector<32x1088xf32>
    %c0_63 = arith.constant 0 : index
    %c0_64 = arith.constant 0 : index
    %52 = vector.load %arg8[%c0_63, %c0_64] : memref<1x1088xf32, #tpu.memory_space<vmem>>, vector<1x1088xf32>
    %53 = vector.broadcast %52 : vector<1x1088xf32> to vector<32x1088xf32>
    %54 = arith.mulf %51, %53 : vector<32x1088xf32>
    %55 = arith.truncf %54 : vector<32x1088xf32> to vector<32x1088xbf16>
    %c0_65 = arith.constant 0 : index
    %c128_66 = arith.constant 128 : index
    %56 = vector.load %arg10[%c0_65, %c128_66] : memref<32x1280xbf16, #tpu.memory_space<vmem>>, vector<32x1088xbf16>
    tpu.vector_store %arg10[%c0_65, %c128_66], %55 {strides = array<i32>} : memref<32x1280xbf16, #tpu.memory_space<vmem>>, vector<32x1088xbf16>,
    %c1 = arith.constant 1 : index
    %c0_67 = arith.constant 0 : index
    %c0_68 = arith.constant 0 : index
    %57 = vector.load %arg2[%c1, %c0_67, %c0_68] : memref<5x32x288xbf16, #tpu.memory_space<vmem>>, vector<1x32x288xbf16>
    %58 = vector.shape_cast %57 : vector<1x32x288xbf16> to vector<32x288xbf16>
    %c1_69 = arith.constant 1 : index
    %c0_70 = arith.constant 0 : index
    %c0_71 = arith.constant 0 : index
    %59 = vector.load %arg3[%c1_69, %c0_70, %c0_71] : memref<5x32x1xf32, #tpu.memory_space<vmem>>, vector<1x32x1xf32>
    %60 = vector.shape_cast %59 : vector<1x32x1xf32> to vector<32x1xf32>
    %c0_72 = arith.constant 0 : index
    %c93_73 = arith.constant 93 : index
    %61 = vector.load %arg10[%c0_72, %c93_73] : memref<32x1280xbf16, #tpu.memory_space<vmem>>, vector<32x1088xbf16>
    %c0_74 = arith.constant 0 : index
    %c0_75 = arith.constant 0 : index
    %62 = vector.load %arg12[%c0_74, %c0_75] : memref<288x1088xbf16, #tpu.memory_space<vmem>>, vector<32x1088xbf16>
    tpu.vector_store %arg12[%c0_74, %c0_75], %61 {strides = array<i32>} : memref<288x1088xbf16, #tpu.memory_space<vmem>>, vector<32x1088xbf16>,
    %c0_76 = arith.constant 0 : index
    %c94_77 = arith.constant 94 : index
    %63 = vector.load %arg10[%c0_76, %c94_77] : memref<32x1280xbf16, #tpu.memory_space<vmem>>, vector<32x1088xbf16>
    %c32_78 = arith.constant 32 : index
    %c0_79 = arith.constant 0 : index
    %64 = vector.load %arg12[%c32_78, %c0_79] : memref<288x1088xbf16, #tpu.memory_space<vmem>>, vector<32x1088xbf16>
    tpu.vector_store %arg12[%c32_78, %c0_79], %63 {strides = array<i32>} : memref<288x1088xbf16, #tpu.memory_space<vmem>>, vector<32x1088xbf16>,
    %c0_80 = arith.constant 0 : index
    %c95_81 = arith.constant 95 : index
    %65 = vector.load %arg10[%c0_80, %c95_81] : memref<32x1280xbf16, #tpu.memory_space<vmem>>, vector<32x1088xbf16>
    %c64_82 = arith.constant 64 : index
    %c0_83 = arith.constant 0 : index
    %66 = vector.load %arg12[%c64_82, %c0_83] : memref<288x1088xbf16, #tpu.memory_space<vmem>>, vector<32x1088xbf16>
    tpu.vector_store %arg12[%c64_82, %c0_83], %65 {strides = array<i32>} : memref<288x1088xbf16, #tpu.memory_space<vmem>>, vector<32x1088xbf16>,
    %c0_84 = arith.constant 0 : index
    %c127_85 = arith.constant 127 : index
    %67 = vector.load %arg10[%c0_84, %c127_85] : memref<32x1280xbf16, #tpu.memory_space<vmem>>, vector<32x1088xbf16>
    %c96_86 = arith.constant 96 : index
    %c0_87 = arith.constant 0 : index
    %68 = vector.load %arg12[%c96_86, %c0_87] : memref<288x1088xbf16, #tpu.memory_space<vmem>>, vector<32x1088xbf16>
    tpu.vector_store %arg12[%c96_86, %c0_87], %67 {strides = array<i32>} : memref<288x1088xbf16, #tpu.memory_space<vmem>>, vector<32x1088xbf16>,
    %c0_88 = arith.constant 0 : index
    %c128_89 = arith.constant 128 : index
    %69 = vector.load %arg10[%c0_88, %c128_89] : memref<32x1280xbf16, #tpu.memory_space<vmem>>, vector<32x1088xbf16>
    %c128_90 = arith.constant 128 : index
    %c0_91 = arith.constant 0 : index
    %70 = vector.load %arg12[%c128_90, %c0_91] : memref<288x1088xbf16, #tpu.memory_space<vmem>>, vector<32x1088xbf16>
    tpu.vector_store %arg12[%c128_90, %c0_91], %69 {strides = array<i32>} : memref<288x1088xbf16, #tpu.memory_space<vmem>>, vector<32x1088xbf16>,
    %c0_92 = arith.constant 0 : index
    %c129_93 = arith.constant 129 : index
    %71 = vector.load %arg10[%c0_92, %c129_93] : memref<32x1280xbf16, #tpu.memory_space<vmem>>, vector<32x1088xbf16>
    %c160_94 = arith.constant 160 : index
    %c0_95 = arith.constant 0 : index
    %72 = vector.load %arg12[%c160_94, %c0_95] : memref<288x1088xbf16, #tpu.memory_space<vmem>>, vector<32x1088xbf16>
    tpu.vector_store %arg12[%c160_94, %c0_95], %71 {strides = array<i32>} : memref<288x1088xbf16, #tpu.memory_space<vmem>>, vector<32x1088xbf16>,
    %c0_96 = arith.constant 0 : index
    %c161_97 = arith.constant 161 : index
    %73 = vector.load %arg10[%c0_96, %c161_97] : memref<32x1280xbf16, #tpu.memory_space<vmem>>, vector<32x1088xbf16>
    %c192_98 = arith.constant 192 : index
    %c0_99 = arith.constant 0 : index
    %74 = vector.load %arg12[%c192_98, %c0_99] : memref<288x1088xbf16, #tpu.memory_space<vmem>>, vector<32x1088xbf16>
    tpu.vector_store %arg12[%c192_98, %c0_99], %73 {strides = array<i32>} : memref<288x1088xbf16, #tpu.memory_space<vmem>>, vector<32x1088xbf16>,
    %c0_100 = arith.constant 0 : index
    %c162_101 = arith.constant 162 : index
    %75 = vector.load %arg10[%c0_100, %c162_101] : memref<32x1280xbf16, #tpu.memory_space<vmem>>, vector<32x1088xbf16>
    %c224_102 = arith.constant 224 : index
    %c0_103 = arith.constant 0 : index
    %76 = vector.load %arg12[%c224_102, %c0_103] : memref<288x1088xbf16, #tpu.memory_space<vmem>>, vector<32x1088xbf16>
    tpu.vector_store %arg12[%c224_102, %c0_103], %75 {strides = array<i32>} : memref<288x1088xbf16, #tpu.memory_space<vmem>>, vector<32x1088xbf16>,
    %c0_104 = arith.constant 0 : index
    %c163_105 = arith.constant 163 : index
    %77 = vector.load %arg10[%c0_104, %c163_105] : memref<32x1280xbf16, #tpu.memory_space<vmem>>, vector<32x1088xbf16>
    %c256_106 = arith.constant 256 : index
    %c0_107 = arith.constant 0 : index
    %78 = vector.load %arg12[%c256_106, %c0_107] : memref<288x1088xbf16, #tpu.memory_space<vmem>>, vector<32x1088xbf16>
    tpu.vector_store %arg12[%c256_106, %c0_107], %77 {strides = array<i32>} : memref<288x1088xbf16, #tpu.memory_space<vmem>>, vector<32x1088xbf16>,
    %c0_108 = arith.constant 0 : index
    %c0_109 = arith.constant 0 : index
    %79 = vector.load %arg12[%c0_108, %c0_109] : memref<288x1088xbf16, #tpu.memory_space<vmem>>, vector<288x1088xbf16>
    %cst_110 = arith.constant dense<0.000000e+00> : vector<32x1088xf32>
    %80 = tpu.matmul %58, %79, %cst_110 {dimension_numbers = #tpu.dot_dimension_numbers<[1], [0], [0], [1], [0, 0, 1, 1], [], []>} : vector<32x288xbf16>, vector<288x1088xbf16>, vector<32x1088xf32> -> vector<32x1088xf32>
    %81 = vector.broadcast %60 : vector<32x1xf32> to vector<32x1088xf32>
    %82 = arith.addf %80, %81 : vector<32x1088xf32>
    %cst_111 = arith.constant 0.000000e+00 : f32
    %83 = vector.broadcast %cst_111 : f32 to vector<32x1088xf32>
    %84 = arith.maximumf %82, %83 : vector<32x1088xf32>
    %c0_112 = arith.constant 0 : index
    %c0_113 = arith.constant 0 : index
    %85 = vector.load %arg8[%c0_112, %c0_113] : memref<1x1088xf32, #tpu.memory_space<vmem>>, vector<1x1088xf32>
    %86 = vector.broadcast %85 : vector<1x1088xf32> to vector<32x1088xf32>
    %87 = arith.mulf %84, %86 : vector<32x1088xf32>
    %88 = arith.truncf %87 : vector<32x1088xf32> to vector<32x1088xbf16>
    %c0_114 = arith.constant 0 : index
    %c128_115 = arith.constant 128 : index
    %89 = vector.load %arg11[%c0_114, %c128_115] : memref<32x1280xbf16, #tpu.memory_space<vmem>>, vector<32x1088xbf16>
    tpu.vector_store %arg11[%c0_114, %c128_115], %88 {strides = array<i32>} : memref<32x1280xbf16, #tpu.memory_space<vmem>>, vector<32x1088xbf16>,
    %c2 = arith.constant 2 : index
    %c0_116 = arith.constant 0 : index
    %c0_117 = arith.constant 0 : index
    %90 = vector.load %arg2[%c2, %c0_116, %c0_117] : memref<5x32x288xbf16, #tpu.memory_space<vmem>>, vector<1x32x288xbf16>
    %91 = vector.shape_cast %90 : vector<1x32x288xbf16> to vector<32x288xbf16>
    %c2_118 = arith.constant 2 : index
    %c0_119 = arith.constant 0 : index
    %c0_120 = arith.constant 0 : index
    %92 = vector.load %arg3[%c2_118, %c0_119, %c0_120] : memref<5x32x1xf32, #tpu.memory_space<vmem>>, vector<1x32x1xf32>
    %93 = vector.shape_cast %92 : vector<1x32x1xf32> to vector<32x1xf32>
    %c0_121 = arith.constant 0 : index
    %c93_122 = arith.constant 93 : index
    %94 = vector.load %arg11[%c0_121, %c93_122] : memref<32x1280xbf16, #tpu.memory_space<vmem>>, vector<32x1088xbf16>
    %c0_123 = arith.constant 0 : index
    %c0_124 = arith.constant 0 : index
    %95 = vector.load %arg12[%c0_123, %c0_124] : memref<288x1088xbf16, #tpu.memory_space<vmem>>, vector<32x1088xbf16>
    tpu.vector_store %arg12[%c0_123, %c0_124], %94 {strides = array<i32>} : memref<288x1088xbf16, #tpu.memory_space<vmem>>, vector<32x1088xbf16>,
    %c0_125 = arith.constant 0 : index
    %c94_126 = arith.constant 94 : index
    %96 = vector.load %arg11[%c0_125, %c94_126] : memref<32x1280xbf16, #tpu.memory_space<vmem>>, vector<32x1088xbf16>
    %c32_127 = arith.constant 32 : index
    %c0_128 = arith.constant 0 : index
    %97 = vector.load %arg12[%c32_127, %c0_128] : memref<288x1088xbf16, #tpu.memory_space<vmem>>, vector<32x1088xbf16>
    tpu.vector_store %arg12[%c32_127, %c0_128], %96 {strides = array<i32>} : memref<288x1088xbf16, #tpu.memory_space<vmem>>, vector<32x1088xbf16>,
    %c0_129 = arith.constant 0 : index
    %c95_130 = arith.constant 95 : index
    %98 = vector.load %arg11[%c0_129, %c95_130] : memref<32x1280xbf16, #tpu.memory_space<vmem>>, vector<32x1088xbf16>
    %c64_131 = arith.constant 64 : index
    %c0_132 = arith.constant 0 : index
    %99 = vector.load %arg12[%c64_131, %c0_132] : memref<288x1088xbf16, #tpu.memory_space<vmem>>, vector<32x1088xbf16>
    tpu.vector_store %arg12[%c64_131, %c0_132], %98 {strides = array<i32>} : memref<288x1088xbf16, #tpu.memory_space<vmem>>, vector<32x1088xbf16>,
    %c0_133 = arith.constant 0 : index
    %c127_134 = arith.constant 127 : index
    %100 = vector.load %arg11[%c0_133, %c127_134] : memref<32x1280xbf16, #tpu.memory_space<vmem>>, vector<32x1088xbf16>
    %c96_135 = arith.constant 96 : index
    %c0_136 = arith.constant 0 : index
    %101 = vector.load %arg12[%c96_135, %c0_136] : memref<288x1088xbf16, #tpu.memory_space<vmem>>, vector<32x1088xbf16>
    tpu.vector_store %arg12[%c96_135, %c0_136], %100 {strides = array<i32>} : memref<288x1088xbf16, #tpu.memory_space<vmem>>, vector<32x1088xbf16>,
    %c0_137 = arith.constant 0 : index
    %c128_138 = arith.constant 128 : index
    %102 = vector.load %arg11[%c0_137, %c128_138] : memref<32x1280xbf16, #tpu.memory_space<vmem>>, vector<32x1088xbf16>
    %c128_139 = arith.constant 128 : index
    %c0_140 = arith.constant 0 : index
    %103 = vector.load %arg12[%c128_139, %c0_140] : memref<288x1088xbf16, #tpu.memory_space<vmem>>, vector<32x1088xbf16>
    tpu.vector_store %arg12[%c128_139, %c0_140], %102 {strides = array<i32>} : memref<288x1088xbf16, #tpu.memory_space<vmem>>, vector<32x1088xbf16>,
    %c0_141 = arith.constant 0 : index
    %c129_142 = arith.constant 129 : index
    %104 = vector.load %arg11[%c0_141, %c129_142] : memref<32x1280xbf16, #tpu.memory_space<vmem>>, vector<32x1088xbf16>
    %c160_143 = arith.constant 160 : index
    %c0_144 = arith.constant 0 : index
    %105 = vector.load %arg12[%c160_143, %c0_144] : memref<288x1088xbf16, #tpu.memory_space<vmem>>, vector<32x1088xbf16>
    tpu.vector_store %arg12[%c160_143, %c0_144], %104 {strides = array<i32>} : memref<288x1088xbf16, #tpu.memory_space<vmem>>, vector<32x1088xbf16>,
    %c0_145 = arith.constant 0 : index
    %c161_146 = arith.constant 161 : index
    %106 = vector.load %arg11[%c0_145, %c161_146] : memref<32x1280xbf16, #tpu.memory_space<vmem>>, vector<32x1088xbf16>
    %c192_147 = arith.constant 192 : index
    %c0_148 = arith.constant 0 : index
    %107 = vector.load %arg12[%c192_147, %c0_148] : memref<288x1088xbf16, #tpu.memory_space<vmem>>, vector<32x1088xbf16>
    tpu.vector_store %arg12[%c192_147, %c0_148], %106 {strides = array<i32>} : memref<288x1088xbf16, #tpu.memory_space<vmem>>, vector<32x1088xbf16>,
    %c0_149 = arith.constant 0 : index
    %c162_150 = arith.constant 162 : index
    %108 = vector.load %arg11[%c0_149, %c162_150] : memref<32x1280xbf16, #tpu.memory_space<vmem>>, vector<32x1088xbf16>
    %c224_151 = arith.constant 224 : index
    %c0_152 = arith.constant 0 : index
    %109 = vector.load %arg12[%c224_151, %c0_152] : memref<288x1088xbf16, #tpu.memory_space<vmem>>, vector<32x1088xbf16>
    tpu.vector_store %arg12[%c224_151, %c0_152], %108 {strides = array<i32>} : memref<288x1088xbf16, #tpu.memory_space<vmem>>, vector<32x1088xbf16>,
    %c0_153 = arith.constant 0 : index
    %c163_154 = arith.constant 163 : index
    %110 = vector.load %arg11[%c0_153, %c163_154] : memref<32x1280xbf16, #tpu.memory_space<vmem>>, vector<32x1088xbf16>
    %c256_155 = arith.constant 256 : index
    %c0_156 = arith.constant 0 : index
    %111 = vector.load %arg12[%c256_155, %c0_156] : memref<288x1088xbf16, #tpu.memory_space<vmem>>, vector<32x1088xbf16>
    tpu.vector_store %arg12[%c256_155, %c0_156], %110 {strides = array<i32>} : memref<288x1088xbf16, #tpu.memory_space<vmem>>, vector<32x1088xbf16>,
    %c0_157 = arith.constant 0 : index
    %c0_158 = arith.constant 0 : index
    %112 = vector.load %arg12[%c0_157, %c0_158] : memref<288x1088xbf16, #tpu.memory_space<vmem>>, vector<288x1088xbf16>
    %cst_159 = arith.constant dense<0.000000e+00> : vector<32x1088xf32>
    %113 = tpu.matmul %91, %112, %cst_159 {dimension_numbers = #tpu.dot_dimension_numbers<[1], [0], [0], [1], [0, 0, 1, 1], [], []>} : vector<32x288xbf16>, vector<288x1088xbf16>, vector<32x1088xf32> -> vector<32x1088xf32>
    %114 = vector.broadcast %93 : vector<32x1xf32> to vector<32x1088xf32>
    %115 = arith.addf %113, %114 : vector<32x1088xf32>
    %cst_160 = arith.constant 0.000000e+00 : f32
    %116 = vector.broadcast %cst_160 : f32 to vector<32x1088xf32>
    %117 = arith.maximumf %115, %116 : vector<32x1088xf32>
    %c0_161 = arith.constant 0 : index
    %c0_162 = arith.constant 0 : index
    %118 = vector.load %arg8[%c0_161, %c0_162] : memref<1x1088xf32, #tpu.memory_space<vmem>>, vector<1x1088xf32>
    %119 = vector.broadcast %118 : vector<1x1088xf32> to vector<32x1088xf32>
    %120 = arith.mulf %117, %119 : vector<32x1088xf32>
    %121 = arith.truncf %120 : vector<32x1088xf32> to vector<32x1088xbf16>
    %c0_163 = arith.constant 0 : index
    %c128_164 = arith.constant 128 : index
    %122 = vector.load %arg10[%c0_163, %c128_164] : memref<32x1280xbf16, #tpu.memory_space<vmem>>, vector<32x1088xbf16>
    tpu.vector_store %arg10[%c0_163, %c128_164], %121 {strides = array<i32>} : memref<32x1280xbf16, #tpu.memory_space<vmem>>, vector<32x1088xbf16>,
    %c3 = arith.constant 3 : index
    %c0_165 = arith.constant 0 : index
    %c0_166 = arith.constant 0 : index
    %123 = vector.load %arg2[%c3, %c0_165, %c0_166] : memref<5x32x288xbf16, #tpu.memory_space<vmem>>, vector<1x32x288xbf16>
    %124 = vector.shape_cast %123 : vector<1x32x288xbf16> to vector<32x288xbf16>
    %c3_167 = arith.constant 3 : index
    %c0_168 = arith.constant 0 : index
    %c0_169 = arith.constant 0 : index
    %125 = vector.load %arg3[%c3_167, %c0_168, %c0_169] : memref<5x32x1xf32, #tpu.memory_space<vmem>>, vector<1x32x1xf32>
    %126 = vector.shape_cast %125 : vector<1x32x1xf32> to vector<32x1xf32>
    %c0_170 = arith.constant 0 : index
    %c93_171 = arith.constant 93 : index
    %127 = vector.load %arg10[%c0_170, %c93_171] : memref<32x1280xbf16, #tpu.memory_space<vmem>>, vector<32x1088xbf16>
    %c0_172 = arith.constant 0 : index
    %c0_173 = arith.constant 0 : index
    %128 = vector.load %arg12[%c0_172, %c0_173] : memref<288x1088xbf16, #tpu.memory_space<vmem>>, vector<32x1088xbf16>
    tpu.vector_store %arg12[%c0_172, %c0_173], %127 {strides = array<i32>} : memref<288x1088xbf16, #tpu.memory_space<vmem>>, vector<32x1088xbf16>,
    %c0_174 = arith.constant 0 : index
    %c94_175 = arith.constant 94 : index
    %129 = vector.load %arg10[%c0_174, %c94_175] : memref<32x1280xbf16, #tpu.memory_space<vmem>>, vector<32x1088xbf16>
    %c32_176 = arith.constant 32 : index
    %c0_177 = arith.constant 0 : index
    %130 = vector.load %arg12[%c32_176, %c0_177] : memref<288x1088xbf16, #tpu.memory_space<vmem>>, vector<32x1088xbf16>
    tpu.vector_store %arg12[%c32_176, %c0_177], %129 {strides = array<i32>} : memref<288x1088xbf16, #tpu.memory_space<vmem>>, vector<32x1088xbf16>,
    %c0_178 = arith.constant 0 : index
    %c95_179 = arith.constant 95 : index
    %131 = vector.load %arg10[%c0_178, %c95_179] : memref<32x1280xbf16, #tpu.memory_space<vmem>>, vector<32x1088xbf16>
    %c64_180 = arith.constant 64 : index
    %c0_181 = arith.constant 0 : index
    %132 = vector.load %arg12[%c64_180, %c0_181] : memref<288x1088xbf16, #tpu.memory_space<vmem>>, vector<32x1088xbf16>
    tpu.vector_store %arg12[%c64_180, %c0_181], %131 {strides = array<i32>} : memref<288x1088xbf16, #tpu.memory_space<vmem>>, vector<32x1088xbf16>,
    %c0_182 = arith.constant 0 : index
    %c127_183 = arith.constant 127 : index
    %133 = vector.load %arg10[%c0_182, %c127_183] : memref<32x1280xbf16, #tpu.memory_space<vmem>>, vector<32x1088xbf16>
    %c96_184 = arith.constant 96 : index
    %c0_185 = arith.constant 0 : index
    %134 = vector.load %arg12[%c96_184, %c0_185] : memref<288x1088xbf16, #tpu.memory_space<vmem>>, vector<32x1088xbf16>
    tpu.vector_store %arg12[%c96_184, %c0_185], %133 {strides = array<i32>} : memref<288x1088xbf16, #tpu.memory_space<vmem>>, vector<32x1088xbf16>,
    %c0_186 = arith.constant 0 : index
    %c128_187 = arith.constant 128 : index
    %135 = vector.load %arg10[%c0_186, %c128_187] : memref<32x1280xbf16, #tpu.memory_space<vmem>>, vector<32x1088xbf16>
    %c128_188 = arith.constant 128 : index
    %c0_189 = arith.constant 0 : index
    %136 = vector.load %arg12[%c128_188, %c0_189] : memref<288x1088xbf16, #tpu.memory_space<vmem>>, vector<32x1088xbf16>
    tpu.vector_store %arg12[%c128_188, %c0_189], %135 {strides = array<i32>} : memref<288x1088xbf16, #tpu.memory_space<vmem>>, vector<32x1088xbf16>,
    %c0_190 = arith.constant 0 : index
    %c129_191 = arith.constant 129 : index
    %137 = vector.load %arg10[%c0_190, %c129_191] : memref<32x1280xbf16, #tpu.memory_space<vmem>>, vector<32x1088xbf16>
    %c160_192 = arith.constant 160 : index
    %c0_193 = arith.constant 0 : index
    %138 = vector.load %arg12[%c160_192, %c0_193] : memref<288x1088xbf16, #tpu.memory_space<vmem>>, vector<32x1088xbf16>
    tpu.vector_store %arg12[%c160_192, %c0_193], %137 {strides = array<i32>} : memref<288x1088xbf16, #tpu.memory_space<vmem>>, vector<32x1088xbf16>,
    %c0_194 = arith.constant 0 : index
    %c161_195 = arith.constant 161 : index
    %139 = vector.load %arg10[%c0_194, %c161_195] : memref<32x1280xbf16, #tpu.memory_space<vmem>>, vector<32x1088xbf16>
    %c192_196 = arith.constant 192 : index
    %c0_197 = arith.constant 0 : index
    %140 = vector.load %arg12[%c192_196, %c0_197] : memref<288x1088xbf16, #tpu.memory_space<vmem>>, vector<32x1088xbf16>
    tpu.vector_store %arg12[%c192_196, %c0_197], %139 {strides = array<i32>} : memref<288x1088xbf16, #tpu.memory_space<vmem>>, vector<32x1088xbf16>,
    %c0_198 = arith.constant 0 : index
    %c162_199 = arith.constant 162 : index
    %141 = vector.load %arg10[%c0_198, %c162_199] : memref<32x1280xbf16, #tpu.memory_space<vmem>>, vector<32x1088xbf16>
    %c224_200 = arith.constant 224 : index
    %c0_201 = arith.constant 0 : index
    %142 = vector.load %arg12[%c224_200, %c0_201] : memref<288x1088xbf16, #tpu.memory_space<vmem>>, vector<32x1088xbf16>
    tpu.vector_store %arg12[%c224_200, %c0_201], %141 {strides = array<i32>} : memref<288x1088xbf16, #tpu.memory_space<vmem>>, vector<32x1088xbf16>,
    %c0_202 = arith.constant 0 : index
    %c163_203 = arith.constant 163 : index
    %143 = vector.load %arg10[%c0_202, %c163_203] : memref<32x1280xbf16, #tpu.memory_space<vmem>>, vector<32x1088xbf16>
    %c256_204 = arith.constant 256 : index
    %c0_205 = arith.constant 0 : index
    %144 = vector.load %arg12[%c256_204, %c0_205] : memref<288x1088xbf16, #tpu.memory_space<vmem>>, vector<32x1088xbf16>
    tpu.vector_store %arg12[%c256_204, %c0_205], %143 {strides = array<i32>} : memref<288x1088xbf16, #tpu.memory_space<vmem>>, vector<32x1088xbf16>,
    %c0_206 = arith.constant 0 : index
    %c0_207 = arith.constant 0 : index
    %145 = vector.load %arg12[%c0_206, %c0_207] : memref<288x1088xbf16, #tpu.memory_space<vmem>>, vector<288x1088xbf16>
    %cst_208 = arith.constant dense<0.000000e+00> : vector<32x1088xf32>
    %146 = tpu.matmul %124, %145, %cst_208 {dimension_numbers = #tpu.dot_dimension_numbers<[1], [0], [0], [1], [0, 0, 1, 1], [], []>} : vector<32x288xbf16>, vector<288x1088xbf16>, vector<32x1088xf32> -> vector<32x1088xf32>
    %147 = vector.broadcast %126 : vector<32x1xf32> to vector<32x1088xf32>
    %148 = arith.addf %146, %147 : vector<32x1088xf32>
    %cst_209 = arith.constant 0.000000e+00 : f32
    %149 = vector.broadcast %cst_209 : f32 to vector<32x1088xf32>
    %150 = arith.maximumf %148, %149 : vector<32x1088xf32>
    %c0_210 = arith.constant 0 : index
    %c0_211 = arith.constant 0 : index
    %151 = vector.load %arg8[%c0_210, %c0_211] : memref<1x1088xf32, #tpu.memory_space<vmem>>, vector<1x1088xf32>
    %152 = vector.broadcast %151 : vector<1x1088xf32> to vector<32x1088xf32>
    %153 = arith.mulf %150, %152 : vector<32x1088xf32>
    %154 = arith.truncf %153 : vector<32x1088xf32> to vector<32x1088xbf16>
    %c0_212 = arith.constant 0 : index
    %c128_213 = arith.constant 128 : index
    %155 = vector.load %arg11[%c0_212, %c128_213] : memref<32x1280xbf16, #tpu.memory_space<vmem>>, vector<32x1088xbf16>
    tpu.vector_store %arg11[%c0_212, %c128_213], %154 {strides = array<i32>} : memref<32x1280xbf16, #tpu.memory_space<vmem>>, vector<32x1088xbf16>,
    %c4 = arith.constant 4 : index
    %c0_214 = arith.constant 0 : index
    %c0_215 = arith.constant 0 : index
    %156 = vector.load %arg2[%c4, %c0_214, %c0_215] : memref<5x32x288xbf16, #tpu.memory_space<vmem>>, vector<1x32x288xbf16>
    %157 = vector.shape_cast %156 : vector<1x32x288xbf16> to vector<32x288xbf16>
    %c4_216 = arith.constant 4 : index
    %c0_217 = arith.constant 0 : index
    %c0_218 = arith.constant 0 : index
    %158 = vector.load %arg3[%c4_216, %c0_217, %c0_218] : memref<5x32x1xf32, #tpu.memory_space<vmem>>, vector<1x32x1xf32>
    %159 = vector.shape_cast %158 : vector<1x32x1xf32> to vector<32x1xf32>
    %c0_219 = arith.constant 0 : index
    %c93_220 = arith.constant 93 : index
    %160 = vector.load %arg11[%c0_219, %c93_220] : memref<32x1280xbf16, #tpu.memory_space<vmem>>, vector<32x1088xbf16>
    %c0_221 = arith.constant 0 : index
    %c0_222 = arith.constant 0 : index
    %161 = vector.load %arg12[%c0_221, %c0_222] : memref<288x1088xbf16, #tpu.memory_space<vmem>>, vector<32x1088xbf16>
    tpu.vector_store %arg12[%c0_221, %c0_222], %160 {strides = array<i32>} : memref<288x1088xbf16, #tpu.memory_space<vmem>>, vector<32x1088xbf16>,
    %c0_223 = arith.constant 0 : index
    %c94_224 = arith.constant 94 : index
    %162 = vector.load %arg11[%c0_223, %c94_224] : memref<32x1280xbf16, #tpu.memory_space<vmem>>, vector<32x1088xbf16>
    %c32_225 = arith.constant 32 : index
    %c0_226 = arith.constant 0 : index
    %163 = vector.load %arg12[%c32_225, %c0_226] : memref<288x1088xbf16, #tpu.memory_space<vmem>>, vector<32x1088xbf16>
    tpu.vector_store %arg12[%c32_225, %c0_226], %162 {strides = array<i32>} : memref<288x1088xbf16, #tpu.memory_space<vmem>>, vector<32x1088xbf16>,
    %c0_227 = arith.constant 0 : index
    %c95_228 = arith.constant 95 : index
    %164 = vector.load %arg11[%c0_227, %c95_228] : memref<32x1280xbf16, #tpu.memory_space<vmem>>, vector<32x1088xbf16>
    %c64_229 = arith.constant 64 : index
    %c0_230 = arith.constant 0 : index
    %165 = vector.load %arg12[%c64_229, %c0_230] : memref<288x1088xbf16, #tpu.memory_space<vmem>>, vector<32x1088xbf16>
    tpu.vector_store %arg12[%c64_229, %c0_230], %164 {strides = array<i32>} : memref<288x1088xbf16, #tpu.memory_space<vmem>>, vector<32x1088xbf16>,
    %c0_231 = arith.constant 0 : index
    %c127_232 = arith.constant 127 : index
    %166 = vector.load %arg11[%c0_231, %c127_232] : memref<32x1280xbf16, #tpu.memory_space<vmem>>, vector<32x1088xbf16>
    %c96_233 = arith.constant 96 : index
    %c0_234 = arith.constant 0 : index
    %167 = vector.load %arg12[%c96_233, %c0_234] : memref<288x1088xbf16, #tpu.memory_space<vmem>>, vector<32x1088xbf16>
    tpu.vector_store %arg12[%c96_233, %c0_234], %166 {strides = array<i32>} : memref<288x1088xbf16, #tpu.memory_space<vmem>>, vector<32x1088xbf16>,
    %c0_235 = arith.constant 0 : index
    %c128_236 = arith.constant 128 : index
    %168 = vector.load %arg11[%c0_235, %c128_236] : memref<32x1280xbf16, #tpu.memory_space<vmem>>, vector<32x1088xbf16>
    %c128_237 = arith.constant 128 : index
    %c0_238 = arith.constant 0 : index
    %169 = vector.load %arg12[%c128_237, %c0_238] : memref<288x1088xbf16, #tpu.memory_space<vmem>>, vector<32x1088xbf16>
    tpu.vector_store %arg12[%c128_237, %c0_238], %168 {strides = array<i32>} : memref<288x1088xbf16, #tpu.memory_space<vmem>>, vector<32x1088xbf16>,
    %c0_239 = arith.constant 0 : index
    %c129_240 = arith.constant 129 : index
    %170 = vector.load %arg11[%c0_239, %c129_240] : memref<32x1280xbf16, #tpu.memory_space<vmem>>, vector<32x1088xbf16>
    %c160_241 = arith.constant 160 : index
    %c0_242 = arith.constant 0 : index
    %171 = vector.load %arg12[%c160_241, %c0_242] : memref<288x1088xbf16, #tpu.memory_space<vmem>>, vector<32x1088xbf16>
    tpu.vector_store %arg12[%c160_241, %c0_242], %170 {strides = array<i32>} : memref<288x1088xbf16, #tpu.memory_space<vmem>>, vector<32x1088xbf16>,
    %c0_243 = arith.constant 0 : index
    %c161_244 = arith.constant 161 : index
    %172 = vector.load %arg11[%c0_243, %c161_244] : memref<32x1280xbf16, #tpu.memory_space<vmem>>, vector<32x1088xbf16>
    %c192_245 = arith.constant 192 : index
    %c0_246 = arith.constant 0 : index
    %173 = vector.load %arg12[%c192_245, %c0_246] : memref<288x1088xbf16, #tpu.memory_space<vmem>>, vector<32x1088xbf16>
    tpu.vector_store %arg12[%c192_245, %c0_246], %172 {strides = array<i32>} : memref<288x1088xbf16, #tpu.memory_space<vmem>>, vector<32x1088xbf16>,
    %c0_247 = arith.constant 0 : index
    %c162_248 = arith.constant 162 : index
    %174 = vector.load %arg11[%c0_247, %c162_248] : memref<32x1280xbf16, #tpu.memory_space<vmem>>, vector<32x1088xbf16>
    %c224_249 = arith.constant 224 : index
    %c0_250 = arith.constant 0 : index
    %175 = vector.load %arg12[%c224_249, %c0_250] : memref<288x1088xbf16, #tpu.memory_space<vmem>>, vector<32x1088xbf16>
    tpu.vector_store %arg12[%c224_249, %c0_250], %174 {strides = array<i32>} : memref<288x1088xbf16, #tpu.memory_space<vmem>>, vector<32x1088xbf16>,
    %c0_251 = arith.constant 0 : index
    %c163_252 = arith.constant 163 : index
    %176 = vector.load %arg11[%c0_251, %c163_252] : memref<32x1280xbf16, #tpu.memory_space<vmem>>, vector<32x1088xbf16>
    %c256_253 = arith.constant 256 : index
    %c0_254 = arith.constant 0 : index
    %177 = vector.load %arg12[%c256_253, %c0_254] : memref<288x1088xbf16, #tpu.memory_space<vmem>>, vector<32x1088xbf16>
    tpu.vector_store %arg12[%c256_253, %c0_254], %176 {strides = array<i32>} : memref<288x1088xbf16, #tpu.memory_space<vmem>>, vector<32x1088xbf16>,
    %c0_255 = arith.constant 0 : index
    %c0_256 = arith.constant 0 : index
    %178 = vector.load %arg12[%c0_255, %c0_256] : memref<288x1088xbf16, #tpu.memory_space<vmem>>, vector<288x1088xbf16>
    %cst_257 = arith.constant dense<0.000000e+00> : vector<32x1088xf32>
    %179 = tpu.matmul %157, %178, %cst_257 {dimension_numbers = #tpu.dot_dimension_numbers<[1], [0], [0], [1], [0, 0, 1, 1], [], []>} : vector<32x288xbf16>, vector<288x1088xbf16>, vector<32x1088xf32> -> vector<32x1088xf32>
    %180 = vector.broadcast %159 : vector<32x1xf32> to vector<32x1088xf32>
    %181 = arith.addf %179, %180 : vector<32x1088xf32>
    %cst_258 = arith.constant 0.000000e+00 : f32
    %182 = vector.broadcast %cst_258 : f32 to vector<32x1088xf32>
    %183 = arith.maximumf %181, %182 : vector<32x1088xf32>
    %c0_259 = arith.constant 0 : index
    %c0_260 = arith.constant 0 : index
    %184 = vector.load %arg8[%c0_259, %c0_260] : memref<1x1088xf32, #tpu.memory_space<vmem>>, vector<1x1088xf32>
    %185 = vector.broadcast %184 : vector<1x1088xf32> to vector<32x1088xf32>
    %186 = arith.mulf %183, %185 : vector<32x1088xf32>
    %187 = arith.truncf %186 : vector<32x1088xf32> to vector<32x1088xbf16>
    %c0_261 = arith.constant 0 : index
    %c128_262 = arith.constant 128 : index
    %188 = vector.load %arg10[%c0_261, %c128_262] : memref<32x1280xbf16, #tpu.memory_space<vmem>>, vector<32x1088xbf16>
    tpu.vector_store %arg10[%c0_261, %c128_262], %187 {strides = array<i32>} : memref<32x1280xbf16, #tpu.memory_space<vmem>>, vector<32x1088xbf16>,
    %c0_263 = arith.constant 0 : index
    %c93_264 = arith.constant 93 : index
    %189 = vector.load %arg10[%c0_263, %c93_264] : memref<32x1280xbf16, #tpu.memory_space<vmem>>, vector<32x1088xbf16>
    %c0_265 = arith.constant 0 : index
    %c0_266 = arith.constant 0 : index
    %190 = vector.load %arg12[%c0_265, %c0_266] : memref<288x1088xbf16, #tpu.memory_space<vmem>>, vector<32x1088xbf16>
    tpu.vector_store %arg12[%c0_265, %c0_266], %189 {strides = array<i32>} : memref<288x1088xbf16, #tpu.memory_space<vmem>>, vector<32x1088xbf16>,
    %c0_267 = arith.constant 0 : index
    %c94_268 = arith.constant 94 : index
    %191 = vector.load %arg10[%c0_267, %c94_268] : memref<32x1280xbf16, #tpu.memory_space<vmem>>, vector<32x1088xbf16>
    %c32_269 = arith.constant 32 : index
    %c0_270 = arith.constant 0 : index
    %192 = vector.load %arg12[%c32_269, %c0_270] : memref<288x1088xbf16, #tpu.memory_space<vmem>>, vector<32x1088xbf16>
    tpu.vector_store %arg12[%c32_269, %c0_270], %191 {strides = array<i32>} : memref<288x1088xbf16, #tpu.memory_space<vmem>>, vector<32x1088xbf16>,
    %c0_271 = arith.constant 0 : index
    %c95_272 = arith.constant 95 : index
    %193 = vector.load %arg10[%c0_271, %c95_272] : memref<32x1280xbf16, #tpu.memory_space<vmem>>, vector<32x1088xbf16>
    %c64_273 = arith.constant 64 : index
    %c0_274 = arith.constant 0 : index
    %194 = vector.load %arg12[%c64_273, %c0_274] : memref<288x1088xbf16, #tpu.memory_space<vmem>>, vector<32x1088xbf16>
    tpu.vector_store %arg12[%c64_273, %c0_274], %193 {strides = array<i32>} : memref<288x1088xbf16, #tpu.memory_space<vmem>>, vector<32x1088xbf16>,
    %c0_275 = arith.constant 0 : index
    %c127_276 = arith.constant 127 : index
    %195 = vector.load %arg10[%c0_275, %c127_276] : memref<32x1280xbf16, #tpu.memory_space<vmem>>, vector<32x1088xbf16>
    %c96_277 = arith.constant 96 : index
    %c0_278 = arith.constant 0 : index
    %196 = vector.load %arg12[%c96_277, %c0_278] : memref<288x1088xbf16, #tpu.memory_space<vmem>>, vector<32x1088xbf16>
    tpu.vector_store %arg12[%c96_277, %c0_278], %195 {strides = array<i32>} : memref<288x1088xbf16, #tpu.memory_space<vmem>>, vector<32x1088xbf16>,
    %c0_279 = arith.constant 0 : index
    %c128_280 = arith.constant 128 : index
    %197 = vector.load %arg10[%c0_279, %c128_280] : memref<32x1280xbf16, #tpu.memory_space<vmem>>, vector<32x1088xbf16>
    %c128_281 = arith.constant 128 : index
    %c0_282 = arith.constant 0 : index
    %198 = vector.load %arg12[%c128_281, %c0_282] : memref<288x1088xbf16, #tpu.memory_space<vmem>>, vector<32x1088xbf16>
    tpu.vector_store %arg12[%c128_281, %c0_282], %197 {strides = array<i32>} : memref<288x1088xbf16, #tpu.memory_space<vmem>>, vector<32x1088xbf16>,
    %c0_283 = arith.constant 0 : index
    %c129_284 = arith.constant 129 : index
    %199 = vector.load %arg10[%c0_283, %c129_284] : memref<32x1280xbf16, #tpu.memory_space<vmem>>, vector<32x1088xbf16>
    %c160_285 = arith.constant 160 : index
    %c0_286 = arith.constant 0 : index
    %200 = vector.load %arg12[%c160_285, %c0_286] : memref<288x1088xbf16, #tpu.memory_space<vmem>>, vector<32x1088xbf16>
    tpu.vector_store %arg12[%c160_285, %c0_286], %199 {strides = array<i32>} : memref<288x1088xbf16, #tpu.memory_space<vmem>>, vector<32x1088xbf16>,
    %c0_287 = arith.constant 0 : index
    %c161_288 = arith.constant 161 : index
    %201 = vector.load %arg10[%c0_287, %c161_288] : memref<32x1280xbf16, #tpu.memory_space<vmem>>, vector<32x1088xbf16>
    %c192_289 = arith.constant 192 : index
    %c0_290 = arith.constant 0 : index
    %202 = vector.load %arg12[%c192_289, %c0_290] : memref<288x1088xbf16, #tpu.memory_space<vmem>>, vector<32x1088xbf16>
    tpu.vector_store %arg12[%c192_289, %c0_290], %201 {strides = array<i32>} : memref<288x1088xbf16, #tpu.memory_space<vmem>>, vector<32x1088xbf16>,
    %c0_291 = arith.constant 0 : index
    %c162_292 = arith.constant 162 : index
    %203 = vector.load %arg10[%c0_291, %c162_292] : memref<32x1280xbf16, #tpu.memory_space<vmem>>, vector<32x1088xbf16>
    %c224_293 = arith.constant 224 : index
    %c0_294 = arith.constant 0 : index
    %204 = vector.load %arg12[%c224_293, %c0_294] : memref<288x1088xbf16, #tpu.memory_space<vmem>>, vector<32x1088xbf16>
    tpu.vector_store %arg12[%c224_293, %c0_294], %203 {strides = array<i32>} : memref<288x1088xbf16, #tpu.memory_space<vmem>>, vector<32x1088xbf16>,
    %c0_295 = arith.constant 0 : index
    %c163_296 = arith.constant 163 : index
    %205 = vector.load %arg10[%c0_295, %c163_296] : memref<32x1280xbf16, #tpu.memory_space<vmem>>, vector<32x1088xbf16>
    %c256_297 = arith.constant 256 : index
    %c0_298 = arith.constant 0 : index
    %206 = vector.load %arg12[%c256_297, %c0_298] : memref<288x1088xbf16, #tpu.memory_space<vmem>>, vector<32x1088xbf16>
    tpu.vector_store %arg12[%c256_297, %c0_298], %205 {strides = array<i32>} : memref<288x1088xbf16, #tpu.memory_space<vmem>>, vector<32x1088xbf16>,
    %c0_299 = arith.constant 0 : index
    %c0_300 = arith.constant 0 : index
    %207 = vector.load %arg4[%c0_299, %c0_300] : memref<1x288xbf16, #tpu.memory_space<vmem>>, vector<1x288xbf16>
    %c0_301 = arith.constant 0 : index
    %c0_302 = arith.constant 0 : index
    %208 = vector.load %arg12[%c0_301, %c0_302] : memref<288x1088xbf16, #tpu.memory_space<vmem>>, vector<288x1088xbf16>
    %cst_303 = arith.constant dense<0.000000e+00> : vector<1x1088xf32>
    %209 = tpu.matmul %207, %208, %cst_303 {dimension_numbers = #tpu.dot_dimension_numbers<[1], [0], [0], [1], [0, 0, 1, 1], [], []>} : vector<1x288xbf16>, vector<288x1088xbf16>, vector<1x1088xf32> -> vector<1x1088xf32>
    %c0_304 = arith.constant 0 : index
    %c0_305 = arith.constant 0 : index
    %210 = vector.load %arg6[%c0_304, %c0_305] : memref<2x1088xf32, #tpu.memory_space<vmem>>, vector<2x1088xf32>
    %211 = vector.broadcast %209 : vector<1x1088xf32> to vector<2x1088xf32>
    %212 = arith.mulf %210, %211 : vector<2x1088xf32>
    %c0_306 = arith.constant 0 : index
    %c0_307 = arith.constant 0 : index
    %213 = vector.load %arg7[%c0_306, %c0_307] : memref<1088x2xf32, #tpu.memory_space<vmem>>, vector<1088x2xf32>
    %cst_308 = arith.constant dense<0.000000e+00> : vector<2x2xf32>
    %214 = tpu.matmul %212, %213, %cst_308 {dimension_numbers = #tpu.dot_dimension_numbers<[1], [0], [0], [1], [0, 0, 1, 1], [], []>} : vector<2x1088xf32>, vector<1088x2xf32>, vector<2x2xf32> -> vector<2x2xf32>
    %c0_309 = arith.constant 0 : index
    %c0_310 = arith.constant 0 : index
    %215 = vector.load %arg5[%c0_309, %c0_310] : memref<1x1xf32, #tpu.memory_space<vmem>>, vector<1x1xf32>
    %216 = vector.broadcast %215 : vector<1x1xf32> to vector<2x2xf32>
    %217 = arith.addf %214, %216 : vector<2x2xf32>
    %c0_311 = arith.constant 0 : index
    %c0_312 = arith.constant 0 : index
    %c0_313 = arith.constant 0 : index
    %218 = vector.load %arg9[%c0_311, %c0_312, %c0_313] : memref<1x2x2xf32, #tpu.memory_space<vmem>>, vector<1x2x2xf32>
    %219 = vector.shape_cast %218 : vector<1x2x2xf32> to vector<2x2xf32>
    %220 = vector.shape_cast %217 : vector<2x2xf32> to vector<1x2x2xf32>
    tpu.vector_store %arg9[%c0_311, %c0_312, %c0_313], %220 {strides = array<i32>} : memref<1x2x2xf32, #tpu.memory_space<vmem>>, vector<1x2x2xf32>,
    return
  }
  func.func @transform_0(%arg0: i32) -> (i32, i32, i32) {
    %c0_i32 = arith.constant 0 : i32
    %c0_i32_0 = arith.constant 0 : i32
    %c0_i32_1 = arith.constant 0 : i32
    return %arg0, %c0_i32, %c0_i32_0 : i32, i32, i32
  }
  func.func @transform_1(%arg0: i32) -> (i32, i32, i32) {
    %c0_i32 = arith.constant 0 : i32
    %c0_i32_0 = arith.constant 0 : i32
    %c0_i32_1 = arith.constant 0 : i32
    %c0_i32_2 = arith.constant 0 : i32
    return %c0_i32, %c0_i32_0, %c0_i32_1 : i32, i32, i32
  }
  func.func @transform_2(%arg0: i32) -> (i32, i32, i32) {
    %c0_i32 = arith.constant 0 : i32
    %c0_i32_0 = arith.constant 0 : i32
    %c0_i32_1 = arith.constant 0 : i32
    %c0_i32_2 = arith.constant 0 : i32
    return %c0_i32, %c0_i32_0, %c0_i32_1 : i32, i32, i32
  }
  func.func @transform_3(%arg0: i32) -> (i32, i32) {
    %c0_i32 = arith.constant 0 : i32
    %c0_i32_0 = arith.constant 0 : i32
    %c0_i32_1 = arith.constant 0 : i32
    return %c0_i32, %c0_i32_0 : i32, i32
  }
  func.func @transform_4(%arg0: i32) -> (i32, i32) {
    %c0_i32 = arith.constant 0 : i32
    %c0_i32_0 = arith.constant 0 : i32
    %c0_i32_1 = arith.constant 0 : i32
    return %c0_i32, %c0_i32_0 : i32, i32
  }
  func.func @transform_5(%arg0: i32) -> (i32, i32) {
    %c0_i32 = arith.constant 0 : i32
    %c0_i32_0 = arith.constant 0 : i32
    %c0_i32_1 = arith.constant 0 : i32
    return %c0_i32, %c0_i32_0 : i32, i32
  }
  func.func @transform_6(%arg0: i32) -> (i32, i32) {
    %c0_i32 = arith.constant 0 : i32
    %c0_i32_0 = arith.constant 0 : i32
    %c0_i32_1 = arith.constant 0 : i32
    return %c0_i32, %c0_i32_0 : i32, i32
  }
  func.func @transform_7(%arg0: i32) -> (i32, i32) {
    %c0_i32 = arith.constant 0 : i32
    %c0_i32_0 = arith.constant 0 : i32
    %c0_i32_1 = arith.constant 0 : i32
    return %c0_i32, %c0_i32_0 : i32, i32
  }
  func.func @transform_8(%arg0: i32) -> (i32, i32, i32) {
    %c0_i32 = arith.constant 0 : i32
    %c0_i32_0 = arith.constant 0 : i32
    %c0_i32_1 = arith.constant 0 : i32
    return %arg0, %c0_i32, %c0_i32_0 : i32, i32, i32
  }
}

</mosaic_0001>

<bundles_post_ra>
// kernel: tpu_custom_call.1
= control target key start
LH: loop header
LB: loop body
LE: loop exit
PB: predicated region body
PF: predicated region fallthrough
CT: control target
= control target key end

     0   :  { %s21371_s0 = inlined_call_operand.vmem [shape: bf16[2,32,1280], index: 0, kind: input, shape index: {}]   ;;  %s21372_s1 = inlined_call_operand.vmem [shape: bf16[5,32,288], index: 1, kind: input, shape index: {}]   ;;  %s21373_s2 = inlined_call_operand.vmem [shape: f32[5,32,1], index: 2, kind: input, shape index: {}]   ;;  %s21374_s3 = inlined_call_operand.vmem [shape: bf16[1,288], index: 3, kind: input, shape index: {}]   ;;  %s21375_s4 = inlined_call_operand.<no memory space> [shape: f32[1,1], index: 4, kind: input, shape index: {}]   ;;  %s21376_s5 = inlined_call_operand.vmem [shape: f32[2,1088], index: 5, kind: input, shape index: {}]   ;;  %s21377_s6 = inlined_call_operand.vmem [shape: f32[1088,2], index: 6, kind: input, shape index: {}]   ;;  %s21378_s7 = inlined_call_operand.vmem [shape: f32[1,1088], index: 7, kind: input, shape index: {}]   ;;  %s21379_s8 = inlined_call_operand.hbm [shape: f32[2,2,2], index: 8, kind: output, shape index: {}]  }
   0x1   :  { %v13_v0 = vstv %s21375_s4 }
   0x2   :  { %14 = vst [vmem:[#allocation5] sm:$0x1] %v13_v0 }
   0x3   :  { %15 = vsyncpa [#allocation7], 0 }
   0x4   :  { %17 = vsyncpa [#allocation7 + $0x1], 0  ;;  %s14799_s29 = smov 0   ;;  %s14801_s30 = smov 0  }
   0x5   :  { %s14803_s9 = smov 0   ;;  %s14805_s10 = smov 0  }
   0x6 LB: > { %s14820_s4 = sadd.s32 4294967295, %s14734_s10   ;;  %s13173_s11 = sadd.s32 4294967294, %s14734_s10   ;;  %s14734_s10 = sphi %s14805_s10, %s21460_s10   ;;  %s14730_s9 = sphi %s14803_s9, %s21459_s9   ;;  %s14726_s30 = sphi %s14801_s30, %s21458_s30   ;;  %s14722_s29 = sphi %s14799_s29, %s21457_s29  }
   0x7   : > { %s14824_s12 = sadd.s32 1, %s14734_s10   ;;  %s203_s13 = sadd.s32 1, %s14730_s9 }
   0x8   : > { %s200_s14 = ssub.s32 %s14734_s10, %s14824_s12  ;;  %p213_p0 = scmp.ne.s32.totalorder %s14730_s9, %s14726_s30 }
   0x9   : > { %p201_p1 = scmp.eq.s32.totalorder %s200_s14, 0  ;;  %p214_p2 = scmp.eq.s32.totalorder %s14820_s4, 1 }
   0xa   : > { %p219_p3 = scmp.ne.s32.totalorder %s14726_s30, %s14722_s29  ;;  %p220_p4 = scmp.eq.s32.totalorder %s13173_s11, 1 }
   0xb   : > { %s14835_s15 = scalar_select %p201_p1, %s14730_s9, %s203_s13  }
   0xc   : > { %p14837_p5 = por %p214_p2, %p213_p0  ;;  %p14841_p6 = por %p220_p4, %p219_p3 }
   0xd   : > { %p13176_p7 = scmp.ge.s32.totalorder %s14734_s10, 1  ;;  %p267_p8 = scmp.lt.s32.totalorder %s14734_s10, 3 }
   0xf   : > { %p268_p9 = pnand %p13176_p7, %p267_p8 }
  0x11   : > { %271 = sbr.rel (%p268_p9) target bundleno = 3340 (0xd0c), region = 52 }
  0x18   : > { %p301_p10 = scmp.lt.s32.totalorder %s14820_s4, 1  ;;  %s14736_s23 = smov 35   ;;  %v14944_v17 = vld [vmem:[%s21372_s1 + $0x4] ss:$12 sps:$4 sm:$0xff]   ;;  %vm468_vm0 = vcmask 285696   ;;  %v14744_v24 = vmov 0  }
  0x19   : > { %s14737_s24 = smov 34   ;;  %s14738_s25 = smov 33   ;;  %2222 = vmatprep.mubr.bf16.mxu0 %v14944_v17  ;;  %2328 = vmatprep.mubr.bf16.mxu1 %v14944_v17  ;;  %307 = vst [vmem:[#allocation2] sm:$0xff] %v14744_v24  ;;  %vm664_vm1 = vcmask 277504   ;;  %vm859_vm2 = vcmask 269312   ;;  %vm1054_vm3 = vcmask 7168  }
  0x1a   : > { %s302_s18 = scalar_select %p301_p10, %s14820_s4, 1  ;;  %14426 = vset.pattern.permute.xlu1 %v14744_v24  ;;  %14425 = vset.pattern.permute.xlu0 %v14744_v24  ;;  %vm1369_vm4 = vcmask 1039360   ;;  %vm1552_vm5 = vcmask 777216   ;;  %vm1735_vm6 = vcmask 769024   ;;  %vm1918_vm7 = vcmask 760832  }
  0x1b   : > { %s14739_s26 = smov 1   ;;  %s14740_s27 = smov 127   ;;  %vm2183_vm8 = vcmask 261120   ;;  %vm513_vm9 = vcmask 523264   ;;  %vm309_vm10 = vcmask 1048064   ;;  %vm14747_vm11 = vmmov 0  }
  0x1c   : > { %s14371_s19 = smul.u32 160, %s302_s18  ;;  %s14741_s28 = smov 95   ;;  %vm13098_vm12 = vcmask 9216  }
  0x1d   : > { %s14742_s11 = smov 94   ;;  %s14743_s18 = smov 93  }
  0x1e   : > { %s14852_s22 = scalar_lea.vmem %s21371_s0, %s14371_s19  ;;  %s298_s14 = sand.u32 1, %s14726_s30  }
  0x1f   : > { %v14527_v1 = vld [vmem:[%s14852_s22 + $0x4] ss:$40 sps:$4 sm:$0xff]   ;;  %v14529_v2 = vld [vmem:[%s14852_s22] ss:$40 sps:$4 sm:$0xff]   ;;  %v14532_v4 = vld [vmem:[%s14852_s22 + $0x54] ss:$40 sps:$4 sm:$0xff]  }
  0x20   : > { %430 = vrot.lane.b32.xlu0 %v14527_v1, %s14736_s23  ;;  %v14530_v3 = vld [vmem:[%s14852_s22 + $0x8] ss:$40 sps:$4 sm:$0xff]   ;;  %428 = vrot.lane.b32.xlu1 %v14529_v2, %s14736_s23  ;;  %v14534_v5 = vld [vmem:[%s14852_s22 + $0x58] ss:$40 sps:$4 sm:$0xff]   ;;  %s13177_s19 = sshll.u32 %s298_s14, 1 }
  0x21   : > { %v14536_v6 = vld [vmem:[%s14852_s22 + $0x50] ss:$40 sps:$4 sm:$0xff]   ;;  %v14537_v7 = vld [vmem:[%s14852_s22 + $0xc] ss:$40 sps:$4 sm:$0xff]   ;;  %v14545_v12 = vld [vmem:[%s14852_s22 + $0x5c] ss:$40 sps:$4 sm:$0xff]  }
  0x22   : > { %v14538_v8 = vld [vmem:[%s14852_s22 + $0x10] ss:$40 sps:$4 sm:$0xff]   ;;  %v14542_v10 = vld [vmem:[%s14852_s22 + $0xc] ss:$40 sps:$4 sm:$0xff]   ;;  %v14546_v13 = vld [vmem:[%s14852_s22 + $0x60] ss:$40 sps:$4 sm:$0xff]  }
  0x23   : > { %v14888_v9 = vld [vmem:[%s14852_s22 + $0x8] ss:$40 sps:$4 sm:$0xff]   ;;  %v14895_v11 = vld [vmem:[%s14852_s22 + $0x4] ss:$40 sps:$4 sm:$0xff]   ;;  %v14904_v14 = vld [vmem:[%s14852_s22 + $0x58] ss:$40 sps:$4 sm:$0xff]  }
  0x24   : > { %432 = vrot.lane.b32.xlu0 %v14530_v3, %s14736_s23  ;;  %450 = vrot.lane.b32.xlu1 %v14532_v4, %s14736_s23  ;;  %v14550_v15 = vld [vmem:[%s14852_s22 + $0x5c] ss:$40 sps:$4 sm:$0xff]   ;;  %v14977_v29 = vld [vmem:[%s14852_s22 + $0x10] ss:$40 sps:$4 sm:$0xff]  }
  0x25   : > { %v14911_v16 = vld [vmem:[%s14852_s22 + $0x54] ss:$40 sps:$4 sm:$0xff]   ;;  %v14996_v35 = vld [vmem:[%s14852_s22 + $0x18] ss:$40 sps:$4 sm:$0xff]   ;;  %v15007_v40 = vld [vmem:[%s14852_s22 + $0x64] ss:$40 sps:$4 sm:$0xff]  }
  0x26   : > { %v14982_v30 = vld [vmem:[%s14852_s22 + $0x14] ss:$40 sps:$4 sm:$0xff]   ;;  %v15002_v39 = vld [vmem:[%s14852_s22 + $0x60] ss:$40 sps:$4 sm:$0xff]   ;;  %v15017_v45 = vld [vmem:[%s14852_s22 + $0x64] ss:$40 sps:$4 sm:$0xff]  }
  0x27   : > { %v14991_v34 = vld [vmem:[%s14852_s22 + $0x14] ss:$40 sps:$4 sm:$0xff]   ;;  %v15022_v46 = vld [vmem:[%s14852_s22 + $0x68] ss:$40 sps:$4 sm:$0xff]  }
  0x28   : > { %452 = vrot.lane.b32.xlu0 %v14534_v5, %s14736_s23  ;;  %448 = vrot.lane.b32.xlu1 %v14536_v6, %s14736_s23 }
  0x2c   : > { %626 = vrot.lane.b32.xlu0 %v14527_v1, %s14737_s24  ;;  %628 = vrot.lane.b32.xlu1 %v14530_v3, %s14737_s24 }
  0x30   : > { %624 = vrot.lane.b32.xlu0 %v14529_v2, %s14737_s24  ;;  %646 = vrot.lane.b32.xlu1 %v14532_v4, %s14737_s24 }
  0x34   : > { %648 = vrot.lane.b32.xlu0 %v14534_v5, %s14737_s24  ;;  %644 = vrot.lane.b32.xlu1 %v14536_v6, %s14737_s24 }
  0x38   : > { %821 = vrot.lane.b32.xlu0 %v14527_v1, %s14738_s25  ;;  %823 = vrot.lane.b32.xlu1 %v14530_v3, %s14738_s25 }
  0x3c   : > { %819 = vrot.lane.b32.xlu0 %v14529_v2, %s14738_s25  ;;  %841 = vrot.lane.b32.xlu1 %v14532_v4, %s14738_s25 }
  0x40   : > { %843 = vrot.lane.b32.xlu0 %v14534_v5, %s14738_s25  ;;  %839 = vrot.lane.b32.xlu1 %v14536_v6, %s14738_s25 }
  0x44   : > { %1016 = vrot.lane.b32.xlu0 %v14527_v1, %s14739_s26  ;;  %1018 = vrot.lane.b32.xlu1 %v14530_v3, %s14739_s26 }
  0x48   : > { %1014 = vrot.lane.b32.xlu0 %v14529_v2, %s14739_s26  ;;  %1036 = vrot.lane.b32.xlu1 %v14532_v4, %s14739_s26 }
  0x4c   : > { %1038 = vrot.lane.b32.xlu0 %v14534_v5, %s14739_s26  ;;  %1034 = vrot.lane.b32.xlu1 %v14536_v6, %s14739_s26 }
  0x50   : > { %434 = vrot.lane.b32.xlu0 %v14537_v7, %s14736_s23  ;;  %436 = vrot.lane.b32.xlu1 %v14538_v8, %s14736_s23 }
  0x54   : > { %1335 = vrot.lane.b32.xlu0 %v14888_v9, %s14740_s27  ;;  %1337 = vrot.lane.b32.xlu1 %v14542_v10, %s14740_s27 }
  0x58   : > { %1333 = vrot.lane.b32.xlu0 %v14895_v11, %s14740_s27  ;;  %454 = vrot.lane.b32.xlu1 %v14545_v12, %s14736_s23 }
  0x5c   : > { %456 = vrot.lane.b32.xlu0 %v14546_v13, %s14736_s23  ;;  %1353 = vrot.lane.b32.xlu1 %v14904_v14, %s14740_s27 }
  0x60   : > { %1355 = vrot.lane.b32.xlu0 %v14550_v15, %s14740_s27  ;;  %1351 = vrot.lane.b32.xlu1 %v14911_v16, %s14740_s27 }
  0x64   : > { %630 = vrot.lane.b32.xlu0 %v14537_v7, %s14737_s24  ;;  %632 = vrot.lane.b32.xlu1 %v14538_v8, %s14737_s24 }
  0x68   : > { %1518 = vrot.lane.b32.xlu0 %v14888_v9, %s14741_s28  ;;  %1520 = vrot.lane.b32.xlu1 %v14542_v10, %s14741_s28 }
  0x6c   : > { %1516 = vrot.lane.b32.xlu0 %v14895_v11, %s14741_s28  ;;  %650 = vrot.lane.b32.xlu1 %v14545_v12, %s14737_s24 }
  0x70   : > { %652 = vrot.lane.b32.xlu0 %v14546_v13, %s14737_s24  ;;  %1536 = vrot.lane.b32.xlu1 %v14904_v14, %s14741_s28 }
  0x74   : > { %1538 = vrot.lane.b32.xlu0 %v14550_v15, %s14741_s28  ;;  %1534 = vrot.lane.b32.xlu1 %v14911_v16, %s14741_s28 }
  0x78   : > { %825 = vrot.lane.b32.xlu0 %v14537_v7, %s14738_s25  ;;  %827 = vrot.lane.b32.xlu1 %v14538_v8, %s14738_s25 }
  0x7c   : > { %1701 = vrot.lane.b32.xlu0 %v14888_v9, %s14742_s11  ;;  %1703 = vrot.lane.b32.xlu1 %v14542_v10, %s14742_s11 }
  0x80   : > { %1699 = vrot.lane.b32.xlu0 %v14895_v11, %s14742_s11  ;;  %845 = vrot.lane.b32.xlu1 %v14545_v12, %s14738_s25 }
  0x84   : > { %847 = vrot.lane.b32.xlu0 %v14546_v13, %s14738_s25  ;;  %1719 = vrot.lane.b32.xlu1 %v14904_v14, %s14742_s11 }
  0x88   : > { %1721 = vrot.lane.b32.xlu0 %v14550_v15, %s14742_s11  ;;  %1717 = vrot.lane.b32.xlu1 %v14911_v16, %s14742_s11 }
  0x8c   : > { %1020 = vrot.lane.b32.xlu0 %v14537_v7, %s14739_s26  ;;  %1022 = vrot.lane.b32.xlu1 %v14538_v8, %s14739_s26 }
  0x90   : > { %1040 = vrot.lane.b32.xlu0 %v14545_v12, %s14739_s26  ;;  %1042 = vrot.lane.b32.xlu1 %v14546_v13, %s14739_s26 }
  0x92   : > { %v431_v18 = vpop.permute.xlu0 %430  ;;  %v429_v19 = vpop.permute.xlu1 %428 }
  0x93   : > { %v469_v23 = vsel %vm468_vm0, %v429_v19, %v431_v18 }
  0x94   : > { %1884 = vrot.lane.b32.xlu0 %v14888_v9, %s14743_s18  ;;  %1886 = vrot.lane.b32.xlu1 %v14542_v10, %s14743_s18 }
  0x96   : > { %v14958_v20 = vpop.permute.xlu0 %432  ;;  %v451_v22 = vpop.permute.xlu1 %450 }
  0x97   : > { %v470_v21 = vsel %vm468_vm0, %v431_v18, %v14958_v20 }
  0x98   : > { %1882 = vrot.lane.b32.xlu0 %v14895_v11, %s14743_s18  ;;  %2190 = vmatprep.subr.bf16.mxu0 %v470_v21 }
  0x99   : > { %1902 = vrot.lane.b32.xlu1 %v14904_v14, %s14743_s18  ;;  %2191 = vmatpush1.bf16.msra.mxu0 %v469_v23 }
  0x9a   : > { %v14968_v25 = vpop.permute.xlu0 %452  ;;  %v449_v27 = vpop.permute.xlu1 %448 }
  0x9b   : > { %v479_v26 = vsel %vm468_vm0, %v451_v22, %v14968_v25  ;;  %v478_v28 = vsel %vm468_vm0, %v449_v27, %v451_v22 }
  0x9c   : > { %1904 = vrot.lane.b32.xlu0 %v14550_v15, %s14743_s18  ;;  %2192 = vmatprep.subr.bf16.mxu0 %v479_v26 }
  0x9d   : > { %1900 = vrot.lane.b32.xlu1 %v14911_v16, %s14743_s18  ;;  %2193 = vmatpush1.bf16.msra.mxu0 %v478_v28 }
  0x9e   : > { %v627_v31 = vpop.permute.xlu0 %626  ;;  %v14984_v32 = vpop.permute.xlu1 %628 }
  0x9f   : > { %v666_v33 = vsel %vm664_vm1, %v627_v31, %v14984_v32 }
  0xa0   : > { %1339 = vrot.lane.b32.xlu0 %v14977_v29, %s14740_s27  ;;  %2194 = vmatprep.subr.bf16.mxu0 %v666_v33 }
  0xa1   : > { %1341 = vrot.lane.b32.xlu1 %v14982_v30, %s14740_s27 }
  0xa2   : > { %v625_v36 = vpop.permute.xlu0 %624  ;;  %v647_v38 = vpop.permute.xlu1 %646 }
  0xa3   : > { %v665_v37 = vsel %vm664_vm1, %v625_v36, %v627_v31  ;;  %v15127_v31 = vld [vmem:[%s14852_s22 + $0x1c] ss:$40 sps:$4 sm:$0xff]  }
  0xa4   : > { %438 = vrot.lane.b32.xlu0 %v14991_v34, %s14736_s23  ;;  %2195 = vmatpush1.bf16.msra.mxu0 %v665_v37  ;;  %v15147_v36 = vld [vmem:[%s14852_s22 + $0x1c] ss:$40 sps:$4 sm:$0xff]  }
  0xa5   : > { %440 = vrot.lane.b32.xlu1 %v14996_v35, %s14736_s23 }
  0xa6   : > { %v15009_v41 = vpop.permute.xlu0 %648  ;;  %v645_v43 = vpop.permute.xlu1 %644 }
  0xa7   : > { %v675_v42 = vsel %vm664_vm1, %v647_v38, %v15009_v41  ;;  %v674_v44 = vsel %vm664_vm1, %v645_v43, %v647_v38  ;;  %v15163_v43 = vld [vmem:[%s14852_s22 + $0x70] ss:$40 sps:$4 sm:$0xff]  }
  0xa8   : > { %1357 = vrot.lane.b32.xlu0 %v15002_v39, %s14740_s27  ;;  %2196 = vmatprep.subr.bf16.mxu0 %v675_v42 }
  0xa9   : > { %1359 = vrot.lane.b32.xlu1 %v15007_v40, %s14740_s27  ;;  %2197 = vmatpush1.bf16.msra.mxu0 %v674_v44 }
  0xaa   : > { %v822_v47 = vpop.permute.xlu0 %821  ;;  %v15024_v48 = vpop.permute.xlu1 %823 }
  0xab   : > { %v861_v49 = vsel %vm859_vm2, %v822_v47, %v15024_v48 }
  0xac   : > { %458 = vrot.lane.b32.xlu0 %v15017_v45, %s14736_s23  ;;  %2198 = vmatprep.subr.bf16.mxu0 %v861_v49  ;;  %v15178_v49 = vld [vmem:[%s14852_s22 + $0x6c] ss:$40 sps:$4 sm:$0xff]  }
  0xad   : > { %460 = vrot.lane.b32.xlu1 %v15022_v46, %s14736_s23 }
  0xae   : > { %v820_v50 = vpop.permute.xlu0 %819  ;;  %v842_v52 = vpop.permute.xlu1 %841 }
  0xaf   : > { %v860_v51 = vsel %vm859_vm2, %v820_v50, %v822_v47  ;;  %v15170_v47 = vld [vmem:[%s14852_s22 + $0x68] ss:$40 sps:$4 sm:$0xff]  }
  0xb0   : > { %1522 = vrot.lane.b32.xlu0 %v14977_v29, %s14741_s28  ;;  %2199 = vmatpush1.bf16.msra.mxu0 %v860_v51 }
  0xb1   : > { %1524 = vrot.lane.b32.xlu1 %v14982_v30, %s14741_s28 }
  0xb2   : > { %v15037_v53 = vpop.permute.xlu0 %843  ;;  %v840_v55 = vpop.permute.xlu1 %839 }
  0xb3   : > { %v870_v54 = vsel %vm859_vm2, %v842_v52, %v15037_v53  ;;  %v869_v56 = vsel %vm859_vm2, %v840_v55, %v842_v52 }
  0xb4   : > { %634 = vrot.lane.b32.xlu0 %v14991_v34, %s14737_s24  ;;  %2200 = vmatprep.subr.bf16.mxu0 %v870_v54 }
  0xb5   : > { %636 = vrot.lane.b32.xlu1 %v14996_v35, %s14737_s24  ;;  %2201 = vmatpush1.bf16.msra.mxu0 %v869_v56 }
  0xb6   : > { %v1017_v57 = vpop.permute.xlu0 %1016  ;;  %v15046_v58 = vpop.permute.xlu1 %1018 }
  0xb7   : > { %v1056_v59 = vsel %vm1054_vm3, %v1017_v57, %v15046_v58 }
  0xb8   : > { %1540 = vrot.lane.b32.xlu0 %v15002_v39, %s14741_s28  ;;  %2202 = vmatprep.subr.bf16.mxu0 %v1056_v59 }
  0xb9   : > { %1542 = vrot.lane.b32.xlu1 %v15007_v40, %s14741_s28 }
  0xba   : > { %v1015_v60 = vpop.permute.xlu0 %1014  ;;  %v1037_v62 = vpop.permute.xlu1 %1036 }
  0xbb   : > { %v1055_v61 = vsel %vm1054_vm3, %v1015_v60, %v1017_v57 }
  0xbc   : > { %654 = vrot.lane.b32.xlu0 %v15017_v45, %s14737_s24  ;;  %2203 = vmatpush1.bf16.msra.mxu0 %v1055_v61 }
  0xbd   : > { %656 = vrot.lane.b32.xlu1 %v15022_v46, %s14737_s24 }
  0xbe   : > { %v15059_v63 = vpop.permute.xlu0 %1038  ;;  %v1035_v1 = vpop.permute.xlu1 %1034 }
  0xbf   : > { %v1065_v0 = vsel %vm1054_vm3, %v1037_v62, %v15059_v63  ;;  %v1064_v2 = vsel %vm1054_vm3, %v1035_v1, %v1037_v62 }
  0xc0   : > { %1705 = vrot.lane.b32.xlu0 %v14977_v29, %s14742_s11  ;;  %2204 = vmatprep.subr.bf16.mxu0 %v1065_v0 }
  0xc1   : > { %1707 = vrot.lane.b32.xlu1 %v14982_v30, %s14742_s11  ;;  %2205 = vmatpush1.bf16.msra.mxu0 %v1064_v2 }
  0xc2   : > { %v435_v3 = vpop.permute.xlu0 %434  ;;  %2206 = vmatprep.subr.bf16.mxu0 %v14888_v9  ;;  %v15071_v5 = vpop.permute.xlu1 %436 }
  0xc3   : > { %v471_v4 = vsel %vm468_vm0, %v14958_v20, %v435_v3  ;;  %v472_v6 = vsel %vm468_vm0, %v435_v3, %v15071_v5 }
  0xc4   : > { %829 = vrot.lane.b32.xlu0 %v14991_v34, %s14738_s25  ;;  %2296 = vmatprep.subr.bf16.mxu1 %v472_v6 }
  0xc5   : > { %831 = vrot.lane.b32.xlu1 %v14996_v35, %s14738_s25  ;;  %2207 = vmatpush1.bf16.msra.mxu0 %v14895_v11 }
  0xc6   : > { %v1336_v7 = vpop.permute.xlu0 %1335  ;;  %2297 = vmatpush1.bf16.msra.mxu1 %v471_v4  ;;  %v15080_v8 = vpop.permute.xlu1 %1337  ;;  %2208 = vmatprep.subr.bf16.mxu0 %v14904_v14 }
  0xc7   : > { %v1371_v9 = vsel %vm1369_vm4, %v1336_v7, %v15080_v8 }
  0xc8   : > { %1723 = vrot.lane.b32.xlu0 %v15002_v39, %s14742_s11 }
  0xc9   : > { %1725 = vrot.lane.b32.xlu1 %v15007_v40, %s14742_s11  ;;  %2209 = vmatpush1.bf16.msra.mxu0 %v14911_v16 }
  0xca   : > { %v1334_v10 = vpop.permute.xlu0 %1333  ;;  %v455_v12 = vpop.permute.xlu1 %454  ;;  %2210 = vmatprep.subr.bf16.mxu0 %v1371_v9  ;;  %v15230_v9 = vld [vmem:[%s21372_s1 + $0x1c] ss:$12 sps:$4 sm:$0xff]  }
  0xcb   : > { %v1370_v11 = vsel %vm1369_vm4, %v1334_v10, %v1336_v7  ;;  %v480_v16 = vsel %vm468_vm0, %v14968_v25, %v455_v12 }
  0xcc   : > { %849 = vrot.lane.b32.xlu0 %v15017_v45, %s14738_s25 }
  0xcd   : > { %851 = vrot.lane.b32.xlu1 %v15022_v46, %s14738_s25  ;;  %2211 = vmatpush1.bf16.msra.mxu0 %v1370_v11 }
  0xce   : > { %v15095_v13 = vpop.permute.xlu0 %456  ;;  %v1354_v15 = vpop.permute.xlu1 %1353 }
  0xcf   : > { %v481_v14 = vsel %vm468_vm0, %v455_v12, %v15095_v13 }
  0xd0   : > { %1024 = vrot.lane.b32.xlu0 %v14991_v34, %s14739_s26  ;;  %2298 = vmatprep.subr.bf16.mxu1 %v481_v14 }
  0xd1   : > { %1026 = vrot.lane.b32.xlu1 %v14996_v35, %s14739_s26  ;;  %2299 = vmatpush1.bf16.msra.mxu1 %v480_v16  ;;  %v15140_v35 = vld [vmem:[%s14852_s22 + $0x18] ss:$40 sps:$4 sm:$0xff]  }
  0xd2   : > { %v15105_v18 = vpop.permute.xlu0 %1355  ;;  %v1352_v20 = vpop.permute.xlu1 %1351  ;;  %v14581_v16 = vld [vmem:[%s14852_s22 + $0x10] ss:$40 sps:$4 sm:$0xff]  }
  0xd3   : > { %v1379_v19 = vsel %vm1369_vm4, %v1354_v15, %v15105_v18  ;;  %v1378_v21 = vsel %vm1369_vm4, %v1352_v20, %v1354_v15  ;;  %v15256_v20 = vld [vmem:[%s21372_s1 + $0x18] ss:$12 sps:$4 sm:$0xff]  }
  0xd4   : > { %1044 = vrot.lane.b32.xlu0 %v15017_v45, %s14739_s26  ;;  %2212 = vmatprep.subr.bf16.mxu0 %v1379_v19 }
  0xd5   : > { %1046 = vrot.lane.b32.xlu1 %v15022_v46, %s14739_s26  ;;  %2213 = vmatpush1.bf16.msra.mxu0 %v1378_v21  ;;  %v14583_v21 = vld [vmem:[%s14852_s22 + $0xc] ss:$40 sps:$4 sm:$0xff]  }
  0xd6   : > { %v631_v22 = vpop.permute.xlu0 %630  ;;  %v15116_v25 = vpop.permute.xlu1 %632 }
  0xd7   : > { %v667_v23 = vsel %vm664_vm1, %v14984_v32, %v631_v22  ;;  %v668_v26 = vsel %vm664_vm1, %v631_v22, %v15116_v25 }
  0xd8   : > { %1888 = vrot.lane.b32.xlu0 %v14977_v29, %s14743_s18  ;;  %2300 = vmatprep.subr.bf16.mxu1 %v668_v26  ;;  %v15136_v29 = vld [vmem:[%s14852_s22 + $0x20] ss:$40 sps:$4 sm:$0xff]  }
  0xd9   : > { %1890 = vrot.lane.b32.xlu1 %v14982_v30, %s14743_s18  ;;  %2301 = vmatpush1.bf16.msra.mxu1 %v667_v23  ;;  %v14586_v23 = vld [vmem:[%s14852_s22 + $0x60] ss:$40 sps:$4 sm:$0xff]  }
  0xda   : > { %v1519_v27 = vpop.permute.xlu0 %1518  ;;  %v15124_v28 = vpop.permute.xlu1 %1520 }
  0xdb   : > { %v1554_v32 = vsel %vm1552_vm5, %v1519_v27, %v15124_v28 }
  0xdc   : > { %1906 = vrot.lane.b32.xlu0 %v15002_v39, %s14743_s18  ;;  %2214 = vmatprep.subr.bf16.mxu0 %v1554_v32  ;;  %v14589_v32 = vld [vmem:[%s14852_s22 + $0x5c] ss:$40 sps:$4 sm:$0xff]  }
  0xdd   : > { %1908 = vrot.lane.b32.xlu1 %v15007_v40, %s14743_s18  ;;  %v15154_v40 = vld [vmem:[%s14852_s22 + $0x6c] ss:$40 sps:$4 sm:$0xff]  }
  0xde   : > { %v1517_v30 = vpop.permute.xlu0 %1516  ;;  %v651_v34 = vpop.permute.xlu1 %650 }
  0xdf   : > { %v1553_v33 = vsel %vm1552_vm5, %v1517_v30, %v1519_v27  ;;  %v676_v42 = vsel %vm664_vm1, %v15009_v41, %v651_v34 }
  0xe0   : > { %442 = vrot.lane.b32.xlu0 %v15127_v31, %s14736_s23  ;;  %2215 = vmatpush1.bf16.msra.mxu0 %v1553_v33 }
  0xe1   : > { %444 = vrot.lane.b32.xlu1 %v15136_v29, %s14736_s23 }
  0xe2   : > { %v15149_v37 = vpop.permute.xlu0 %652  ;;  %v1537_v39 = vpop.permute.xlu1 %1536 }
  0xe3   : > { %v677_v38 = vsel %vm664_vm1, %v651_v34, %v15149_v37 }
  0xe4   : > { %1343 = vrot.lane.b32.xlu0 %v15140_v35, %s14740_s27  ;;  %2302 = vmatprep.subr.bf16.mxu1 %v677_v38 }
  0xe5   : > { %1345 = vrot.lane.b32.xlu1 %v15147_v36, %s14740_s27  ;;  %2303 = vmatpush1.bf16.msra.mxu1 %v676_v42 }
  0xe6   : > { %v15165_v44 = vpop.permute.xlu0 %1538  ;;  %v1535_v46 = vpop.permute.xlu1 %1534 }
  0xe7   : > { %v1562_v45 = vsel %vm1552_vm5, %v1537_v39, %v15165_v44  ;;  %v1561_v41 = vsel %vm1552_vm5, %v1535_v46, %v1537_v39 }
  0xe8   : > { %462 = vrot.lane.b32.xlu0 %v15154_v40, %s14736_s23  ;;  %2216 = vmatprep.subr.bf16.mxu0 %v1562_v45  ;;  %v15288_v45 = vld [vmem:[%s21372_s1 + $0x8] ss:$12 sps:$4 sm:$0xff]  }
  0xe9   : > { %464 = vrot.lane.b32.xlu1 %v15163_v43, %s14736_s23  ;;  %2217 = vmatpush1.bf16.msra.mxu0 %v1561_v41 }
  0xea   : > { %v826_v50 = vpop.permute.xlu0 %825  ;;  %v15182_v52 = vpop.permute.xlu1 %827 }
  0xeb   : > { %v862_v51 = vsel %vm859_vm2, %v15024_v48, %v826_v50  ;;  %v863_v54 = vsel %vm859_vm2, %v826_v50, %v15182_v52 }
  0xec   : > { %1361 = vrot.lane.b32.xlu0 %v15170_v47, %s14740_s27  ;;  %2304 = vmatprep.subr.bf16.mxu1 %v863_v54 }
  0xed   : > { %1363 = vrot.lane.b32.xlu1 %v15178_v49, %s14740_s27  ;;  %2305 = vmatpush1.bf16.msra.mxu1 %v862_v51 }
  0xee   : > { %v1702_v55 = vpop.permute.xlu0 %1701  ;;  %v15190_v56 = vpop.permute.xlu1 %1703 }
  0xef   : > { %v1737_v48 = vsel %vm1735_vm6, %v1702_v55, %v15190_v56 }
  0xf0   : > { %638 = vrot.lane.b32.xlu0 %v15127_v31, %s14737_s24  ;;  %2218 = vmatprep.subr.bf16.mxu0 %v1737_v48  ;;  %v15329_v48 = vld [vmem:[%s14852_s22 + $0x20] ss:$40 sps:$4 sm:$0xff]  }
  0xf1   : > { %640 = vrot.lane.b32.xlu1 %v15136_v29, %s14737_s24 }
  0xf2   : > { %v1700_v57 = vpop.permute.xlu0 %1699  ;;  %v846_v60 = vpop.permute.xlu1 %845 }
  0xf3   : > { %v1736_v59 = vsel %vm1735_vm6, %v1700_v57, %v1702_v55  ;;  %v871_v1 = vsel %vm859_vm2, %v15037_v53, %v846_v60  ;;  %v15223_v53 = vld [vmem:[%s21372_s1] ss:$12 sps:$4 sm:$0xff]  }
  0xf4   : > { %1526 = vrot.lane.b32.xlu0 %v15140_v35, %s14741_s28  ;;  %2219 = vmatpush1.bf16.msra.mxu0 %v1736_v59 }
  0xf5   : > { %1528 = vrot.lane.b32.xlu1 %v15147_v36, %s14741_s28 }
  0xf6   : > { %v15203_v61 = vpop.permute.xlu0 %847  ;;  %v1720_v0 = vpop.permute.xlu1 %1719 }
  0xf7   : > { %v872_v62 = vsel %vm859_vm2, %v846_v60, %v15203_v61  ;;  %v15346_v60 = vld [vmem:[%s14852_s22 + $0x70] ss:$40 sps:$4 sm:$0xff]  }
  0xf8   : > { %658 = vrot.lane.b32.xlu0 %v15154_v40, %s14737_s24  ;;  %2306 = vmatprep.subr.bf16.mxu1 %v872_v62 }
  0xf9   : > { %660 = vrot.lane.b32.xlu1 %v15163_v43, %s14737_s24  ;;  %2307 = vmatpush1.bf16.msra.mxu1 %v871_v1 }
  0xfa   : > { %v15213_v2 = vpop.permute.xlu0 %1721  ;;  %v1718_v4 = vpop.permute.xlu1 %1717 }
  0xfb   : > { %v1745_v3 = vsel %vm1735_vm6, %v1720_v0, %v15213_v2  ;;  %v1744_v6 = vsel %vm1735_vm6, %v1718_v4, %v1720_v0 }
  0xfc   : > { %1544 = vrot.lane.b32.xlu0 %v15170_v47, %s14741_s28  ;;  %2220 = vmatprep.subr.bf16.mxu0 %v1745_v3  ;;  %v14595_v3 = vld [vmem:[%s14852_s22 + $0x24] ss:$40 sps:$4 sm:$0xff]  }
  0xfd   : > { %1546 = vrot.lane.b32.xlu1 %v15178_v49, %s14741_s28  ;;  %2221 = vmatpush1.bf16.msra.mxu0 %v1744_v6 }
  0xfe   : > { %v1021_v7 = vpop.permute.xlu0 %1020  ;;  %v15234_v11 = vpop.permute.xlu1 %1022 }
  0xff   : > { %v1057_v10 = vsel %vm1054_vm3, %v15046_v58, %v1021_v7  ;;  %v1058_v12 = vsel %vm1054_vm3, %v1021_v7, %v15234_v11 }
 0x100   : > { %833 = vrot.lane.b32.xlu0 %v15127_v31, %s14738_s25  ;;  %2223 = vmatmul.mubr.bf16.vlgmr.msra.gmra.mrb[0].mxu0 %v15223_v53 }
 0x101   : > { %835 = vrot.lane.b32.xlu1 %v15136_v29, %s14738_s25  ;;  %2308 = vmatprep.subr.bf16.mxu1 %v1058_v12 }
 0x102   : > { %v1041_v14 = vpop.permute.xlu0 %1040  ;;  %2309 = vmatpush1.bf16.msra.mxu1 %v1057_v10  ;;  %2232 = vmatprep.mubr.bf16.mxu0 %v15230_v9  ;;  %v15246_v15 = vpop.permute.xlu1 %1042  ;;  %v14596_v10 = vld [vmem:[%s14852_s22 + $0x74] ss:$40 sps:$4 sm:$0xff]  }
 0x103   : > { %v1066_v58 = vsel %vm1054_vm3, %v15059_v63, %v1041_v14  ;;  %v1067_v19 = vsel %vm1054_vm3, %v1041_v14, %v15246_v15 }
 0x104   : > { %1709 = vrot.lane.b32.xlu0 %v15140_v35, %s14742_s11  ;;  %2310 = vmatprep.subr.bf16.mxu1 %v1067_v19 }
 0x105   : > { %1711 = vrot.lane.b32.xlu1 %v15147_v36, %s14742_s11 }
 0x106   : > { %v1885_v63 = vpop.permute.xlu0 %1884  ;;  %2311 = vmatpush1.bf16.msra.mxu1 %v1066_v58  ;;  %v15261_v22 = vpop.permute.xlu1 %1886 }
 0x107   : > { %2312 = vmatprep.subr.bf16.mxu1 %v14581_v16  ;;  %v1920_v26 = vsel %vm1918_vm7, %v1885_v63, %v15261_v22  ;;  %v14597_v16 = vld [vmem:[%s14852_s22 + $0x24] ss:$40 sps:$4 sm:$0xff]  }
 0x108   : > { %853 = vrot.lane.b32.xlu0 %v15154_v40, %s14738_s25  ;;  %2233 = vmatmul.mubr.bf16.gmra.mrb[4].mxu0 %v15256_v20 }
 0x109   : > { %855 = vrot.lane.b32.xlu1 %v15163_v43, %s14738_s25  ;;  %2243 = vmatprep.subr.bf16.mxu0 %v1920_v26 }
 0x10a   : > { %v1883_v27 = vpop.permute.xlu0 %1882  ;;  %2313 = vmatpush1.bf16.msra.mxu1 %v14583_v21  ;;  %2275 = vmatprep.mubr.bf16.mxu0 %v14744_v24 }
 0x10b   : > { %v1919_v30 = vsel %vm1918_vm7, %v1883_v27, %v1885_v63  ;;  %v1903_v33 = vpop.permute.xlu1 %1902  ;;  %2314 = vmatprep.subr.bf16.mxu1 %v14586_v23  ;;  %v14598_v23 = vld [vmem:[%s14852_s22 + $0x74] ss:$40 sps:$4 sm:$0xff]   ;;  %v14615_v27 = vld [vmem:[%s14852_s22 + $0x24] ss:$40 sps:$4 sm:$0xff]  }
 0x10c   : > { %1727 = vrot.lane.b32.xlu0 %v15170_v47, %s14742_s11  ;;  %2244 = vmatpush1.bf16.msra.mxu0 %v1919_v30  ;;  %1229 = vst.msk [vmem:[#allocation4 + $0x280] sm:$0xff] %vm513_vm9, %v14615_v27 }
 0x10d   : > { %1729 = vrot.lane.b32.xlu1 %v15178_v49, %s14742_s11 }
 0x10e   : > { %v15278_v34 = vpop.permute.xlu0 %1904  ;;  %2315 = vmatpush1.bf16.msra.mxu1 %v14589_v32 }
 0x10f   : > { %v1928_v38 = vsel %vm1918_vm7, %v1903_v33, %v15278_v34  ;;  %v1901_v39 = vpop.permute.xlu1 %1900 }
 0x110   : > { %v1927_v42 = vsel %vm1918_vm7, %v1901_v39, %v1903_v33  ;;  %1028 = vrot.lane.b32.xlu0 %v15127_v31, %s14739_s26  ;;  %2245 = vmatprep.subr.bf16.mxu0 %v1928_v38  ;;  %v14599_v33 = vld [vmem:[%s14852_s22 + $0x24] ss:$40 sps:$4 sm:$0xff]   ;;  %v14616_v39 = vld [vmem:[%s14852_s22 + $0x74] ss:$40 sps:$4 sm:$0xff]  }
 0x111   : > { %1030 = vrot.lane.b32.xlu1 %v15136_v29, %s14739_s26  ;;  %2246 = vmatpush1.bf16.msra.mxu0 %v1927_v42  ;;  %1238 = vst.msk [vmem:[#allocation4 + $0x2c8] sm:$0xff] %vm513_vm9, %v14616_v39 }
 0x112   : > { %v1340_v46 = vpop.permute.xlu0 %1339 }
 0x113   : > { %v1372_v41 = vsel %vm1369_vm4, %v15080_v8, %v1340_v46  ;;  %v15294_v50 = vpop.permute.xlu1 %1341 }
 0x114   : > { %v1373_v31 = vsel %vm1369_vm4, %v1340_v46, %v15294_v50  ;;  %1048 = vrot.lane.b32.xlu0 %v15154_v40, %s14739_s26  ;;  %13355 = vmatmul.mubr.msk.bf16.vlgmr.msra.gmra.mrb[0].mxu0 %vm2183_vm8, %v15288_v45 }
 0x115   : > { %1050 = vrot.lane.b32.xlu1 %v15163_v43, %s14739_s26  ;;  %2316 = vmatprep.subr.bf16.mxu1 %v1373_v31  ;;  %v15316_v43 = vld [vmem:[%s21372_s1 + $0x20] ss:$12 sps:$4 sm:$0xff]  }
 0x116   : > { %v439_v29 = vpop.permute.xlu0 %438  ;;  %2317 = vmatpush1.bf16.msra.mxu1 %v1372_v41  ;;  %2285 = vmatprep.mubr.bf16.mxu0 %v14744_v24  ;;  %v14600_v41 = vld [vmem:[%s14852_s22 + $0x74] ss:$40 sps:$4 sm:$0xff]  }
 0x117   : > { %v473_v8 = vsel %vm468_vm0, %v15071_v5, %v439_v29  ;;  %v15307_v51 = vpop.permute.xlu1 %440 }
 0x118   : > { %v474_v40 = vsel %vm468_vm0, %v439_v29, %v15307_v51  ;;  %1892 = vrot.lane.b32.xlu0 %v15140_v35, %s14743_s18 }
 0x119   : > { %1894 = vrot.lane.b32.xlu1 %v15147_v36, %s14743_s18  ;;  %2402 = vmatprep.subr.bf16.mxu0 %v474_v40  ;;  %v14591_v36 = vld [vmem:[%s14852_s22 + $0x24] ss:$40 sps:$4 sm:$0xff]  }
 0x11a   : > { %v1358_v54 = vpop.permute.xlu0 %1357  ;;  %2403 = vmatpush1.bf16.msra.mxu0 %v473_v8  ;;  %v14571_v8 = vld [vmem:[%s14852_s22 + $0x24] ss:$40 sps:$4 sm:$0xff]  }
 0x11b   : > { %v1380_v5 = vsel %vm1369_vm4, %v15105_v18, %v1358_v54  ;;  %v15322_v55 = vpop.permute.xlu1 %1359 }
 0x11c   : > { %v1381_v35 = vsel %vm1369_vm4, %v1358_v54, %v15322_v55  ;;  %1910 = vrot.lane.b32.xlu0 %v15170_v47, %s14743_s18  ;;  %13356 = vmatmul.mubr.msk.bf16.gmra.mrb[4].mxu0 %vm2183_vm8, %v15316_v43  ;;  %v14601_v54 = vld [vmem:[%s14852_s22 + $0x74] ss:$40 sps:$4 sm:$0xff]  }
 0x11d   : > { %1912 = vrot.lane.b32.xlu1 %v15178_v49, %s14743_s18  ;;  %2318 = vmatprep.subr.bf16.mxu1 %v1381_v35  ;;  %v14594_v49 = vld [vmem:[%s14852_s22 + $0x74] ss:$40 sps:$4 sm:$0xff]  }
 0x11e   : > { %v459_v18 = vpop.permute.xlu0 %458  ;;  %2319 = vmatpush1.bf16.msra.mxu1 %v1380_v5  ;;  %2434 = vmatprep.mubr.bf16.mxu0 %v14944_v17 }
 0x11f   : > { %v482_v57 = vsel %vm468_vm0, %v15095_v13, %v459_v18  ;;  %v15339_v59 = vpop.permute.xlu1 %460 }
 0x120   : > { %v483_v47 = vsel %vm468_vm0, %v459_v18, %v15339_v59  ;;  %1347 = vrot.lane.b32.xlu0 %v15329_v48, %s14740_s27 }
 0x121   : > { %1349 = vrot.lane.b32.xlu1 %v14591_v36, %s14740_s27  ;;  %2404 = vmatprep.subr.bf16.mxu0 %v483_v47 }
 0x122   : > { %v1523_v62 = vpop.permute.xlu0 %1522  ;;  %2405 = vmatpush1.bf16.msra.mxu0 %v482_v57 }
 0x123   : > { %v1555_v13 = vsel %vm1552_vm5, %v15124_v28, %v1523_v62  ;;  %v15352_v0 = vpop.permute.xlu1 %1524 }
 0x124   : > { %v1556_v1 = vsel %vm1552_vm5, %v1523_v62, %v15352_v0  ;;  %1365 = vrot.lane.b32.xlu0 %v15346_v60, %s14740_s27 }
 0x125   : > { %1367 = vrot.lane.b32.xlu1 %v14594_v49, %s14740_s27  ;;  %2320 = vmatprep.subr.bf16.mxu1 %v1556_v1  ;;  %v14603_v49 = vld [vmem:[%s14852_s22 + $0x18] ss:$40 sps:$4 sm:$0xff]   ;;  %v14605_v1 = vld [vmem:[%s14852_s22 + $0x14] ss:$40 sps:$4 sm:$0xff]  }
 0x126   : > { %v635_v4 = vpop.permute.xlu0 %634  ;;  %2321 = vmatpush1.bf16.msra.mxu1 %v1555_v13 }
 0x127   : > { %v669_v6 = vsel %vm664_vm1, %v15116_v25, %v635_v4  ;;  %v15362_v7 = vpop.permute.xlu1 %636 }
 0x128   : > { %v670_v28 = vsel %vm664_vm1, %v635_v4, %v15362_v7  ;;  %1530 = vrot.lane.b32.xlu0 %v15329_v48, %s14741_s28  ;;  %v14606_v4 = vld [vmem:[%s14852_s22 + $0x68] ss:$40 sps:$4 sm:$0xff]  }
 0x129   : > { %1532 = vrot.lane.b32.xlu1 %v14595_v3, %s14741_s28  ;;  %2406 = vmatprep.subr.bf16.mxu0 %v670_v28  ;;  %v324_v28 = vld [vmem:[%s21373_s2] sm:$0xff] }
 0x12a   : > { %v1541_v12 = vpop.permute.xlu0 %1540  ;;  %2407 = vmatpush1.bf16.msra.mxu0 %v669_v6 }
 0x12b   : > { %v1563_v14 = vsel %vm1552_vm5, %v15165_v44, %v1541_v12  ;;  %v15372_v58 = vpop.permute.xlu1 %1542 }
 0x12c   : > { %v1564_v25 = vsel %vm1552_vm5, %v1541_v12, %v15372_v58  ;;  %1548 = vrot.lane.b32.xlu0 %v15346_v60, %s14741_s28  ;;  %v325_v12 = vld [vmem:[%s21373_s2 + $0x8] sm:$0xff] }
 0x12d   : > { %1550 = vrot.lane.b32.xlu1 %v14596_v10, %s14741_s28  ;;  %2322 = vmatprep.subr.bf16.mxu1 %v1564_v25 }
 0x12e   : > { %v655_v19 = vpop.permute.xlu0 %654  ;;  %2323 = vmatpush1.bf16.msra.mxu1 %v1563_v14 }
 0x12f   : > { %v678_v63 = vsel %vm664_vm1, %v15149_v37, %v655_v19  ;;  %v15382_v21 = vpop.permute.xlu1 %656 }
 0x130   : > { %v679_v44 = vsel %vm664_vm1, %v655_v19, %v15382_v21  ;;  %1713 = vrot.lane.b32.xlu0 %v15329_v48, %s14742_s11  ;;  %v327_v19 = vld [vmem:[%s21373_s2 + $0x18] sm:$0xff] }
 0x131   : > { %1715 = vrot.lane.b32.xlu1 %v14597_v16, %s14742_s11  ;;  %2408 = vmatprep.subr.bf16.mxu0 %v679_v44 }
 0x132   : > { %v1706_v26 = vpop.permute.xlu0 %1705  ;;  %2409 = vmatpush1.bf16.msra.mxu0 %v678_v63 }
 0x133   : > { %v1738_v37 = vsel %vm1735_vm6, %v15190_v56, %v1706_v26  ;;  %v15393_v32 = vpop.permute.xlu1 %1707 }
 0x134   : > { %v1739_v30 = vsel %vm1735_vm6, %v1706_v26, %v15393_v32  ;;  %1731 = vrot.lane.b32.xlu0 %v15346_v60, %s14742_s11  ;;  %v326_v26 = vld [vmem:[%s21373_s2 + $0x10] sm:$0xff] }
 0x135   : > { %1733 = vrot.lane.b32.xlu1 %v14598_v23, %s14742_s11  ;;  %2324 = vmatprep.subr.bf16.mxu1 %v1739_v30 }
 0x136   : > { %v830_v38 = vpop.permute.xlu0 %829  ;;  %2325 = vmatpush1.bf16.msra.mxu1 %v1738_v37 }
 0x137   : > { %v864_v56 = vsel %vm859_vm2, %v15182_v52, %v830_v38  ;;  %v15405_v42 = vpop.permute.xlu1 %831 }
 0x138   : > { %v865_v46 = vsel %vm859_vm2, %v830_v38, %v15405_v42  ;;  %1896 = vrot.lane.b32.xlu0 %v15329_v48, %s14743_s18 }
 0x139   : > { %1898 = vrot.lane.b32.xlu1 %v14599_v33, %s14743_s18  ;;  %2410 = vmatprep.subr.bf16.mxu0 %v865_v46 }
 0x13a   : > { %v1724_v31 = vpop.permute.xlu0 %1723  ;;  %2411 = vmatpush1.bf16.msra.mxu0 %v864_v56 }
 0x13b   : > { %v1746_v52 = vsel %vm1735_vm6, %v15213_v2, %v1724_v31  ;;  %v15416_v29 = vpop.permute.xlu1 %1725 }
 0x13c   : > { %v1747_v40 = vsel %vm1735_vm6, %v1724_v31, %v15416_v29  ;;  %1914 = vrot.lane.b32.xlu0 %v15346_v60, %s14743_s18 }
 0x13d   : > { %1916 = vrot.lane.b32.xlu1 %v14600_v41, %s14743_s18  ;;  %2326 = vmatprep.subr.bf16.mxu1 %v1747_v40 }
 0x13e   : > { %v850_v5 = vpop.permute.xlu0 %849  ;;  %2327 = vmatpush1.bf16.msra.mxu1 %v1746_v52 }
 0x13f   : > { %v873_v35 = vsel %vm859_vm2, %v15203_v61, %v850_v5  ;;  %v15427_v48 = vpop.permute.xlu1 %851 }
 0x140   : > { %v874_v2 = vsel %vm859_vm2, %v850_v5, %v15427_v48  ;;  %446 = vrot.lane.b32.xlu0 %v14571_v8, %s14736_s23 }
 0x141   : > { %466 = vrot.lane.b32.xlu1 %v14601_v54, %s14736_s23  ;;  %2412 = vmatprep.subr.bf16.mxu0 %v874_v2 }
 0x142   : > { %v1025_v36 = vpop.permute.xlu0 %1024  ;;  %2413 = vmatpush1.bf16.msra.mxu0 %v873_v35  ;;  %2329 = vmatmul.mubr.bf16.vlgmr.msra.gmra.mrb[0].mxu1 %v15223_v53 }
 0x143   : > { %v1059_v18 = vsel %vm1054_vm3, %v15234_v11, %v1025_v36  ;;  %v15436_v57 = vpop.permute.xlu1 %1026  ;;  %2338 = vmatprep.mubr.bf16.mxu1 %v15230_v9 }
 0x144   : > { %v1060_v61 = vsel %vm1054_vm3, %v1025_v36, %v15436_v57  ;;  %642 = vrot.lane.b32.xlu0 %v14571_v8, %s14737_s24 }
 0x145   : > { %662 = vrot.lane.b32.xlu1 %v14601_v54, %s14737_s24  ;;  %2414 = vmatprep.subr.bf16.mxu0 %v1060_v61 }
 0x146   : > { %v1045_v47 = vpop.permute.xlu0 %1044  ;;  %2415 = vmatpush1.bf16.msra.mxu0 %v1059_v18 }
 0x147   : > { %v1068_v60 = vsel %vm1054_vm3, %v15246_v15, %v1045_v47  ;;  %v15445_v11 = vpop.permute.xlu1 %1046 }
 0x148   : > { %v1069_v62 = vsel %vm1054_vm3, %v1045_v47, %v15445_v11  ;;  %837 = vrot.lane.b32.xlu0 %v14571_v8, %s14738_s25 }
 0x149   : > { %2416 = vmatprep.subr.bf16.mxu0 %v1069_v62  ;;  %857 = vrot.lane.b32.xlu1 %v14601_v54, %s14738_s25 }
 0x14a   : > { %v1889_v13 = vpop.permute.xlu0 %1888  ;;  %2417 = vmatpush1.bf16.msra.mxu0 %v1068_v60  ;;  %2339 = vmatmul.mubr.bf16.gmra.mrb[4].mxu1 %v15256_v20 }
 0x14b   : > { %v1921_v15 = vsel %vm1918_vm7, %v15261_v22, %v1889_v13  ;;  %v15456_v3 = vpop.permute.xlu1 %1890  ;;  %2418 = vmatprep.subr.bf16.mxu0 %v14603_v49  ;;  %2381 = vmatprep.mubr.bf16.mxu1 %v14744_v24  ;;  %v14608_v22 = vld [vmem:[%s14852_s22 + $0x64] ss:$40 sps:$4 sm:$0xff]  }
 0x14c   : > { %v1922_v6 = vsel %vm1918_vm7, %v1889_v13, %v15456_v3  ;;  %1032 = vrot.lane.b32.xlu0 %v14571_v8, %s14739_s26 }
 0x14d   : > { %2349 = vmatprep.subr.bf16.mxu1 %v1922_v6  ;;  %1052 = vrot.lane.b32.xlu1 %v14601_v54, %s14739_s26 }
 0x14e   : > { %v1907_v10 = vpop.permute.xlu0 %1906  ;;  %2350 = vmatpush1.bf16.msra.mxu1 %v1921_v15  ;;  %2419 = vmatpush1.bf16.msra.mxu0 %v14605_v1 }
 0x14f   : > { %v1929_v14 = vsel %vm1918_vm7, %v15278_v34, %v1907_v10  ;;  %v15473_v25 = vpop.permute.xlu1 %1908  ;;  %2420 = vmatprep.subr.bf16.mxu0 %v14606_v4 }
 0x150   : > { %v1930_v16 = vsel %vm1918_vm7, %v1907_v10, %v15473_v25  ;;  %2135 = vperm.xlu0 %14425, %v324_v28  }
 0x151   : > { %2351 = vmatprep.subr.bf16.mxu1 %v1930_v16  ;;  %2140 = vperm.xlu1 %14426, %v325_v12  }
 0x152   : > { %v443_v63 = vpop.permute.xlu0 %442  ;;  %2352 = vmatpush1.bf16.msra.mxu1 %v1929_v14  ;;  %2421 = vmatpush1.bf16.msra.mxu0 %v14608_v22 }
 0x153   : > { %v475_v44 = vsel %vm468_vm0, %v15307_v51, %v443_v63  ;;  %v15482_v34 = vpop.permute.xlu1 %444 }
 0x154   : > { %v476_v23 = vsel %vm468_vm0, %v443_v63, %v15482_v34  ;;  %2150 = vperm.xlu0 %14425, %v327_v19  }
 0x155   : > { %13357 = vmatmul.mubr.msk.bf16.vlgmr.msra.gmra.mrb[0].mxu1 %vm2183_vm8, %v15288_v45  ;;  %2508 = vmatprep.subr.bf16.mxu1 %v476_v23 }
 0x156   : > { %v1344_v27 = vpop.permute.xlu0 %1343  ;;  %2509 = vmatpush1.bf16.msra.mxu1 %v475_v44  ;;  %2391 = vmatprep.mubr.bf16.mxu1 %v14744_v24  ;;  %v14609_v44 = vld [vmem:[%s14852_s22 + $0x20] ss:$40 sps:$4 sm:$0xff]  }
 0x157   : > { %v1374_v51 = vsel %vm1369_vm4, %v15294_v50, %v1344_v27  ;;  %v15494_v37 = vpop.permute.xlu1 %1345  ;;  %2145 = vperm.xlu1 %14426, %v326_v26   ;;  %v14611_v26 = vld [vmem:[%s14852_s22 + $0x1c] ss:$40 sps:$4 sm:$0xff]  }
 0x158   : > { %v1375_v30 = vsel %vm1369_vm4, %v1344_v27, %v15494_v37  ;;  %14433 = vrot.lane.b32.xlu0 %v14744_v24, %s14737_s24 }
 0x159   : > { %2422 = vmatprep.subr.bf16.mxu0 %v1375_v30  ;;  %v14612_v30 = vld [vmem:[%s14852_s22 + $0x70] ss:$40 sps:$4 sm:$0xff]  }
 0x15a   : > { %v463_v33 = vpop.permute.xlu0 %462  ;;  %2423 = vmatpush1.bf16.msra.mxu0 %v1374_v51 }
 0x15b   : > { %v484_v38 = vsel %vm468_vm0, %v15339_v59, %v463_v33  ;;  %v15500_v39 = vpop.permute.xlu1 %464  ;;  %14428 = vrot.lane.b32.xlu1 %v14744_v24, %s14736_s23 }
 0x15c   : > { %v485_v56 = vsel %vm468_vm0, %v463_v33, %v15500_v39  ;;  %14443 = vrot.lane.b32.xlu0 %v14744_v24, %s14739_s26 }
 0x15d   : > { %13358 = vmatmul.mubr.msk.bf16.gmra.mrb[4].mxu1 %vm2183_vm8, %v15316_v43  ;;  %2510 = vmatprep.subr.bf16.mxu1 %v485_v56 }
 0x15e   : > { %v1362_v50 = vpop.permute.xlu0 %1361  ;;  %2511 = vmatpush1.bf16.msra.mxu1 %v484_v38  ;;  %2540 = vmatprep.mubr.bf16.mxu1 %v14944_v17  ;;  %v14614_v38 = vld [vmem:[%s14852_s22 + $0x6c] ss:$40 sps:$4 sm:$0xff]  }
 0x15f   : > { %v1382_v46 = vsel %vm1369_vm4, %v15322_v55, %v1362_v50  ;;  %v15509_v41 = vpop.permute.xlu1 %1363  ;;  %14438 = vrot.lane.b32.xlu1 %v14744_v24, %s14738_s25 }
 0x160   : > { %v1383_v59 = vsel %vm1369_vm4, %v1362_v50, %v15509_v41 }
 0x161   : > { %2424 = vmatprep.subr.bf16.mxu0 %v1383_v59  ;;  %v2051_v59 = vld [vmem:[#allocation4 + $0x280] sm:$0xff] }
 0x162   : > { %v639_v31 = vpop.permute.xlu0 %638  ;;  %2425 = vmatpush1.bf16.msra.mxu0 %v1382_v46 }
 0x163   : > { %v671_v52 = vsel %vm664_vm1, %v15362_v7, %v639_v31  ;;  %v15515_v8 = vpop.permute.xlu1 %640 }
 0x164   : > { %v672_v40 = vsel %vm664_vm1, %v639_v31, %v15515_v8 }
 0x165   : > { %2512 = vmatprep.subr.bf16.mxu1 %v672_v40 }
 0x166   : > { %v1527_v17 = vpop.permute.xlu0 %1526  ;;  %2513 = vmatpush1.bf16.msra.mxu1 %v671_v52 }
 0x167   : > { %v1557_v55 = vsel %vm1552_vm5, %v15352_v0, %v1527_v17  ;;  %v15521_v54 = vpop.permute.xlu1 %1528 }
 0x168   : > { %v1558_v5 = vsel %vm1552_vm5, %v1527_v17, %v15521_v54 }
 0x169   : > { %2426 = vmatprep.subr.bf16.mxu0 %v1558_v5 }
 0x16a   : > { %v659_v35 = vpop.permute.xlu0 %658  ;;  %2427 = vmatpush1.bf16.msra.mxu0 %v1557_v55 }
 0x16b   : > { %v680_v7 = vsel %vm664_vm1, %v15382_v21, %v659_v35  ;;  %v15527_v2 = vpop.permute.xlu1 %660 }
 0x16c   : > { %v681_v36 = vsel %vm664_vm1, %v659_v35, %v15527_v2 }
 0x16d   : > { %2514 = vmatprep.subr.bf16.mxu1 %v681_v36 }
 0x16e   : > { %v1545_v18 = vpop.permute.xlu0 %1544  ;;  %2515 = vmatpush1.bf16.msra.mxu1 %v680_v7 }
 0x16f   : > { %v1565_v0 = vsel %vm1552_vm5, %v15372_v58, %v1545_v18  ;;  %v15533_v61 = vpop.permute.xlu1 %1546 }
 0x170   : > { %v1566_v47 = vsel %vm1552_vm5, %v1545_v18, %v15533_v61 }
 0x171   : > { %2428 = vmatprep.subr.bf16.mxu0 %v1566_v47 }
 0x172   : > { %v834_v60 = vpop.permute.xlu0 %833  ;;  %2429 = vmatpush1.bf16.msra.mxu0 %v1565_v0  ;;  %v14650_v0 = vld [vmem:[%s21372_s1 + $0x4] ss:$12 sps:$4 sm:$0xff]  }
 0x173   : > { %v866_v21 = vsel %vm859_vm2, %v15405_v42, %v834_v60  ;;  %v15539_v49 = vpop.permute.xlu1 %835 }
 0x174   : > { %v867_v62 = vsel %vm859_vm2, %v834_v60, %v15539_v49 }
 0x175   : > { %2516 = vmatprep.subr.bf16.mxu1 %v867_v62 }
 0x176   : > { %v1710_v58 = vpop.permute.xlu0 %1709  ;;  %2517 = vmatpush1.bf16.msra.mxu1 %v866_v21 }
 0x177   : > { %v1740_v13 = vsel %vm1735_vm6, %v15393_v32, %v1710_v58  ;;  %v15549_v1 = vpop.permute.xlu1 %1711 }
 0x178   : > { %v1741_v42 = vsel %vm1735_vm6, %v1710_v58, %v15549_v1 }
 0x179   : > { %2430 = vmatprep.subr.bf16.mxu0 %v1741_v42 }
 0x17a   : > { %v854_v15 = vpop.permute.xlu0 %853  ;;  %2431 = vmatpush1.bf16.msra.mxu0 %v1740_v13 }
 0x17b   : > { %v875_v4 = vsel %vm859_vm2, %v15427_v48, %v854_v15  ;;  %v15559_v6 = vpop.permute.xlu1 %855 }
 0x17c   : > { %v876_v32 = vsel %vm859_vm2, %v854_v15, %v15559_v6 }
 0x17d   : > { %2518 = vmatprep.subr.bf16.mxu1 %v876_v32 }
 0x17e   : > { %v1728_v28 = vpop.permute.xlu0 %1727  ;;  %2519 = vmatpush1.bf16.msra.mxu1 %v875_v4 }
 0x17f   : > { %v1748_v10 = vsel %vm1735_vm6, %v15416_v29, %v1728_v28  ;;  %v15565_v22 = vpop.permute.xlu1 %1729 }
 0x180   : > { %v1749_v24 = vsel %vm1735_vm6, %v1728_v28, %v15565_v22 }
 0x181   : > { %2432 = vmatprep.subr.bf16.mxu0 %v1749_v24 }
 0x182   : > { %v1029_v12 = vpop.permute.xlu0 %1028  ;;  %2433 = vmatpush1.bf16.msra.mxu0 %v1748_v10 }
 0x183   : > { %v1061_v48 = vsel %vm1054_vm3, %v15436_v57, %v1029_v12  ;;  %v15571_v14 = vpop.permute.xlu1 %1030 }
 0x184   : > { %v1062_v16 = vsel %vm1054_vm3, %v1029_v12, %v15571_v14 }
 0x185   : > { %2435 = vmatmul.mubr.bf16.vlgmr.msra.gmra.mrb[8].mxu0 %v15223_v53  ;;  %2520 = vmatprep.subr.bf16.mxu1 %v1062_v16 }
 0x186   : > { %v1049_v29 = vpop.permute.xlu0 %1048  ;;  %2521 = vmatpush1.bf16.msra.mxu1 %v1061_v48  ;;  %2444 = vmatprep.mubr.bf16.mxu0 %v15230_v9 }
 0x187   : > { %v1070_v19 = vsel %vm1054_vm3, %v15445_v11, %v1049_v29  ;;  %v15579_v63 = vpop.permute.xlu1 %1050 }
 0x188   : > { %v1071_v57 = vsel %vm1054_vm3, %v1049_v29, %v15579_v63 }
 0x189   : > { %2522 = vmatprep.subr.bf16.mxu1 %v1071_v57 }
 0x18a   : > { %v1893_v23 = vpop.permute.xlu0 %1892  ;;  %2523 = vmatpush1.bf16.msra.mxu1 %v1070_v19 }
 0x18b   : > { %v1923_v27 = vsel %vm1918_vm7, %v15456_v3, %v1893_v23  ;;  %v15587_v51 = vpop.permute.xlu1 %1894  ;;  %2524 = vmatprep.subr.bf16.mxu1 %v14609_v44  ;;  %v15598_v3 = vld [vmem:[#allocation2] sm:$0xff] }
 0x18c   : > { %v1924_v11 = vsel %vm1918_vm7, %v1893_v23, %v15587_v51  ;;  %310 = vst.msk [vmem:[#allocation2 + $0x48] sm:$0xff] %vm309_vm10, %v15598_v3  ;;  %311 = vst.msk [vmem:[#allocation2 + $0x98] sm:$0xff] %vm309_vm10, %v15598_v3 }
 0x18d   : > { %2445 = vmatmul.mubr.bf16.gmra.mrb[12].mxu0 %v15256_v20  ;;  %2455 = vmatprep.subr.bf16.mxu0 %v1924_v11  ;;  %314 = vst.msk [vmem:[#allocation3 + $0x48] sm:$0xff] %vm309_vm10, %v15598_v3  ;;  %315 = vst.msk [vmem:[#allocation3 + $0x98] sm:$0xff] %vm309_vm10, %v15598_v3 }
 0x18e   : > { %v1911_v33 = vpop.permute.xlu0 %1910  ;;  %2456 = vmatpush1.bf16.msra.mxu0 %v1923_v27  ;;  %2525 = vmatpush1.bf16.msra.mxu1 %v14611_v26 }
 0x18f   : > { %v1931_v56 = vsel %vm1918_vm7, %v15473_v25, %v1911_v33  ;;  %v15596_v50 = vpop.permute.xlu1 %1912  ;;  %2526 = vmatprep.subr.bf16.mxu1 %v14612_v30  ;;  %2487 = vmatprep.mubr.bf16.mxu0 %v15598_v3 }
 0x190   : > { %v1932_v46 = vsel %vm1918_vm7, %v1911_v33, %v15596_v50 }
 0x191   : > { %2457 = vmatprep.subr.bf16.mxu0 %v1932_v46 }
 0x192   : > { %v1348_v31 = vpop.permute.xlu0 %1347  ;;  %2458 = vmatpush1.bf16.msra.mxu0 %v1931_v56  ;;  %2527 = vmatpush1.bf16.msra.mxu1 %v14614_v38 }
 0x193   : > { %v1376_v52 = vsel %vm1369_vm4, %v15494_v37, %v1348_v31  ;;  %v1350_v40 = vpop.permute.xlu1 %1349  ;;  %13494 = vmatprep.subr.bf16.mxu0 %v2051_v59 }
 0x194   : > { %v1377_v25 = vsel %vm1369_vm4, %v1348_v31, %v1350_v40  ;;  %1412 = vst.msk [vmem:[#allocation4 + $0x310] sm:$0xff] %vm513_vm9, %v1350_v40 }
 0x195   : > { %13359 = vmatmul.mubr.msk.bf16.vlgmr.msra.gmra.mrb[8].mxu0 %vm2183_vm8, %v15288_v45  ;;  %2528 = vmatprep.subr.bf16.mxu1 %v1377_v25 }
 0x196   : > { %v1366_v17 = vpop.permute.xlu0 %1365  ;;  %2529 = vmatpush1.bf16.msra.mxu1 %v1376_v52  ;;  %2497 = vmatprep.mubr.bf16.mxu0 %v15598_v3 }
 0x197   : > { %v1384_v55 = vsel %vm1369_vm4, %v15509_v41, %v1366_v17  ;;  %v1368_v5 = vpop.permute.xlu1 %1367 }
 0x198   : > { %v1385_v37 = vsel %vm1369_vm4, %v1366_v17, %v1368_v5  ;;  %1421 = vst.msk [vmem:[#allocation4 + $0x358] sm:$0xff] %vm513_vm9, %v1368_v5 }
 0x199   : > { %2530 = vmatprep.subr.bf16.mxu1 %v1385_v37 }
 0x19a   : > { %v1531_v35 = vpop.permute.xlu0 %1530  ;;  %2531 = vmatpush1.bf16.msra.mxu1 %v1384_v55 }
 0x19b   : > { %v1559_v7 = vsel %vm1552_vm5, %v15521_v54, %v1531_v35  ;;  %v1533_v36 = vpop.permute.xlu1 %1532 }
 0x19c   : > { %v1560_v18 = vsel %vm1552_vm5, %v1531_v35, %v1533_v36  ;;  %1595 = vst.msk [vmem:[#allocation4 + $0x3a0] sm:$0xff] %vm513_vm9, %v1533_v36 }
 0x19d   : > { %13360 = vmatmul.mubr.msk.bf16.gmra.mrb[12].mxu0 %vm2183_vm8, %v15316_v43  ;;  %2532 = vmatprep.subr.bf16.mxu1 %v1560_v18 }
 0x19e   : > { %v1549_v41 = vpop.permute.xlu0 %1548  ;;  %2533 = vmatpush1.bf16.msra.mxu1 %v1559_v7  ;;  %2646 = vmatprep.mubr.bf16.mxu0 %v14650_v0  ;;  %v15691_v7 = vld [vmem:[%s21378_s7] sm:$0xff] }
 0x19f   : > { %v1567_v47 = vsel %vm1552_vm5, %v15533_v61, %v1549_v41  ;;  %v1551_v54 = vpop.permute.xlu1 %1550  ;;  %v2078_v59 = vld [vmem:[#allocation4 + $0x358] sm:$0xff] }
 0x1a0   : > { %v1568_v60 = vsel %vm1552_vm5, %v1549_v41, %v1551_v54  ;;  %1604 = vst.msk [vmem:[#allocation4 + $0x3e8] sm:$0xff] %vm513_vm9, %v1551_v54 }
 0x1a1   : > { %2534 = vmatprep.subr.bf16.mxu1 %v1568_v60 }
 0x1a2   : > { %v1714_v21 = vpop.permute.xlu0 %1713  ;;  %2535 = vmatpush1.bf16.msra.mxu1 %v1567_v47 }
 0x1a3   : > { %v1742_v62 = vsel %vm1735_vm6, %v15549_v1, %v1714_v21  ;;  %v1716_v58 = vpop.permute.xlu1 %1715 }
 0x1a4   : > { %v1743_v13 = vsel %vm1735_vm6, %v1714_v21, %v1716_v58  ;;  %1778 = vst.msk [vmem:[#allocation4 + $0x430] sm:$0xff] %vm513_vm9, %v1716_v58 }
 0x1a5   : > { %2536 = vmatprep.subr.bf16.mxu1 %v1743_v13 }
 0x1a6   : > { %v1732_v42 = vpop.permute.xlu0 %1731  ;;  %2537 = vmatpush1.bf16.msra.mxu1 %v1742_v62 }
 0x1a7   : > { %v1750_v61 = vsel %vm1735_vm6, %v15565_v22, %v1732_v42  ;;  %v1734_v15 = vpop.permute.xlu1 %1733  ;;  %v2096_v40 = vld [vmem:[#allocation4 + $0x3e8] sm:$0xff] }
 0x1a8   : > { %v1751_v4 = vsel %vm1735_vm6, %v1732_v42, %v1734_v15  ;;  %1787 = vst.msk [vmem:[#allocation4 + $0x478] sm:$0xff] %vm513_vm9, %v1734_v15 }
 0x1a9   : > { %2538 = vmatprep.subr.bf16.mxu1 %v1751_v4 }
 0x1aa   : > { %v1897_v32 = vpop.permute.xlu0 %1896  ;;  %2539 = vmatpush1.bf16.msra.mxu1 %v1750_v61 }
 0x1ab   : > { %v1925_v1 = vsel %vm1918_vm7, %v15587_v51, %v1897_v32  ;;  %v1899_v28 = vpop.permute.xlu1 %1898  ;;  %v2060_v51 = vld [vmem:[#allocation4 + $0x2c8] sm:$0xff]  ;;  %v2105_v25 = vld [vmem:[#allocation4 + $0x430] sm:$0xff] }
 0x1ac   : > { %v1926_v10 = vsel %vm1918_vm7, %v1897_v32, %v1899_v28  ;;  %1961 = vst.msk [vmem:[#allocation4 + $0x4c0] sm:$0xff] %vm513_vm9, %v1899_v28 }
 0x1ad   : > { %2541 = vmatmul.mubr.bf16.vlgmr.msra.gmra.mrb[8].mxu1 %v15223_v53  ;;  %2561 = vmatprep.subr.bf16.mxu1 %v1926_v10 }
 0x1ae   : > { %v1915_v22 = vpop.permute.xlu0 %1914  ;;  %2550 = vmatprep.mubr.bf16.mxu1 %v15230_v9  ;;  %2562 = vmatpush1.bf16.msra.mxu1 %v1925_v1 }
 0x1af   : > { %v1933_v24 = vsel %vm1918_vm7, %v15596_v50, %v1915_v22  ;;  %v1917_v12 = vpop.permute.xlu1 %1916  ;;  %v2114_v5 = vld [vmem:[#allocation4 + $0x478] sm:$0xff] }
 0x1b0   : > { %v1934_v48 = vsel %vm1918_vm7, %v1915_v22, %v1917_v12  ;;  %1970 = vst.msk [vmem:[#allocation4 + $0x508] sm:$0xff] %vm513_vm9, %v1917_v12 }
 0x1b1   : > { %2563 = vmatprep.subr.bf16.mxu1 %v1934_v48 }
 0x1b2   : > { %v447_v16 = vpop.permute.xlu0 %446  ;;  %2564 = vmatpush1.bf16.msra.mxu1 %v1933_v24 }
 0x1b3   : > { %v477_v29 = vsel %vm468_vm0, %v15482_v34, %v447_v16  ;;  %v467_v19 = vpop.permute.xlu1 %466  ;;  %v2123_v44 = vld [vmem:[#allocation4 + $0x4c0] sm:$0xff] }
 0x1b4   : > { %514 = vst.msk [vmem:[#allocation4 + $0x40] sm:$0xff] %vm513_vm9, %v477_v29  ;;  %v486_v57 = vsel %vm468_vm0, %v15500_v39, %v467_v19  ;;  %13828 = vmatprep.subr.bf16.mxu1 %v2123_v44 }
 0x1b5   : > { %523 = vst.msk [vmem:[#allocation4 + $0x88] sm:$0xff] %vm513_vm9, %v486_v57  ;;  %2551 = vmatmul.mubr.bf16.gmra.mrb[12].mxu1 %v15256_v20 }
 0x1b6   : > { %v643_v23 = vpop.permute.xlu0 %642  ;;  %2593 = vmatprep.mubr.bf16.mxu1 %v15598_v3 }
 0x1b7   : > { %v673_v26 = vsel %vm664_vm1, %v15515_v8, %v643_v23  ;;  %v663_v27 = vpop.permute.xlu1 %662  ;;  %v2132_v38 = vld [vmem:[#allocation4 + $0x508] sm:$0xff] }
 0x1b8   : > { %709 = vst.msk [vmem:[#allocation4 + $0xd0] sm:$0xff] %vm513_vm9, %v673_v26  ;;  %v682_v34 = vsel %vm664_vm1, %v15527_v2, %v663_v27  ;;  %v2069_v2 = vld [vmem:[#allocation4 + $0x310] sm:$0xff] }
 0x1b9   : > { %718 = vst.msk [vmem:[#allocation4 + $0x118] sm:$0xff] %vm513_vm9, %v682_v34 }
 0x1ba   : > { %v838_v39 = vpop.permute.xlu0 %837 }
 0x1bb   : > { %v1979_v30 = vld [vmem:[#allocation4 + $0x40] sm:$0xff]  ;;  %v868_v11 = vsel %vm859_vm2, %v15539_v49, %v838_v39  ;;  %v858_v33 = vpop.permute.xlu1 %857 }
 0x1bc   : > { %13495 = vmatpush3.bf16.msra.mxu0 %v1979_v30  ;;  %904 = vst.msk [vmem:[#allocation4 + $0x160] sm:$0xff] %vm513_vm9, %v868_v11  ;;  %v877_v8 = vsel %vm859_vm2, %v15559_v6, %v858_v33  ;;  %v1988_v49 = vld [vmem:[#allocation4 + $0x88] sm:$0xff] }
 0x1bd   : > { %13496 = vmatprep.subr.bf16.mxu0 %v2060_v51  ;;  %13361 = vmatmul.mubr.msk.bf16.vlgmr.msra.gmra.mrb[8].mxu1 %vm2183_vm8, %v15288_v45  ;;  %913 = vst.msk [vmem:[#allocation4 + $0x1a8] sm:$0xff] %vm513_vm9, %v877_v8 }
 0x1be   : > { %v1033_v56 = vpop.permute.xlu0 %1032  ;;  %2603 = vmatprep.mubr.bf16.mxu1 %v15598_v3  ;;  %13829 = vmatpush3.bf16.msra.mxu1 %v2123_v44 }
 0x1bf   : > { %v1063_v50 = vsel %vm1054_vm3, %v15571_v14, %v1033_v56  ;;  %v1053_v46 = vpop.permute.xlu1 %1052  ;;  %13830 = vmatprep.subr.bf16.mxu1 %v2132_v38  ;;  %v1997_v31 = vld [vmem:[#allocation4 + $0xd0] sm:$0xff]  ;;  %v2087_v14 = vld [vmem:[#allocation4 + $0x3a0] sm:$0xff] }
 0x1c0   : > { %13497 = vmatpush3.bf16.msra.mxu0 %v1988_v49  ;;  %1099 = vst.msk [vmem:[#allocation4 + $0x1f0] sm:$0xff] %vm513_vm9, %v1063_v50  ;;  %v1072_v6 = vsel %vm1054_vm3, %v15579_v63, %v1053_v46  ;;  %v2006_v52 = vld [vmem:[#allocation4 + $0x118] sm:$0xff] }
 0x1c1   : > { %13498 = vmatprep.subr.bf16.mxu0 %v2069_v2  ;;  %1108 = vst.msk [vmem:[#allocation4 + $0x238] sm:$0xff] %vm513_vm9, %v1072_v6 }
 0x1c2   : > { %13831 = vmatpush3.bf16.msra.mxu1 %v2132_v38 }
 0x1c3   : > { %v2015_v63 = vld [vmem:[#allocation4 + $0x160] sm:$0xff] }
 0x1c4   : > { %13499 = vmatpush3.bf16.msra.mxu0 %v1997_v31  ;;  %v2024_v17 = vld [vmem:[#allocation4 + $0x1a8] sm:$0xff] }
 0x1c5   : > { %13500 = vmatprep.subr.bf16.mxu0 %v2078_v59  ;;  %13362 = vmatmul.mubr.msk.bf16.gmra.mrb[12].mxu1 %vm2183_vm8, %v15316_v43 }
 0x1c6   : > { %13832 = vmatprep.mubr.msk.bf16.mxu1 %vm2183_vm8, %v15288_v45  ;;  %v2752_v45 = vlaneseq }
 0x1c7   : > { %v2033_v55 = vld [vmem:[#allocation4 + $0x1f0] sm:$0xff] }
 0x1c8   : > { %13501 = vmatpush3.bf16.msra.mxu0 %v2006_v52  ;;  %v2042_v37 = vld [vmem:[#allocation4 + $0x238] sm:$0xff]  ;;  %v15682_v35 = vshrl.u32 %v2752_v45, 7 }
 0x1c9   : > { %13502 = vmatprep.subr.bf16.mxu0 %v2087_v14 }
 0x1ca   : > { %21412 = vst [vmem:[#allocation9_spill] sm:$0xff] %v15682_v35  ;;  %v15696_v18 = vsub.s32 1, %v15682_v35  ;;  %v15737_v56 = vsub.s32 2, %v15682_v35  ;;  %v15740_v50 = vsub.s32 3, %v15682_v35  ;;  %v15812_v3 = vsub.s32 4, %v15682_v35 }
 0x1cc   : > { %13503 = vmatpush3.bf16.msra.mxu0 %v2015_v63  ;;  %21414 = vst [vmem:[#allocation11_spill] sm:$0xff] %v15696_v18  ;;  %v2759_v60 = vrot.slane %v15691_v7, %v15696_v18  ;;  %21415 = vst [vmem:[#allocation12_spill] sm:$0xff] %v15737_v56  ;;  %v2763_v52 = vrot.slane %v15691_v7, %v15737_v56 }
 0x1cd   : > { %13504 = vmatprep.subr.bf16.mxu0 %v2096_v40  ;;  %13833 = vmatmul.mubr.msk.bf16.vlgmr.msra.gmra.mrb[16].mxu1 %vm2183_vm8, %v15316_v43  ;;  %v15686_v43 = vsub.s32 0, %v15682_v35  ;;  %21416 = vst [vmem:[#allocation13_spill] sm:$0xff] %v15740_v50  ;;  %21417 = vst [vmem:[#allocation14_spill] sm:$0xff] %v15812_v3 }
 0x1cf   : > { %21413 = vst [vmem:[#allocation10_spill] sm:$0xff] %v15686_v43  ;;  %v15693_v36 = vpop.permute.xlu0 %2135 }
 0x1d0   : > { %13505 = vmatpush3.bf16.msra.mxu0 %v2024_v17  ;;  %v2767_v17 = vrot.slane %v15691_v7, %v15740_v50 }
 0x1d1   : > { %13506 = vmatprep.subr.bf16.mxu0 %v2105_v25 }
 0x1d3   : > { %v15710_v24 = vpop.permute.xlu0 %2150 }
 0x1d4   : > { %13507 = vmatpush3.bf16.msra.mxu0 %v2033_v55 }
 0x1d5   : > { %13508 = vmatprep.subr.bf16.mxu0 %v2114_v5 }
 0x1d8   : > { %13509 = vmatpush3.bf16.msra.mxu0 %v2042_v37 }
 0x1db   : > { %2647 = vmatmul.mubr.bf16.vlgmr.msra.gmra.mrb[16].mxu0 %v15223_v53 }
 0x1dc   : > { %2654 = vmatprep.mubr.bf16.mxu0 %v15230_v9  ;;  %v15698_v9 = vpop.permute.xlu1 %2140 }
 0x1e0   : > { %v15708_v1 = vpop.permute.xlu1 %2145 }
 0x1e3   : > { %2655 = vmatmul.mubr.bf16.gmra.mrb[20].mxu0 %v15256_v20  ;;  %v2755_v20 = vrot.slane %v15691_v7, %v15686_v43 }
 0x1e7   : > { %v2277_v53 = vpop.f32.mrb[0].mxu0 }
 0x1e8   : > { %v2279_v41 = vpop.f32.mrb[1].mxu0  ;;  %v14035_v0 = vadd.f32 %v2277_v53, %v15693_v36 }
 0x1e9   : > { %v2281_v47 = vpop.f32.mrb[2].mxu0  ;;  %v14036_v54 = vadd.f32 %v2279_v41, %v15693_v36 }
 0x1ea   : > { %v2712_v21 = vmax.f32 %v14035_v0, 0.0  ;;  %v14037_v62 = vadd.f32 %v2281_v47, %v15698_v9  ;;  %v2283_v58 = vpop.f32.mrb[3].mxu0 }
 0x1eb   : > { %v14038_v13 = vadd.f32 %v2283_v58, %v15698_v9  ;;  %v2713_v42 = vmax.f32 %v14036_v54, 0.0 }
 0x1ec   : > { %v2797_v61 = vmul.f32 %v2755_v20, %v2712_v21  ;;  %v2721_v15 = vmax.f32 %v14037_v62, 0.0 }
 0x1ed   : > { %v2722_v4 = vmax.f32 %v14038_v13, 0.0  ;;  %v2798_v32 = vmul.f32 %v2759_v60, %v2713_v42 }
 0x1ee   : > { %v2806_v28 = vmul.f32 %v2755_v20, %v2721_v15 }
 0x1ef   : > { %v2807_v10 = vmul.f32 %v2759_v60, %v2722_v4  ;;  %v2287_v22 = vpop.f32.mrb[4].mxu0 }
 0x1f0   : > { %v15712_v12 = vpack.c.bf16 %v2806_v28, %v2797_v61  ;;  %v2289_v48 = vpop.f32.mrb[5].mxu0  ;;  %v14039_v16 = vadd.f32 %v2287_v22, %v15708_v1 }
 0x1f1   : > { %v15715_v29 = vpack.c.bf16 %v2807_v10, %v2798_v32  ;;  %v2291_v19 = vpop.f32.mrb[6].mxu0  ;;  %v14040_v44 = vadd.f32 %v2289_v48, %v15708_v1 }
 0x1f2   : > { %2851 = vst [vmem:[#allocation2 + $0x8] sm:$0xff] %v15712_v12  ;;  %v14041_v57 = vadd.f32 %v2291_v19, %v15710_v24  ;;  %v2293_v23 = vpop.f32.mrb[7].mxu0  ;;  %v2730_v26 = vmax.f32 %v14039_v16, 0.0  ;;  %3059 = vrot.lane.b32.xlu0 %v15712_v12, %s14737_s24  ;;  %2925 = vrot.lane.b32.xlu1 %v15712_v12, %s14736_s23 }
 0x1f3   : > { %2852 = vst [vmem:[#allocation2 + $0x10] sm:$0xff] %v15715_v29  ;;  %v14042_v27 = vadd.f32 %v2293_v23, %v15710_v24  ;;  %v2731_v34 = vmax.f32 %v14040_v44, 0.0  ;;  %v15819_v23 = vsub.s32 5, %v15682_v35 }
 0x1f4   : > { %v2739_v39 = vmax.f32 %v14041_v57, 0.0  ;;  %v2815_v51 = vmul.f32 %v2755_v20, %v2730_v26 }
 0x1f5   : > { %v2740_v30 = vmax.f32 %v14042_v27, 0.0  ;;  %v2816_v11 = vmul.f32 %v2759_v60, %v2731_v34  ;;  %21418 = vst [vmem:[#allocation15_spill] sm:$0xff] %v15819_v23 }
 0x1f6   : > { %v2824_v33 = vmul.f32 %v2755_v20, %v2739_v39  ;;  %3327 = vrot.lane.b32.xlu0 %v15712_v12, %s14739_s26  ;;  %3193 = vrot.lane.b32.xlu1 %v15712_v12, %s14738_s25 }
 0x1f7   : > { %v2825_v8 = vmul.f32 %v2759_v60, %v2740_v30 }
 0x1f8   : > { %v15730_v38 = vpack.c.bf16 %v2824_v33, %v2815_v51  ;;  %v2771_v51 = vrot.slane %v15691_v7, %v15812_v3 }
 0x1f9   : > { %v15732_v2 = vpack.c.bf16 %v2825_v8, %v2816_v11  ;;  %v2775_v8 = vrot.slane %v15691_v7, %v15819_v23 }
 0x1fa   : > { %2860 = vst [vmem:[#allocation2 + $0x58] sm:$0xff] %v15730_v38 }
 0x1fb   : > { %2861 = vst [vmem:[#allocation2 + $0x60] sm:$0xff] %v15732_v2 }
 0x228   : > { %v2383_v49 = vpop.f32.mrb[0].mxu1 }
 0x229   : > { %v14043_v46 = vadd.f32 %v2383_v49, %v15693_v36  ;;  %v2385_v6 = vpop.f32.mrb[1].mxu1 }
 0x22a   : > { %v14044_v59 = vadd.f32 %v2385_v6, %v15693_v36  ;;  %v2387_v31 = vpop.f32.mrb[2].mxu1 }
 0x22b   : > { %v2714_v14 = vmax.f32 %v14043_v46, 0.0  ;;  %v14045_v40 = vadd.f32 %v2387_v31, %v15698_v9  ;;  %v2389_v63 = vpop.f32.mrb[3].mxu1 }
 0x22c   : > { %v2715_v25 = vmax.f32 %v14044_v59, 0.0  ;;  %v14046_v55 = vadd.f32 %v2389_v63, %v15698_v9 }
 0x22d   : > { %v2723_v5 = vmax.f32 %v14045_v40, 0.0  ;;  %v2799_v45 = vmul.f32 %v2763_v52, %v2714_v14 }
 0x22e   : > { %v2724_v37 = vmax.f32 %v14046_v55, 0.0  ;;  %v2800_v41 = vmul.f32 %v2767_v17, %v2715_v25 }
 0x22f   : > { %v2808_v53 = vmul.f32 %v2763_v52, %v2723_v5 }
 0x230   : > { %v2809_v20 = vmul.f32 %v2767_v17, %v2724_v37  ;;  %v2393_v0 = vpop.f32.mrb[4].mxu1 }
 0x231   : > { %v2835_v47 = vpack.c.bf16 %v2808_v53, %v2799_v45  ;;  %v14047_v54 = vadd.f32 %v2393_v0, %v15708_v1  ;;  %v2395_v60 = vpop.f32.mrb[5].mxu1 }
 0x232   : > { %v15751_v21 = vpack.c.bf16 %v2809_v20, %v2800_v41  ;;  %v14048_v62 = vadd.f32 %v2395_v60, %v15708_v1  ;;  %v2397_v58 = vpop.f32.mrb[6].mxu1 }
 0x233   : > { %3439 = vst [vmem:[#allocation4 + $0x250] sm:$0xff] %v2835_v47  ;;  %v2732_v13 = vmax.f32 %v14047_v54, 0.0  ;;  %v14049_v42 = vadd.f32 %v2397_v58, %v15710_v24  ;;  %v2399_v61 = vpop.f32.mrb[7].mxu1  ;;  %3495 = vrot.lane.b32.xlu0 %v2835_v47, %s14740_s27  ;;  %2929 = vrot.lane.b32.xlu1 %v2835_v47, %s14736_s23 }
 0x234   : > { %2854 = vst [vmem:[#allocation2 + $0x20] sm:$0xff] %v15751_v21  ;;  %v2733_v15 = vmax.f32 %v14048_v62, 0.0  ;;  %v14050_v4 = vadd.f32 %v2399_v61, %v15710_v24 }
 0x235   : > { %v2741_v32 = vmax.f32 %v14049_v42, 0.0  ;;  %v2817_v10 = vmul.f32 %v2763_v52, %v2732_v13 }
 0x236   : > { %v2742_v28 = vmax.f32 %v14050_v4, 0.0  ;;  %v2818_v48 = vmul.f32 %v2767_v17, %v2733_v15  ;;  %v15883_v15 = vpop.permute.xlu1 %14428 }
 0x237   : > { %v2826_v22 = vmul.f32 %v2763_v52, %v2741_v32  ;;  %3619 = vrot.lane.b32.xlu0 %v2835_v47, %s14741_s28  ;;  %3491 = vrot.lane.b32.xlu1 %v15712_v12, %s14740_s27  ;;  %v15893_v32 = vsub.s32 7, %v15682_v35 }
 0x238   : > { %v2827_v16 = vmul.f32 %v2767_v17, %v2742_v28 }
 0x239   : > { %v15762_v19 = vpack.c.bf16 %v2826_v22, %v2817_v10  ;;  %21420 = vst [vmem:[#allocation17_spill] sm:$0xff] %v15893_v32 }
 0x23a   : > { %v15768_v44 = vpack.c.bf16 %v2827_v16, %v2818_v48 }
 0x23b   : > { %3448 = vst [vmem:[#allocation4 + $0x298] sm:$0xff] %v15762_v19  ;;  %3743 = vrot.lane.b32.xlu0 %v2835_v47, %s14742_s11  ;;  %3063 = vrot.lane.b32.xlu1 %v2835_v47, %s14737_s24 }
 0x23c   : > { %2863 = vst [vmem:[#allocation2 + $0x70] sm:$0xff] %v15768_v44 }
 0x23f   : > { %3867 = vrot.lane.b32.xlu0 %v2835_v47, %s14743_s18  ;;  %3615 = vrot.lane.b32.xlu1 %v15712_v12, %s14741_s28 }
 0x243   : > { %2927 = vrot.lane.b32.xlu0 %v15715_v29, %s14736_s23  ;;  %3197 = vrot.lane.b32.xlu1 %v2835_v47, %s14738_s25 }
 0x247   : > { %3195 = vrot.lane.b32.xlu0 %v15715_v29, %s14738_s25  ;;  %3739 = vrot.lane.b32.xlu1 %v15712_v12, %s14742_s11 }
 0x24b   : > { %2931 = vrot.lane.b32.xlu0 %v15751_v21, %s14736_s23  ;;  %3331 = vrot.lane.b32.xlu1 %v2835_v47, %s14739_s26 }
 0x24f   : > { %3065 = vrot.lane.b32.xlu0 %v15751_v21, %s14737_s24  ;;  %3061 = vrot.lane.b32.xlu1 %v15715_v29, %s14737_s24 }
 0x253   : > { %3199 = vrot.lane.b32.xlu0 %v15751_v21, %s14738_s25  ;;  %3329 = vrot.lane.b32.xlu1 %v15715_v29, %s14739_s26 }
 0x257   : > { %3333 = vrot.lane.b32.xlu0 %v15751_v21, %s14739_s26  ;;  %3493 = vrot.lane.b32.xlu1 %v15715_v29, %s14740_s27 }
 0x25b   : > { %3617 = vrot.lane.b32.xlu1 %v15715_v29, %s14741_s28  ;;  %2945 = vrot.lane.b32.xlu0 %v15730_v38, %s14736_s23 }
 0x25f   : > { %3741 = vrot.lane.b32.xlu1 %v15715_v29, %s14742_s11  ;;  %3213 = vrot.lane.b32.xlu0 %v15730_v38, %s14738_s25 }
 0x263   : > { %3865 = vrot.lane.b32.xlu1 %v15715_v29, %s14743_s18  ;;  %2949 = vrot.lane.b32.xlu0 %v15762_v19, %s14736_s23 }
 0x267   : > { %3079 = vrot.lane.b32.xlu1 %v15730_v38, %s14737_s24  ;;  %3509 = vrot.lane.b32.xlu0 %v15730_v38, %s14740_s27 }
 0x268   : > { %v2489_v57 = vpop.f32.mrb[8].mxu0 }
 0x269   : > { %v14051_v26 = vadd.f32 %v2489_v57, %v15693_v36  ;;  %v2491_v27 = vpop.f32.mrb[9].mxu0 }
 0x26a   : > { %v14052_v29 = vadd.f32 %v2491_v27, %v15693_v36  ;;  %v2493_v34 = vpop.f32.mrb[10].mxu0 }
 0x26b   : > { %v2716_v39 = vmax.f32 %v14051_v26, 0.0  ;;  %v14053_v30 = vadd.f32 %v2493_v34, %v15698_v9  ;;  %v2495_v11 = vpop.f32.mrb[11].mxu0  ;;  %3347 = vrot.lane.b32.xlu1 %v15730_v38, %s14739_s26  ;;  %3083 = vrot.lane.b32.xlu0 %v15762_v19, %s14737_s24  ;;  %v2783_v34 = vrot.slane %v15691_v7, %v15893_v32 }
 0x26c   : > { %v2717_v33 = vmax.f32 %v14052_v29, 0.0  ;;  %v14054_v49 = vadd.f32 %v2495_v11, %v15698_v9 }
 0x26d   : > { %v2725_v46 = vmax.f32 %v14053_v30, 0.0  ;;  %v2801_v59 = vmul.f32 %v2771_v51, %v2716_v39 }
 0x26e   : > { %v2726_v6 = vmax.f32 %v14054_v49, 0.0  ;;  %v2802_v14 = vmul.f32 %v2775_v8, %v2717_v33 }
 0x26f   : > { %v2810_v31 = vmul.f32 %v2771_v51, %v2725_v46  ;;  %3513 = vrot.lane.b32.xlu1 %v15762_v19, %s14740_s27  ;;  %3633 = vrot.lane.b32.xlu0 %v15730_v38, %s14741_s28 }
 0x270   : > { %v2811_v52 = vmul.f32 %v2775_v8, %v2726_v6  ;;  %v2499_v40 = vpop.f32.mrb[12].mxu0 }
 0x271   : > { %v15837_v63 = vpack.c.bf16 %v2810_v31, %v2801_v59  ;;  %v14055_v25 = vadd.f32 %v2499_v40, %v15708_v1  ;;  %v2501_v17 = vpop.f32.mrb[13].mxu0 }
 0x272   : > { %v15840_v55 = vpack.c.bf16 %v2811_v52, %v2802_v14  ;;  %v14056_v5 = vadd.f32 %v2501_v17, %v15708_v1  ;;  %v2503_v37 = vpop.f32.mrb[14].mxu0 }
 0x273   : > { %3441 = vst [vmem:[#allocation4 + $0x260] sm:$0xff] %v15837_v63  ;;  %v2734_v45 = vmax.f32 %v14055_v25, 0.0  ;;  %v14057_v53 = vadd.f32 %v2503_v37, %v15710_v24  ;;  %v2505_v41 = vpop.f32.mrb[15].mxu0  ;;  %3637 = vrot.lane.b32.xlu1 %v15762_v19, %s14741_s28  ;;  %3217 = vrot.lane.b32.xlu0 %v15762_v19, %s14738_s25 }
 0x274   : > { %2856 = vst [vmem:[#allocation2 + $0x30] sm:$0xff] %v15840_v55  ;;  %v2735_v20 = vmax.f32 %v14056_v5, 0.0  ;;  %v14058_v0 = vadd.f32 %v2505_v41, %v15710_v24 }
 0x275   : > { %v2743_v47 = vmax.f32 %v14057_v53, 0.0  ;;  %v2819_v60 = vmul.f32 %v2771_v51, %v2734_v45 }
 0x276   : > { %v2744_v54 = vmax.f32 %v14058_v0, 0.0  ;;  %v2820_v58 = vmul.f32 %v2775_v8, %v2735_v20 }
 0x277   : > { %v2828_v62 = vmul.f32 %v2771_v51, %v2743_v47  ;;  %3761 = vrot.lane.b32.xlu1 %v15762_v19, %s14742_s11  ;;  %3757 = vrot.lane.b32.xlu0 %v15730_v38, %s14742_s11  ;;  %v15909_v51 = vpop.permute.xlu1 %14438 }
 0x278   : > { %v2829_v13 = vmul.f32 %v2775_v8, %v2744_v54 }
 0x279   : > { %v15855_v42 = vpack.c.bf16 %v2828_v62, %v2819_v60 }
 0x27a   : > { %v15857_v61 = vpack.c.bf16 %v2829_v13, %v2820_v58 }
 0x27b   : > { %3450 = vst [vmem:[#allocation4 + $0x2a8] sm:$0xff] %v15855_v42  ;;  %3351 = vrot.lane.b32.xlu1 %v15762_v19, %s14739_s26  ;;  %3881 = vrot.lane.b32.xlu0 %v15730_v38, %s14743_s18  ;;  %v15881_v38 = vpop.permute.xlu0 %14433  ;;  %v15924_v17 = vpop.permute.xlu1 %2925 }
 0x27c   : > { %2865 = vst [vmem:[#allocation2 + $0x80] sm:$0xff] %v15857_v61 }
 0x27f   : > { %2947 = vrot.lane.b32.xlu1 %v15732_v2, %s14736_s23  ;;  %3081 = vrot.lane.b32.xlu0 %v15732_v2, %s14737_s24  ;;  %v15904_v27 = vpop.permute.xlu0 %14443  ;;  %v15941_v13 = vpop.permute.xlu1 %3193 }
 0x283   : > { %3863 = vrot.lane.b32.xlu1 %v15712_v12, %s14743_s18  ;;  %3349 = vrot.lane.b32.xlu0 %v15732_v2, %s14739_s26  ;;  %v15886_v12 = vsub.s32 6, %v15682_v35  ;;  %v15920_v52 = vpop.permute.xlu0 %3059  ;;  %v14435_v35 = vunpack.i.l.bf16 %v15881_v38 }
 0x285   : > { %21419 = vst [vmem:[#allocation16_spill] sm:$0xff] %v15886_v12 }
 0x287   : > { %3885 = vrot.lane.b32.xlu1 %v15762_v19, %s14743_s18  ;;  %3511 = vrot.lane.b32.xlu0 %v15732_v2, %s14740_s27  ;;  %v2779_v19 = vrot.slane %v15691_v7, %v15886_v12  ;;  %v15937_v60 = vpop.permute.xlu0 %3327 }
 0x28b   : > { %3497 = vrot.lane.b32.xlu1 %v15751_v21, %s14740_s27  ;;  %3635 = vrot.lane.b32.xlu0 %v15732_v2, %s14741_s28 }
 0x28f   : > { %3215 = vrot.lane.b32.xlu1 %v15732_v2, %s14738_s25  ;;  %3759 = vrot.lane.b32.xlu0 %v15732_v2, %s14742_s11 }
 0x290   : > { %v2595_v4 = vpop.f32.mrb[8].mxu1 }
 0x291   : > { %v14059_v28 = vadd.f32 %v2595_v4, %v15693_v36  ;;  %v2597_v10 = vpop.f32.mrb[9].mxu1 }
 0x292   : > { %v14060_v22 = vadd.f32 %v2597_v10, %v15693_v36  ;;  %v2599_v48 = vpop.f32.mrb[10].mxu1 }
 0x293   : > { %v2718_v16 = vmax.f32 %v14059_v28, 0.0  ;;  %v14061_v57 = vadd.f32 %v2599_v48, %v15698_v9  ;;  %v2601_v26 = vpop.f32.mrb[11].mxu1  ;;  %3621 = vrot.lane.b32.xlu1 %v15751_v21, %s14741_s28  ;;  %3353 = vrot.lane.b32.xlu0 %v15768_v44, %s14739_s26 }
 0x294   : > { %v2719_v29 = vmax.f32 %v14060_v22, 0.0  ;;  %v14062_v39 = vadd.f32 %v2601_v26, %v15698_v9 }
 0x295   : > { %v2727_v30 = vmax.f32 %v14061_v57, 0.0  ;;  %v2803_v33 = vmul.f32 %v2779_v19, %v2718_v16 }
 0x296   : > { %v2728_v11 = vmax.f32 %v14062_v39, 0.0  ;;  %v2804_v49 = vmul.f32 %v2783_v34, %v2719_v29  ;;  %v15978_v39 = vld [vmem:[%s21372_s1 + $0x34] ss:$12 sps:$4 sm:$0xff]  }
 0x297   : > { %v2812_v8 = vmul.f32 %v2779_v19, %v2727_v30  ;;  %3745 = vrot.lane.b32.xlu1 %v15751_v21, %s14742_s11  ;;  %3883 = vrot.lane.b32.xlu0 %v15732_v2, %s14743_s18 }
 0x298   : > { %v2813_v46 = vmul.f32 %v2783_v34, %v2728_v11  ;;  %v2605_v6 = vpop.f32.mrb[12].mxu1  ;;  %4201 = vmatprep.mubr.bf16.mxu1 %v15978_v39  ;;  %4307 = vmatprep.mubr.bf16.mxu0 %v15978_v39 }
 0x299   : > { %v15915_v59 = vpack.c.bf16 %v2812_v8, %v2803_v33  ;;  %v14063_v7 = vadd.f32 %v2605_v6, %v15708_v1  ;;  %v2607_v31 = vpop.f32.mrb[13].mxu1 }
 0x29a   : > { %v15918_v14 = vpack.c.bf16 %v2813_v46, %v2804_v49  ;;  %v14064_v40 = vadd.f32 %v2607_v31, %v15708_v1  ;;  %v2609_v25 = vpop.f32.mrb[14].mxu1 }
 0x29b   : > { %3443 = vst [vmem:[#allocation4 + $0x270] sm:$0xff] %v15915_v59  ;;  %v2736_v2 = vmax.f32 %v14063_v7, 0.0  ;;  %v14065_v5 = vadd.f32 %v2609_v25, %v15710_v24  ;;  %v2611_v37 = vpop.f32.mrb[15].mxu1  ;;  %2951 = vrot.lane.b32.xlu1 %v15768_v44, %s14736_s23  ;;  %3499 = vrot.lane.b32.xlu0 %v15837_v63, %s14740_s27 }
 0x29c   : > { %2858 = vst [vmem:[#allocation2 + $0x40] sm:$0xff] %v15918_v14  ;;  %v2737_v45 = vmax.f32 %v14064_v40, 0.0  ;;  %v14066_v53 = vadd.f32 %v2611_v37, %v15710_v24  ;;  %v14430_v40 = vunpack.i.l.bf16 %v15883_v15 }
 0x29d   : > { %v2745_v41 = vmax.f32 %v14065_v5, 0.0  ;;  %v2821_v0 = vmul.f32 %v2779_v19, %v2736_v2 }
 0x29e   : > { %v2746_v20 = vmax.f32 %v14066_v53, 0.0  ;;  %v2822_v54 = vmul.f32 %v2783_v34, %v2737_v45 }
 0x29f   : > { %v2830_v47 = vmul.f32 %v2779_v19, %v2745_v41  ;;  %3085 = vrot.lane.b32.xlu1 %v15768_v44, %s14737_s24  ;;  %3623 = vrot.lane.b32.xlu0 %v15837_v63, %s14741_s28 }
 0x2a0   : > { %v2831_v62 = vmul.f32 %v2783_v34, %v2746_v20  ;;  %v15939_v58 = vpop.f32.mrb[16].mxu1 }
 0x2a1   : > { %v15943_v4 = vpack.c.bf16 %v2830_v47, %v2821_v0  ;;  %v2697_v28 = vpop.f32.mrb[17].mxu1 }
 0x2a2   : > { %v15945_v10 = vpack.c.bf16 %v2831_v62, %v2822_v54  ;;  %v15947_v22 = vpop.f32.mrb[18].mxu1 }
 0x2a3   : > { %3452 = vst [vmem:[#allocation4 + $0x2b8] sm:$0xff] %v15943_v4  ;;  %3219 = vrot.lane.b32.xlu1 %v15768_v44, %s14738_s25  ;;  %3747 = vrot.lane.b32.xlu0 %v15837_v63, %s14742_s11  ;;  %v2700_v48 = vpop.f32.mrb[19].mxu1 }
 0x2a4   : > { %2867 = vst [vmem:[#allocation2 + $0x90] sm:$0xff] %v15945_v10 }
 0x2a5   : > { %v15955_v16 = vpop.permute.xlu0 %3495  ;;  %v15957_v19 = vpop.permute.xlu1 %2929 }
 0x2a7   : > { %3515 = vrot.lane.b32.xlu1 %v15768_v44, %s14740_s27  ;;  %3871 = vrot.lane.b32.xlu0 %v15837_v63, %s14743_s18 }
 0x2a9   : > { %v15963_v57 = vpop.permute.xlu0 %3619  ;;  %v15965_v26 = vpop.permute.xlu1 %3491 }
 0x2ab   : > { %3639 = vrot.lane.b32.xlu1 %v15768_v44, %s14741_s28  ;;  %2935 = vrot.lane.b32.xlu0 %v15840_v55, %s14736_s23 }
 0x2ad   : > { %v15971_v29 = vpop.permute.xlu0 %3743  ;;  %v15973_v34 = vpop.permute.xlu1 %3063 }
 0x2ae   : > { %v13510_v30 = vpop.f32.mrb[16].mxu0 }
 0x2af   : > { %v13511_v11 = vpop.f32.mrb[17].mxu0  ;;  %3763 = vrot.lane.b32.xlu1 %v15768_v44, %s14742_s11  ;;  %3069 = vrot.lane.b32.xlu0 %v15840_v55, %s14737_s24 }
 0x2b0   : > { %v13512_v33 = vadd.f32 %v13511_v11, %v13510_v30  ;;  %v13513_v8 = vpop.f32.mrb[18].mxu0 }
 0x2b1   : > { %v13514_v49 = vpop.f32.mrb[19].mxu0  ;;  %v15986_v46 = vpop.permute.xlu0 %3867 }
 0x2b2   : > { %v13515_v6 = vadd.f32 %v13514_v49, %v13513_v8  ;;  %v2649_v7 = vadd.f32 %v13512_v33, %v15693_v36  ;;  %v15989_v31 = vpop.permute.xlu1 %3615 }
 0x2b3   : > { %3869 = vrot.lane.b32.xlu1 %v15751_v21, %s14743_s18  ;;  %3203 = vrot.lane.b32.xlu0 %v15840_v55, %s14738_s25  ;;  %v13365_v21 = vld [vmem:[%s21378_s7 + $0x8] ss:$0 sm:$0xff] }
 0x2b4   : > { %v2698_v25 = vadd.f32 %v2697_v28, %v2649_v7  ;;  %v2652_v2 = vadd.f32 %v13515_v6, %v15698_v9  ;;  %v2963_v9 = vsel %vm468_vm0, %v14430_v40, %v15924_v17 }
 0x2b5   : > { %v2928_v5 = vpop.permute.xlu0 %2927 }
 0x2b6   : > { %v2720_v37 = vmax.f32 %v2698_v25, 0.0  ;;  %v2701_v45 = vadd.f32 %v2700_v48, %v2652_v2  ;;  %v13516_v53 = vpop.f32.mrb[20].mxu0  ;;  %v2964_v36 = vsel %vm468_vm0, %v15924_v17, %v2928_v5  ;;  %v15999_v41 = vpop.permute.xlu1 %3197 }
 0x2b7   : > { %v13517_v20 = vpop.f32.mrb[21].mxu0  ;;  %3887 = vrot.lane.b32.xlu1 %v15768_v44, %s14743_s18  ;;  %3337 = vrot.lane.b32.xlu0 %v15840_v55, %s14739_s26 }
 0x2b8   : > { %v2729_v0 = vmax.f32 %v2701_v45, 0.0  ;;  %v13518_v47 = vadd.f32 %v13517_v20, %v13516_v53  ;;  %v13519_v54 = vpop.f32.mrb[22].mxu0  ;;  %4169 = vmatprep.subr.bf16.mxu1 %v2964_v36  ;;  %v2805_v48 = vmul.f32 %v13365_v21, %v2720_v37 }
 0x2b9   : > { %v13520_v62 = vpop.f32.mrb[23].mxu0  ;;  %v16010_v28 = vpop.permute.xlu0 %3195  ;;  %4170 = vmatpush1.bf16.msra.mxu1 %v2963_v9 }
 0x2ba   : > { %v2814_v30 = vmul.f32 %v13365_v21, %v2729_v0  ;;  %v2657_v11 = vadd.f32 %v13518_v47, %v15708_v1  ;;  %v13521_v33 = vadd.f32 %v13520_v62, %v13519_v54  ;;  %v16013_v44 = vpop.permute.xlu1 %3739 }
 0x2bb   : > { %2933 = vrot.lane.b32.xlu1 %v15837_v63, %s14736_s23  ;;  %2939 = vrot.lane.b32.xlu0 %v15918_v14, %s14736_s23 }
 0x2bc   : > { %v2841_v17 = vpack.c.bf16 %v2814_v30, %v2805_v48  ;;  %v2706_v8 = vadd.f32 %v15939_v58, %v2657_v11  ;;  %v2660_v49 = vadd.f32 %v13521_v33, %v15710_v24  ;;  %v2965_v58 = vsel %vm468_vm0, %v2928_v5, %v15957_v19 }
 0x2bd   : > { %v16021_v6 = vpop.permute.xlu0 %2931 }
 0x2be   : > { %2859 = vst.msk [vmem:[#allocation2 + $0x48] sm:$0xff] %vm513_vm9, %v2841_v17  ;;  %v2738_v7 = vmax.f32 %v2706_v8, 0.0  ;;  %v2709_v1 = vadd.f32 %v15947_v22, %v2660_v49  ;;  %v2966_v40 = vsel %vm468_vm0, %v15957_v19, %v16021_v6  ;;  %v16028_v25 = vpop.permute.xlu1 %3331 }
 0x2bf   : > { %3067 = vrot.lane.b32.xlu1 %v15837_v63, %s14737_s24  ;;  %3517 = vrot.lane.b32.xlu0 %v15855_v42, %s14740_s27 }
 0x2c0   : > { %v2747_v24 = vmax.f32 %v2709_v1, 0.0  ;;  %4275 = vmatprep.subr.bf16.mxu0 %v2966_v40  ;;  %v2823_v22 = vmul.f32 %v13365_v21, %v2738_v7 }
 0x2c1   : > { %v16036_v2 = vpop.permute.xlu0 %3065  ;;  %4276 = vmatpush1.bf16.msra.mxu0 %v2965_v58 }
 0x2c2   : > { %v2832_v37 = vmul.f32 %v13365_v21, %v2747_v24  ;;  %v16038_v45 = vpop.permute.xlu1 %3061 }
 0x2c3   : > { %3201 = vrot.lane.b32.xlu1 %v15837_v63, %s14738_s25  ;;  %3641 = vrot.lane.b32.xlu0 %v15855_v42, %s14741_s28 }
 0x2c4   : > { %v2850_v53 = vpack.c.bf16 %v2832_v37, %v2823_v22  ;;  %v14431_v37 = vunpack.i.h.bf16 %v15883_v15  ;;  %v3098_v15 = vsel %vm664_vm1, %v15920_v52, %v16038_v45 }
 0x2c5   : > { %v16044_v36 = vpop.permute.xlu0 %3199  ;;  %v16046_v20 = vld [vmem:[#allocation2 + $0x48] sm:$0xff] }
 0x2c6   : > { %2868 = vst.msk [vmem:[#allocation2 + $0x98] sm:$0xff] %vm513_vm9, %v2850_v53  ;;  %v16049_v19 = vpop.permute.xlu1 %3329  ;;  %3445 = vst.msk [vmem:[#allocation4 + $0x280] sm:$0xff] %vm513_vm9, %v16046_v20 }
 0x2c7   : > { %3335 = vrot.lane.b32.xlu1 %v15837_v63, %s14739_s26  ;;  %3765 = vrot.lane.b32.xlu0 %v15855_v42, %s14742_s11 }
 0x2c9   : > { %v16057_v5 = vpop.permute.xlu0 %3333 }
 0x2ca   : > { %v16059_v21 = vpop.permute.xlu1 %3493 }
 0x2cb   : > { %2937 = vrot.lane.b32.xlu1 %v15915_v59, %s14736_s23  ;;  %3889 = vrot.lane.b32.xlu0 %v15855_v42, %s14743_s18 }
 0x2cd   : > { %v2946_v9 = vpop.permute.xlu0 %2945  ;;  %v3436_v0 = vld [vmem:[#allocation2 + $0x98] sm:$0xff] }
 0x2ce   : > { %v16065_v47 = vpop.permute.xlu1 %3617  ;;  %3454 = vst.msk [vmem:[#allocation4 + $0x2c8] sm:$0xff] %vm513_vm9, %v3436_v0  ;;  %v2972_v32 = vsel %vm468_vm0, %v14431_v37, %v2946_v9 }
 0x2cf   : > { %2953 = vrot.lane.b32.xlu1 %v15855_v42, %s14736_s23  ;;  %2955 = vrot.lane.b32.xlu0 %v15857_v61, %s14736_s23 }
 0x2d1   : > { %v16072_v63 = vpop.permute.xlu0 %3213 }
 0x2d2   : > { %v16074_v54 = vpop.permute.xlu1 %3741 }
 0x2d3   : > { %3501 = vrot.lane.b32.xlu1 %v15840_v55, %s14740_s27  ;;  %3503 = vrot.lane.b32.xlu0 %v15915_v59, %s14740_s27 }
 0x2d5   : > { %v16080_v62 = vpop.permute.xlu0 %2949 }
 0x2d6   : > { %v16082_v48 = vpop.permute.xlu1 %3865 }
 0x2d7   : > { %3087 = vrot.lane.b32.xlu1 %v15855_v42, %s14737_s24  ;;  %3089 = vrot.lane.b32.xlu0 %v15857_v61, %s14737_s24 }
 0x2d9   : > { %v16088_v30 = vpop.permute.xlu0 %3509 }
 0x2da   : > { %v3080_v11 = vpop.permute.xlu1 %3079 }
 0x2db   : > { %3221 = vrot.lane.b32.xlu1 %v15855_v42, %s14738_s25  ;;  %3521 = vrot.lane.b32.xlu0 %v15943_v4, %s14740_s27 }
 0x2dd   : > { %v16094_v33 = vpop.permute.xlu0 %3083 }
 0x2de   : > { %v16096_v17 = vpop.permute.xlu1 %3347 }
 0x2df   : > { %3355 = vrot.lane.b32.xlu1 %v15855_v42, %s14739_s26  ;;  %3223 = vrot.lane.b32.xlu0 %v15857_v61, %s14738_s25 }
 0x2e1   : > { %v16102_v8 = vpop.permute.xlu0 %3633 }
 0x2e2   : > { %v16104_v49 = vpop.permute.xlu1 %3513 }
 0x2e3   : > { %2957 = vrot.lane.b32.xlu1 %v15943_v4, %s14736_s23  ;;  %3073 = vrot.lane.b32.xlu0 %v15918_v14, %s14737_s24 }
 0x2e5   : > { %v16110_v7 = vpop.permute.xlu0 %3217 }
 0x2e6   : > { %v16112_v1 = vpop.permute.xlu1 %3637 }
 0x2e7   : > { %3357 = vrot.lane.b32.xlu0 %v15857_v61, %s14739_s26  ;;  %3071 = vrot.lane.b32.xlu1 %v15915_v59, %s14737_s24 }
 0x2e9   : > { %v16118_v42 = vpop.permute.xlu0 %3757 }
 0x2ea   : > { %v16120_v40 = vpop.permute.xlu1 %3761 }
 0x2eb   : > { %3627 = vrot.lane.b32.xlu0 %v15915_v59, %s14741_s28  ;;  %3625 = vrot.lane.b32.xlu1 %v15840_v55, %s14741_s28 }
 0x2ed   : > { %v16126_v24 = vpop.permute.xlu0 %3881 }
 0x2ee   : > { %v16128_v58 = vpop.permute.xlu1 %3351 }
 0x2ef   : > { %3645 = vrot.lane.b32.xlu0 %v15943_v4, %s14741_s28  ;;  %3091 = vrot.lane.b32.xlu1 %v15943_v4, %s14737_s24 }
 0x2f1   : > { %v16134_v22 = vpop.permute.xlu0 %3081 }
 0x2f2   : > { %v16137_v53 = vpop.permute.xlu1 %2947  ;;  %v3107_v37 = vsel %vm664_vm1, %v3080_v11, %v16134_v22 }
 0x2f3   : > { %v2973_v0 = vsel %vm468_vm0, %v2946_v9, %v16137_v53  ;;  %3207 = vrot.lane.b32.xlu0 %v15918_v14, %s14738_s25  ;;  %3205 = vrot.lane.b32.xlu1 %v15915_v59, %s14738_s25  ;;  %v3097_v9 = vsel %vm664_vm1, %v14435_v35, %v15920_v52  ;;  %v3232_v52 = vsel %vm859_vm2, %v15941_v13, %v16010_v28 }
 0x2f4   : > { %4171 = vmatprep.subr.bf16.mxu1 %v2973_v0 }
 0x2f5   : > { %v16150_v12 = vpop.permute.xlu0 %3349  ;;  %4172 = vmatpush1.bf16.msra.mxu1 %v2972_v32  ;;  %v14436_v32 = vunpack.i.h.bf16 %v15881_v38 }
 0x2f6   : > { %v16152_v23 = vpop.permute.xlu1 %3863  ;;  %4173 = vmatprep.subr.bf16.mxu1 %v3098_v15  ;;  %v14440_v15 = vunpack.i.l.bf16 %v15909_v51 }
 0x2f7   : > { %2959 = vrot.lane.b32.xlu0 %v15945_v10, %s14736_s23  ;;  %3519 = vrot.lane.b32.xlu1 %v15857_v61, %s14740_s27  ;;  %v3106_v35 = vsel %vm664_vm1, %v14436_v32, %v3080_v11  ;;  %v14441_v32 = vunpack.i.h.bf16 %v15909_v51  ;;  %v3366_v51 = vsel %vm1054_vm3, %v15937_v60, %v16049_v19 }
 0x2f9   : > { %v16162_v0 = vpop.permute.xlu0 %3511  ;;  %4174 = vmatpush1.bf16.msra.mxu1 %v3097_v9 }
 0x2fa   : > { %v16165_v3 = vpop.permute.xlu1 %3885  ;;  %4175 = vmatprep.subr.bf16.mxu1 %v3107_v37  ;;  %v3231_v37 = vsel %vm859_vm2, %v14440_v15, %v15941_v13  ;;  %v3240_v13 = vsel %vm859_vm2, %v14441_v32, %v16072_v63  ;;  %v3375_v32 = vsel %vm1054_vm3, %v16096_v17, %v16150_v12 }
 0x2fb   : > { %3093 = vrot.lane.b32.xlu0 %v15945_v10, %s14737_s24  ;;  %3749 = vrot.lane.b32.xlu1 %v15840_v55, %s14742_s11 }
 0x2fd   : > { %v16176_v9 = vpop.permute.xlu0 %3635  ;;  %4176 = vmatpush1.bf16.msra.mxu1 %v3106_v35 }
 0x2fe   : > { %v16178_v38 = vpop.permute.xlu1 %3497  ;;  %4177 = vmatprep.subr.bf16.mxu1 %v3232_v52  ;;  %v14445_v52 = vunpack.i.l.bf16 %v15904_v27 }
 0x2ff   : > { %3751 = vrot.lane.b32.xlu0 %v15915_v59, %s14742_s11  ;;  %3643 = vrot.lane.b32.xlu1 %v15857_v61, %s14741_s28 }
 0x301   : > { %v16186_v11 = vpop.permute.xlu0 %3759  ;;  %4178 = vmatpush1.bf16.msra.mxu1 %v3231_v37 }
 0x302   : > { %v16189_v50 = vpop.permute.xlu1 %3215 }
 0x303   : > { %v3241_v35 = vsel %vm859_vm2, %v16072_v63, %v16189_v50  ;;  %3227 = vrot.lane.b32.xlu0 %v15945_v10, %s14738_s25  ;;  %3225 = vrot.lane.b32.xlu1 %v15943_v4, %s14738_s25  ;;  %v3365_v63 = vsel %vm1054_vm3, %v14445_v52, %v15937_v60 }
 0x304   : > { %4179 = vmatprep.subr.bf16.mxu1 %v3241_v35 }
 0x305   : > { %v16204_v15 = vpop.permute.xlu0 %3353  ;;  %4180 = vmatpush1.bf16.msra.mxu1 %v3240_v13  ;;  %v14446_v13 = vunpack.i.h.bf16 %v15904_v27 }
 0x306   : > { %v16206_v37 = vpop.permute.xlu1 %3621  ;;  %4181 = vmatprep.subr.bf16.mxu1 %v3366_v51  ;;  %v3420_v51 = vld [vmem:[#allocation2 + $0x10] sm:$0xff] }
 0x307   : > { %3769 = vrot.lane.b32.xlu0 %v15943_v4, %s14742_s11  ;;  %3767 = vrot.lane.b32.xlu1 %v15857_v61, %s14742_s11  ;;  %v3374_v60 = vsel %vm1054_vm3, %v14446_v13, %v16096_v17  ;;  %v2974_v17 = vsel %vm468_vm0, %v16137_v53, %v16080_v62  ;;  %v3428_v53 = vld [vmem:[#allocation2 + $0x58] sm:$0xff] }
 0x309   : > { %v16217_v35 = vpop.permute.xlu0 %3883  ;;  %4182 = vmatpush1.bf16.msra.mxu1 %v3365_v63  ;;  %v3419_v63 = vld [vmem:[#allocation2 + $0x8] sm:$0xff] }
 0x30a   : > { %v16220_v56 = vpop.permute.xlu1 %3745  ;;  %4183 = vmatprep.subr.bf16.mxu1 %v3375_v32  ;;  %v3100_v32 = vsel %vm664_vm1, %v15973_v34, %v16036_v2 }
 0x30b   : > { %3341 = vrot.lane.b32.xlu0 %v15918_v14, %s14739_s26  ;;  %3339 = vrot.lane.b32.xlu1 %v15915_v59, %s14739_s26 }
 0x30d   : > { %v16228_v52 = vpop.permute.xlu0 %3499  ;;  %4184 = vmatpush1.bf16.msra.mxu1 %v3374_v60  ;;  %v3429_v60 = vld [vmem:[#allocation2 + $0x60] sm:$0xff] }
 0x30e   : > { %v16230_v18 = vpop.permute.xlu1 %2951  ;;  %4185 = vmatprep.subr.bf16.mxu1 %v3420_v51 }
 0x30f   : > { %v2975_v27 = vsel %vm468_vm0, %v16080_v62, %v16230_v18  ;;  %3361 = vrot.lane.b32.xlu0 %v15945_v10, %s14739_s26  ;;  %3359 = vrot.lane.b32.xlu1 %v15943_v4, %s14739_s26  ;;  %v3099_v62 = vsel %vm664_vm1, %v16038_v45, %v15973_v34  ;;  %v3108_v34 = vsel %vm664_vm1, %v16134_v22, %v16094_v33 }
 0x310   : > { %4277 = vmatprep.subr.bf16.mxu0 %v2975_v27  ;;  %v3528_v27 = vsel %vm1369_vm4, %v16059_v21, %v15955_v16  ;;  %v3234_v45 = vsel %vm859_vm2, %v15999_v41, %v16044_v36 }
 0x311   : > { %v16245_v13 = vpop.permute.xlu0 %3623  ;;  %4186 = vmatpush1.bf16.msra.mxu1 %v3419_v63  ;;  %4278 = vmatpush1.bf16.msra.mxu0 %v2974_v17 }
 0x312   : > { %v16247_v51 = vpop.permute.xlu1 %3085  ;;  %4279 = vmatprep.subr.bf16.mxu0 %v3100_v32  ;;  %4187 = vmatprep.subr.bf16.mxu1 %v3429_v60  ;;  %v3536_v32 = vsel %vm1369_vm4, %v16162_v0, %v16104_v49 }
 0x313   : > { %3875 = vrot.lane.b32.xlu0 %v15915_v59, %s14743_s18  ;;  %3873 = vrot.lane.b32.xlu1 %v15840_v55, %s14743_s18  ;;  %v3109_v17 = vsel %vm664_vm1, %v16094_v33, %v16247_v51  ;;  %v3527_v55 = vsel %vm1369_vm4, %v15965_v26, %v16059_v21  ;;  %v3233_v26 = vsel %vm859_vm2, %v16010_v28, %v15999_v41 }
 0x314   : > { %v3535_v21 = vsel %vm1369_vm4, %v16088_v30, %v16162_v0  ;;  %v3652_v33 = vsel %vm1552_vm5, %v16065_v47, %v15963_v57  ;;  %v3651_v41 = vsel %vm1552_vm5, %v15989_v31, %v16065_v47  ;;  %v3242_v28 = vsel %vm859_vm2, %v16189_v50, %v16110_v7 }
 0x315   : > { %v16262_v63 = vpop.permute.xlu0 %3747  ;;  %4188 = vmatpush1.bf16.msra.mxu1 %v3428_v53  ;;  %4280 = vmatpush1.bf16.msra.mxu0 %v3099_v62  ;;  %v16306_v53 = vld [vmem:[#allocation2 + $0x98] sm:$0xff]  ;;  %v3368_v30 = vsel %vm1054_vm3, %v16028_v25, %v16057_v5  ;;  %v3660_v0 = vsel %vm1552_vm5, %v16176_v9, %v16112_v1  ;;  %v3367_v50 = vsel %vm1054_vm3, %v16049_v19, %v16028_v25 }
 0x316   : > { %v16264_v59 = vpop.permute.xlu1 %3219  ;;  %4281 = vmatprep.subr.bf16.mxu0 %v3109_v17  ;;  %4189 = vmatprep.subr.bf16.mxu1 %v3528_v27  ;;  %v3659_v31 = vsel %vm1552_vm5, %v16102_v8, %v16176_v9  ;;  %v3776_v47 = vsel %vm1735_vm6, %v16074_v54, %v15971_v29  ;;  %v3775_v25 = vsel %vm1735_vm6, %v16013_v44, %v16074_v54  ;;  %v4025_v44 = vld [vmem:[#allocation4 + $0x250] sm:$0xff] }
 0x317   : > { %3893 = vrot.lane.b32.xlu0 %v15943_v4, %s14743_s18  ;;  %3891 = vrot.lane.b32.xlu1 %v15857_v61, %s14743_s18  ;;  %v3243_v22 = vsel %vm859_vm2, %v16110_v7, %v16264_v59  ;;  %v3377_v7 = vsel %vm1054_vm3, %v16128_v58, %v16204_v15  ;;  %v3376_v19 = vsel %vm1054_vm3, %v16150_v12, %v16128_v58  ;;  %v16375_v54 = vld [vmem:[%s21372_s1 + $0x30] ss:$12 sps:$4 sm:$0xff]  }
 0x318   : > { %v3784_v8 = vsel %vm1735_vm6, %v16186_v11, %v16120_v40  ;;  %v3783_v12 = vsel %vm1735_vm6, %v16118_v42, %v16186_v11  ;;  %v3900_v58 = vsel %vm1918_vm7, %v16082_v48, %v15986_v46  ;;  %v3899_v42 = vsel %vm1918_vm7, %v16152_v23, %v16082_v48  ;;  %v4034_v11 = vld [vmem:[#allocation4 + $0x298] sm:$0xff]  ;;  %v16405_v48 = vld [vmem:[#allocation2 + $0x40] sm:$0xff] }
 0x319   : > { %v16282_v4 = vpop.permute.xlu0 %3871  ;;  %4190 = vmatpush1.bf16.msra.mxu1 %v3527_v55  ;;  %4282 = vmatpush1.bf16.msra.mxu0 %v3108_v34 }
 0x31a   : > { %v16284_v61 = vpop.permute.xlu1 %3515  ;;  %4283 = vmatprep.subr.bf16.mxu0 %v3234_v45  ;;  %4191 = vmatprep.subr.bf16.mxu1 %v3536_v32  ;;  %v3422_v45 = vld [vmem:[#allocation2 + $0x20] sm:$0xff] }
 0x31b   : > { %3507 = vrot.lane.b32.xlu0 %v16046_v20, %s14740_s27  ;;  %3505 = vrot.lane.b32.xlu1 %v15918_v14, %s14740_s27 }
 0x31d   : > { %v16302_v60 = vpop.permute.xlu0 %2935  ;;  %4192 = vmatpush1.bf16.msra.mxu1 %v3535_v21  ;;  %4284 = vmatpush1.bf16.msra.mxu0 %v3233_v26  ;;  %v3431_v21 = vld [vmem:[#allocation2 + $0x70] sm:$0xff] }
 0x31e   : > { %v16304_v62 = vpop.permute.xlu1 %3639  ;;  %4285 = vmatprep.subr.bf16.mxu0 %v3243_v22  ;;  %4193 = vmatprep.subr.bf16.mxu1 %v3652_v33  ;;  %v16393_v33 = vld [vmem:[%s21372_s1 + $0x4c] ss:$12 sps:$4 sm:$0xff]   ;;  %v3908_v22 = vsel %vm1918_vm7, %v16217_v35, %v16165_v3 }
 0x31f   : > { %3525 = vrot.lane.b32.xlu0 %v16306_v53, %s14740_s27  ;;  %3523 = vrot.lane.b32.xlu1 %v15945_v10, %s14740_s27 }
 0x321   : > { %v16324_v27 = vpop.permute.xlu0 %3069  ;;  %4194 = vmatpush1.bf16.msra.mxu1 %v3651_v41  ;;  %4286 = vmatpush1.bf16.msra.mxu0 %v3242_v28  ;;  %v3529_v28 = vsel %vm1369_vm4, %v15955_v16, %v16178_v38 }
 0x322   : > { %v16326_v17 = vpop.permute.xlu1 %3763  ;;  %4287 = vmatprep.subr.bf16.mxu0 %v3368_v30  ;;  %4195 = vmatprep.subr.bf16.mxu1 %v3660_v0  ;;  %v3907_v30 = vsel %vm1918_vm7, %v16126_v24, %v16217_v35  ;;  %v16421_v0 = vld [vmem:[%s21372_s1 + $0x48] ss:$12 sps:$4 sm:$0xff]   ;;  %v3654_v35 = vsel %vm1552_vm5, %v16206_v37, %v16245_v13 }
 0x323   : > { %3631 = vrot.lane.b32.xlu0 %v16046_v20, %s14741_s28  ;;  %3629 = vrot.lane.b32.xlu1 %v15918_v14, %s14741_s28  ;;  %v16432_v24 = vld [vmem:[#allocation2 + $0x90] sm:$0xff] }
 0x325   : > { %v16344_v55 = vpop.permute.xlu0 %3203  ;;  %4196 = vmatpush1.bf16.msra.mxu1 %v3659_v31  ;;  %4288 = vmatpush1.bf16.msra.mxu0 %v3367_v50 }
 0x326   : > { %v16346_v34 = vpop.permute.xlu1 %3869  ;;  %4289 = vmatprep.subr.bf16.mxu0 %v3377_v7  ;;  %4197 = vmatprep.subr.bf16.mxu1 %v3776_v47 }
 0x327   : > { %3649 = vrot.lane.b32.xlu0 %v16306_v53, %s14741_s28  ;;  %3647 = vrot.lane.b32.xlu1 %v15945_v10, %s14741_s28 }
 0x329   : > { %v16361_v9 = vpop.permute.xlu0 %3337  ;;  %4198 = vmatpush1.bf16.msra.mxu1 %v3775_v25  ;;  %4290 = vmatpush1.bf16.msra.mxu0 %v3376_v19  ;;  %v16447_v25 = vld [vmem:[#allocation2] sm:$0xff] }
 0x32a   : > { %v16363_v32 = vpop.permute.xlu1 %3887  ;;  %4291 = vmatprep.subr.bf16.mxu0 %v3422_v45  ;;  %4199 = vmatprep.subr.bf16.mxu1 %v3784_v8 }
 0x32b   : > { %3755 = vrot.lane.b32.xlu0 %v16046_v20, %s14742_s11  ;;  %3753 = vrot.lane.b32.xlu1 %v15918_v14, %s14742_s11 }
 0x32d   : > { %v16380_v26 = vpop.permute.xlu0 %2939  ;;  %4200 = vmatpush1.bf16.msra.mxu1 %v3783_v12  ;;  %4292 = vmatpush1.bf16.msra.mxu0 %v4025_v44  ;;  %v3778_v44 = vsel %vm1735_vm6, %v16220_v56, %v16262_v63 }
 0x32e   : > { %v2934_v14 = vpop.permute.xlu1 %2933  ;;  %4293 = vmatprep.subr.bf16.mxu0 %v3431_v21  ;;  %4222 = vmatprep.subr.bf16.mxu1 %v3900_v58 }
 0x32f   : > { %3773 = vrot.lane.b32.xlu0 %v16306_v53, %s14742_s11  ;;  %3771 = vrot.lane.b32.xlu1 %v15945_v10, %s14742_s11  ;;  %v3530_v10 = vsel %vm1369_vm4, %v16178_v38, %v16228_v52  ;;  %v2968_v50 = vsel %vm468_vm0, %v2934_v14, %v16302_v60  ;;  %v3537_v38 = vsel %vm1369_vm4, %v16104_v49, %v16284_v61 }
 0x330   : > { %4202 = vmatmul.mubr.bf16.vlgmr.msra.gmra.mrb[20].mxu1 %v16375_v54  ;;  %v3653_v49 = vsel %vm1552_vm5, %v15963_v57, %v16206_v37  ;;  %v3661_v57 = vsel %vm1552_vm5, %v16112_v1, %v16304_v62  ;;  %v2967_v37 = vsel %vm468_vm0, %v16021_v6, %v2934_v14  ;;  %v16502_v14 = vld [vmem:[%s21372_s1 + $0x50] ss:$12 sps:$4 sm:$0xff]  }
 0x331   : > { %v16401_v41 = vpop.permute.xlu0 %3517  ;;  %4223 = vmatpush1.bf16.msra.mxu1 %v3899_v42  ;;  %4294 = vmatpush1.bf16.msra.mxu0 %v4034_v11 }
 0x332   : > { %v16403_v23 = vpop.permute.xlu1 %3067  ;;  %4295 = vmatprep.subr.bf16.mxu0 %v3530_v10  ;;  %4224 = vmatprep.subr.bf16.mxu1 %v3908_v22  ;;  %v3538_v31 = vsel %vm1369_vm4, %v16284_v61, %v16401_v41  ;;  %v16462_v61 = vld [vmem:[%s21372_s1 + $0x38] ss:$12 sps:$4 sm:$0xff]   ;;  %v13375_v10 = vld [vmem:[%s21373_s2 + $0x28] sm:$0xff] }
 0x333   : > { %3879 = vrot.lane.b32.xlu0 %v16046_v20, %s14743_s18  ;;  %3877 = vrot.lane.b32.xlu1 %v16405_v48, %s14743_s18 }
 0x334   : > { %4211 = vmatprep.mubr.bf16.mxu1 %v16393_v33 }
 0x335   : > { %v16428_v47 = vpop.permute.xlu0 %3641  ;;  %4225 = vmatpush1.bf16.msra.mxu1 %v3907_v30  ;;  %4296 = vmatpush1.bf16.msra.mxu0 %v3529_v28  ;;  %v13374_v28 = vld [vmem:[%s21373_s2 + $0x20] sm:$0xff]  ;;  %v13377_v30 = vld [vmem:[%s21373_s2 + $0x38] sm:$0xff] }
 0x336   : > { %v16430_v16 = vpop.permute.xlu1 %3201  ;;  %4297 = vmatprep.subr.bf16.mxu0 %v3538_v31  ;;  %4381 = vmatprep.subr.bf16.mxu1 %v2968_v50  ;;  %v3662_v8 = vsel %vm1552_vm5, %v16304_v62, %v16428_v47  ;;  %v3777_v62 = vsel %vm1735_vm6, %v15971_v29, %v16220_v56  ;;  %v3785_v56 = vsel %vm1735_vm6, %v16120_v40, %v16326_v17  ;;  %v13376_v50 = vld [vmem:[%s21373_s2 + $0x30] sm:$0xff] }
 0x337   : > { %3897 = vrot.lane.b32.xlu0 %v16306_v53, %s14743_s18  ;;  %3895 = vrot.lane.b32.xlu1 %v16432_v24, %s14743_s18  ;;  %v3101_v29 = vsel %vm664_vm1, %v16036_v2, %v16403_v23 }
 0x338   : > { %4212 = vmatmul.mubr.bf16.gmra.mrb[24].mxu1 %v16421_v0 }
 0x339   : > { %v16445_v7 = vpop.permute.xlu0 %3765  ;;  %4298 = vmatpush1.bf16.msra.mxu0 %v3537_v38  ;;  %4254 = vmatprep.mubr.bf16.mxu1 %v16447_v25  ;;  %v3909_v38 = vsel %vm1918_vm7, %v16165_v3, %v16363_v32 }
 0x33a   : > { %v16450_v19 = vpop.permute.xlu1 %3335  ;;  %4299 = vmatprep.subr.bf16.mxu0 %v3654_v35  ;;  %v3786_v42 = vsel %vm1735_vm6, %v16326_v17, %v16445_v7  ;;  %v3235_v35 = vsel %vm859_vm2, %v16044_v36, %v16430_v16 }
 0x33b   : > { %2961 = vrot.lane.b32.xlu0 %v16306_v53, %s14736_s23  ;;  %2941 = vrot.lane.b32.xlu1 %v16046_v20, %s14736_s23  ;;  %v3370_v36 = vsel %vm1054_vm3, %v16450_v19, %v16361_v9 }
 0x33d   : > { %v16467_v45 = vpop.permute.xlu0 %3889  ;;  %4300 = vmatpush1.bf16.msra.mxu0 %v3653_v49 }
 0x33e   : > { %v16469_v12 = vpop.permute.xlu1 %2937  ;;  %4301 = vmatprep.subr.bf16.mxu0 %v3662_v8  ;;  %v3910_v31 = vsel %vm1918_vm7, %v16363_v32, %v16467_v45 }
 0x33f   : > { %3095 = vrot.lane.b32.xlu0 %v16306_v53, %s14737_s24  ;;  %3075 = vrot.lane.b32.xlu1 %v16046_v20, %s14737_s24  ;;  %v2970_v49 = vsel %vm468_vm0, %v16469_v12, %v16380_v26 }
 0x340   : > { %13384 = vmatmul.mubr.msk.bf16.vlgmr.msra.gmra.mrb[20].mxu1 %vm2183_vm8, %v16462_v61 }
 0x341   : > { %v16485_v58 = vpop.permute.xlu0 %2955  ;;  %4382 = vmatpush1.bf16.msra.mxu1 %v2967_v37  ;;  %4302 = vmatpush1.bf16.msra.mxu0 %v3661_v57 }
 0x342   : > { %v2954_v21 = vpop.permute.xlu1 %2953  ;;  %4303 = vmatprep.subr.bf16.mxu0 %v3778_v44  ;;  %4264 = vmatprep.mubr.bf16.mxu1 %v16447_v25  ;;  %v3369_v44 = vsel %vm1054_vm3, %v16057_v5, %v16450_v19  ;;  %v3424_v5 = vld [vmem:[#allocation2 + $0x30] sm:$0xff] }
 0x343   : > { %v2976_v1 = vsel %vm468_vm0, %v16230_v18, %v2954_v21  ;;  %v2977_v6 = vsel %vm468_vm0, %v2954_v21, %v16485_v58  ;;  %3229 = vrot.lane.b32.xlu0 %v16306_v53, %s14738_s25  ;;  %3209 = vrot.lane.b32.xlu1 %v16046_v20, %s14738_s25  ;;  %v3102_v18 = vsel %vm664_vm1, %v16403_v23, %v16324_v27 }
 0x344   : > { %4383 = vmatprep.subr.bf16.mxu1 %v2977_v6  ;;  %v3901_v23 = vsel %vm1918_vm7, %v15986_v46, %v16346_v34  ;;  %v2969_v6 = vsel %vm468_vm0, %v16302_v60, %v16469_v12  ;;  %v3433_v60 = vld [vmem:[#allocation2 + $0x80] sm:$0xff] }
 0x345   : > { %v16510_v11 = vpop.permute.xlu0 %3503  ;;  %4304 = vmatpush1.bf16.msra.mxu0 %v3777_v62  ;;  %4384 = vmatpush1.bf16.msra.mxu1 %v2976_v1 }
 0x346   : > { %v16512_v22 = vpop.permute.xlu1 %3501  ;;  %4305 = vmatprep.subr.bf16.mxu0 %v3786_v42  ;;  %4385 = vmatprep.subr.bf16.mxu1 %v3102_v18  ;;  %v4027_v42 = vld [vmem:[#allocation4 + $0x260] sm:$0xff] }
 0x347   : > { %3363 = vrot.lane.b32.xlu0 %v16306_v53, %s14739_s26  ;;  %3343 = vrot.lane.b32.xlu1 %v16046_v20, %s14739_s26  ;;  %v3902_v20 = vsel %vm1918_vm7, %v16346_v34, %v16282_v4 }
 0x348   : > { %13385 = vmatmul.mubr.msk.bf16.gmra.mrb[24].mxu1 %vm2183_vm8, %v16502_v14 }
 0x349   : > { %v16535_v40 = vpop.permute.xlu0 %3089  ;;  %4306 = vmatpush1.bf16.msra.mxu0 %v3785_v56  ;;  %4386 = vmatpush1.bf16.msra.mxu1 %v3101_v29  ;;  %v3532_v29 = vsel %vm1369_vm4, %v16512_v22, %v16510_v11 }
 0x34a   : > { %v3088_v2 = vpop.permute.xlu1 %3087  ;;  %4328 = vmatprep.subr.bf16.mxu0 %v3902_v20  ;;  %4413 = vmatprep.mubr.bf16.mxu1 %v15978_v39  ;;  %v3531_v20 = vsel %vm1369_vm4, %v16228_v52, %v16512_v22 }
 0x34b   : > { %v3110_v53 = vsel %vm664_vm1, %v16247_v51, %v3088_v2  ;;  %v3111_v17 = vsel %vm664_vm1, %v3088_v2, %v16535_v40  ;;  %4120 = vperm.xlu0 %14425, %v13375_v10   ;;  %4115 = vperm.xlu1 %14426, %v13374_v28   ;;  %v3236_v51 = vsel %vm859_vm2, %v16430_v16, %v16344_v55 }
 0x34c   : > { %4308 = vmatmul.mubr.bf16.vlgmr.msra.gmra.mrb[24].mxu0 %v16375_v54  ;;  %4387 = vmatprep.subr.bf16.mxu1 %v3111_v17 }
 0x34d   : > { %v16558_v46 = vpop.permute.xlu0 %3521  ;;  %4329 = vmatpush1.bf16.msra.mxu0 %v3901_v23  ;;  %4388 = vmatpush1.bf16.msra.mxu1 %v3110_v53 }
 0x34e   : > { %v3222_v34 = vpop.permute.xlu1 %3221  ;;  %4330 = vmatprep.subr.bf16.mxu0 %v3910_v31  ;;  %4389 = vmatprep.subr.bf16.mxu1 %v3236_v51 }
 0x34f   : > { %4130 = vperm.xlu0 %14425, %v13377_v30   ;;  %4125 = vperm.xlu1 %14426, %v13376_v50   ;;  %v3244_v3 = vsel %vm859_vm2, %v16264_v59, %v3222_v34 }
 0x350   : > { %4317 = vmatprep.mubr.bf16.mxu0 %v16393_v33 }
 0x351   : > { %v16570_v8 = vpop.permute.xlu0 %3223  ;;  %4331 = vmatpush1.bf16.msra.mxu0 %v3909_v38  ;;  %4390 = vmatpush1.bf16.msra.mxu1 %v3235_v35 }
 0x352   : > { %v3245_v57 = vsel %vm859_vm2, %v3222_v34, %v16570_v8  ;;  %v3356_v37 = vpop.permute.xlu1 %3355  ;;  %4487 = vmatprep.subr.bf16.mxu0 %v2970_v49 }
 0x353   : > { %4391 = vmatprep.subr.bf16.mxu1 %v3245_v57  ;;  %v3378_v62 = vsel %vm1054_vm3, %v16204_v15, %v3356_v37  ;;  %v4036_v15 = vld [vmem:[#allocation4 + $0x2a8] sm:$0xff] }
 0x354   : > { %4318 = vmatmul.mubr.bf16.gmra.mrb[28].mxu0 %v16421_v0 }
 0x355   : > { %v16580_v32 = vpop.permute.xlu0 %3073  ;;  %4392 = vmatpush1.bf16.msra.mxu1 %v3244_v3  ;;  %4360 = vmatprep.mubr.bf16.mxu0 %v16447_v25 }
 0x356   : > { %v2958_v16 = vpop.permute.xlu1 %2957  ;;  %4393 = vmatprep.subr.bf16.mxu1 %v3370_v36 }
 0x357   : > { %v2978_v23 = vsel %vm468_vm0, %v16485_v58, %v2958_v16 }
 0x359   : > { %v16586_v21 = vpop.permute.xlu0 %3357  ;;  %4394 = vmatpush1.bf16.msra.mxu1 %v3369_v44 }
 0x35a   : > { %v3379_v59 = vsel %vm1054_vm3, %v3356_v37, %v16586_v21  ;;  %v3072_v1 = vpop.permute.xlu1 %3071 }
 0x35b   : > { %4395 = vmatprep.subr.bf16.mxu1 %v3379_v59  ;;  %v3104_v52 = vsel %vm664_vm1, %v3072_v1, %v16580_v32 }
 0x35c   : > { %13386 = vmatmul.mubr.msk.bf16.vlgmr.msra.gmra.mrb[24].mxu0 %vm2183_vm8, %v16462_v61 }
 0x35d   : > { %v16597_v18 = vpop.permute.xlu0 %3627  ;;  %4488 = vmatpush1.bf16.msra.mxu0 %v2969_v6  ;;  %4396 = vmatpush1.bf16.msra.mxu1 %v3378_v62 }
 0x35e   : > { %v3626_v19 = vpop.permute.xlu1 %3625  ;;  %4397 = vmatprep.subr.bf16.mxu1 %v3424_v5  ;;  %4370 = vmatprep.mubr.bf16.mxu0 %v16447_v25 }
 0x35f   : > { %v3656_v22 = vsel %vm1552_vm5, %v3626_v19, %v16597_v18  ;;  %v3655_v51 = vsel %vm1552_vm5, %v16245_v13, %v3626_v19 }
 0x361   : > { %v16600_v56 = vpop.permute.xlu0 %3645  ;;  %4398 = vmatpush1.bf16.msra.mxu1 %v4027_v42 }
 0x362   : > { %v3092_v12 = vpop.permute.xlu1 %3091  ;;  %4399 = vmatprep.subr.bf16.mxu1 %v3433_v60 }
 0x363   : > { %v3112_v35 = vsel %vm664_vm1, %v16535_v40, %v3092_v12 }
 0x364   : > { %13387 = vmatmul.mubr.msk.bf16.gmra.mrb[28].mxu0 %vm2183_vm8, %v16502_v14 }
 0x365   : > { %v16607_v10 = vpop.permute.xlu0 %3207  ;;  %4400 = vmatpush1.bf16.msra.mxu1 %v4036_v15  ;;  %4519 = vmatprep.mubr.bf16.mxu0 %v15978_v39 }
 0x366   : > { %v3206_v28 = vpop.permute.xlu1 %3205  ;;  %4401 = vmatprep.subr.bf16.mxu1 %v3532_v29 }
 0x367   : > { %v3238_v13 = vsel %vm859_vm2, %v3206_v28, %v16607_v10 }
 0x369   : > { %v16613_v2 = vpop.permute.xlu0 %2959  ;;  %4402 = vmatpush1.bf16.msra.mxu1 %v3531_v20  ;;  %v4038_v20 = vld [vmem:[#allocation4 + $0x2b8] sm:$0xff] }
 0x36a   : > { %v2979_v53 = vsel %vm468_vm0, %v2958_v16, %v16613_v2  ;;  %v3520_v17 = vpop.permute.xlu1 %3519 }
 0x36b   : > { %v3539_v30 = vsel %vm1369_vm4, %v16401_v41, %v3520_v17  ;;  %v3540_v39 = vsel %vm1369_vm4, %v3520_v17, %v16558_v46  ;;  %4489 = vmatprep.subr.bf16.mxu0 %v2979_v53  ;;  %v3103_v41 = vsel %vm664_vm1, %v16324_v27, %v3072_v1  ;;  %v4031_v17 = vld [vmem:[#allocation4 + $0x280] sm:$0xff] }
 0x36c   : > { %4403 = vmatprep.subr.bf16.mxu1 %v3540_v39  ;;  %4490 = vmatpush1.bf16.msra.mxu0 %v2978_v23 }
 0x36d   : > { %v16627_v50 = vpop.permute.xlu0 %3093  ;;  %4404 = vmatpush1.bf16.msra.mxu1 %v3539_v30  ;;  %4491 = vmatprep.subr.bf16.mxu0 %v3104_v52 }
 0x36e   : > { %v3750_v58 = vpop.permute.xlu1 %3749  ;;  %4405 = vmatprep.subr.bf16.mxu1 %v3656_v22  ;;  %v3113_v31 = vsel %vm664_vm1, %v3092_v12, %v16627_v50 }
 0x36f   : > { %v3779_v40 = vsel %vm1735_vm6, %v16262_v63, %v3750_v58 }
 0x370   : > { %4492 = vmatpush1.bf16.msra.mxu0 %v3103_v41 }
 0x371   : > { %v16635_v34 = vpop.permute.xlu0 %3751  ;;  %4406 = vmatpush1.bf16.msra.mxu1 %v3655_v51  ;;  %4493 = vmatprep.subr.bf16.mxu0 %v3113_v31 }
 0x372   : > { %v3644_v38 = vpop.permute.xlu1 %3643  ;;  %v3780_v57 = vsel %vm1735_vm6, %v3750_v58, %v16635_v34  ;;  %v14452_v58 = vpack.i.bf16 %v16447_v25, %v16447_v25 }
 0x373   : > { %v3663_v49 = vsel %vm1552_vm5, %v16428_v47, %v3644_v38  ;;  %v3664_v27 = vsel %vm1552_vm5, %v3644_v38, %v16600_v56  ;;  %v3237_v47 = vsel %vm859_vm2, %v16344_v55, %v3206_v28  ;;  %v14652_v38 = vld [vmem:[%s21372_s1 + $0x34] ss:$12 sps:$4 sm:$0xff]  }
 0x374   : > { %4407 = vmatprep.subr.bf16.mxu1 %v3664_v27  ;;  %4494 = vmatpush1.bf16.msra.mxu0 %v3112_v35 }
 0x375   : > { %v16647_v37 = vpop.permute.xlu0 %3227  ;;  %4408 = vmatpush1.bf16.msra.mxu1 %v3663_v49  ;;  %4495 = vmatprep.subr.bf16.mxu0 %v3238_v13 }
 0x376   : > { %v3226_v3 = vpop.permute.xlu1 %3225  ;;  %4409 = vmatprep.subr.bf16.mxu1 %v3780_v57  ;;  %14453 = vrot.lane.b32.xlu0 %v14452_v58, %s14737_s24 }
 0x377   : > { %v3247_v36 = vsel %vm859_vm2, %v3226_v3, %v16647_v37  ;;  %v3246_v59 = vsel %vm859_vm2, %v16570_v8, %v3226_v3  ;;  %14448 = vrot.lane.b32.xlu1 %v14452_v58, %s14736_s23 }
 0x378   : > { %4496 = vmatpush1.bf16.msra.mxu0 %v3237_v47 }
 0x379   : > { %v16655_v16 = vpop.permute.xlu0 %3769  ;;  %4410 = vmatpush1.bf16.msra.mxu1 %v3779_v40  ;;  %4497 = vmatprep.subr.bf16.mxu0 %v3247_v36 }
 0x37a   : > { %v3768_v44 = vpop.permute.xlu1 %3767  ;;  %14463 = vrot.lane.b32.xlu0 %v14452_v58, %s14739_s26 }
 0x37b   : > { %v3787_v1 = vsel %vm1735_vm6, %v16445_v7, %v3768_v44  ;;  %v3788_v55 = vsel %vm1735_vm6, %v3768_v44, %v16655_v16  ;;  %14458 = vrot.lane.b32.xlu1 %v14452_v58, %s14738_s25  ;;  %v16784_v58 = vld [vmem:[%s21378_s7] sm:$0xff] }
 0x37c   : > { %4411 = vmatprep.subr.bf16.mxu1 %v3788_v55  ;;  %4498 = vmatpush1.bf16.msra.mxu0 %v3246_v59 }
 0x37d   : > { %v16663_v63 = vpop.permute.xlu0 %3341  ;;  %4412 = vmatpush1.bf16.msra.mxu1 %v3787_v1 }
 0x37e   : > { %v3340_v6 = vpop.permute.xlu1 %3339 }
 0x37f   : > { %v3371_v62 = vsel %vm1054_vm3, %v16361_v9, %v3340_v6  ;;  %v3372_v5 = vsel %vm1054_vm3, %v3340_v6, %v16663_v63 }
 0x380   : > { %4414 = vmatmul.mubr.bf16.vlgmr.msra.gmra.mrb[28].mxu1 %v16375_v54  ;;  %4499 = vmatprep.subr.bf16.mxu0 %v3372_v5 }
 0x381   : > { %v16670_v8 = vpop.permute.xlu0 %3361  ;;  %4500 = vmatpush1.bf16.msra.mxu0 %v3371_v62  ;;  %4423 = vmatprep.mubr.bf16.mxu1 %v16393_v33 }
 0x382   : > { %v3360_v7 = vpop.permute.xlu1 %3359 }
 0x383   : > { %v3380_v19 = vsel %vm1054_vm3, %v16586_v21, %v3360_v7  ;;  %v3381_v42 = vsel %vm1054_vm3, %v3360_v7, %v16670_v8  ;;  %v4029_v21 = vld [vmem:[#allocation4 + $0x270] sm:$0xff] }
 0x384   : > { %4501 = vmatprep.subr.bf16.mxu0 %v3381_v42 }
 0x385   : > { %v16677_v9 = vpop.permute.xlu0 %3875  ;;  %4502 = vmatpush1.bf16.msra.mxu0 %v3380_v19 }
 0x386   : > { %v3874_v60 = vpop.permute.xlu1 %3873  ;;  %4503 = vmatprep.subr.bf16.mxu0 %v16405_v48 }
 0x387   : > { %v3903_v12 = vsel %vm1918_vm7, %v16282_v4, %v3874_v60  ;;  %v3904_v15 = vsel %vm1918_vm7, %v3874_v60, %v16677_v9 }
 0x388   : > { %4424 = vmatmul.mubr.bf16.gmra.mrb[32].mxu1 %v16421_v0  ;;  %4434 = vmatprep.subr.bf16.mxu1 %v3904_v15 }
 0x389   : > { %v16685_v29 = vpop.permute.xlu0 %3893  ;;  %4435 = vmatpush1.bf16.msra.mxu1 %v3903_v12  ;;  %4504 = vmatpush1.bf16.msra.mxu0 %v4029_v21 }
 0x38a   : > { %v3892_v28 = vpop.permute.xlu1 %3891  ;;  %4505 = vmatprep.subr.bf16.mxu0 %v16432_v24  ;;  %4466 = vmatprep.mubr.bf16.mxu1 %v16447_v25 }
 0x38b   : > { %v3911_v48 = vsel %vm1918_vm7, %v16467_v45, %v3892_v28  ;;  %v3912_v4 = vsel %vm1918_vm7, %v3892_v28, %v16685_v29 }
 0x38c   : > { %4436 = vmatprep.subr.bf16.mxu1 %v3912_v4 }
 0x38d   : > { %v3508_v53 = vpop.permute.xlu0 %3507  ;;  %4437 = vmatpush1.bf16.msra.mxu1 %v3911_v48  ;;  %4506 = vmatpush1.bf16.msra.mxu0 %v4038_v20 }
 0x38e   : > { %3569 = vst.msk [vmem:[#allocation4 + $0x310] sm:$0xff] %vm513_vm9, %v3508_v53  ;;  %v3506_v23 = vpop.permute.xlu1 %3505  ;;  %13526 = vmatprep.subr.bf16.mxu1 %v4031_v17 }
 0x38f   : > { %v3533_v24 = vsel %vm1369_vm4, %v16510_v11, %v3506_v23  ;;  %v3534_v30 = vsel %vm1369_vm4, %v3506_v23, %v3508_v53 }
 0x390   : > { %13388 = vmatmul.mubr.msk.bf16.vlgmr.msra.gmra.mrb[28].mxu1 %vm2183_vm8, %v16462_v61  ;;  %4507 = vmatprep.subr.bf16.mxu0 %v3534_v30 }
 0x391   : > { %v3526_v45 = vpop.permute.xlu0 %3525  ;;  %4508 = vmatpush1.bf16.msra.mxu0 %v3533_v24  ;;  %4476 = vmatprep.mubr.bf16.mxu1 %v16447_v25 }
 0x392   : > { %3578 = vst.msk [vmem:[#allocation4 + $0x358] sm:$0xff] %vm513_vm9, %v3526_v45  ;;  %v3524_v39 = vpop.permute.xlu1 %3523 }
 0x393   : > { %v3541_v52 = vsel %vm1369_vm4, %v16558_v46, %v3524_v39  ;;  %v3542_v22 = vsel %vm1369_vm4, %v3524_v39, %v3526_v45 }
 0x394   : > { %4509 = vmatprep.subr.bf16.mxu0 %v3542_v22 }
 0x395   : > { %v3632_v11 = vpop.permute.xlu0 %3631  ;;  %4510 = vmatpush1.bf16.msra.mxu0 %v3541_v52  ;;  %v4049_v17 = vld [vmem:[#allocation4 + $0x310] sm:$0xff] }
 0x396   : > { %3693 = vst.msk [vmem:[#allocation4 + $0x3a0] sm:$0xff] %vm513_vm9, %v3632_v11  ;;  %v3630_v41 = vpop.permute.xlu1 %3629 }
 0x397   : > { %v3657_v51 = vsel %vm1552_vm5, %v16597_v18, %v3630_v41  ;;  %v3658_v31 = vsel %vm1552_vm5, %v3630_v41, %v3632_v11 }
 0x398   : > { %13389 = vmatmul.mubr.msk.bf16.gmra.mrb[32].mxu1 %vm2183_vm8, %v16502_v14  ;;  %4511 = vmatprep.subr.bf16.mxu0 %v3658_v31 }
 0x399   : > { %v3650_v46 = vpop.permute.xlu0 %3649  ;;  %4512 = vmatpush1.bf16.msra.mxu0 %v3657_v51  ;;  %4625 = vmatprep.mubr.bf16.mxu1 %v14652_v38  ;;  %v4058_v24 = vld [vmem:[#allocation4 + $0x358] sm:$0xff] }
 0x39a   : > { %3702 = vst.msk [vmem:[#allocation4 + $0x3e8] sm:$0xff] %vm513_vm9, %v3650_v46  ;;  %v3648_v18 = vpop.permute.xlu1 %3647 }
 0x39b   : > { %v3665_v35 = vsel %vm1552_vm5, %v16600_v56, %v3648_v18  ;;  %v3666_v49 = vsel %vm1552_vm5, %v3648_v18, %v3650_v46 }
 0x39c   : > { %4513 = vmatprep.subr.bf16.mxu0 %v3666_v49  ;;  %v21421_v49 = vld [vmem:[#allocation11_spill] sm:$0xff] }
 0x39d   : > { %v3756_v27 = vpop.permute.xlu0 %3755  ;;  %4514 = vmatpush1.bf16.msra.mxu0 %v3665_v35 }
 0x39e   : > { %3817 = vst.msk [vmem:[#allocation4 + $0x430] sm:$0xff] %vm513_vm9, %v3756_v27  ;;  %v3754_v13 = vpop.permute.xlu1 %3753 }
 0x39f   : > { %v3781_v57 = vsel %vm1735_vm6, %v16635_v34, %v3754_v13  ;;  %v3782_v3 = vsel %vm1735_vm6, %v3754_v13, %v3756_v27  ;;  %v4738_v27 = vrot.slane %v16784_v58, %v21421_v49 }
 0x3a0   : > { %4515 = vmatprep.subr.bf16.mxu0 %v3782_v3 }
 0x3a1   : > { %v3774_v47 = vpop.permute.xlu0 %3773  ;;  %4516 = vmatpush1.bf16.msra.mxu0 %v3781_v57  ;;  %v4076_v30 = vld [vmem:[#allocation4 + $0x3e8] sm:$0xff] }
 0x3a2   : > { %3826 = vst.msk [vmem:[#allocation4 + $0x478] sm:$0xff] %vm513_vm9, %v3774_v47  ;;  %v3772_v56 = vpop.permute.xlu1 %3771 }
 0x3a3   : > { %v3789_v40 = vsel %vm1735_vm6, %v16655_v16, %v3772_v56  ;;  %v3790_v36 = vsel %vm1735_vm6, %v3772_v56, %v3774_v47 }
 0x3a4   : > { %4517 = vmatprep.subr.bf16.mxu0 %v3790_v36 }
 0x3a5   : > { %v3880_v44 = vpop.permute.xlu0 %3879  ;;  %4518 = vmatpush1.bf16.msra.mxu0 %v3789_v40  ;;  %v4085_v39 = vld [vmem:[#allocation4 + $0x430] sm:$0xff] }
 0x3a6   : > { %3941 = vst.msk [vmem:[#allocation4 + $0x4c0] sm:$0xff] %vm513_vm9, %v3880_v44  ;;  %v3878_v59 = vpop.permute.xlu1 %3877 }
 0x3a7   : > { %v3905_v34 = vsel %vm1918_vm7, %v16677_v9, %v3878_v59  ;;  %v3906_v1 = vsel %vm1918_vm7, %v3878_v59, %v3880_v44 }
 0x3a8   : > { %4520 = vmatmul.mubr.bf16.vlgmr.msra.gmra.mrb[32].mxu0 %v16375_v54  ;;  %4540 = vmatprep.subr.bf16.mxu0 %v3906_v1 }
 0x3a9   : > { %v3898_v55 = vpop.permute.xlu0 %3897  ;;  %4541 = vmatpush1.bf16.msra.mxu0 %v3905_v34  ;;  %4529 = vmatprep.mubr.bf16.mxu0 %v16393_v33  ;;  %v4094_v22 = vld [vmem:[#allocation4 + $0x478] sm:$0xff] }
 0x3aa   : > { %3950 = vst.msk [vmem:[#allocation4 + $0x508] sm:$0xff] %vm513_vm9, %v3898_v55  ;;  %v3896_v16 = vpop.permute.xlu1 %3895 }
 0x3ab   : > { %v3913_v6 = vsel %vm1918_vm7, %v16685_v29, %v3896_v16  ;;  %v3914_v62 = vsel %vm1918_vm7, %v3896_v16, %v3898_v55 }
 0x3ac   : > { %4542 = vmatprep.subr.bf16.mxu0 %v3914_v62 }
 0x3ad   : > { %v2962_v5 = vpop.permute.xlu0 %2961  ;;  %4543 = vmatpush1.bf16.msra.mxu0 %v3913_v6  ;;  %v4103_v7 = vld [vmem:[#allocation4 + $0x4c0] sm:$0xff] }
 0x3ae   : > { %v2980_v19 = vsel %vm468_vm0, %v16613_v2, %v2962_v5  ;;  %v2942_v42 = vpop.permute.xlu1 %2941  ;;  %13836 = vmatprep.subr.bf16.mxu0 %v4103_v7 }
 0x3af   : > { %3016 = vst.msk [vmem:[#allocation4 + $0x88] sm:$0xff] %vm513_vm9, %v2980_v19  ;;  %v2971_v9 = vsel %vm468_vm0, %v16380_v26, %v2942_v42 }
 0x3b0   : > { %3007 = vst.msk [vmem:[#allocation4 + $0x40] sm:$0xff] %vm513_vm9, %v2971_v9  ;;  %4530 = vmatmul.mubr.bf16.gmra.mrb[36].mxu0 %v16421_v0 }
 0x3b1   : > { %v3096_v60 = vpop.permute.xlu0 %3095  ;;  %4572 = vmatprep.mubr.bf16.mxu0 %v16447_v25  ;;  %v4112_v4 = vld [vmem:[#allocation4 + $0x508] sm:$0xff] }
 0x3b2   : > { %v3114_v12 = vsel %vm664_vm1, %v16627_v50, %v3096_v60  ;;  %v3076_v15 = vpop.permute.xlu1 %3075  ;;  %v4040_v50 = vld [vmem:[#allocation4 + $0x2c8] sm:$0xff] }
 0x3b3   : > { %3150 = vst.msk [vmem:[#allocation4 + $0x118] sm:$0xff] %vm513_vm9, %v3114_v12  ;;  %v3105_v2 = vsel %vm664_vm1, %v16580_v32, %v3076_v15 }
 0x3b4   : > { %3141 = vst.msk [vmem:[#allocation4 + $0xd0] sm:$0xff] %vm513_vm9, %v3105_v2 }
 0x3b5   : > { %v3230_v21 = vpop.permute.xlu0 %3229 }
 0x3b6   : > { %v3248_v26 = vsel %vm859_vm2, %v16647_v37, %v3230_v21  ;;  %v3210_v29 = vpop.permute.xlu1 %3209  ;;  %v3968_v53 = vld [vmem:[#allocation4 + $0x88] sm:$0xff] }
 0x3b7   : > { %3284 = vst.msk [vmem:[#allocation4 + $0x1a8] sm:$0xff] %vm513_vm9, %v3248_v26  ;;  %v3239_v28 = vsel %vm859_vm2, %v16607_v10, %v3210_v29  ;;  %v3959_v48 = vld [vmem:[#allocation4 + $0x40] sm:$0xff] }
 0x3b8   : > { %3275 = vst.msk [vmem:[#allocation4 + $0x160] sm:$0xff] %vm513_vm9, %v3239_v28  ;;  %13527 = vmatpush3.bf16.msra.mxu1 %v3959_v48  ;;  %13390 = vmatmul.mubr.msk.bf16.vlgmr.msra.gmra.mrb[32].mxu0 %vm2183_vm8, %v16462_v61 }
 0x3b9   : > { %13528 = vmatprep.subr.bf16.mxu1 %v4040_v50  ;;  %v3364_v32 = vpop.permute.xlu0 %3363  ;;  %13837 = vmatpush3.bf16.msra.mxu0 %v4103_v7 }
 0x3ba   : > { %v3382_v37 = vsel %vm1054_vm3, %v16670_v8, %v3364_v32  ;;  %v3344_v20 = vpop.permute.xlu1 %3343  ;;  %13838 = vmatprep.subr.bf16.mxu0 %v4112_v4  ;;  %4582 = vmatprep.mubr.bf16.mxu0 %v16447_v25  ;;  %v3986_v25 = vld [vmem:[#allocation4 + $0x118] sm:$0xff] }
 0x3bb   : > { %3418 = vst.msk [vmem:[#allocation4 + $0x238] sm:$0xff] %vm513_vm9, %v3382_v37  ;;  %v3373_v10 = vsel %vm1054_vm3, %v16663_v63, %v3344_v20  ;;  %v3977_v23 = vld [vmem:[#allocation4 + $0xd0] sm:$0xff]  ;;  %v4067_v63 = vld [vmem:[#allocation4 + $0x3a0] sm:$0xff] }
 0x3bc   : > { %3409 = vst.msk [vmem:[#allocation4 + $0x1f0] sm:$0xff] %vm513_vm9, %v3373_v10  ;;  %13529 = vmatpush3.bf16.msra.mxu1 %v3968_v53  ;;  %v21422_v53 = vld [vmem:[#allocation12_spill] sm:$0xff] }
 0x3bd   : > { %13530 = vmatprep.subr.bf16.mxu1 %v4049_v17  ;;  %13839 = vmatpush3.bf16.msra.mxu0 %v4112_v4  ;;  %v4742_v17 = vrot.slane %v16784_v58, %v21422_v53 }
 0x3be   : > { %v4004_v45 = vld [vmem:[#allocation4 + $0x1a8] sm:$0xff] }
 0x3bf   : > { %v3995_v8 = vld [vmem:[#allocation4 + $0x160] sm:$0xff] }
 0x3c0   : > { %13531 = vmatpush3.bf16.msra.mxu1 %v3977_v23  ;;  %13391 = vmatmul.mubr.msk.bf16.gmra.mrb[36].mxu0 %vm2183_vm8, %v16502_v14 }
 0x3c1   : > { %13532 = vmatprep.subr.bf16.mxu1 %v4058_v24  ;;  %13840 = vmatprep.mubr.msk.bf16.mxu0 %vm2183_vm8, %v16462_v61 }
 0x3c2   : > { %v4022_v61 = vld [vmem:[#allocation4 + $0x238] sm:$0xff] }
 0x3c3   : > { %v4013_v52 = vld [vmem:[#allocation4 + $0x1f0] sm:$0xff] }
 0x3c4   : > { %13533 = vmatpush3.bf16.msra.mxu1 %v3986_v25 }
 0x3c5   : > { %13534 = vmatprep.subr.bf16.mxu1 %v4067_v63  ;;  %v21423_v63 = vld [vmem:[#allocation13_spill] sm:$0xff] }
 0x3c8   : > { %13535 = vmatpush3.bf16.msra.mxu1 %v3995_v8  ;;  %13841 = vmatmul.mubr.msk.bf16.vlgmr.msra.gmra.mrb[40].mxu0 %vm2183_vm8, %v16502_v14  ;;  %v4746_v8 = vrot.slane %v16784_v58, %v21423_v63 }
 0x3c9   : > { %13536 = vmatprep.subr.bf16.mxu1 %v4076_v30 }
 0x3ca   : > { %v16779_v11 = vpop.permute.xlu1 %4115  ;;  %v16787_v31 = vpop.permute.xlu0 %4120 }
 0x3cc   : > { %13537 = vmatpush3.bf16.msra.mxu1 %v4004_v45 }
 0x3cd   : > { %13538 = vmatprep.subr.bf16.mxu1 %v4085_v39 }
 0x3ce   : > { %v16796_v40 = vpop.permute.xlu1 %4125  ;;  %v16799_v16 = vpop.permute.xlu0 %4130 }
 0x3d0   : > { %13539 = vmatpush3.bf16.msra.mxu1 %v4013_v52 }
 0x3d1   : > { %13540 = vmatprep.subr.bf16.mxu1 %v4094_v22 }
 0x3d4   : > { %13541 = vmatpush3.bf16.msra.mxu1 %v4022_v61 }
 0x3d7   : > { %4626 = vmatmul.mubr.bf16.vlgmr.msra.gmra.mrb[36].mxu1 %v16375_v54 }
 0x3d8   : > { %4633 = vmatprep.mubr.bf16.mxu1 %v16393_v33  ;;  %v4734_v33 = vrot.slane %v16784_v58, %v15686_v43 }
 0x3df   : > { %4634 = vmatmul.mubr.bf16.gmra.mrb[40].mxu1 %v16421_v0 }
 0x413   : > { %v4256_v14 = vpop.f32.mrb[20].mxu1 }
 0x414   : > { %v14067_v41 = vadd.f32 %v4256_v14, %v16779_v11  ;;  %v4258_v51 = vpop.f32.mrb[21].mxu1 }
 0x415   : > { %v14068_v46 = vadd.f32 %v4258_v51, %v16779_v11  ;;  %v4260_v54 = vpop.f32.mrb[22].mxu1 }
 0x416   : > { %v4691_v38 = vmax.f32 %v14067_v41, 0.0  ;;  %v14069_v0 = vadd.f32 %v4260_v54, %v16787_v31  ;;  %v4262_v18 = vpop.f32.mrb[23].mxu1 }
 0x417   : > { %v4692_v35 = vmax.f32 %v14068_v46, 0.0  ;;  %v14070_v13 = vadd.f32 %v4262_v18, %v16787_v31 }
 0x418   : > { %v4700_v57 = vmax.f32 %v14069_v0, 0.0  ;;  %v4776_v47 = vmul.f32 %v4734_v33, %v4691_v38 }
 0x419   : > { %v4701_v3 = vmax.f32 %v14070_v13, 0.0  ;;  %v4777_v36 = vmul.f32 %v4738_v27, %v4692_v35 }
 0x41a   : > { %v4785_v56 = vmul.f32 %v4734_v33, %v4700_v57 }
 0x41b   : > { %v4786_v44 = vmul.f32 %v4738_v27, %v4701_v3  ;;  %v4266_v59 = vpop.f32.mrb[24].mxu1 }
 0x41c   : > { %v4812_v34 = vpack.c.bf16 %v4785_v56, %v4776_v47  ;;  %v14071_v1 = vadd.f32 %v4266_v59, %v16796_v40  ;;  %v4268_v55 = vpop.f32.mrb[25].mxu1 }
 0x41d   : > { %v16801_v6 = vpack.c.bf16 %v4786_v44, %v4777_v36  ;;  %v14072_v62 = vadd.f32 %v4268_v55, %v16796_v40  ;;  %v4270_v5 = vpop.f32.mrb[26].mxu1 }
 0x41e   : > { %5416 = vst [vmem:[#allocation4 + $0x240] sm:$0xff] %v4812_v34  ;;  %v4709_v7 = vmax.f32 %v14071_v1, 0.0  ;;  %v14073_v19 = vadd.f32 %v4270_v5, %v16799_v16  ;;  %v4272_v42 = vpop.f32.mrb[27].mxu1  ;;  %5038 = vrot.lane.b32.xlu0 %v4812_v34, %s14737_s24  ;;  %4904 = vrot.lane.b32.xlu1 %v4812_v34, %s14736_s23 }
 0x41f   : > { %4831 = vst [vmem:[#allocation3 + $0x10] sm:$0xff] %v16801_v6  ;;  %v4710_v9 = vmax.f32 %v14072_v62, 0.0  ;;  %v14074_v60 = vadd.f32 %v4272_v42, %v16799_v16  ;;  %v21424_v42 = vld [vmem:[#allocation14_spill] sm:$0xff] }
 0x420   : > { %v4718_v12 = vmax.f32 %v14073_v19, 0.0  ;;  %v4794_v2 = vmul.f32 %v4734_v33, %v4709_v7 }
 0x421   : > { %v4719_v15 = vmax.f32 %v14074_v60, 0.0  ;;  %v4795_v26 = vmul.f32 %v4738_v27, %v4710_v9  ;;  %v4750_v9 = vrot.slane %v16784_v58, %v21424_v42 }
 0x422   : > { %v4803_v21 = vmul.f32 %v4734_v33, %v4718_v12  ;;  %5306 = vrot.lane.b32.xlu0 %v4812_v34, %s14739_s26  ;;  %5172 = vrot.lane.b32.xlu1 %v4812_v34, %s14738_s25 }
 0x423   : > { %v4804_v29 = vmul.f32 %v4738_v27, %v4719_v15 }
 0x424   : > { %v16811_v28 = vpack.c.bf16 %v4803_v21, %v4794_v2  ;;  %v21425_v2 = vld [vmem:[#allocation15_spill] sm:$0xff] }
 0x425   : > { %v16813_v48 = vpack.c.bf16 %v4804_v29, %v4795_v26  ;;  %v4754_v21 = vrot.slane %v16784_v58, %v21425_v2 }
 0x426   : > { %5425 = vst [vmem:[#allocation4 + $0x288] sm:$0xff] %v16811_v28  ;;  %4906 = vrot.lane.b32.xlu0 %v16801_v6, %s14736_s23  ;;  %5470 = vrot.lane.b32.xlu1 %v4812_v34, %s14740_s27 }
 0x427   : > { %4840 = vst [vmem:[#allocation3 + $0x60] sm:$0xff] %v16813_v48 }
 0x42a   : > { %5174 = vrot.lane.b32.xlu0 %v16801_v6, %s14738_s25  ;;  %5594 = vrot.lane.b32.xlu1 %v4812_v34, %s14741_s28 }
 0x42e   : > { %4924 = vrot.lane.b32.xlu0 %v16811_v28, %s14736_s23  ;;  %5718 = vrot.lane.b32.xlu1 %v4812_v34, %s14742_s11 }
 0x42f   : > { %v4362_v50 = vpop.f32.mrb[24].mxu0 }
 0x430   : > { %v14075_v32 = vadd.f32 %v4362_v50, %v16779_v11  ;;  %v4364_v4 = vpop.f32.mrb[25].mxu0 }
 0x431   : > { %v14076_v37 = vadd.f32 %v4364_v4, %v16779_v11  ;;  %v4366_v20 = vpop.f32.mrb[26].mxu0 }
 0x432   : > { %v4693_v10 = vmax.f32 %v14075_v32, 0.0  ;;  %v14077_v23 = vadd.f32 %v4366_v20, %v16787_v31  ;;  %v4368_v24 = vpop.f32.mrb[27].mxu0  ;;  %5192 = vrot.lane.b32.xlu0 %v16811_v28, %s14738_s25  ;;  %5842 = vrot.lane.b32.xlu1 %v4812_v34, %s14743_s18 }
 0x433   : > { %v4694_v25 = vmax.f32 %v14076_v37, 0.0  ;;  %v14078_v30 = vadd.f32 %v4368_v24, %v16787_v31 }
 0x434   : > { %v4702_v45 = vmax.f32 %v14077_v23, 0.0  ;;  %v4778_v52 = vmul.f32 %v4742_v17, %v4693_v10 }
 0x435   : > { %v4703_v39 = vmax.f32 %v14078_v30, 0.0  ;;  %v4779_v61 = vmul.f32 %v4746_v8, %v4694_v25 }
 0x436   : > { %v4787_v22 = vmul.f32 %v4742_v17, %v4702_v45  ;;  %5488 = vrot.lane.b32.xlu0 %v16811_v28, %s14740_s27  ;;  %5040 = vrot.lane.b32.xlu1 %v16801_v6, %s14737_s24 }
 0x437   : > { %v4788_v14 = vmul.f32 %v4746_v8, %v4703_v39  ;;  %v4372_v41 = vpop.f32.mrb[28].mxu0 }
 0x438   : > { %v16841_v51 = vpack.c.bf16 %v4787_v22, %v4778_v52  ;;  %v14079_v46 = vadd.f32 %v4372_v41, %v16796_v40  ;;  %v4374_v54 = vpop.f32.mrb[29].mxu0 }
 0x439   : > { %v16844_v38 = vpack.c.bf16 %v4788_v14, %v4779_v61  ;;  %v14080_v33 = vadd.f32 %v4374_v54, %v16796_v40  ;;  %v4376_v0 = vpop.f32.mrb[30].mxu0 }
 0x43a   : > { %5418 = vst [vmem:[#allocation4 + $0x250] sm:$0xff] %v16841_v51  ;;  %v4711_v18 = vmax.f32 %v14079_v46, 0.0  ;;  %v14081_v35 = vadd.f32 %v4376_v0, %v16799_v16  ;;  %v4378_v27 = vpop.f32.mrb[31].mxu0  ;;  %5612 = vrot.lane.b32.xlu0 %v16811_v28, %s14741_s28  ;;  %5308 = vrot.lane.b32.xlu1 %v16801_v6, %s14739_s26  ;;  %v16957_v0 = vpop.permute.xlu0 %14453 }
 0x43b   : > { %4833 = vst [vmem:[#allocation3 + $0x20] sm:$0xff] %v16844_v38  ;;  %v4712_v13 = vmax.f32 %v14080_v33, 0.0  ;;  %v14082_v57 = vadd.f32 %v4378_v27, %v16799_v16 }
 0x43c   : > { %v4720_v3 = vmax.f32 %v14081_v35, 0.0  ;;  %v4796_v56 = vmul.f32 %v4742_v17, %v4711_v18  ;;  %v16959_v18 = vpop.permute.xlu1 %14448 }
 0x43d   : > { %v4721_v47 = vmax.f32 %v14082_v57, 0.0  ;;  %v4797_v44 = vmul.f32 %v4746_v8, %v4712_v13 }
 0x43e   : > { %v4805_v36 = vmul.f32 %v4742_v17, %v4720_v3  ;;  %5736 = vrot.lane.b32.xlu0 %v16811_v28, %s14742_s11  ;;  %5472 = vrot.lane.b32.xlu1 %v16801_v6, %s14740_s27  ;;  %v16976_v35 = vpop.permute.xlu0 %14463 }
 0x43f   : > { %v4806_v59 = vmul.f32 %v4746_v8, %v4721_v47 }
 0x440   : > { %v16859_v34 = vpack.c.bf16 %v4805_v36, %v4796_v56  ;;  %v16978_v27 = vpop.permute.xlu1 %14458 }
 0x441   : > { %v16861_v1 = vpack.c.bf16 %v4806_v59, %v4797_v44  ;;  %v21426_v44 = vld [vmem:[#allocation16_spill] sm:$0xff] }
 0x442   : > { %5427 = vst [vmem:[#allocation4 + $0x298] sm:$0xff] %v16859_v34  ;;  %5860 = vrot.lane.b32.xlu0 %v16811_v28, %s14743_s18  ;;  %5596 = vrot.lane.b32.xlu1 %v16801_v6, %s14741_s28  ;;  %v4758_v59 = vrot.slane %v16784_v58, %v21426_v44 }
 0x443   : > { %4842 = vst [vmem:[#allocation3 + $0x70] sm:$0xff] %v16861_v1 }
 0x446   : > { %5060 = vrot.lane.b32.xlu0 %v16813_v48, %s14737_s24  ;;  %5720 = vrot.lane.b32.xlu1 %v16801_v6, %s14742_s11 }
 0x44a   : > { %5328 = vrot.lane.b32.xlu0 %v16813_v48, %s14739_s26  ;;  %5844 = vrot.lane.b32.xlu1 %v16801_v6, %s14743_s18 }
 0x44e   : > { %5490 = vrot.lane.b32.xlu0 %v16813_v48, %s14740_s27  ;;  %5058 = vrot.lane.b32.xlu1 %v16811_v28, %s14737_s24 }
 0x452   : > { %5614 = vrot.lane.b32.xlu0 %v16813_v48, %s14741_s28  ;;  %5326 = vrot.lane.b32.xlu1 %v16811_v28, %s14739_s26 }
 0x456   : > { %5738 = vrot.lane.b32.xlu0 %v16813_v48, %s14742_s11  ;;  %4926 = vrot.lane.b32.xlu1 %v16813_v48, %s14736_s23 }
 0x45a   : > { %5862 = vrot.lane.b32.xlu0 %v16813_v48, %s14743_s18  ;;  %5194 = vrot.lane.b32.xlu1 %v16813_v48, %s14738_s25 }
 0x45e   : > { %5474 = vrot.lane.b32.xlu0 %v16841_v51, %s14740_s27  ;;  %4908 = vrot.lane.b32.xlu1 %v16841_v51, %s14736_s23 }
 0x462   : > { %5598 = vrot.lane.b32.xlu0 %v16841_v51, %s14741_s28  ;;  %5042 = vrot.lane.b32.xlu1 %v16841_v51, %s14737_s24 }
 0x463   : > { %v4468_v55 = vpop.f32.mrb[28].mxu1 }
 0x464   : > { %v14083_v6 = vadd.f32 %v4468_v55, %v16779_v11  ;;  %v4470_v62 = vpop.f32.mrb[29].mxu1 }
 0x465   : > { %v14084_v5 = vadd.f32 %v4470_v62, %v16779_v11  ;;  %v4472_v7 = vpop.f32.mrb[30].mxu1 }
 0x466   : > { %v4695_v19 = vmax.f32 %v14083_v6, 0.0  ;;  %v14085_v60 = vadd.f32 %v4472_v7, %v16787_v31  ;;  %v4474_v12 = vpop.f32.mrb[31].mxu1  ;;  %5722 = vrot.lane.b32.xlu0 %v16841_v51, %s14742_s11  ;;  %5176 = vrot.lane.b32.xlu1 %v16841_v51, %s14738_s25 }
 0x467   : > { %v4696_v15 = vmax.f32 %v14084_v5, 0.0  ;;  %v14086_v26 = vadd.f32 %v4474_v12, %v16787_v31  ;;  %v21427_v5 = vld [vmem:[#allocation17_spill] sm:$0xff] }
 0x468   : > { %v4704_v29 = vmax.f32 %v14085_v60, 0.0  ;;  %v4780_v48 = vmul.f32 %v4750_v9, %v4695_v19  ;;  %v4762_v7 = vrot.slane %v16784_v58, %v21427_v5 }
 0x469   : > { %v4705_v28 = vmax.f32 %v14086_v26, 0.0  ;;  %v4781_v32 = vmul.f32 %v4754_v21, %v4696_v15 }
 0x46a   : > { %v4789_v50 = vmul.f32 %v4750_v9, %v4704_v29  ;;  %5846 = vrot.lane.b32.xlu0 %v16841_v51, %s14743_s18  ;;  %5310 = vrot.lane.b32.xlu1 %v16841_v51, %s14739_s26 }
 0x46b   : > { %v4790_v4 = vmul.f32 %v4754_v21, %v4705_v28  ;;  %v4478_v37 = vpop.f32.mrb[32].mxu1 }
 0x46c   : > { %v16917_v20 = vpack.c.bf16 %v4789_v50, %v4780_v48  ;;  %v14087_v10 = vadd.f32 %v4478_v37, %v16796_v40  ;;  %v4480_v17 = vpop.f32.mrb[33].mxu1 }
 0x46d   : > { %v16920_v23 = vpack.c.bf16 %v4790_v4, %v4781_v32  ;;  %v14088_v24 = vadd.f32 %v4480_v17, %v16796_v40  ;;  %v4482_v25 = vpop.f32.mrb[34].mxu1 }
 0x46e   : > { %5420 = vst [vmem:[#allocation4 + $0x260] sm:$0xff] %v16917_v20  ;;  %v4713_v8 = vmax.f32 %v14087_v10, 0.0  ;;  %v14089_v30 = vadd.f32 %v4482_v25, %v16799_v16  ;;  %v4484_v45 = vpop.f32.mrb[35].mxu1  ;;  %4910 = vrot.lane.b32.xlu0 %v16844_v38, %s14736_s23  ;;  %5476 = vrot.lane.b32.xlu1 %v16844_v38, %s14740_s27 }
 0x46f   : > { %4835 = vst [vmem:[#allocation3 + $0x30] sm:$0xff] %v16920_v23  ;;  %v4714_v39 = vmax.f32 %v14088_v24, 0.0  ;;  %v14090_v52 = vadd.f32 %v4484_v45, %v16799_v16 }
 0x470   : > { %v4722_v22 = vmax.f32 %v14089_v30, 0.0  ;;  %v4798_v14 = vmul.f32 %v4750_v9, %v4713_v8 }
 0x471   : > { %v4723_v61 = vmax.f32 %v14090_v52, 0.0  ;;  %v4799_v51 = vmul.f32 %v4754_v21, %v4714_v39 }
 0x472   : > { %v4807_v41 = vmul.f32 %v4750_v9, %v4722_v22  ;;  %5044 = vrot.lane.b32.xlu0 %v16844_v38, %s14737_s24  ;;  %5600 = vrot.lane.b32.xlu1 %v16844_v38, %s14741_s28  ;;  %v14450_v22 = vunpack.i.l.bf16 %v16959_v18 }
 0x473   : > { %v4808_v46 = vmul.f32 %v4754_v21, %v4723_v61 }
 0x474   : > { %v16935_v54 = vpack.c.bf16 %v4807_v41, %v4798_v14 }
 0x475   : > { %v16937_v33 = vpack.c.bf16 %v4808_v46, %v4799_v51 }
 0x476   : > { %5429 = vst [vmem:[#allocation4 + $0x2a8] sm:$0xff] %v16935_v54  ;;  %5178 = vrot.lane.b32.xlu0 %v16844_v38, %s14738_s25  ;;  %5724 = vrot.lane.b32.xlu1 %v16844_v38, %s14742_s11 }
 0x477   : > { %4844 = vst [vmem:[#allocation3 + $0x80] sm:$0xff] %v16937_v33 }
 0x47a   : > { %5312 = vrot.lane.b32.xlu0 %v16844_v38, %s14739_s26  ;;  %5848 = vrot.lane.b32.xlu1 %v16844_v38, %s14743_s18  ;;  %v16964_v38 = vld [vmem:[%s21372_s1 + $0x64] ss:$12 sps:$4 sm:$0xff]  }
 0x47b   : > { %6180 = vmatprep.mubr.bf16.mxu0 %v16964_v38  ;;  %6286 = vmatprep.mubr.bf16.mxu1 %v16964_v38 }
 0x47e   : > { %4928 = vrot.lane.b32.xlu0 %v16859_v34, %s14736_s23  ;;  %5492 = vrot.lane.b32.xlu1 %v16859_v34, %s14740_s27 }
 0x482   : > { %5062 = vrot.lane.b32.xlu0 %v16859_v34, %s14737_s24  ;;  %5616 = vrot.lane.b32.xlu1 %v16859_v34, %s14741_s28 }
 0x486   : > { %5196 = vrot.lane.b32.xlu0 %v16859_v34, %s14738_s25  ;;  %5740 = vrot.lane.b32.xlu1 %v16859_v34, %s14742_s11 }
 0x48a   : > { %5332 = vrot.lane.b32.xlu0 %v16861_v1, %s14739_s26  ;;  %5330 = vrot.lane.b32.xlu1 %v16859_v34, %s14739_s26 }
 0x48b   : > { %v4574_v13 = vpop.f32.mrb[32].mxu0 }
 0x48c   : > { %v14091_v57 = vadd.f32 %v4574_v13, %v16779_v11  ;;  %v4576_v3 = vpop.f32.mrb[33].mxu0 }
 0x48d   : > { %v14092_v47 = vadd.f32 %v4576_v3, %v16779_v11  ;;  %v4578_v56 = vpop.f32.mrb[34].mxu0 }
 0x48e   : > { %v4697_v36 = vmax.f32 %v14091_v57, 0.0  ;;  %v14093_v55 = vadd.f32 %v4578_v56, %v16787_v31  ;;  %v4580_v6 = vpop.f32.mrb[35].mxu0  ;;  %5478 = vrot.lane.b32.xlu0 %v16917_v20, %s14740_s27  ;;  %5864 = vrot.lane.b32.xlu1 %v16859_v34, %s14743_s18 }
 0x48f   : > { %v4698_v62 = vmax.f32 %v14092_v47, 0.0  ;;  %v14094_v19 = vadd.f32 %v4580_v6, %v16787_v31 }
 0x490   : > { %v4706_v9 = vmax.f32 %v14093_v55, 0.0  ;;  %v16992_v60 = vpop.permute.xlu0 %5038  ;;  %v4905_v12 = vpop.permute.xlu1 %4904  ;;  %v4782_v21 = vmul.f32 %v4758_v59, %v4697_v36 }
 0x491   : > { %v4707_v15 = vmax.f32 %v14094_v19, 0.0  ;;  %v4783_v34 = vmul.f32 %v4762_v7, %v4698_v62  ;;  %v4942_v3 = vsel %vm468_vm0, %v14450_v22, %v4905_v12 }
 0x492   : > { %v4791_v26 = vmul.f32 %v4758_v59, %v4706_v9  ;;  %5602 = vrot.lane.b32.xlu0 %v16917_v20, %s14741_s28  ;;  %4930 = vrot.lane.b32.xlu1 %v16861_v1, %s14736_s23 }
 0x493   : > { %v4792_v29 = vmul.f32 %v4762_v7, %v4707_v15  ;;  %v4584_v28 = vpop.f32.mrb[36].mxu0 }
 0x494   : > { %v16998_v48 = vpack.c.bf16 %v4791_v26, %v4782_v21  ;;  %v14095_v58 = vadd.f32 %v4584_v28, %v16796_v40  ;;  %v4586_v50 = vpop.f32.mrb[37].mxu0  ;;  %v17001_v32 = vpop.permute.xlu0 %5306 }
 0x495   : > { %v17003_v4 = vpack.c.bf16 %v4792_v29, %v4783_v34  ;;  %v14096_v37 = vadd.f32 %v4586_v50, %v16796_v40  ;;  %v4588_v10 = vpop.f32.mrb[38].mxu0  ;;  %v17006_v17 = vpop.permute.xlu1 %5172 }
 0x496   : > { %5422 = vst [vmem:[#allocation4 + $0x270] sm:$0xff] %v16998_v48  ;;  %v4715_v24 = vmax.f32 %v14095_v58, 0.0  ;;  %v14097_v25 = vadd.f32 %v4588_v10, %v16799_v16  ;;  %v4590_v8 = vpop.f32.mrb[39].mxu0  ;;  %5726 = vrot.lane.b32.xlu0 %v16917_v20, %s14742_s11  ;;  %5064 = vrot.lane.b32.xlu1 %v16861_v1, %s14737_s24 }
 0x497   : > { %4837 = vst [vmem:[#allocation3 + $0x40] sm:$0xff] %v17003_v4  ;;  %v4716_v30 = vmax.f32 %v14096_v37, 0.0  ;;  %v14098_v45 = vadd.f32 %v4590_v8, %v16799_v16 }
 0x498   : > { %v4724_v39 = vmax.f32 %v14097_v25, 0.0  ;;  %v17016_v52 = vpop.permute.xlu0 %4906  ;;  %v4800_v51 = vmul.f32 %v4758_v59, %v4715_v24 }
 0x499   : > { %v4725_v61 = vmax.f32 %v14098_v45, 0.0  ;;  %v4943_v14 = vsel %vm468_vm0, %v4905_v12, %v17016_v52  ;;  %v17021_v41 = vpop.permute.xlu1 %5470  ;;  %v4801_v13 = vmul.f32 %v4762_v7, %v4716_v30 }
 0x49a   : > { %v4809_v46 = vmul.f32 %v4758_v59, %v4724_v39  ;;  %5850 = vrot.lane.b32.xlu0 %v16917_v20, %s14743_s18  ;;  %5198 = vrot.lane.b32.xlu1 %v16861_v1, %s14738_s25 }
 0x49b   : > { %v4810_v57 = vmul.f32 %v4762_v7, %v4725_v61  ;;  %v13842_v47 = vpop.f32.mrb[40].mxu0  ;;  %6148 = vmatprep.subr.bf16.mxu0 %v4943_v14 }
 0x49c   : > { %v17028_v56 = vpack.c.bf16 %v4809_v46, %v4800_v51  ;;  %v17030_v36 = vpop.permute.xlu0 %5174  ;;  %v4676_v55 = vpop.f32.mrb[41].mxu0  ;;  %6149 = vmatpush1.bf16.msra.mxu0 %v4942_v3 }
 0x49d   : > { %v17032_v6 = vpack.c.bf16 %v4810_v57, %v4801_v13  ;;  %v17034_v59 = vpop.permute.xlu1 %5594  ;;  %v13843_v62 = vpop.f32.mrb[42].mxu0 }
 0x49e   : > { %5431 = vst [vmem:[#allocation4 + $0x2b8] sm:$0xff] %v17028_v56  ;;  %4914 = vrot.lane.b32.xlu0 %v16920_v23, %s14736_s23  ;;  %5494 = vrot.lane.b32.xlu1 %v16861_v1, %s14740_s27  ;;  %v4679_v7 = vpop.f32.mrb[43].mxu0 }
 0x49f   : > { %4846 = vst [vmem:[#allocation3 + $0x90] sm:$0xff] %v17032_v6 }
 0x4a0   : > { %v17042_v19 = vpop.permute.xlu0 %4924 }
 0x4a1   : > { %v17044_v9 = vpop.permute.xlu1 %5718 }
 0x4a2   : > { %5048 = vrot.lane.b32.xlu0 %v16920_v23, %s14737_s24  ;;  %5618 = vrot.lane.b32.xlu1 %v16861_v1, %s14741_s28 }
 0x4a4   : > { %v17050_v12 = vpop.permute.xlu0 %5192 }
 0x4a5   : > { %v17052_v15 = vpop.permute.xlu1 %5842 }
 0x4a6   : > { %5182 = vrot.lane.b32.xlu0 %v16920_v23, %s14738_s25  ;;  %5742 = vrot.lane.b32.xlu1 %v16861_v1, %s14742_s11 }
 0x4a8   : > { %v17058_v21 = vpop.permute.xlu0 %5488 }
 0x4a9   : > { %v17060_v26 = vpop.permute.xlu1 %5040 }
 0x4aa   : > { %v13542_v34 = vpop.f32.mrb[36].mxu1  ;;  %5316 = vrot.lane.b32.xlu0 %v16920_v23, %s14739_s26  ;;  %5866 = vrot.lane.b32.xlu1 %v16861_v1, %s14743_s18 }
 0x4ab   : > { %v13543_v29 = vpop.f32.mrb[37].mxu1 }
 0x4ac   : > { %v13544_v28 = vadd.f32 %v13543_v29, %v13542_v34  ;;  %v13545_v58 = vpop.f32.mrb[38].mxu1  ;;  %v17066_v50 = vpop.permute.xlu0 %5612 }
 0x4ad   : > { %v13546_v37 = vpop.f32.mrb[39].mxu1  ;;  %v17068_v10 = vpop.permute.xlu1 %5308 }
 0x4ae   : > { %v13547_v24 = vadd.f32 %v13546_v37, %v13545_v58  ;;  %v4628_v25 = vadd.f32 %v13544_v28, %v16779_v11  ;;  %5496 = vrot.lane.b32.xlu0 %v16935_v54, %s14740_s27  ;;  %4912 = vrot.lane.b32.xlu1 %v16917_v20, %s14736_s23  ;;  %v13394_v11 = vld [vmem:[%s21378_s7 + $0x8] ss:$0 sm:$0xff] }
 0x4b0   : > { %v4677_v8 = vadd.f32 %v4676_v55, %v4628_v25  ;;  %v4631_v1 = vadd.f32 %v13547_v24, %v16787_v31  ;;  %v17076_v30 = vpop.permute.xlu0 %5736 }
 0x4b1   : > { %v17078_v45 = vpop.permute.xlu1 %5472 }
 0x4b2   : > { %v4699_v39 = vmax.f32 %v4677_v8, 0.0  ;;  %v4680_v22 = vadd.f32 %v4679_v7, %v4631_v1  ;;  %v13548_v61 = vpop.f32.mrb[40].mxu1  ;;  %5620 = vrot.lane.b32.xlu0 %v16935_v54, %s14741_s28  ;;  %5046 = vrot.lane.b32.xlu1 %v16917_v20, %s14737_s24 }
 0x4b3   : > { %v13549_v14 = vpop.f32.mrb[41].mxu1 }
 0x4b4   : > { %v4708_v51 = vmax.f32 %v4680_v22, 0.0  ;;  %v13550_v31 = vadd.f32 %v13549_v14, %v13548_v61  ;;  %v13551_v46 = vpop.f32.mrb[42].mxu1  ;;  %v17087_v13 = vpop.permute.xlu0 %5860  ;;  %v4784_v55 = vmul.f32 %v13394_v11, %v4699_v39 }
 0x4b5   : > { %v13552_v57 = vpop.f32.mrb[43].mxu1  ;;  %v17089_v3 = vpop.permute.xlu1 %5596 }
 0x4b6   : > { %v4793_v7 = vmul.f32 %v13394_v11, %v4708_v51  ;;  %v4636_v34 = vadd.f32 %v13550_v31, %v16796_v40  ;;  %v13553_v29 = vadd.f32 %v13552_v57, %v13551_v46  ;;  %5744 = vrot.lane.b32.xlu0 %v16935_v54, %s14742_s11  ;;  %5180 = vrot.lane.b32.xlu1 %v16917_v20, %s14738_s25  ;;  %v14451_v46 = vunpack.i.h.bf16 %v16959_v18 }
 0x4b7   : > { %v5077_v18 = vsel %vm664_vm1, %v16992_v60, %v17060_v26 }
 0x4b8   : > { %v4820_v28 = vpack.c.bf16 %v4793_v7, %v4784_v55  ;;  %v4685_v58 = vadd.f32 %v13842_v47, %v4636_v34  ;;  %v4639_v37 = vadd.f32 %v13553_v29, %v16799_v16  ;;  %v17097_v24 = vpop.permute.xlu0 %5060  ;;  %v14455_v34 = vunpack.i.l.bf16 %v16957_v0 }
 0x4b9   : > { %v17099_v25 = vpop.permute.xlu1 %5720  ;;  %v4951_v29 = vsel %vm468_vm0, %v14451_v46, %v17042_v19 }
 0x4ba   : > { %4838 = vst.msk [vmem:[#allocation3 + $0x48] sm:$0xff] %vm513_vm9, %v4820_v28  ;;  %v4717_v8 = vmax.f32 %v4685_v58, 0.0  ;;  %v4688_v1 = vadd.f32 %v13843_v62, %v4639_v37  ;;  %5868 = vrot.lane.b32.xlu0 %v16935_v54, %s14743_s18  ;;  %5314 = vrot.lane.b32.xlu1 %v16917_v20, %s14739_s26 }
 0x4bc   : > { %v4726_v40 = vmax.f32 %v4688_v1, 0.0  ;;  %v17106_v39 = vpop.permute.xlu0 %5328  ;;  %v4802_v16 = vmul.f32 %v13394_v11, %v4717_v8  ;;  %v14456_v1 = vunpack.i.h.bf16 %v16957_v0 }
 0x4bd   : > { %v17108_v47 = vpop.permute.xlu1 %5844 }
 0x4be   : > { %v4811_v22 = vmul.f32 %v13394_v11, %v4726_v40  ;;  %4934 = vrot.lane.b32.xlu0 %v16937_v33, %s14736_s23  ;;  %5480 = vrot.lane.b32.xlu1 %v16920_v23, %s14740_s27 }
 0x4c0   : > { %v4829_v62 = vpack.c.bf16 %v4811_v22, %v4802_v16  ;;  %v17114_v61 = vpop.permute.xlu0 %5490 }
 0x4c1   : > { %v5059_v14 = vpop.permute.xlu1 %5058  ;;  %v17116_v51 = vld [vmem:[#allocation3 + $0x48] sm:$0xff] }
 0x4c2   : > { %4847 = vst.msk [vmem:[#allocation3 + $0x98] sm:$0xff] %vm513_vm9, %v4829_v62  ;;  %5068 = vrot.lane.b32.xlu0 %v16937_v33, %s14737_s24  ;;  %5424 = vst.msk [vmem:[#allocation4 + $0x280] sm:$0xff] %vm513_vm9, %v17116_v51  ;;  %4932 = vrot.lane.b32.xlu1 %v16935_v54, %s14736_s23  ;;  %v5086_v37 = vsel %vm664_vm1, %v5059_v14, %v17097_v24  ;;  %v5085_v16 = vsel %vm664_vm1, %v14456_v1, %v5059_v14  ;;  %v14460_v62 = vunpack.i.l.bf16 %v16978_v27 }
 0x4c3   : > { %v14466_v1 = vunpack.i.h.bf16 %v16976_v35 }
 0x4c4   : > { %v17125_v20 = vpop.permute.xlu0 %5614  ;;  %v5210_v14 = vsel %vm859_vm2, %v14460_v62, %v17006_v17 }
 0x4c5   : > { %v17127_v11 = vpop.permute.xlu1 %5326 }
 0x4c6   : > { %5202 = vrot.lane.b32.xlu0 %v16937_v33, %s14738_s25  ;;  %5604 = vrot.lane.b32.xlu1 %v16920_v23, %s14741_s28  ;;  %v5353_v62 = vsel %vm1054_vm3, %v14466_v1, %v17127_v11 }
 0x4c8   : > { %v17133_v31 = vpop.permute.xlu0 %5738 }
 0x4c9   : > { %v17136_v57 = vpop.permute.xlu1 %4926  ;;  %v5415_v55 = vld [vmem:[#allocation3 + $0x98] sm:$0xff] }
 0x4ca   : > { %v4952_v7 = vsel %vm468_vm0, %v17042_v19, %v17136_v57  ;;  %5336 = vrot.lane.b32.xlu0 %v16937_v33, %s14739_s26  ;;  %5433 = vst.msk [vmem:[#allocation4 + $0x2c8] sm:$0xff] %vm513_vm9, %v5415_v55  ;;  %5066 = vrot.lane.b32.xlu1 %v16935_v54, %s14737_s24  ;;  %v5076_v19 = vsel %vm664_vm1, %v14455_v34, %v16992_v60  ;;  %v14461_v55 = vunpack.i.h.bf16 %v16978_v27 }
 0x4cb   : > { %6150 = vmatprep.subr.bf16.mxu0 %v4952_v7  ;;  %v5211_v60 = vsel %vm859_vm2, %v17006_v17, %v17030_v36  ;;  %v14465_v17 = vunpack.i.l.bf16 %v16976_v35 }
 0x4cc   : > { %v17152_v28 = vpop.permute.xlu0 %5862  ;;  %6151 = vmatpush1.bf16.msra.mxu0 %v4951_v29  ;;  %v5219_v34 = vsel %vm859_vm2, %v14461_v55, %v17050_v12  ;;  %v5345_v29 = vsel %vm1054_vm3, %v17001_v32, %v17068_v10 }
 0x4cd   : > { %v17154_v58 = vpop.permute.xlu1 %5194  ;;  %6152 = vmatprep.subr.bf16.mxu0 %v5077_v18 }
 0x4ce   : > { %5482 = vrot.lane.b32.xlu0 %v16998_v48, %s14740_s27  ;;  %5200 = vrot.lane.b32.xlu1 %v16935_v54, %s14738_s25 }
 0x4d0   : > { %v17164_v8 = vpop.permute.xlu0 %5474  ;;  %6153 = vmatpush1.bf16.msra.mxu0 %v5076_v19  ;;  %v5344_v19 = vsel %vm1054_vm3, %v14465_v17, %v17001_v32  ;;  %v6011_v17 = vld [vmem:[#allocation4 + $0x288] sm:$0xff] }
 0x4d1   : > { %v4909_v40 = vpop.permute.xlu1 %4908  ;;  %6154 = vmatprep.subr.bf16.mxu0 %v5086_v37 }
 0x4d2   : > { %5606 = vrot.lane.b32.xlu0 %v16998_v48, %s14741_s28  ;;  %5334 = vrot.lane.b32.xlu1 %v16935_v54, %s14739_s26  ;;  %v5220_v54 = vsel %vm859_vm2, %v17050_v12, %v17154_v58  ;;  %v5354_v12 = vsel %vm1054_vm3, %v17127_v11, %v17106_v39  ;;  %v4944_v32 = vsel %vm468_vm0, %v17016_v52, %v4909_v40  ;;  %v6002_v52 = vld [vmem:[#allocation4 + $0x240] sm:$0xff] }
 0x4d3   : > { %v5408_v11 = vld [vmem:[#allocation3 + $0x60] sm:$0xff] }
 0x4d4   : > { %v17175_v22 = vpop.permute.xlu0 %5598  ;;  %6155 = vmatpush1.bf16.msra.mxu0 %v5085_v16 }
 0x4d5   : > { %v17178_v0 = vpop.permute.xlu1 %5042  ;;  %6156 = vmatprep.subr.bf16.mxu0 %v5211_v60 }
 0x4d6   : > { %4918 = vrot.lane.b32.xlu0 %v17003_v4, %s14736_s23  ;;  %5498 = vrot.lane.b32.xlu1 %v16937_v33, %s14740_s27 }
 0x4d8   : > { %v17189_v46 = vpop.permute.xlu0 %5722  ;;  %6157 = vmatpush1.bf16.msra.mxu0 %v5210_v14  ;;  %v5399_v14 = vld [vmem:[#allocation3 + $0x10] sm:$0xff] }
 0x4d9   : > { %v17192_v7 = vpop.permute.xlu1 %5176  ;;  %6158 = vmatprep.subr.bf16.mxu0 %v5220_v54 }
 0x4da   : > { %5052 = vrot.lane.b32.xlu0 %v17003_v4, %s14737_s24  ;;  %5622 = vrot.lane.b32.xlu1 %v16937_v33, %s14741_s28 }
 0x4dc   : > { %v17204_v18 = vpop.permute.xlu0 %5846  ;;  %6159 = vmatpush1.bf16.msra.mxu0 %v5219_v34  ;;  %v5507_v34 = vsel %vm1369_vm4, %v17078_v45, %v17164_v8 }
 0x4dd   : > { %v17206_v27 = vpop.permute.xlu1 %5310  ;;  %6160 = vmatprep.subr.bf16.mxu0 %v5345_v29 }
 0x4de   : > { %5186 = vrot.lane.b32.xlu0 %v17003_v4, %s14738_s25  ;;  %4916 = vrot.lane.b32.xlu1 %v16998_v48, %s14736_s23 }
 0x4e0   : > { %v17217_v37 = vpop.permute.xlu0 %4910  ;;  %6161 = vmatpush1.bf16.msra.mxu0 %v5344_v19 }
 0x4e1   : > { %v4945_v16 = vsel %vm468_vm0, %v4909_v40, %v17217_v37  ;;  %v17222_v60 = vpop.permute.xlu1 %5476  ;;  %6162 = vmatprep.subr.bf16.mxu0 %v5354_v12  ;;  %v5506_v12 = vsel %vm1369_vm4, %v17021_v41, %v17078_v45 }
 0x4e2   : > { %5500 = vrot.lane.b32.xlu0 %v17028_v56, %s14740_s27  ;;  %6254 = vmatprep.subr.bf16.mxu1 %v4945_v16 }
 0x4e3   : > { %5050 = vrot.lane.b32.xlu1 %v16998_v48, %s14737_s24  ;;  %6255 = vmatpush1.bf16.msra.mxu1 %v4944_v32 }
 0x4e4   : > { %v17232_v35 = vpop.permute.xlu0 %5044  ;;  %6163 = vmatpush1.bf16.msra.mxu0 %v5353_v62  ;;  %v5514_v62 = vsel %vm1369_vm4, %v17058_v21, %v17114_v61  ;;  %v5630_v21 = vsel %vm1552_vm5, %v17034_v59, %v17089_v3  ;;  %v5638_v59 = vsel %vm1552_vm5, %v17066_v50, %v17125_v20  ;;  %v5754_v50 = vsel %vm1735_vm6, %v17044_v9, %v17099_v25 }
 0x4e5   : > { %v17234_v54 = vpop.permute.xlu1 %5600  ;;  %6164 = vmatprep.subr.bf16.mxu0 %v5399_v14  ;;  %v5762_v9 = vsel %vm1735_vm6, %v17076_v30, %v17133_v31 }
 0x4e6   : > { %5624 = vrot.lane.b32.xlu0 %v17028_v56, %s14741_s28 }
 0x4e7   : > { %5184 = vrot.lane.b32.xlu1 %v16998_v48, %s14738_s25 }
 0x4e8   : > { %v17240_v40 = vpop.permute.xlu0 %5178  ;;  %6165 = vmatpush1.bf16.msra.mxu0 %v6002_v52 }
 0x4e9   : > { %v17242_v55 = vpop.permute.xlu1 %5724  ;;  %6166 = vmatprep.subr.bf16.mxu0 %v5408_v11 }
 0x4ea   : > { %4938 = vrot.lane.b32.xlu0 %v17032_v6, %s14736_s23 }
 0x4eb   : > { %4936 = vrot.lane.b32.xlu1 %v17028_v56, %s14736_s23 }
 0x4ec   : > { %v17251_v29 = vpop.permute.xlu0 %5312  ;;  %6167 = vmatpush1.bf16.msra.mxu0 %v6011_v17 }
 0x4ed   : > { %v17253_v19 = vpop.permute.xlu1 %5848  ;;  %6168 = vmatprep.subr.bf16.mxu0 %v5507_v34 }
 0x4ee   : > { %5730 = vrot.lane.b32.xlu0 %v16998_v48, %s14742_s11 }
 0x4ef   : > { %5728 = vrot.lane.b32.xlu1 %v16920_v23, %s14742_s11  ;;  %v5631_v23 = vsel %vm1552_vm5, %v17089_v3, %v17175_v22  ;;  %v5755_v3 = vsel %vm1735_vm6, %v17099_v25, %v17189_v46  ;;  %v17333_v25 = vld [vmem:[%s21372_s1 + $0x60] ss:$12 sps:$4 sm:$0xff]  }
 0x4f0   : > { %v4929_v1 = vpop.permute.xlu0 %4928  ;;  %6169 = vmatpush1.bf16.msra.mxu0 %v5506_v12 }
 0x4f1   : > { %v17262_v16 = vpop.permute.xlu1 %5492 }
 0x4f2   : > { %v5515_v32 = vsel %vm1369_vm4, %v17114_v61, %v17262_v16  ;;  %5072 = vrot.lane.b32.xlu0 %v17032_v6, %s14737_s24 }
 0x4f3   : > { %5070 = vrot.lane.b32.xlu1 %v17028_v56, %s14737_s24  ;;  %6170 = vmatprep.subr.bf16.mxu0 %v5515_v32  ;;  %v5879_v32 = vsel %vm1918_vm7, %v17108_v47, %v17204_v18 }
 0x4f4   : > { %v17277_v41 = vpop.permute.xlu0 %5062  ;;  %6171 = vmatpush1.bf16.msra.mxu0 %v5514_v62 }
 0x4f5   : > { %v17279_v45 = vpop.permute.xlu1 %5616  ;;  %6172 = vmatprep.subr.bf16.mxu0 %v5631_v23 }
 0x4f6   : > { %5748 = vrot.lane.b32.xlu0 %v17028_v56, %s14742_s11  ;;  %v5639_v61 = vsel %vm1552_vm5, %v17125_v20, %v17279_v45 }
 0x4f7   : > { %5204 = vrot.lane.b32.xlu1 %v17028_v56, %s14738_s25 }
 0x4f8   : > { %v17291_v14 = vpop.permute.xlu0 %5196  ;;  %6173 = vmatpush1.bf16.msra.mxu0 %v5630_v21  ;;  %v5878_v21 = vsel %vm1918_vm7, %v17052_v15, %v17108_v47  ;;  %v5079_v15 = vsel %vm664_vm1, %v17178_v0, %v17232_v35 }
 0x4f9   : > { %v17293_v52 = vpop.permute.xlu1 %5740  ;;  %6174 = vmatprep.subr.bf16.mxu0 %v5639_v61  ;;  %v17357_v61 = vld [vmem:[%s21372_s1 + $0x7c] ss:$12 sps:$4 sm:$0xff]  }
 0x4fa   : > { %5206 = vrot.lane.b32.xlu0 %v17032_v6, %s14738_s25  ;;  %v5763_v20 = vsel %vm1735_vm6, %v17133_v31, %v17293_v52  ;;  %v17346_v31 = vld [vmem:[#allocation3 + $0x30] sm:$0xff] }
 0x4fb   : > { %5746 = vrot.lane.b32.xlu1 %v16937_v33, %s14742_s11 }
 0x4fc   : > { %v17305_v11 = vpop.permute.xlu0 %5332  ;;  %6175 = vmatpush1.bf16.msra.mxu0 %v5638_v59  ;;  %v4953_v59 = vsel %vm468_vm0, %v17136_v57, %v4929_v1  ;;  %v5886_v57 = vsel %vm1918_vm7, %v17087_v13, %v17152_v28 }
 0x4fd   : > { %v17307_v17 = vpop.permute.xlu1 %5330  ;;  %6176 = vmatprep.subr.bf16.mxu0 %v5755_v3 }
 0x4fe   : > { %5320 = vrot.lane.b32.xlu0 %v17003_v4, %s14739_s26 }
 0x4ff   : > { %5318 = vrot.lane.b32.xlu1 %v16998_v48, %s14739_s26 }
 0x500   : > { %v17319_v34 = vpop.permute.xlu0 %5478  ;;  %6177 = vmatpush1.bf16.msra.mxu0 %v5754_v50  ;;  %v5078_v50 = vsel %vm664_vm1, %v17060_v26, %v17178_v0  ;;  %v17404_v0 = vld [vmem:[#allocation2] sm:$0xff] }
 0x501   : > { %v17321_v12 = vpop.permute.xlu1 %5864  ;;  %6178 = vmatprep.subr.bf16.mxu0 %v5763_v20  ;;  %v5213_v20 = vsel %vm859_vm2, %v17192_v7, %v17240_v40 }
 0x502   : > { %5340 = vrot.lane.b32.xlu0 %v17032_v6, %s14739_s26 }
 0x503   : > { %5338 = vrot.lane.b32.xlu1 %v17028_v56, %s14739_s26 }
 0x504   : > { %v17338_v62 = vpop.permute.xlu0 %5602  ;;  %6179 = vmatpush1.bf16.msra.mxu0 %v5762_v9 }
 0x505   : > { %v17340_v23 = vpop.permute.xlu1 %4930  ;;  %6201 = vmatprep.subr.bf16.mxu0 %v5879_v32  ;;  %v17412_v32 = vld [vmem:[#allocation3 + $0x98] sm:$0xff] }
 0x506   : > { %v4954_v30 = vsel %vm468_vm0, %v4929_v1, %v17340_v23  ;;  %5854 = vrot.lane.b32.xlu0 %v16998_v48, %s14743_s18  ;;  %v5887_v48 = vsel %vm1918_vm7, %v17152_v28, %v17321_v12  ;;  %v17382_v1 = vld [vmem:[%s21372_s1 + $0x78] ss:$12 sps:$4 sm:$0xff]  }
 0x507   : > { %5852 = vrot.lane.b32.xlu1 %v17346_v31, %s14743_s18  ;;  %6181 = vmatmul.mubr.bf16.vlgmr.msra.gmra.mrb[44].mxu0 %v17333_v25 }
 0x508   : > { %v17364_v3 = vpop.permute.xlu0 %5726  ;;  %6256 = vmatprep.subr.bf16.mxu1 %v4954_v30  ;;  %6202 = vmatpush1.bf16.msra.mxu0 %v5878_v21 }
 0x509   : > { %v17369_v47 = vpop.permute.xlu1 %5064  ;;  %6257 = vmatpush1.bf16.msra.mxu1 %v4953_v59  ;;  %6203 = vmatprep.subr.bf16.mxu0 %v5887_v48  ;;  %v5347_v48 = vsel %vm1054_vm3, %v17206_v27, %v17251_v29 }
 0x50a   : > { %5872 = vrot.lane.b32.xlu0 %v17028_v56, %s14743_s18  ;;  %6258 = vmatprep.subr.bf16.mxu1 %v5079_v15  ;;  %v5088_v13 = vsel %vm664_vm1, %v17277_v41, %v17369_v47 }
 0x50b   : > { %5870 = vrot.lane.b32.xlu1 %v16937_v33, %s14743_s18  ;;  %6190 = vmatprep.mubr.bf16.mxu0 %v17357_v61  ;;  %v5087_v33 = vsel %vm664_vm1, %v17097_v24, %v17277_v41  ;;  %v17421_v24 = vld [vmem:[%s21372_s1 + $0x68] ss:$12 sps:$4 sm:$0xff]   ;;  %v5212_v41 = vsel %vm859_vm2, %v17030_v36, %v17192_v7  ;;  %v5221_v36 = vsel %vm859_vm2, %v17154_v58, %v17291_v14 }
 0x50c   : > { %v17387_v56 = vpop.permute.xlu0 %5850  ;;  %6204 = vmatpush1.bf16.msra.mxu0 %v5886_v57  ;;  %v5346_v58 = vsel %vm1054_vm3, %v17068_v10, %v17206_v27  ;;  %v5356_v57 = vsel %vm1054_vm3, %v17307_v17, %v17305_v11  ;;  %v5355_v10 = vsel %vm1054_vm3, %v17106_v39, %v17307_v17 }
 0x50d   : > { %v17392_v28 = vpop.permute.xlu1 %5198  ;;  %6259 = vmatpush1.bf16.msra.mxu1 %v5078_v50 }
 0x50e   : > { %5486 = vrot.lane.b32.xlu0 %v17116_v51, %s14740_s27  ;;  %6260 = vmatprep.subr.bf16.mxu1 %v5088_v13  ;;  %v5222_v21 = vsel %vm859_vm2, %v17291_v14, %v17392_v28  ;;  %v17471_v13 = vld [vmem:[#allocation3 + $0x40] sm:$0xff] }
 0x50f   : > { %5484 = vrot.lane.b32.xlu1 %v17003_v4, %s14740_s27  ;;  %6191 = vmatmul.mubr.bf16.gmra.mrb[48].mxu0 %v17382_v1 }
 0x510   : > { %v17402_v26 = vpop.permute.xlu0 %4914  ;;  %6233 = vmatprep.mubr.bf16.mxu0 %v17404_v0 }
 0x511   : > { %v17410_v9 = vpop.permute.xlu1 %5494  ;;  %6261 = vmatpush1.bf16.msra.mxu1 %v5087_v33 }
 0x512   : > { %5504 = vrot.lane.b32.xlu0 %v17412_v32, %s14740_s27  ;;  %6262 = vmatprep.subr.bf16.mxu1 %v5213_v20  ;;  %v5401_v20 = vld [vmem:[#allocation3 + $0x20] sm:$0xff] }
 0x513   : > { %5502 = vrot.lane.b32.xlu1 %v17032_v6, %s14740_s27 }
 0x514   : > { %v17426_v30 = vpop.permute.xlu0 %5048 }
 0x515   : > { %v17431_v59 = vpop.permute.xlu1 %5618  ;;  %6263 = vmatpush1.bf16.msra.mxu1 %v5212_v41 }
 0x516   : > { %5610 = vrot.lane.b32.xlu0 %v17116_v51, %s14741_s28  ;;  %6264 = vmatprep.subr.bf16.mxu1 %v5222_v21 }
 0x517   : > { %5608 = vrot.lane.b32.xlu1 %v17003_v4, %s14741_s28  ;;  %13413 = vmatmul.mubr.msk.bf16.vlgmr.msra.gmra.mrb[44].mxu0 %vm2183_vm8, %v17421_v24  ;;  %v17457_v4 = vld [vmem:[%s21372_s1 + $0x80] ss:$12 sps:$4 sm:$0xff]  }
 0x518   : > { %v17442_v7 = vpop.permute.xlu0 %5182  ;;  %6243 = vmatprep.mubr.bf16.mxu0 %v17404_v0 }
 0x519   : > { %v17448_v15 = vpop.permute.xlu1 %5742  ;;  %6265 = vmatpush1.bf16.msra.mxu1 %v5221_v36  ;;  %v5410_v36 = vld [vmem:[#allocation3 + $0x70] sm:$0xff] }
 0x51a   : > { %5628 = vrot.lane.b32.xlu0 %v17412_v32, %s14741_s28  ;;  %6266 = vmatprep.subr.bf16.mxu1 %v5347_v48  ;;  %v6013_v48 = vld [vmem:[#allocation4 + $0x298] sm:$0xff] }
 0x51b   : > { %5626 = vrot.lane.b32.xlu1 %v17032_v6, %s14741_s28 }
 0x51c   : > { %v17462_v14 = vpop.permute.xlu0 %5316 }
 0x51d   : > { %v17467_v50 = vpop.permute.xlu1 %5866  ;;  %6267 = vmatpush1.bf16.msra.mxu1 %v5346_v58 }
 0x51e   : > { %5734 = vrot.lane.b32.xlu0 %v17116_v51, %s14742_s11  ;;  %6268 = vmatprep.subr.bf16.mxu1 %v5356_v57  ;;  %v17506_v57 = vld [vmem:[#allocation3 + $0x90] sm:$0xff] }
 0x51f   : > { %5732 = vrot.lane.b32.xlu1 %v17471_v13, %s14742_s11  ;;  %13414 = vmatmul.mubr.msk.bf16.gmra.mrb[48].mxu0 %vm2183_vm8, %v17457_v4 }
 0x520   : > { %v17480_v27 = vpop.permute.xlu0 %5496  ;;  %6392 = vmatprep.mubr.bf16.mxu0 %v16964_v38  ;;  %v6004_v38 = vld [vmem:[#allocation4 + $0x250] sm:$0xff] }
 0x521   : > { %v4913_v33 = vpop.permute.xlu1 %4912  ;;  %6269 = vmatpush1.bf16.msra.mxu1 %v5355_v10  ;;  %v5508_v10 = vsel %vm1369_vm4, %v17164_v8, %v17222_v60  ;;  %v5516_v8 = vsel %vm1369_vm4, %v17262_v16, %v17410_v9  ;;  %v5632_v16 = vsel %vm1552_vm5, %v17175_v22, %v17234_v54  ;;  %v5640_v22 = vsel %vm1552_vm5, %v17279_v45, %v17431_v59 }
 0x522   : > { %v4946_v41 = vsel %vm468_vm0, %v17217_v37, %v4913_v33  ;;  %v4947_v21 = vsel %vm468_vm0, %v4913_v33, %v17402_v26  ;;  %5752 = vrot.lane.b32.xlu0 %v17412_v32, %s14742_s11  ;;  %6270 = vmatprep.subr.bf16.mxu1 %v5401_v20  ;;  %v5517_v20 = vsel %vm1369_vm4, %v17410_v9, %v17480_v27 }
 0x523   : > { %5750 = vrot.lane.b32.xlu1 %v17032_v6, %s14742_s11  ;;  %6360 = vmatprep.subr.bf16.mxu0 %v4947_v21  ;;  %v5509_v6 = vsel %vm1369_vm4, %v17222_v60, %v17319_v34  ;;  %v5633_v21 = vsel %vm1552_vm5, %v17234_v54, %v17338_v62 }
 0x524   : > { %v17491_v39 = vpop.permute.xlu0 %5620  ;;  %6361 = vmatpush1.bf16.msra.mxu0 %v4946_v41 }
 0x525   : > { %v5047_v17 = vpop.permute.xlu1 %5046  ;;  %6271 = vmatpush1.bf16.msra.mxu1 %v6004_v38 }
 0x526   : > { %5858 = vrot.lane.b32.xlu0 %v17116_v51, %s14743_s18  ;;  %6272 = vmatprep.subr.bf16.mxu1 %v5410_v36  ;;  %v5641_v36 = vsel %vm1552_vm5, %v17431_v59, %v17491_v39  ;;  %v5081_v54 = vsel %vm664_vm1, %v5047_v17, %v17426_v30  ;;  %v5080_v45 = vsel %vm664_vm1, %v17232_v35, %v5047_v17  ;;  %v13404_v59 = vld [vmem:[%s21373_s2 + $0x48] sm:$0xff] }
 0x527   : > { %5856 = vrot.lane.b32.xlu1 %v17471_v13, %s14743_s18 }
 0x528   : > { %v17497_v37 = vpop.permute.xlu0 %5744 }
 0x529   : > { %v17502_v58 = vpop.permute.xlu1 %5180  ;;  %6273 = vmatpush1.bf16.msra.mxu1 %v6013_v48  ;;  %v5765_v35 = vsel %vm1735_vm6, %v17448_v15, %v17497_v37 }
 0x52a   : > { %5876 = vrot.lane.b32.xlu0 %v17412_v32, %s14743_s18  ;;  %6274 = vmatprep.subr.bf16.mxu1 %v5509_v6 }
 0x52b   : > { %5874 = vrot.lane.b32.xlu1 %v17506_v57, %s14743_s18 }
 0x52c   : > { %v17513_v33 = vpop.permute.xlu0 %5868 }
 0x52d   : > { %v17518_v41 = vpop.permute.xlu1 %5314  ;;  %6275 = vmatpush1.bf16.msra.mxu1 %v5508_v10 }
 0x52e   : > { %4940 = vrot.lane.b32.xlu0 %v17412_v32, %s14736_s23  ;;  %6276 = vmatprep.subr.bf16.mxu1 %v5517_v20 }
 0x52f   : > { %4920 = vrot.lane.b32.xlu1 %v17116_v51, %s14736_s23 }
 0x530   : > { %v17527_v60 = vpop.permute.xlu0 %4934 }
 0x531   : > { %v17532_v38 = vpop.permute.xlu1 %5480  ;;  %6277 = vmatpush1.bf16.msra.mxu1 %v5516_v8 }
 0x532   : > { %5074 = vrot.lane.b32.xlu0 %v17412_v32, %s14737_s24  ;;  %6278 = vmatprep.subr.bf16.mxu1 %v5633_v21  ;;  %v5756_v21 = vsel %vm1735_vm6, %v17189_v46, %v17242_v55  ;;  %v13406_v46 = vld [vmem:[%s21373_s2 + $0x58] sm:$0xff] }
 0x533   : > { %5054 = vrot.lane.b32.xlu1 %v17116_v51, %s14737_s24 }
 0x534   : > { %v17541_v9 = vpop.permute.xlu0 %5068 }
 0x535   : > { %v4933_v48 = vpop.permute.xlu1 %4932  ;;  %6279 = vmatpush1.bf16.msra.mxu1 %v5632_v16 }
 0x536   : > { %v4955_v6 = vsel %vm468_vm0, %v17340_v23, %v4933_v48  ;;  %v4956_v10 = vsel %vm468_vm0, %v4933_v48, %v17527_v60  ;;  %5208 = vrot.lane.b32.xlu0 %v17412_v32, %s14738_s25  ;;  %6280 = vmatprep.subr.bf16.mxu1 %v5641_v36  ;;  %v5757_v23 = vsel %vm1735_vm6, %v17242_v55, %v17364_v3 }
 0x537   : > { %5188 = vrot.lane.b32.xlu1 %v17116_v51, %s14738_s25  ;;  %6362 = vmatprep.subr.bf16.mxu0 %v4956_v10  ;;  %v5764_v55 = vsel %vm1735_vm6, %v17293_v52, %v17448_v15  ;;  %v5215_v48 = vsel %vm859_vm2, %v17502_v58, %v17442_v7  ;;  %v5881_v10 = vsel %vm1918_vm7, %v17253_v19, %v17387_v56 }
 0x538   : > { %v17559_v20 = vpop.permute.xlu0 %5202  ;;  %6363 = vmatpush1.bf16.msra.mxu0 %v4955_v6  ;;  %v13405_v6 = vld [vmem:[%s21373_s2 + $0x50] sm:$0xff]  ;;  %v5214_v52 = vsel %vm859_vm2, %v17240_v40, %v17502_v58  ;;  %v5880_v15 = vsel %vm1918_vm7, %v17204_v18, %v17253_v19  ;;  %v5888_v40 = vsel %vm1918_vm7, %v17321_v12, %v17467_v50  ;;  %v5349_v19 = vsel %vm1054_vm3, %v17518_v41, %v17462_v14 }
 0x539   : > { %v17564_v8 = vpop.permute.xlu1 %5604  ;;  %6281 = vmatpush1.bf16.msra.mxu1 %v5640_v22  ;;  %6364 = vmatprep.subr.bf16.mxu0 %v5081_v54 }
 0x53a   : > { %5342 = vrot.lane.b32.xlu0 %v17412_v32, %s14739_s26  ;;  %6282 = vmatprep.subr.bf16.mxu1 %v5757_v23  ;;  %v13403_v32 = vld [vmem:[%s21373_s2 + $0x40] sm:$0xff] }
 0x53b   : > { %5322 = vrot.lane.b32.xlu1 %v17116_v51, %s14739_s26 }
 0x53c   : > { %v17578_v16 = vpop.permute.xlu0 %5336  ;;  %6365 = vmatpush1.bf16.msra.mxu0 %v5080_v45  ;;  %v5889_v45 = vsel %vm1918_vm7, %v17467_v50, %v17513_v33 }
 0x53d   : > { %v5067_v51 = vpop.permute.xlu1 %5066  ;;  %6283 = vmatpush1.bf16.msra.mxu1 %v5756_v21 }
 0x53e   : > { %v5089_v17 = vsel %vm664_vm1, %v17369_v47, %v5067_v51  ;;  %v5090_v36 = vsel %vm664_vm1, %v5067_v51, %v17541_v9  ;;  %6099 = vperm.xlu0 %14425, %v13404_v59   ;;  %6284 = vmatprep.subr.bf16.mxu1 %v5765_v35 }
 0x53f   : > { %6094 = vperm.xlu1 %14426, %v13403_v32   ;;  %6366 = vmatprep.subr.bf16.mxu0 %v5090_v36  ;;  %v5348_v32 = vsel %vm1054_vm3, %v17251_v29, %v17518_v41  ;;  %v6006_v36 = vld [vmem:[#allocation4 + $0x260] sm:$0xff] }
 0x540   : > { %v17599_v47 = vpop.permute.xlu0 %5482  ;;  %6367 = vmatpush1.bf16.msra.mxu0 %v5089_v17 }
 0x541   : > { %v5201_v22 = vpop.permute.xlu1 %5200  ;;  %6285 = vmatpush1.bf16.msra.mxu1 %v5764_v55  ;;  %6368 = vmatprep.subr.bf16.mxu0 %v5215_v48 }
 0x542   : > { %6109 = vperm.xlu0 %14425, %v13406_v46   ;;  %6307 = vmatprep.subr.bf16.mxu1 %v5881_v10  ;;  %v5224_v54 = vsel %vm859_vm2, %v5201_v22, %v17559_v20  ;;  %v5223_v18 = vsel %vm859_vm2, %v17392_v28, %v5201_v22  ;;  %v5510_v10 = vsel %vm1369_vm4, %v17319_v34, %v17532_v38 }
 0x543   : > { %6104 = vperm.xlu1 %14426, %v13405_v6  }
 0x544   : > { %v17615_v23 = vpop.permute.xlu0 %5606  ;;  %6287 = vmatmul.mubr.bf16.vlgmr.msra.gmra.mrb[44].mxu1 %v17333_v25  ;;  %6369 = vmatpush1.bf16.msra.mxu0 %v5214_v52 }
 0x545   : > { %v5335_v59 = vpop.permute.xlu1 %5334  ;;  %6308 = vmatpush1.bf16.msra.mxu1 %v5880_v15  ;;  %6370 = vmatprep.subr.bf16.mxu0 %v5224_v54  ;;  %v17672_v54 = vld [vmem:[%s21372_s1 + $0x64] ss:$12 sps:$4 sm:$0xff]  }
 0x546   : > { %6309 = vmatprep.subr.bf16.mxu1 %v5889_v45  ;;  %6296 = vmatprep.mubr.bf16.mxu1 %v17357_v61  ;;  %v5358_v28 = vsel %vm1054_vm3, %v5335_v59, %v17578_v16  ;;  %v5357_v50 = vsel %vm1054_vm3, %v17305_v11, %v5335_v59  ;;  %v5412_v11 = vld [vmem:[#allocation3 + $0x80] sm:$0xff]  ;;  %v5635_v59 = vsel %vm1552_vm5, %v17564_v8, %v17615_v23 }
 0x548   : > { %v17630_v58 = vpop.permute.xlu0 %4918  ;;  %6371 = vmatpush1.bf16.msra.mxu0 %v5223_v18 }
 0x549   : > { %v5499_v21 = vpop.permute.xlu1 %5498  ;;  %6310 = vmatpush1.bf16.msra.mxu1 %v5888_v40  ;;  %6372 = vmatprep.subr.bf16.mxu0 %v5349_v19 }
 0x54a   : > { %v5518_v45 = vsel %vm1369_vm4, %v17480_v27, %v5499_v21 }
 0x54c   : > { %v17637_v35 = vpop.permute.xlu0 %5052  ;;  %6297 = vmatmul.mubr.bf16.gmra.mrb[48].mxu1 %v17382_v1  ;;  %6373 = vmatpush1.bf16.msra.mxu0 %v5348_v32 }
 0x54d   : > { %v5623_v12 = vpop.permute.xlu1 %5622  ;;  %6374 = vmatprep.subr.bf16.mxu0 %v5358_v28  ;;  %6339 = vmatprep.mubr.bf16.mxu1 %v17404_v0 }
 0x550   : > { %v17643_v51 = vpop.permute.xlu0 %5186  ;;  %6375 = vmatpush1.bf16.msra.mxu0 %v5357_v50 }
 0x551   : > { %v4917_v17 = vpop.permute.xlu1 %4916  ;;  %6376 = vmatprep.subr.bf16.mxu0 %v17346_v31  ;;  %v6015_v31 = vld [vmem:[#allocation4 + $0x2a8] sm:$0xff] }
 0x552   : > { %v4948_v29 = vsel %vm468_vm0, %v17402_v26, %v4917_v17  ;;  %v4949_v41 = vsel %vm468_vm0, %v4917_v17, %v17630_v58  ;;  %v5511_v26 = vsel %vm1369_vm4, %v17532_v38, %v17599_v47 }
 0x553   : > { %6466 = vmatprep.subr.bf16.mxu1 %v4949_v41 }
 0x554   : > { %v17650_v46 = vpop.permute.xlu0 %5500  ;;  %13415 = vmatmul.mubr.msk.bf16.vlgmr.msra.gmra.mrb[44].mxu1 %vm2183_vm8, %v17421_v24  ;;  %6377 = vmatpush1.bf16.msra.mxu0 %v6006_v36  ;;  %v14472_v36 = vpack.i.bf16 %v17404_v0, %v17404_v0 }
 0x555   : > { %v5051_v55 = vpop.permute.xlu1 %5050  ;;  %6467 = vmatpush1.bf16.msra.mxu1 %v4948_v29  ;;  %6378 = vmatprep.subr.bf16.mxu0 %v5412_v11  ;;  %v5519_v22 = vsel %vm1369_vm4, %v5499_v21, %v17650_v46 }
 0x556   : > { %6349 = vmatprep.mubr.bf16.mxu1 %v17404_v0  ;;  %v5083_v18 = vsel %vm664_vm1, %v5051_v55, %v17637_v35  ;;  %v5082_v27 = vsel %vm664_vm1, %v17426_v30, %v5051_v55  ;;  %14473 = vrot.lane.b32.xlu0 %v14472_v36, %s14737_s24 }
 0x557   : > { %14468 = vrot.lane.b32.xlu1 %v14472_v36, %s14736_s23 }
 0x558   : > { %v17658_v48 = vpop.permute.xlu0 %5624  ;;  %6379 = vmatpush1.bf16.msra.mxu0 %v6015_v31 }
 0x559   : > { %v5185_v6 = vpop.permute.xlu1 %5184  ;;  %6380 = vmatprep.subr.bf16.mxu0 %v5511_v26  ;;  %v5643_v21 = vsel %vm1552_vm5, %v5623_v12, %v17658_v48 }
 0x55a   : > { %v5217_v30 = vsel %vm859_vm2, %v5185_v6, %v17643_v51  ;;  %14483 = vrot.lane.b32.xlu0 %v14472_v36, %s14739_s26 }
 0x55b   : > { %14478 = vrot.lane.b32.xlu1 %v14472_v36, %s14738_s25 }
 0x55c   : > { %v17665_v52 = vpop.permute.xlu0 %4938  ;;  %13416 = vmatmul.mubr.msk.bf16.gmra.mrb[48].mxu1 %vm2183_vm8, %v17457_v4  ;;  %6381 = vmatpush1.bf16.msra.mxu0 %v5510_v10 }
 0x55d   : > { %v4937_v15 = vpop.permute.xlu1 %4936  ;;  %6382 = vmatprep.subr.bf16.mxu0 %v5519_v22  ;;  %6498 = vmatprep.mubr.bf16.mxu1 %v17672_v54 }
 0x55e   : > { %v4957_v34 = vsel %vm468_vm0, %v17527_v60, %v4937_v15  ;;  %v4958_v38 = vsel %vm468_vm0, %v4937_v15, %v17665_v52  ;;  %v5634_v60 = vsel %vm1552_vm5, %v17338_v62, %v17564_v8  ;;  %v5642_v62 = vsel %vm1552_vm5, %v17491_v39, %v5623_v12 }
 0x55f   : > { %6468 = vmatprep.subr.bf16.mxu1 %v4958_v38 }
 0x560   : > { %v17686_v40 = vpop.permute.xlu0 %5730  ;;  %6383 = vmatpush1.bf16.msra.mxu0 %v5518_v45  ;;  %6469 = vmatpush1.bf16.msra.mxu1 %v4957_v34 }
 0x561   : > { %v5729_v19 = vpop.permute.xlu1 %5728  ;;  %6384 = vmatprep.subr.bf16.mxu0 %v5635_v59  ;;  %6470 = vmatprep.subr.bf16.mxu1 %v5083_v18 }
 0x562   : > { %v5759_v8 = vsel %vm1735_vm6, %v5729_v19, %v17686_v40  ;;  %v5758_v39 = vsel %vm1735_vm6, %v17364_v3, %v5729_v19 }
 0x564   : > { %v17695_v32 = vpop.permute.xlu0 %5072  ;;  %6385 = vmatpush1.bf16.msra.mxu0 %v5634_v60  ;;  %6471 = vmatpush1.bf16.msra.mxu1 %v5082_v27  ;;  %v6017_v60 = vld [vmem:[#allocation4 + $0x2b8] sm:$0xff] }
 0x565   : > { %v5071_v28 = vpop.permute.xlu1 %5070  ;;  %6386 = vmatprep.subr.bf16.mxu0 %v5643_v21  ;;  %v6010_v21 = vld [vmem:[#allocation4 + $0x280] sm:$0xff] }
 0x566   : > { %v5091_v50 = vsel %vm664_vm1, %v17541_v9, %v5071_v28  ;;  %v5092_v17 = vsel %vm664_vm1, %v5071_v28, %v17695_v32  ;;  %v5216_v9 = vsel %vm859_vm2, %v17442_v7, %v5185_v6 }
 0x567   : > { %6472 = vmatprep.subr.bf16.mxu1 %v5092_v17 }
 0x568   : > { %v17707_v29 = vpop.permute.xlu0 %5748  ;;  %6387 = vmatpush1.bf16.msra.mxu0 %v5642_v62  ;;  %6473 = vmatpush1.bf16.msra.mxu1 %v5091_v50 }
 0x569   : > { %v5205_v41 = vpop.permute.xlu1 %5204  ;;  %6388 = vmatprep.subr.bf16.mxu0 %v5759_v8  ;;  %6474 = vmatprep.subr.bf16.mxu1 %v5217_v30 }
 0x56a   : > { %v5225_v3 = vsel %vm859_vm2, %v17559_v20, %v5205_v41 }
 0x56c   : > { %v17713_v12 = vpop.permute.xlu0 %5206  ;;  %6389 = vmatpush1.bf16.msra.mxu0 %v5758_v39  ;;  %6475 = vmatpush1.bf16.msra.mxu1 %v5216_v9 }
 0x56d   : > { %v5226_v11 = vsel %vm859_vm2, %v5205_v41, %v17713_v12  ;;  %v5747_v55 = vpop.permute.xlu1 %5746 }
 0x56e   : > { %v5766_v31 = vsel %vm1735_vm6, %v17497_v37, %v5747_v55  ;;  %v5767_v7 = vsel %vm1735_vm6, %v5747_v55, %v17707_v29  ;;  %6476 = vmatprep.subr.bf16.mxu1 %v5226_v11 }
 0x56f   : > { %6390 = vmatprep.subr.bf16.mxu0 %v5767_v7 }
 0x570   : > { %v17727_v26 = vpop.permute.xlu0 %5320  ;;  %6391 = vmatpush1.bf16.msra.mxu0 %v5766_v31  ;;  %6477 = vmatpush1.bf16.msra.mxu1 %v5225_v3 }
 0x571   : > { %v5319_v6 = vpop.permute.xlu1 %5318 }
 0x572   : > { %v5350_v37 = vsel %vm1054_vm3, %v17462_v14, %v5319_v6  ;;  %v5351_v10 = vsel %vm1054_vm3, %v5319_v6, %v17727_v26 }
 0x573   : > { %6393 = vmatmul.mubr.bf16.vlgmr.msra.gmra.mrb[52].mxu0 %v17333_v25  ;;  %6478 = vmatprep.subr.bf16.mxu1 %v5351_v10 }
 0x574   : > { %v17735_v20 = vpop.permute.xlu0 %5340  ;;  %6479 = vmatpush1.bf16.msra.mxu1 %v5350_v37  ;;  %6402 = vmatprep.mubr.bf16.mxu0 %v17357_v61 }
 0x575   : > { %v5339_v22 = vpop.permute.xlu1 %5338 }
 0x576   : > { %v5359_v15 = vsel %vm1054_vm3, %v17578_v16, %v5339_v22  ;;  %v5360_v14 = vsel %vm1054_vm3, %v5339_v22, %v17735_v20  ;;  %v6008_v16 = vld [vmem:[#allocation4 + $0x270] sm:$0xff] }
 0x577   : > { %6480 = vmatprep.subr.bf16.mxu1 %v5360_v14 }
 0x578   : > { %v17743_v34 = vpop.permute.xlu0 %5854  ;;  %6481 = vmatpush1.bf16.msra.mxu1 %v5359_v15 }
 0x579   : > { %v5853_v38 = vpop.permute.xlu1 %5852  ;;  %6482 = vmatprep.subr.bf16.mxu1 %v17471_v13 }
 0x57a   : > { %v5882_v45 = vsel %vm1918_vm7, %v17387_v56, %v5853_v38  ;;  %v5883_v59 = vsel %vm1918_vm7, %v5853_v38, %v17743_v34 }
 0x57b   : > { %6403 = vmatmul.mubr.bf16.gmra.mrb[56].mxu0 %v17382_v1  ;;  %6413 = vmatprep.subr.bf16.mxu0 %v5883_v59 }
 0x57c   : > { %v17751_v18 = vpop.permute.xlu0 %5872  ;;  %6414 = vmatpush1.bf16.msra.mxu0 %v5882_v45  ;;  %6483 = vmatpush1.bf16.msra.mxu1 %v6008_v16 }
 0x57d   : > { %v5871_v19 = vpop.permute.xlu1 %5870  ;;  %6484 = vmatprep.subr.bf16.mxu1 %v17506_v57  ;;  %6445 = vmatprep.mubr.bf16.mxu0 %v17404_v0 }
 0x57e   : > { %v5890_v13 = vsel %vm1918_vm7, %v17513_v33, %v5871_v19  ;;  %v5891_v56 = vsel %vm1918_vm7, %v5871_v19, %v17751_v18 }
 0x57f   : > { %6415 = vmatprep.subr.bf16.mxu0 %v5891_v56 }
 0x580   : > { %v5487_v27 = vpop.permute.xlu0 %5486  ;;  %6416 = vmatpush1.bf16.msra.mxu0 %v5890_v13  ;;  %6485 = vmatpush1.bf16.msra.mxu1 %v6017_v60 }
 0x581   : > { %5548 = vst.msk [vmem:[#allocation4 + $0x310] sm:$0xff] %vm513_vm9, %v5487_v27  ;;  %v5485_v28 = vpop.permute.xlu1 %5484  ;;  %13558 = vmatprep.subr.bf16.mxu0 %v6010_v21 }
 0x582   : > { %v5512_v57 = vsel %vm1369_vm4, %v17599_v47, %v5485_v28  ;;  %v5513_v50 = vsel %vm1369_vm4, %v5485_v28, %v5487_v27 }
 0x583   : > { %13417 = vmatmul.mubr.msk.bf16.vlgmr.msra.gmra.mrb[52].mxu0 %vm2183_vm8, %v17421_v24  ;;  %6486 = vmatprep.subr.bf16.mxu1 %v5513_v50 }
 0x584   : > { %v5505_v33 = vpop.permute.xlu0 %5504  ;;  %6487 = vmatpush1.bf16.msra.mxu1 %v5512_v57  ;;  %6455 = vmatprep.mubr.bf16.mxu0 %v17404_v0 }
 0x585   : > { %5557 = vst.msk [vmem:[#allocation4 + $0x358] sm:$0xff] %vm513_vm9, %v5505_v33  ;;  %v5503_v17 = vpop.permute.xlu1 %5502 }
 0x586   : > { %v5520_v62 = vsel %vm1369_vm4, %v17650_v46, %v5503_v17  ;;  %v5521_v30 = vsel %vm1369_vm4, %v5503_v17, %v5505_v33 }
 0x587   : > { %6488 = vmatprep.subr.bf16.mxu1 %v5521_v30 }
 0x588   : > { %v5611_v47 = vpop.permute.xlu0 %5610  ;;  %6489 = vmatpush1.bf16.msra.mxu1 %v5520_v62  ;;  %v6028_v17 = vld [vmem:[#allocation4 + $0x310] sm:$0xff] }
 0x589   : > { %5672 = vst.msk [vmem:[#allocation4 + $0x3a0] sm:$0xff] %vm513_vm9, %v5611_v47  ;;  %v5609_v8 = vpop.permute.xlu1 %5608 }
 0x58a   : > { %v5636_v41 = vsel %vm1552_vm5, %v17615_v23, %v5609_v8  ;;  %v5637_v9 = vsel %vm1552_vm5, %v5609_v8, %v5611_v47 }
 0x58b   : > { %13418 = vmatmul.mubr.msk.bf16.gmra.mrb[56].mxu0 %vm2183_vm8, %v17457_v4  ;;  %6490 = vmatprep.subr.bf16.mxu1 %v5637_v9 }
 0x58c   : > { %v5629_v39 = vpop.permute.xlu0 %5628  ;;  %6491 = vmatpush1.bf16.msra.mxu1 %v5636_v41  ;;  %6604 = vmatprep.mubr.bf16.mxu0 %v17672_v54  ;;  %v6037_v30 = vld [vmem:[#allocation4 + $0x358] sm:$0xff] }
 0x58d   : > { %5681 = vst.msk [vmem:[#allocation4 + $0x3e8] sm:$0xff] %vm513_vm9, %v5629_v39  ;;  %v5627_v46 = vpop.permute.xlu1 %5626 }
 0x58e   : > { %v5644_v36 = vsel %vm1552_vm5, %v17658_v48, %v5627_v46  ;;  %v5645_v11 = vsel %vm1552_vm5, %v5627_v46, %v5629_v39 }
 0x58f   : > { %6492 = vmatprep.subr.bf16.mxu1 %v5645_v11 }
 0x590   : > { %v5735_v23 = vpop.permute.xlu0 %5734  ;;  %6493 = vmatpush1.bf16.msra.mxu1 %v5644_v36  ;;  %v17842_v36 = vld [vmem:[%s21378_s7] sm:$0xff] }
 0x591   : > { %5796 = vst.msk [vmem:[#allocation4 + $0x430] sm:$0xff] %vm513_vm9, %v5735_v23  ;;  %v5733_v55 = vpop.permute.xlu1 %5732 }
 0x592   : > { %v5760_v31 = vsel %vm1735_vm6, %v17686_v40, %v5733_v55  ;;  %v5761_v7 = vsel %vm1735_vm6, %v5733_v55, %v5735_v23 }
 0x593   : > { %6494 = vmatprep.subr.bf16.mxu1 %v5761_v7 }
 0x594   : > { %v5753_v54 = vpop.permute.xlu0 %5752  ;;  %6495 = vmatpush1.bf16.msra.mxu1 %v5760_v31  ;;  %v6055_v47 = vld [vmem:[#allocation4 + $0x3e8] sm:$0xff] }
 0x595   : > { %5805 = vst.msk [vmem:[#allocation4 + $0x478] sm:$0xff] %vm513_vm9, %v5753_v54  ;;  %v5751_v3 = vpop.permute.xlu1 %5750 }
 0x596   : > { %v5768_v48 = vsel %vm1735_vm6, %v17707_v29, %v5751_v3  ;;  %v5769_v6 = vsel %vm1735_vm6, %v5751_v3, %v5753_v54 }
 0x597   : > { %6496 = vmatprep.subr.bf16.mxu1 %v5769_v6 }
 0x598   : > { %v5859_v37 = vpop.permute.xlu0 %5858  ;;  %6497 = vmatpush1.bf16.msra.mxu1 %v5768_v48  ;;  %v6064_v41 = vld [vmem:[#allocation4 + $0x430] sm:$0xff]  ;;  %v6717_v48 = vrot.slane %v17842_v36, %v21421_v49 }
 0x599   : > { %5920 = vst.msk [vmem:[#allocation4 + $0x4c0] sm:$0xff] %vm513_vm9, %v5859_v37  ;;  %v5857_v10 = vpop.permute.xlu1 %5856 }
 0x59a   : > { %v5884_v40 = vsel %vm1918_vm7, %v17743_v34, %v5857_v10  ;;  %v5885_v22 = vsel %vm1918_vm7, %v5857_v10, %v5859_v37 }
 0x59b   : > { %6499 = vmatmul.mubr.bf16.vlgmr.msra.gmra.mrb[52].mxu1 %v17333_v25  ;;  %6519 = vmatprep.subr.bf16.mxu1 %v5885_v22 }
 0x59c   : > { %v5877_v15 = vpop.permute.xlu0 %5876  ;;  %6520 = vmatpush1.bf16.msra.mxu1 %v5884_v40  ;;  %6508 = vmatprep.mubr.bf16.mxu1 %v17357_v61  ;;  %v6073_v39 = vld [vmem:[#allocation4 + $0x478] sm:$0xff] }
 0x59d   : > { %5929 = vst.msk [vmem:[#allocation4 + $0x508] sm:$0xff] %vm513_vm9, %v5877_v15  ;;  %v5875_v29 = vpop.permute.xlu1 %5874 }
 0x59e   : > { %v5892_v14 = vsel %vm1918_vm7, %v17751_v18, %v5875_v29  ;;  %v5893_v38 = vsel %vm1918_vm7, %v5875_v29, %v5877_v15 }
 0x59f   : > { %6521 = vmatprep.subr.bf16.mxu1 %v5893_v38 }
 0x5a0   : > { %v4941_v45 = vpop.permute.xlu0 %4940  ;;  %6522 = vmatpush1.bf16.msra.mxu1 %v5892_v14  ;;  %v6082_v34 = vld [vmem:[#allocation4 + $0x4c0] sm:$0xff] }
 0x5a1   : > { %v4959_v59 = vsel %vm468_vm0, %v17665_v52, %v4941_v45  ;;  %v4921_v16 = vpop.permute.xlu1 %4920  ;;  %13844 = vmatprep.subr.bf16.mxu1 %v6082_v34 }
 0x5a2   : > { %4995 = vst.msk [vmem:[#allocation4 + $0x88] sm:$0xff] %vm513_vm9, %v4959_v59  ;;  %v4950_v19 = vsel %vm468_vm0, %v17630_v58, %v4921_v16 }
 0x5a3   : > { %4986 = vst.msk [vmem:[#allocation4 + $0x40] sm:$0xff] %vm513_vm9, %v4950_v19  ;;  %6509 = vmatmul.mubr.bf16.gmra.mrb[56].mxu1 %v17382_v1 }
 0x5a4   : > { %v5075_v18 = vpop.permute.xlu0 %5074  ;;  %6551 = vmatprep.mubr.bf16.mxu1 %v17404_v0  ;;  %v6091_v57 = vld [vmem:[#allocation4 + $0x508] sm:$0xff] }
 0x5a5   : > { %v5093_v13 = vsel %vm664_vm1, %v17695_v32, %v5075_v18  ;;  %v5055_v56 = vpop.permute.xlu1 %5054  ;;  %v6019_v32 = vld [vmem:[#allocation4 + $0x2c8] sm:$0xff] }
 0x5a6   : > { %5129 = vst.msk [vmem:[#allocation4 + $0x118] sm:$0xff] %vm513_vm9, %v5093_v13  ;;  %v5084_v52 = vsel %vm664_vm1, %v17637_v35, %v5055_v56 }
 0x5a7   : > { %5120 = vst.msk [vmem:[#allocation4 + $0xd0] sm:$0xff] %vm513_vm9, %v5084_v52 }
 0x5a8   : > { %v5209_v60 = vpop.permute.xlu0 %5208 }
 0x5a9   : > { %v5227_v58 = vsel %vm859_vm2, %v17713_v12, %v5209_v60  ;;  %v5189_v27 = vpop.permute.xlu1 %5188  ;;  %v5947_v33 = vld [vmem:[#allocation4 + $0x88] sm:$0xff] }
 0x5aa   : > { %5263 = vst.msk [vmem:[#allocation4 + $0x1a8] sm:$0xff] %vm513_vm9, %v5227_v58  ;;  %v5218_v21 = vsel %vm859_vm2, %v17643_v51, %v5189_v27  ;;  %v5938_v28 = vld [vmem:[#allocation4 + $0x40] sm:$0xff] }
 0x5ab   : > { %5254 = vst.msk [vmem:[#allocation4 + $0x160] sm:$0xff] %vm513_vm9, %v5218_v21  ;;  %13559 = vmatpush3.bf16.msra.mxu0 %v5938_v28  ;;  %13419 = vmatmul.mubr.msk.bf16.vlgmr.msra.gmra.mrb[52].mxu1 %vm2183_vm8, %v17421_v24 }
 0x5ac   : > { %13560 = vmatprep.subr.bf16.mxu0 %v6019_v32  ;;  %v5343_v35 = vpop.permute.xlu0 %5342  ;;  %13845 = vmatpush3.bf16.msra.mxu1 %v6082_v34 }
 0x5ad   : > { %v5361_v12 = vsel %vm1054_vm3, %v17735_v20, %v5343_v35  ;;  %v5323_v50 = vpop.permute.xlu1 %5322  ;;  %13846 = vmatprep.subr.bf16.mxu1 %v6091_v57  ;;  %6561 = vmatprep.mubr.bf16.mxu1 %v17404_v0  ;;  %v5965_v0 = vld [vmem:[#allocation4 + $0x118] sm:$0xff] }
 0x5ae   : > { %5397 = vst.msk [vmem:[#allocation4 + $0x238] sm:$0xff] %vm513_vm9, %v5361_v12  ;;  %v5352_v51 = vsel %vm1054_vm3, %v17727_v26, %v5323_v50  ;;  %v5956_v62 = vld [vmem:[#allocation4 + $0xd0] sm:$0xff]  ;;  %v6046_v26 = vld [vmem:[#allocation4 + $0x3a0] sm:$0xff] }
 0x5af   : > { %5388 = vst.msk [vmem:[#allocation4 + $0x1f0] sm:$0xff] %vm513_vm9, %v5352_v51  ;;  %13561 = vmatpush3.bf16.msra.mxu0 %v5947_v33 }
 0x5b0   : > { %13562 = vmatprep.subr.bf16.mxu0 %v6028_v17  ;;  %13847 = vmatpush3.bf16.msra.mxu1 %v6091_v57 }
 0x5b1   : > { %v5983_v8 = vld [vmem:[#allocation4 + $0x1a8] sm:$0xff] }
 0x5b2   : > { %v5974_v20 = vld [vmem:[#allocation4 + $0x160] sm:$0xff] }
 0x5b3   : > { %13563 = vmatpush3.bf16.msra.mxu0 %v5956_v62  ;;  %13420 = vmatmul.mubr.msk.bf16.gmra.mrb[56].mxu1 %vm2183_vm8, %v17457_v4 }
 0x5b4   : > { %13564 = vmatprep.subr.bf16.mxu0 %v6037_v30  ;;  %13848 = vmatprep.mubr.msk.bf16.mxu1 %vm2183_vm8, %v17421_v24 }
 0x5b5   : > { %v6001_v24 = vld [vmem:[#allocation4 + $0x238] sm:$0xff] }
 0x5b6   : > { %v5992_v9 = vld [vmem:[#allocation4 + $0x1f0] sm:$0xff] }
 0x5b7   : > { %13565 = vmatpush3.bf16.msra.mxu0 %v5965_v0 }
 0x5b8   : > { %13566 = vmatprep.subr.bf16.mxu0 %v6046_v26 }
 0x5bb   : > { %13567 = vmatpush3.bf16.msra.mxu0 %v5974_v20  ;;  %13849 = vmatmul.mubr.msk.bf16.vlgmr.msra.gmra.mrb[60].mxu1 %vm2183_vm8, %v17457_v4  ;;  %v6721_v20 = vrot.slane %v17842_v36, %v21422_v53 }
 0x5bc   : > { %13568 = vmatprep.subr.bf16.mxu0 %v6055_v47 }
 0x5bd   : > { %v17845_v55 = vpop.permute.xlu0 %6099 }
 0x5be   : > { %v17837_v46 = vpop.permute.xlu1 %6094 }
 0x5bf   : > { %13569 = vmatpush3.bf16.msra.mxu0 %v5983_v8 }
 0x5c0   : > { %13570 = vmatprep.subr.bf16.mxu0 %v6064_v41 }
 0x5c1   : > { %v17857_v16 = vpop.permute.xlu0 %6109 }
 0x5c2   : > { %v17854_v15 = vpop.permute.xlu1 %6104 }
 0x5c3   : > { %13571 = vmatpush3.bf16.msra.mxu0 %v5992_v9  ;;  %v6725_v9 = vrot.slane %v17842_v36, %v21423_v63 }
 0x5c4   : > { %13572 = vmatprep.subr.bf16.mxu0 %v6073_v39 }
 0x5c7   : > { %13573 = vmatpush3.bf16.msra.mxu0 %v6001_v24 }
 0x5ca   : > { %6605 = vmatmul.mubr.bf16.vlgmr.msra.gmra.mrb[60].mxu0 %v17333_v25 }
 0x5cb   : > { %6612 = vmatprep.mubr.bf16.mxu0 %v17357_v61  ;;  %v6713_v61 = vrot.slane %v17842_v36, %v15686_v43 }
 0x5d2   : > { %6613 = vmatmul.mubr.bf16.gmra.mrb[64].mxu0 %v17382_v1 }
 0x5ea   : > { %v6235_v4 = vpop.f32.mrb[44].mxu0 }
 0x5eb   : > { %v14099_v11 = vadd.f32 %v6235_v4, %v17837_v46  ;;  %v6237_v23 = vpop.f32.mrb[45].mxu0 }
 0x5ec   : > { %v14100_v31 = vadd.f32 %v6237_v23, %v17837_v46  ;;  %v6239_v25 = vpop.f32.mrb[46].mxu0 }
 0x5ed   : > { %v6670_v7 = vmax.f32 %v14099_v11, 0.0  ;;  %v14101_v1 = vadd.f32 %v6239_v25, %v17845_v55  ;;  %v6241_v54 = vpop.f32.mrb[47].mxu0 }
 0x5ee   : > { %v6671_v3 = vmax.f32 %v14100_v31, 0.0  ;;  %v14102_v6 = vadd.f32 %v6241_v54, %v17845_v55 }
 0x5ef   : > { %v6679_v37 = vmax.f32 %v14101_v1, 0.0  ;;  %v6755_v40 = vmul.f32 %v6713_v61, %v6670_v7 }
 0x5f0   : > { %v6680_v10 = vmax.f32 %v14102_v6, 0.0  ;;  %v6756_v29 = vmul.f32 %v6717_v48, %v6671_v3 }
 0x5f1   : > { %v6764_v22 = vmul.f32 %v6713_v61, %v6679_v37 }
 0x5f2   : > { %v6765_v14 = vmul.f32 %v6717_v48, %v6680_v10  ;;  %v6245_v38 = vpop.f32.mrb[48].mxu0 }
 0x5f3   : > { %v6791_v45 = vpack.c.bf16 %v6764_v22, %v6755_v40  ;;  %v14103_v34 = vadd.f32 %v6245_v38, %v17854_v15  ;;  %v6247_v59 = vpop.f32.mrb[49].mxu0 }
 0x5f4   : > { %v6792_v19 = vpack.c.bf16 %v6765_v14, %v6756_v29  ;;  %v14104_v18 = vadd.f32 %v6247_v59, %v17854_v15  ;;  %v6249_v13 = vpop.f32.mrb[50].mxu0 }
 0x5f5   : > { %6809 = vst [vmem:[#allocation2 + $0x8] sm:$0xff] %v6791_v45  ;;  %v6688_v56 = vmax.f32 %v14103_v34, 0.0  ;;  %v14105_v52 = vadd.f32 %v6249_v13, %v17857_v16  ;;  %v6251_v60 = vpop.f32.mrb[51].mxu0  ;;  %7017 = vrot.lane.b32.xlu0 %v6791_v45, %s14737_s24  ;;  %6883 = vrot.lane.b32.xlu1 %v6791_v45, %s14736_s23 }
 0x5f6   : > { %6810 = vst [vmem:[#allocation2 + $0x10] sm:$0xff] %v6792_v19  ;;  %v6689_v58 = vmax.f32 %v14104_v18, 0.0  ;;  %v14106_v27 = vadd.f32 %v6251_v60, %v17857_v16 }
 0x5f7   : > { %v6697_v21 = vmax.f32 %v14105_v52, 0.0  ;;  %v6773_v32 = vmul.f32 %v6713_v61, %v6688_v56 }
 0x5f8   : > { %v6698_v28 = vmax.f32 %v14106_v27, 0.0  ;;  %v6774_v57 = vmul.f32 %v6717_v48, %v6689_v58 }
 0x5f9   : > { %v6782_v35 = vmul.f32 %v6713_v61, %v6697_v21  ;;  %7285 = vrot.lane.b32.xlu0 %v6791_v45, %s14739_s26  ;;  %7151 = vrot.lane.b32.xlu1 %v6791_v45, %s14738_s25 }
 0x5fa   : > { %v6783_v12 = vmul.f32 %v6717_v48, %v6698_v28  ;;  %v6729_v28 = vrot.slane %v17842_v36, %v21424_v42 }
 0x5fb   : > { %v6800_v50 = vpack.c.bf16 %v6782_v35, %v6773_v32 }
 0x5fc   : > { %v6801_v51 = vpack.c.bf16 %v6783_v12, %v6774_v57  ;;  %v6733_v12 = vrot.slane %v17842_v36, %v21425_v2 }
 0x5fd   : > { %6818 = vst [vmem:[#allocation2 + $0x58] sm:$0xff] %v6800_v50  ;;  %6885 = vrot.lane.b32.xlu0 %v6792_v19, %s14736_s23  ;;  %7449 = vrot.lane.b32.xlu1 %v6791_v45, %s14740_s27 }
 0x5fe   : > { %6819 = vst [vmem:[#allocation2 + $0x60] sm:$0xff] %v6801_v51 }
 0x601   : > { %7153 = vrot.lane.b32.xlu0 %v6792_v19, %s14738_s25  ;;  %7573 = vrot.lane.b32.xlu1 %v6791_v45, %s14741_s28 }
 0x605   : > { %7697 = vrot.lane.b32.xlu1 %v6791_v45, %s14742_s11  ;;  %6903 = vrot.lane.b32.xlu0 %v6800_v50, %s14736_s23 }
 0x609   : > { %7821 = vrot.lane.b32.xlu1 %v6791_v45, %s14743_s18  ;;  %7171 = vrot.lane.b32.xlu0 %v6800_v50, %s14738_s25 }
 0x60d   : > { %7019 = vrot.lane.b32.xlu1 %v6792_v19, %s14737_s24  ;;  %7467 = vrot.lane.b32.xlu0 %v6800_v50, %s14740_s27 }
 0x611   : > { %7287 = vrot.lane.b32.xlu1 %v6792_v19, %s14739_s26  ;;  %7591 = vrot.lane.b32.xlu0 %v6800_v50, %s14741_s28 }
 0x615   : > { %7451 = vrot.lane.b32.xlu1 %v6792_v19, %s14740_s27  ;;  %7715 = vrot.lane.b32.xlu0 %v6800_v50, %s14742_s11 }
 0x619   : > { %7575 = vrot.lane.b32.xlu1 %v6792_v19, %s14741_s28  ;;  %7839 = vrot.lane.b32.xlu0 %v6800_v50, %s14743_s18 }
 0x61d   : > { %7699 = vrot.lane.b32.xlu1 %v6792_v19, %s14742_s11  ;;  %7039 = vrot.lane.b32.xlu0 %v6801_v51, %s14737_s24 }
 0x621   : > { %7823 = vrot.lane.b32.xlu1 %v6792_v19, %s14743_s18  ;;  %7307 = vrot.lane.b32.xlu0 %v6801_v51, %s14739_s26 }
 0x625   : > { %7037 = vrot.lane.b32.xlu1 %v6800_v50, %s14737_s24  ;;  %7469 = vrot.lane.b32.xlu0 %v6801_v51, %s14740_s27 }
 0x627   : > { %v6341_v33 = vpop.f32.mrb[44].mxu1 }
 0x628   : > { %v14107_v17 = vadd.f32 %v6341_v33, %v17837_v46  ;;  %v6343_v62 = vpop.f32.mrb[45].mxu1 }
 0x629   : > { %v14108_v30 = vadd.f32 %v6343_v62, %v17837_v46  ;;  %v6345_v0 = vpop.f32.mrb[46].mxu1  ;;  %7305 = vrot.lane.b32.xlu1 %v6800_v50, %s14739_s26  ;;  %7593 = vrot.lane.b32.xlu0 %v6801_v51, %s14741_s28  ;;  %v17951_v62 = vld [vmem:[%s21372_s1 + $0x94] ss:$12 sps:$4 sm:$0xff]  }
 0x62a   : > { %v6672_v26 = vmax.f32 %v14107_v17, 0.0  ;;  %v14109_v47 = vadd.f32 %v6345_v0, %v17845_v55  ;;  %v6347_v8 = vpop.f32.mrb[47].mxu1  ;;  %v17946_v17 = vpop.permute.xlu1 %14468  ;;  %8159 = vmatprep.mubr.bf16.mxu1 %v17951_v62  ;;  %8265 = vmatprep.mubr.bf16.mxu0 %v17951_v62 }
 0x62b   : > { %v6673_v41 = vmax.f32 %v14108_v30, 0.0  ;;  %v14110_v39 = vadd.f32 %v6347_v8, %v17845_v55 }
 0x62c   : > { %v6681_v24 = vmax.f32 %v14109_v47, 0.0  ;;  %v6757_v11 = vmul.f32 %v6721_v20, %v6672_v26 }
 0x62d   : > { %v6682_v4 = vmax.f32 %v14110_v39, 0.0  ;;  %6905 = vrot.lane.b32.xlu1 %v6801_v51, %s14736_s23  ;;  %7717 = vrot.lane.b32.xlu0 %v6801_v51, %s14742_s11  ;;  %v6758_v31 = vmul.f32 %v6725_v9, %v6673_v41 }
 0x62e   : > { %v6766_v23 = vmul.f32 %v6721_v20, %v6681_v24 }
 0x62f   : > { %v6767_v25 = vmul.f32 %v6725_v9, %v6682_v4  ;;  %v6351_v7 = vpop.f32.mrb[48].mxu1 }
 0x630   : > { %v6793_v61 = vpack.c.bf16 %v6766_v23, %v6757_v11  ;;  %v14111_v1 = vadd.f32 %v6351_v7, %v17854_v15  ;;  %v6353_v54 = vpop.f32.mrb[49].mxu1 }
 0x631   : > { %v6794_v3 = vpack.c.bf16 %v6767_v25, %v6758_v31  ;;  %v14112_v48 = vadd.f32 %v6353_v54, %v17854_v15  ;;  %v6355_v6 = vpop.f32.mrb[50].mxu1  ;;  %7173 = vrot.lane.b32.xlu1 %v6801_v51, %s14738_s25  ;;  %7841 = vrot.lane.b32.xlu0 %v6801_v51, %s14743_s18  ;;  %v17944_v51 = vpop.permute.xlu0 %14473 }
 0x632   : > { %6811 = vst [vmem:[#allocation2 + $0x18] sm:$0xff] %v6793_v61  ;;  %v6690_v37 = vmax.f32 %v14111_v1, 0.0  ;;  %v14113_v10 = vadd.f32 %v6355_v6, %v17857_v16  ;;  %v6357_v40 = vpop.f32.mrb[51].mxu1 }
 0x633   : > { %6812 = vst [vmem:[#allocation2 + $0x20] sm:$0xff] %v6794_v3  ;;  %v6691_v22 = vmax.f32 %v14112_v48, 0.0  ;;  %v14114_v29 = vadd.f32 %v6357_v40, %v17857_v16 }
 0x634   : > { %v6699_v14 = vmax.f32 %v14113_v10, 0.0  ;;  %v6775_v45 = vmul.f32 %v6721_v20, %v6690_v37 }
 0x635   : > { %v6700_v38 = vmax.f32 %v14114_v29, 0.0  ;;  %6887 = vrot.lane.b32.xlu1 %v6793_v61, %s14736_s23  ;;  %7453 = vrot.lane.b32.xlu0 %v6793_v61, %s14740_s27  ;;  %v6776_v59 = vmul.f32 %v6725_v9, %v6691_v22  ;;  %v17965_v23 = vpop.permute.xlu0 %14483 }
 0x636   : > { %v6784_v34 = vmul.f32 %v6721_v20, %v6699_v14 }
 0x637   : > { %v6785_v19 = vmul.f32 %v6725_v9, %v6700_v38 }
 0x638   : > { %v17908_v18 = vpack.c.bf16 %v6784_v34, %v6775_v45 }
 0x639   : > { %v17910_v13 = vpack.c.bf16 %v6785_v19, %v6776_v59  ;;  %7021 = vrot.lane.b32.xlu1 %v6793_v61, %s14737_s24  ;;  %7577 = vrot.lane.b32.xlu0 %v6793_v61, %s14741_s28 }
 0x63a   : > { %6820 = vst [vmem:[#allocation2 + $0x68] sm:$0xff] %v17908_v18 }
 0x63b   : > { %6821 = vst [vmem:[#allocation2 + $0x70] sm:$0xff] %v17910_v13 }
 0x63d   : > { %7155 = vrot.lane.b32.xlu1 %v6793_v61, %s14738_s25  ;;  %7701 = vrot.lane.b32.xlu0 %v6793_v61, %s14742_s11 }
 0x641   : > { %7289 = vrot.lane.b32.xlu1 %v6793_v61, %s14739_s26  ;;  %7825 = vrot.lane.b32.xlu0 %v6793_v61, %s14743_s18  ;;  %v17973_v61 = vpop.permute.xlu1 %14478 }
 0x645   : > { %7455 = vrot.lane.b32.xlu1 %v6794_v3, %s14740_s27  ;;  %6889 = vrot.lane.b32.xlu0 %v6794_v3, %s14736_s23 }
 0x649   : > { %7579 = vrot.lane.b32.xlu1 %v6794_v3, %s14741_s28  ;;  %7023 = vrot.lane.b32.xlu0 %v6794_v3, %s14737_s24 }
 0x64d   : > { %7703 = vrot.lane.b32.xlu1 %v6794_v3, %s14742_s11  ;;  %7157 = vrot.lane.b32.xlu0 %v6794_v3, %s14738_s25 }
 0x651   : > { %7827 = vrot.lane.b32.xlu1 %v6794_v3, %s14743_s18  ;;  %7291 = vrot.lane.b32.xlu0 %v6794_v3, %s14739_s26 }
 0x655   : > { %7471 = vrot.lane.b32.xlu1 %v17908_v18, %s14740_s27  ;;  %6907 = vrot.lane.b32.xlu0 %v17908_v18, %s14736_s23 }
 0x656   : > { %v6447_v56 = vpop.f32.mrb[52].mxu0 }
 0x657   : > { %v14115_v52 = vadd.f32 %v6447_v56, %v17837_v46  ;;  %v6449_v60 = vpop.f32.mrb[53].mxu0 }
 0x658   : > { %v14116_v58 = vadd.f32 %v6449_v60, %v17837_v46  ;;  %v6451_v27 = vpop.f32.mrb[54].mxu0 }
 0x659   : > { %v6674_v21 = vmax.f32 %v14115_v52, 0.0  ;;  %v14117_v32 = vadd.f32 %v6451_v27, %v17845_v55  ;;  %v6453_v35 = vpop.f32.mrb[55].mxu0  ;;  %7595 = vrot.lane.b32.xlu1 %v17908_v18, %s14741_s28  ;;  %7041 = vrot.lane.b32.xlu0 %v17908_v18, %s14737_s24 }
 0x65a   : > { %v6675_v57 = vmax.f32 %v14116_v58, 0.0  ;;  %v14118_v50 = vadd.f32 %v6453_v35, %v17845_v55 }
 0x65b   : > { %v6683_v33 = vmax.f32 %v14117_v32, 0.0  ;;  %v6759_v0 = vmul.f32 %v6729_v28, %v6674_v21 }
 0x65c   : > { %v6684_v30 = vmax.f32 %v14118_v50, 0.0  ;;  %v6760_v20 = vmul.f32 %v6733_v12, %v6675_v57 }
 0x65d   : > { %v6768_v26 = vmul.f32 %v6729_v28, %v6683_v33  ;;  %7719 = vrot.lane.b32.xlu1 %v17908_v18, %s14742_s11  ;;  %7175 = vrot.lane.b32.xlu0 %v17908_v18, %s14738_s25 }
 0x65e   : > { %v6769_v47 = vmul.f32 %v6733_v12, %v6684_v30  ;;  %v6457_v8 = vpop.f32.mrb[56].mxu0 }
 0x65f   : > { %v17959_v41 = vpack.c.bf16 %v6768_v26, %v6759_v0  ;;  %v14119_v9 = vadd.f32 %v6457_v8, %v17854_v15  ;;  %v6459_v39 = vpop.f32.mrb[57].mxu0 }
 0x660   : > { %v17962_v24 = vpack.c.bf16 %v6769_v47, %v6760_v20  ;;  %v14120_v4 = vadd.f32 %v6459_v39, %v17854_v15  ;;  %v6461_v11 = vpop.f32.mrb[58].mxu0  ;;  %v6737_v20 = vrot.slane %v17842_v36, %v21426_v44  ;;  %v6741_v39 = vrot.slane %v17842_v36, %v21427_v5 }
 0x661   : > { %6813 = vst [vmem:[#allocation2 + $0x28] sm:$0xff] %v17959_v41  ;;  %v6692_v31 = vmax.f32 %v14119_v9, 0.0  ;;  %v14121_v25 = vadd.f32 %v6461_v11, %v17857_v16  ;;  %v6463_v7 = vpop.f32.mrb[59].mxu0  ;;  %7309 = vrot.lane.b32.xlu1 %v17908_v18, %s14739_s26  ;;  %7311 = vrot.lane.b32.xlu0 %v17910_v13, %s14739_s26 }
 0x662   : > { %6814 = vst [vmem:[#allocation2 + $0x30] sm:$0xff] %v17962_v24  ;;  %v6693_v1 = vmax.f32 %v14120_v4, 0.0  ;;  %v14122_v54 = vadd.f32 %v6463_v7, %v17857_v16 }
 0x663   : > { %v6701_v3 = vmax.f32 %v14121_v25, 0.0  ;;  %v6777_v6 = vmul.f32 %v6729_v28, %v6692_v31 }
 0x664   : > { %v6702_v48 = vmax.f32 %v14122_v54, 0.0  ;;  %v6778_v10 = vmul.f32 %v6733_v12, %v6693_v1 }
 0x665   : > { %v6786_v37 = vmul.f32 %v6729_v28, %v6701_v3  ;;  %7843 = vrot.lane.b32.xlu1 %v17908_v18, %s14743_s18  ;;  %7457 = vrot.lane.b32.xlu0 %v17959_v41, %s14740_s27  ;;  %v14470_v18 = vunpack.i.l.bf16 %v17946_v17 }
 0x666   : > { %v6787_v40 = vmul.f32 %v6733_v12, %v6702_v48 }
 0x667   : > { %v17981_v22 = vpack.c.bf16 %v6786_v37, %v6777_v6  ;;  %v17983_v29 = vpop.permute.xlu0 %7017  ;;  %v6884_v14 = vpop.permute.xlu1 %6883 }
 0x668   : > { %v17985_v38 = vpack.c.bf16 %v6787_v40, %v6778_v10  ;;  %v6921_v52 = vsel %vm468_vm0, %v14470_v18, %v6884_v14 }
 0x669   : > { %6822 = vst [vmem:[#allocation2 + $0x78] sm:$0xff] %v17981_v22  ;;  %6909 = vrot.lane.b32.xlu1 %v17910_v13, %s14736_s23  ;;  %7581 = vrot.lane.b32.xlu0 %v17959_v41, %s14741_s28 }
 0x66a   : > { %6823 = vst [vmem:[#allocation2 + $0x80] sm:$0xff] %v17985_v38 }
 0x66b   : > { %v17993_v45 = vpop.permute.xlu0 %7285  ;;  %v17995_v34 = vpop.permute.xlu1 %7151 }
 0x66d   : > { %7043 = vrot.lane.b32.xlu1 %v17910_v13, %s14737_s24  ;;  %7705 = vrot.lane.b32.xlu0 %v17959_v41, %s14742_s11 }
 0x66f   : > { %v18001_v59 = vpop.permute.xlu0 %6885  ;;  %v18003_v19 = vpop.permute.xlu1 %7449 }
 0x670   : > { %v6922_v56 = vsel %vm468_vm0, %v6884_v14, %v18001_v59 }
 0x671   : > { %7177 = vrot.lane.b32.xlu1 %v17910_v13, %s14738_s25  ;;  %7829 = vrot.lane.b32.xlu0 %v17959_v41, %s14743_s18 }
 0x672   : > { %8127 = vmatprep.subr.bf16.mxu1 %v6922_v56 }
 0x673   : > { %v18013_v60 = vpop.permute.xlu0 %7153  ;;  %v18015_v58 = vpop.permute.xlu1 %7573  ;;  %8128 = vmatpush1.bf16.msra.mxu1 %v6921_v52 }
 0x675   : > { %7473 = vrot.lane.b32.xlu1 %v17910_v13, %s14740_s27  ;;  %6893 = vrot.lane.b32.xlu0 %v17962_v24, %s14736_s23 }
 0x677   : > { %v18021_v27 = vpop.permute.xlu0 %6903  ;;  %v18023_v21 = vpop.permute.xlu1 %7697 }
 0x679   : > { %7597 = vrot.lane.b32.xlu1 %v17910_v13, %s14741_s28  ;;  %7027 = vrot.lane.b32.xlu0 %v17962_v24, %s14737_s24 }
 0x67b   : > { %v18029_v28 = vpop.permute.xlu0 %7171  ;;  %v18031_v32 = vpop.permute.xlu1 %7821 }
 0x67d   : > { %7721 = vrot.lane.b32.xlu1 %v17910_v13, %s14742_s11  ;;  %7161 = vrot.lane.b32.xlu0 %v17962_v24, %s14738_s25 }
 0x67e   : > { %v6553_v35 = vpop.f32.mrb[52].mxu1 }
 0x67f   : > { %v14123_v57 = vadd.f32 %v6553_v35, %v17837_v46  ;;  %v6555_v12 = vpop.f32.mrb[53].mxu1  ;;  %v18038_v50 = vpop.permute.xlu0 %7467 }
 0x680   : > { %v14124_v33 = vadd.f32 %v6555_v12, %v17837_v46  ;;  %v6557_v30 = vpop.f32.mrb[54].mxu1  ;;  %v18041_v0 = vpop.permute.xlu1 %7019 }
 0x681   : > { %v6676_v26 = vmax.f32 %v14123_v57, 0.0  ;;  %v14125_v47 = vadd.f32 %v6557_v30, %v17845_v55  ;;  %v6559_v8 = vpop.f32.mrb[55].mxu1  ;;  %7845 = vrot.lane.b32.xlu1 %v17910_v13, %s14743_s18  ;;  %7295 = vrot.lane.b32.xlu0 %v17962_v24, %s14739_s26 }
 0x682   : > { %v6677_v9 = vmax.f32 %v14124_v33, 0.0  ;;  %v14126_v4 = vadd.f32 %v6559_v8, %v17845_v55 }
 0x683   : > { %v6685_v11 = vmax.f32 %v14125_v47, 0.0  ;;  %v18053_v31 = vpop.permute.xlu0 %7591  ;;  %v6761_v1 = vmul.f32 %v6737_v20, %v6676_v26 }
 0x684   : > { %v6686_v25 = vmax.f32 %v14126_v4, 0.0  ;;  %v18055_v7 = vpop.permute.xlu1 %7287  ;;  %v6762_v13 = vmul.f32 %v6741_v39, %v6677_v9 }
 0x685   : > { %v6770_v54 = vmul.f32 %v6737_v20, %v6685_v11  ;;  %6891 = vrot.lane.b32.xlu1 %v17959_v41, %s14736_s23  ;;  %7475 = vrot.lane.b32.xlu0 %v17981_v22, %s14740_s27 }
 0x686   : > { %v6771_v3 = vmul.f32 %v6741_v39, %v6686_v25  ;;  %v6563_v48 = vpop.f32.mrb[56].mxu1 }
 0x687   : > { %v18061_v36 = vpack.c.bf16 %v6770_v54, %v6761_v1  ;;  %v14127_v6 = vadd.f32 %v6563_v48, %v17854_v15  ;;  %v6565_v37 = vpop.f32.mrb[57].mxu1  ;;  %v18064_v10 = vpop.permute.xlu0 %7715 }
 0x688   : > { %v18066_v40 = vpack.c.bf16 %v6771_v3, %v6762_v13  ;;  %v14128_v14 = vadd.f32 %v6565_v37, %v17854_v15  ;;  %v6567_v18 = vpop.f32.mrb[58].mxu1  ;;  %v18069_v56 = vpop.permute.xlu1 %7451 }
 0x689   : > { %6815 = vst [vmem:[#allocation2 + $0x38] sm:$0xff] %v18061_v36  ;;  %v6694_v52 = vmax.f32 %v14127_v6, 0.0  ;;  %v14129_v35 = vadd.f32 %v6567_v18, %v17857_v16  ;;  %v6569_v57 = vpop.f32.mrb[59].mxu1  ;;  %7025 = vrot.lane.b32.xlu1 %v17959_v41, %s14737_s24  ;;  %7599 = vrot.lane.b32.xlu0 %v17981_v22, %s14741_s28 }
 0x68a   : > { %6816 = vst [vmem:[#allocation2 + $0x40] sm:$0xff] %v18066_v40  ;;  %v6695_v12 = vmax.f32 %v14128_v14, 0.0  ;;  %v14130_v33 = vadd.f32 %v6569_v57, %v17857_v16 }
 0x68b   : > { %v6703_v30 = vmax.f32 %v14129_v35, 0.0  ;;  %v18079_v26 = vpop.permute.xlu0 %7839  ;;  %v6779_v9 = vmul.f32 %v6737_v20, %v6694_v52 }
 0x68c   : > { %v6704_v47 = vmax.f32 %v14130_v33, 0.0  ;;  %v18081_v8 = vpop.permute.xlu1 %7575  ;;  %v6780_v11 = vmul.f32 %v6741_v39, %v6695_v12 }
 0x68d   : > { %v6788_v4 = vmul.f32 %v6737_v20, %v6703_v30  ;;  %7159 = vrot.lane.b32.xlu1 %v17959_v41, %s14738_s25  ;;  %7723 = vrot.lane.b32.xlu0 %v17981_v22, %s14742_s11 }
 0x68e   : > { %v6789_v25 = vmul.f32 %v6741_v39, %v6704_v47  ;;  %v18087_v1 = vpop.f32.mrb[60].mxu1 }
 0x68f   : > { %v18089_v54 = vpack.c.bf16 %v6788_v4, %v6779_v9  ;;  %v18091_v13 = vpop.permute.xlu0 %7039  ;;  %v6655_v3 = vpop.f32.mrb[61].mxu1  ;;  %v14471_v9 = vunpack.i.h.bf16 %v17946_v17 }
 0x690   : > { %v18093_v48 = vpack.c.bf16 %v6789_v25, %v6780_v11  ;;  %v18095_v6 = vpop.permute.xlu1 %7699  ;;  %v18097_v20 = vpop.f32.mrb[62].mxu1 }
 0x691   : > { %6824 = vst [vmem:[#allocation2 + $0x88] sm:$0xff] %v18089_v54  ;;  %7293 = vrot.lane.b32.xlu1 %v17959_v41, %s14739_s26  ;;  %7847 = vrot.lane.b32.xlu0 %v17981_v22, %s14743_s18  ;;  %v6658_v39 = vpop.f32.mrb[63].mxu1  ;;  %v6930_v17 = vsel %vm468_vm0, %v14471_v9, %v18021_v27 }
 0x692   : > { %6825 = vst [vmem:[#allocation2 + $0x90] sm:$0xff] %v18093_v48 }
 0x693   : > { %v18105_v37 = vpop.permute.xlu0 %7307 }
 0x694   : > { %v18107_v14 = vpop.permute.xlu1 %7823 }
 0x695   : > { %7459 = vrot.lane.b32.xlu1 %v17962_v24, %s14740_s27  ;;  %6913 = vrot.lane.b32.xlu0 %v17985_v38, %s14736_s23 }
 0x697   : > { %v18113_v18 = vpop.permute.xlu0 %7469 }
 0x698   : > { %v7038_v52 = vpop.permute.xlu1 %7037 }
 0x699   : > { %6911 = vrot.lane.b32.xlu1 %v17981_v22, %s14736_s23  ;;  %7047 = vrot.lane.b32.xlu0 %v17985_v38, %s14737_s24 }
 0x69b   : > { %v18119_v41 = vpop.permute.xlu0 %7593 }
 0x69c   : > { %v18121_v35 = vpop.permute.xlu1 %7305 }
 0x69d   : > { %v13574_v57 = vpop.f32.mrb[60].mxu0  ;;  %7583 = vrot.lane.b32.xlu1 %v17962_v24, %s14741_s28  ;;  %7181 = vrot.lane.b32.xlu0 %v17985_v38, %s14738_s25 }
 0x69e   : > { %v13575_v12 = vpop.f32.mrb[61].mxu0 }
 0x69f   : > { %v13576_v33 = vadd.f32 %v13575_v12, %v13574_v57  ;;  %v13577_v30 = vpop.f32.mrb[62].mxu0  ;;  %v18127_v47 = vpop.permute.xlu0 %7717  ;;  %v14475_v57 = vunpack.i.l.bf16 %v17944_v51 }
 0x6a0   : > { %v13578_v4 = vpop.f32.mrb[63].mxu0  ;;  %v18130_v11 = vpop.permute.xlu1 %6905 }
 0x6a1   : > { %v13579_v25 = vadd.f32 %v13578_v4, %v13577_v30  ;;  %v6607_v5 = vadd.f32 %v13576_v33, %v17837_v46  ;;  %v6931_v44 = vsel %vm468_vm0, %v18021_v27, %v18130_v11  ;;  %7045 = vrot.lane.b32.xlu1 %v17981_v22, %s14737_s24  ;;  %7315 = vrot.lane.b32.xlu0 %v17985_v38, %s14739_s26 }
 0x6a2   : > { %8129 = vmatprep.subr.bf16.mxu1 %v6931_v44  ;;  %v7056_v46 = vsel %vm664_vm1, %v17983_v29, %v18041_v0  ;;  %v7055_v44 = vsel %vm664_vm1, %v14475_v57, %v17983_v29 }
 0x6a3   : > { %v6656_v12 = vadd.f32 %v6655_v3, %v6607_v5  ;;  %v6610_v33 = vadd.f32 %v13579_v25, %v17845_v55  ;;  %v18147_v30 = vpop.permute.xlu0 %7841  ;;  %8130 = vmatpush1.bf16.msra.mxu1 %v6930_v17  ;;  %v13423_v5 = vld [vmem:[%s21378_s7 + $0x8] ss:$0 sm:$0xff]  ;;  %v14476_v17 = vunpack.i.h.bf16 %v17944_v51 }
 0x6a4   : > { %v18149_v4 = vpop.permute.xlu1 %7173  ;;  %8131 = vmatprep.subr.bf16.mxu1 %v7056_v46 }
 0x6a5   : > { %v6678_v2 = vmax.f32 %v6656_v12, 0.0  ;;  %v6659_v42 = vadd.f32 %v6658_v39, %v6610_v33  ;;  %v13580_v63 = vpop.f32.mrb[64].mxu0  ;;  %7179 = vrot.lane.b32.xlu1 %v17981_v22, %s14738_s25  ;;  %7461 = vrot.lane.b32.xlu0 %v18061_v36, %s14740_s27  ;;  %v7065_v39 = vsel %vm664_vm1, %v7038_v52, %v18091_v13 }
 0x6a6   : > { %v13581_v55 = vpop.f32.mrb[65].mxu0 }
 0x6a7   : > { %v6687_v27 = vmax.f32 %v6659_v42, 0.0  ;;  %v13582_v3 = vadd.f32 %v13581_v55, %v13580_v63  ;;  %v13583_v9 = vpop.f32.mrb[66].mxu0  ;;  %v18162_v25 = vpop.permute.xlu0 %7453  ;;  %8132 = vmatpush1.bf16.msra.mxu1 %v7055_v44  ;;  %v6763_v29 = vmul.f32 %v13423_v5, %v6678_v2  ;;  %v7064_v63 = vsel %vm664_vm1, %v14476_v17, %v7038_v52 }
 0x6a8   : > { %v13584_v46 = vpop.f32.mrb[67].mxu0  ;;  %v6888_v12 = vpop.permute.xlu1 %6887  ;;  %8133 = vmatprep.subr.bf16.mxu1 %v7065_v39  ;;  %v7190_v42 = vsel %vm859_vm2, %v17995_v34, %v18013_v60 }
 0x6a9   : > { %v6772_v57 = vmul.f32 %v13423_v5, %v6687_v27  ;;  %v6615_v33 = vadd.f32 %v13582_v3, %v17854_v15  ;;  %v13585_v53 = vadd.f32 %v13584_v46, %v13583_v9  ;;  %7313 = vrot.lane.b32.xlu1 %v17981_v22, %s14739_s26  ;;  %7585 = vrot.lane.b32.xlu0 %v18061_v36, %s14741_s28  ;;  %v14480_v15 = vunpack.i.l.bf16 %v17973_v61 }
 0x6aa   : > { %v14481_v9 = vunpack.i.h.bf16 %v17973_v61  ;;  %v7324_v61 = vsel %vm1054_vm3, %v17993_v45, %v18055_v7 }
 0x6ab   : > { %v6799_v51 = vpack.c.bf16 %v6772_v57, %v6763_v29  ;;  %v6664_v44 = vadd.f32 %v18087_v1, %v6615_v33  ;;  %v6618_v2 = vadd.f32 %v13585_v53, %v17857_v16  ;;  %v18176_v55 = vpop.permute.xlu0 %7577  ;;  %8134 = vmatpush1.bf16.msra.mxu1 %v7064_v63  ;;  %v7189_v1 = vsel %vm859_vm2, %v14480_v15, %v17995_v34 }
 0x6ac   : > { %v18179_v22 = vpop.permute.xlu1 %7021  ;;  %8135 = vmatprep.subr.bf16.mxu1 %v7190_v42  ;;  %v7199_v16 = vsel %vm859_vm2, %v18029_v28, %v18149_v4  ;;  %v14485_v34 = vunpack.i.l.bf16 %v17965_v23  ;;  %v7198_v46 = vsel %vm859_vm2, %v14481_v9, %v18029_v28  ;;  %v7333_v63 = vsel %vm1054_vm3, %v18121_v35, %v18105_v37 }
 0x6ad   : > { %6817 = vst.msk [vmem:[#allocation2 + $0x48] sm:$0xff] %vm513_vm9, %v6799_v51  ;;  %v6696_v52 = vmax.f32 %v6664_v44, 0.0  ;;  %v6667_v27 = vadd.f32 %v18097_v20, %v6618_v2  ;;  %7477 = vrot.lane.b32.xlu1 %v17985_v38, %s14740_s27  ;;  %6897 = vrot.lane.b32.xlu0 %v18066_v40, %s14736_s23  ;;  %v14486_v51 = vunpack.i.h.bf16 %v17965_v23  ;;  %v7486_v9 = vsel %vm1369_vm4, %v18069_v56, %v18162_v25 }
 0x6ae   : > { %v7323_v28 = vsel %vm1054_vm3, %v14485_v34, %v17993_v45  ;;  %v6923_v45 = vsel %vm468_vm0, %v18001_v59, %v6888_v12  ;;  %v7377_v59 = vld [vmem:[#allocation2 + $0x8] sm:$0xff]  ;;  %v7485_v34 = vsel %vm1369_vm4, %v18003_v19, %v18069_v56  ;;  %v7610_v19 = vsel %vm1552_vm5, %v18081_v8, %v18176_v55 }
 0x6af   : > { %v6705_v53 = vmax.f32 %v6667_v27, 0.0  ;;  %v18192_v3 = vpop.permute.xlu0 %7701  ;;  %8136 = vmatpush1.bf16.msra.mxu1 %v7189_v1  ;;  %v6781_v39 = vmul.f32 %v13423_v5, %v6696_v52  ;;  %v7332_v15 = vsel %vm1054_vm3, %v14486_v51, %v18121_v35  ;;  %v7378_v52 = vld [vmem:[#allocation2 + $0x10] sm:$0xff] }
 0x6b0   : > { %v18195_v20 = vpop.permute.xlu1 %7155  ;;  %8137 = vmatprep.subr.bf16.mxu1 %v7199_v16  ;;  %v7386_v16 = vld [vmem:[#allocation2 + $0x58] sm:$0xff] }
 0x6b1   : > { %v6790_v17 = vmul.f32 %v13423_v5, %v6705_v53  ;;  %7601 = vrot.lane.b32.xlu1 %v17985_v38, %s14741_s28  ;;  %7031 = vrot.lane.b32.xlu0 %v18066_v40, %s14737_s24 }
 0x6b3   : > { %v6808_v29 = vpack.c.bf16 %v6790_v17, %v6781_v39  ;;  %v18207_v57 = vpop.permute.xlu0 %7825  ;;  %8138 = vmatpush1.bf16.msra.mxu1 %v7198_v46 }
 0x6b4   : > { %v18209_v5 = vpop.permute.xlu1 %7289  ;;  %8139 = vmatprep.subr.bf16.mxu1 %v7324_v61  ;;  %v18211_v33 = vld [vmem:[#allocation2 + $0x48] sm:$0xff] }
 0x6b5   : > { %6826 = vst.msk [vmem:[#allocation2 + $0x98] sm:$0xff] %vm513_vm9, %v6808_v29  ;;  %6895 = vrot.lane.b32.xlu1 %v18061_v36, %s14736_s23  ;;  %7403 = vst.msk [vmem:[#allocation4 + $0x280] sm:$0xff] %vm513_vm9, %v18211_v33  ;;  %7165 = vrot.lane.b32.xlu0 %v18066_v40, %s14738_s25 }
 0x6b7   : > { %v18225_v42 = vpop.permute.xlu0 %6889  ;;  %8140 = vmatpush1.bf16.msra.mxu1 %v7323_v28  ;;  %v7493_v28 = vsel %vm1369_vm4, %v18038_v50, %v18113_v18  ;;  %v7609_v50 = vsel %vm1552_vm5, %v18015_v58, %v18081_v8  ;;  %v7617_v58 = vsel %vm1552_vm5, %v18053_v31, %v18119_v41  ;;  %v7734_v8 = vsel %vm1735_vm6, %v18095_v6, %v18192_v3 }
 0x6b8   : > { %v6924_v44 = vsel %vm468_vm0, %v6888_v12, %v18225_v42  ;;  %v18230_v2 = vpop.permute.xlu1 %7455  ;;  %8141 = vmatprep.subr.bf16.mxu1 %v7333_v63  ;;  %v7387_v12 = vld [vmem:[#allocation2 + $0x60] sm:$0xff]  ;;  %v7733_v31 = vsel %vm1735_vm6, %v18023_v21, %v18095_v6  ;;  %v7741_v21 = vsel %vm1735_vm6, %v18064_v10, %v18127_v47  ;;  %v18342_v6 = vld [vmem:[%s21372_s1 + $0x90] ss:$12 sps:$4 sm:$0xff]  }
 0x6b9   : > { %7029 = vrot.lane.b32.xlu1 %v18061_v36, %s14737_s24  ;;  %8233 = vmatprep.subr.bf16.mxu0 %v6924_v44 }
 0x6ba   : > { %7479 = vrot.lane.b32.xlu0 %v18089_v54, %s14740_s27  ;;  %8234 = vmatpush1.bf16.msra.mxu0 %v6923_v45 }
 0x6bb   : > { %v18240_v23 = vpop.permute.xlu0 %7023  ;;  %8142 = vmatpush1.bf16.msra.mxu1 %v7332_v15 }
 0x6bc   : > { %v18242_v27 = vpop.permute.xlu1 %7579  ;;  %8143 = vmatprep.subr.bf16.mxu1 %v7378_v52  ;;  %v7394_v1 = vld [vmem:[#allocation2 + $0x98] sm:$0xff] }
 0x6bd   : > { %7163 = vrot.lane.b32.xlu1 %v18061_v36, %s14738_s25  ;;  %7412 = vst.msk [vmem:[#allocation4 + $0x2c8] sm:$0xff] %vm513_vm9, %v7394_v1 }
 0x6be   : > { %7603 = vrot.lane.b32.xlu0 %v18089_v54, %s14741_s28 }
 0x6bf   : > { %v18249_v35 = vpop.permute.xlu0 %7157  ;;  %8144 = vmatpush1.bf16.msra.mxu1 %v7377_v59  ;;  %v7858_v59 = vsel %vm1918_vm7, %v18107_v14, %v18207_v57 }
 0x6c0   : > { %v18251_v53 = vpop.permute.xlu1 %7703  ;;  %8145 = vmatprep.subr.bf16.mxu1 %v7387_v12 }
 0x6c1   : > { %6915 = vrot.lane.b32.xlu1 %v18089_v54, %s14736_s23 }
 0x6c2   : > { %6917 = vrot.lane.b32.xlu0 %v18093_v48, %s14736_s23 }
 0x6c3   : > { %v18260_v39 = vpop.permute.xlu0 %7291  ;;  %8146 = vmatpush1.bf16.msra.mxu1 %v7386_v16 }
 0x6c4   : > { %v18262_v17 = vpop.permute.xlu1 %7827  ;;  %8147 = vmatprep.subr.bf16.mxu1 %v7486_v9  ;;  %v18364_v9 = vld [vmem:[%s21372_s1 + $0xac] ss:$12 sps:$4 sm:$0xff]  }
 0x6c5   : > { %7707 = vrot.lane.b32.xlu1 %v17962_v24, %s14742_s11 }
 0x6c6   : > { %7709 = vrot.lane.b32.xlu0 %v18061_v36, %s14742_s11 }
 0x6c7   : > { %v6908_v46 = vpop.permute.xlu0 %6907  ;;  %8148 = vmatpush1.bf16.msra.mxu1 %v7485_v34 }
 0x6c8   : > { %v18271_v61 = vpop.permute.xlu1 %7471  ;;  %v6932_v34 = vsel %vm468_vm0, %v18130_v11, %v6908_v46  ;;  %v18389_v11 = vld [vmem:[%s21372_s1 + $0xa8] ss:$12 sps:$4 sm:$0xff]  }
 0x6c9   : > { %v7494_v29 = vsel %vm1369_vm4, %v18113_v18, %v18271_v61  ;;  %7049 = vrot.lane.b32.xlu1 %v18089_v54, %s14737_s24 }
 0x6ca   : > { %7051 = vrot.lane.b32.xlu0 %v18093_v48, %s14737_s24  ;;  %8149 = vmatprep.subr.bf16.mxu1 %v7494_v29 }
 0x6cb   : > { %v18286_v56 = vpop.permute.xlu0 %7041  ;;  %8150 = vmatpush1.bf16.msra.mxu1 %v7493_v28  ;;  %v7192_v28 = vsel %vm859_vm2, %v18195_v20, %v18249_v35 }
 0x6cc   : > { %v18288_v63 = vpop.permute.xlu1 %7595  ;;  %8151 = vmatprep.subr.bf16.mxu1 %v7610_v19 }
 0x6cd   : > { %7183 = vrot.lane.b32.xlu1 %v18089_v54, %s14738_s25  ;;  %v7618_v18 = vsel %vm1552_vm5, %v18119_v41, %v18288_v63 }
 0x6ce   : > { %7727 = vrot.lane.b32.xlu0 %v18089_v54, %s14742_s11 }
 0x6cf   : > { %v18300_v51 = vpop.permute.xlu0 %7175  ;;  %8152 = vmatpush1.bf16.msra.mxu1 %v7609_v50  ;;  %v18419_v50 = vld [vmem:[#allocation2 + $0x98] sm:$0xff] }
 0x6d0   : > { %v18302_v44 = vpop.permute.xlu1 %7719  ;;  %8153 = vmatprep.subr.bf16.mxu1 %v7618_v18 }
 0x6d1   : > { %7725 = vrot.lane.b32.xlu1 %v17985_v38, %s14742_s11  ;;  %v7742_v41 = vsel %vm1735_vm6, %v18127_v47, %v18302_v44  ;;  %v7857_v47 = vsel %vm1918_vm7, %v18031_v32, %v18107_v14  ;;  %v7058_v32 = vsel %vm664_vm1, %v18179_v22, %v18240_v23  ;;  %v7865_v14 = vsel %vm1918_vm7, %v18079_v26, %v18147_v30 }
 0x6d2   : > { %7185 = vrot.lane.b32.xlu0 %v18093_v48, %s14738_s25 }
 0x6d3   : > { %v18314_v45 = vpop.permute.xlu0 %7311  ;;  %8154 = vmatpush1.bf16.msra.mxu1 %v7617_v58 }
 0x6d4   : > { %v18316_v15 = vpop.permute.xlu1 %7309  ;;  %8155 = vmatprep.subr.bf16.mxu1 %v7734_v8 }
 0x6d5   : > { %7297 = vrot.lane.b32.xlu1 %v18061_v36, %s14739_s26 }
 0x6d6   : > { %7299 = vrot.lane.b32.xlu0 %v18066_v40, %s14739_s26 }
 0x6d7   : > { %v18328_v52 = vpop.permute.xlu0 %7457  ;;  %8156 = vmatpush1.bf16.msra.mxu1 %v7733_v31  ;;  %v7326_v31 = vsel %vm1054_vm3, %v18209_v5, %v18260_v39 }
 0x6d8   : > { %v18330_v1 = vpop.permute.xlu1 %7843  ;;  %8157 = vmatprep.subr.bf16.mxu1 %v7742_v41 }
 0x6d9   : > { %7317 = vrot.lane.b32.xlu1 %v18089_v54, %s14739_s26 }
 0x6da   : > { %7319 = vrot.lane.b32.xlu0 %v18093_v48, %s14739_s26 }
 0x6db   : > { %v18347_v12 = vpop.permute.xlu0 %7581  ;;  %8158 = vmatpush1.bf16.msra.mxu1 %v7741_v21 }
 0x6dc   : > { %v18349_v16 = vpop.permute.xlu1 %6909  ;;  %8180 = vmatprep.subr.bf16.mxu1 %v7858_v59  ;;  %v7335_v59 = vsel %vm1054_vm3, %v18316_v15, %v18314_v45 }
 0x6dd   : > { %v6933_v10 = vsel %vm468_vm0, %v6908_v46, %v18349_v16  ;;  %7831 = vrot.lane.b32.xlu1 %v17962_v24, %s14743_s18  ;;  %v7866_v24 = vsel %vm1918_vm7, %v18147_v30, %v18330_v1  ;;  %v7057_v46 = vsel %vm664_vm1, %v18041_v0, %v18179_v22  ;;  %v7066_v0 = vsel %vm664_vm1, %v18091_v13, %v18286_v56  ;;  %v18411_v22 = vld [vmem:[#allocation2] sm:$0xff] }
 0x6de   : > { %7833 = vrot.lane.b32.xlu0 %v18061_v36, %s14743_s18  ;;  %8160 = vmatmul.mubr.bf16.vlgmr.msra.gmra.mrb[64].mxu1 %v18342_v6  ;;  %v18428_v13 = vld [vmem:[%s21372_s1 + $0x98] ss:$12 sps:$4 sm:$0xff]  }
 0x6df   : > { %v18371_v29 = vpop.permute.xlu0 %7705  ;;  %8235 = vmatprep.subr.bf16.mxu0 %v6933_v10  ;;  %8181 = vmatpush1.bf16.msra.mxu1 %v7857_v47 }
 0x6e0   : > { %v18376_v36 = vpop.permute.xlu1 %7043  ;;  %8236 = vmatpush1.bf16.msra.mxu0 %v6932_v34  ;;  %8182 = vmatprep.subr.bf16.mxu1 %v7866_v24  ;;  %v7380_v34 = vld [vmem:[#allocation2 + $0x20] sm:$0xff] }
 0x6e1   : > { %7849 = vrot.lane.b32.xlu1 %v17985_v38, %s14743_s18  ;;  %8237 = vmatprep.subr.bf16.mxu0 %v7058_v32  ;;  %v7067_v26 = vsel %vm664_vm1, %v18286_v56, %v18376_v36  ;;  %v7191_v56 = vsel %vm859_vm2, %v18013_v60, %v18195_v20  ;;  %v7200_v60 = vsel %vm859_vm2, %v18149_v4, %v18300_v51  ;;  %v18464_v4 = vld [vmem:[%s21372_s1 + $0xb0] ss:$12 sps:$4 sm:$0xff]  }
 0x6e2   : > { %7851 = vrot.lane.b32.xlu0 %v18089_v54, %s14743_s18  ;;  %8169 = vmatprep.mubr.bf16.mxu1 %v18364_v9 }
 0x6e3   : > { %v18394_v38 = vpop.permute.xlu0 %7829  ;;  %8183 = vmatpush1.bf16.msra.mxu1 %v7865_v14  ;;  %v7389_v14 = vld [vmem:[#allocation2 + $0x70] sm:$0xff] }
 0x6e4   : > { %v18399_v30 = vpop.permute.xlu1 %7177  ;;  %8238 = vmatpush1.bf16.msra.mxu0 %v7057_v46  ;;  %v7388_v46 = vld [vmem:[#allocation2 + $0x68] sm:$0xff] }
 0x6e5   : > { %7463 = vrot.lane.b32.xlu1 %v18066_v40, %s14740_s27  ;;  %8239 = vmatprep.subr.bf16.mxu0 %v7067_v26  ;;  %v7201_v58 = vsel %vm859_vm2, %v18300_v51, %v18399_v30  ;;  %v7325_v51 = vsel %vm1054_vm3, %v18055_v7, %v18209_v5  ;;  %v7334_v7 = vsel %vm1054_vm3, %v18105_v37, %v18316_v15 }
 0x6e6   : > { %7465 = vrot.lane.b32.xlu0 %v18211_v33, %s14740_s27  ;;  %8170 = vmatmul.mubr.bf16.gmra.mrb[68].mxu1 %v18389_v11  ;;  %v7488_v26 = vsel %vm1369_vm4, %v18230_v2, %v18328_v52 }
 0x6e7   : > { %v18409_v54 = vpop.permute.xlu0 %6893  ;;  %8212 = vmatprep.mubr.bf16.mxu1 %v18411_v22 }
 0x6e8   : > { %v18417_v19 = vpop.permute.xlu1 %7473  ;;  %8240 = vmatpush1.bf16.msra.mxu0 %v7066_v0 }
 0x6e9   : > { %7481 = vrot.lane.b32.xlu1 %v18093_v48, %s14740_s27  ;;  %8241 = vmatprep.subr.bf16.mxu0 %v7192_v28 }
 0x6ea   : > { %7483 = vrot.lane.b32.xlu0 %v18419_v50, %s14740_s27 }
 0x6eb   : > { %v18433_v18 = vpop.permute.xlu0 %7027 }
 0x6ec   : > { %v18438_v8 = vpop.permute.xlu1 %7597  ;;  %8242 = vmatpush1.bf16.msra.mxu0 %v7191_v56 }
 0x6ed   : > { %7587 = vrot.lane.b32.xlu1 %v18066_v40, %s14741_s28  ;;  %8243 = vmatprep.subr.bf16.mxu0 %v7201_v58 }
 0x6ee   : > { %7589 = vrot.lane.b32.xlu0 %v18211_v33, %s14741_s28  ;;  %13442 = vmatmul.mubr.msk.bf16.vlgmr.msra.gmra.mrb[64].mxu1 %vm2183_vm8, %v18428_v13 }
 0x6ef   : > { %v18449_v20 = vpop.permute.xlu0 %7161  ;;  %8222 = vmatprep.mubr.bf16.mxu1 %v18411_v22 }
 0x6f0   : > { %v18455_v41 = vpop.permute.xlu1 %7721  ;;  %8244 = vmatpush1.bf16.msra.mxu0 %v7200_v60 }
 0x6f1   : > { %7605 = vrot.lane.b32.xlu1 %v18093_v48, %s14741_s28  ;;  %8245 = vmatprep.subr.bf16.mxu0 %v7326_v31 }
 0x6f2   : > { %7607 = vrot.lane.b32.xlu0 %v18419_v50, %s14741_s28 }
 0x6f3   : > { %v18469_v21 = vpop.permute.xlu0 %7295 }
 0x6f4   : > { %v18474_v10 = vpop.permute.xlu1 %7845  ;;  %8246 = vmatpush1.bf16.msra.mxu0 %v7325_v51 }
 0x6f5   : > { %7711 = vrot.lane.b32.xlu1 %v18066_v40, %s14742_s11  ;;  %8247 = vmatprep.subr.bf16.mxu0 %v7335_v59 }
 0x6f6   : > { %7713 = vrot.lane.b32.xlu0 %v18211_v33, %s14742_s11  ;;  %13443 = vmatmul.mubr.msk.bf16.gmra.mrb[68].mxu1 %vm2183_vm8, %v18464_v4 }
 0x6f7   : > { %v18485_v5 = vpop.permute.xlu0 %7475  ;;  %8371 = vmatprep.mubr.bf16.mxu1 %v17951_v62  ;;  %v7379_v62 = vld [vmem:[#allocation2 + $0x18] sm:$0xff] }
 0x6f8   : > { %v6892_v47 = vpop.permute.xlu1 %6891  ;;  %8248 = vmatpush1.bf16.msra.mxu0 %v7334_v7  ;;  %v7496_v56 = vsel %vm1369_vm4, %v18417_v19, %v18485_v5 }
 0x6f9   : > { %v6925_v24 = vsel %vm468_vm0, %v18225_v42, %v6892_v47  ;;  %v6926_v32 = vsel %vm468_vm0, %v6892_v47, %v18409_v54  ;;  %7729 = vrot.lane.b32.xlu1 %v18093_v48, %s14742_s11  ;;  %8249 = vmatprep.subr.bf16.mxu0 %v7380_v34 }
 0x6fa   : > { %7731 = vrot.lane.b32.xlu0 %v18419_v50, %s14742_s11  ;;  %8339 = vmatprep.subr.bf16.mxu1 %v6926_v32 }
 0x6fb   : > { %v18496_v37 = vpop.permute.xlu0 %7599  ;;  %8340 = vmatpush1.bf16.msra.mxu1 %v6925_v24  ;;  %v7735_v24 = vsel %vm1735_vm6, %v18192_v3, %v18251_v53  ;;  %v13434_v3 = vld [vmem:[%s21373_s2 + $0x70] sm:$0xff] }
 0x6fc   : > { %v7026_v15 = vpop.permute.xlu1 %7025  ;;  %8250 = vmatpush1.bf16.msra.mxu0 %v7379_v62  ;;  %v7620_v31 = vsel %vm1552_vm5, %v18438_v8, %v18496_v37 }
 0x6fd   : > { %7835 = vrot.lane.b32.xlu1 %v18066_v40, %s14743_s18  ;;  %8251 = vmatprep.subr.bf16.mxu0 %v7389_v14  ;;  %v7487_v40 = vsel %vm1369_vm4, %v18162_v25, %v18230_v2  ;;  %v7612_v2 = vsel %vm1552_vm5, %v18242_v27, %v18347_v12 }
 0x6fe   : > { %7837 = vrot.lane.b32.xlu0 %v18211_v33, %s14743_s18 }
 0x6ff   : > { %v18502_v42 = vpop.permute.xlu0 %7723 }
 0x700   : > { %v18507_v0 = vpop.permute.xlu1 %7159  ;;  %8252 = vmatpush1.bf16.msra.mxu0 %v7388_v46  ;;  %v13435_v46 = vld [vmem:[%s21373_s2 + $0x78] sm:$0xff] }
 0x701   : > { %7853 = vrot.lane.b32.xlu1 %v18093_v48, %s14743_s18  ;;  %8253 = vmatprep.subr.bf16.mxu0 %v7488_v26  ;;  %v7495_v48 = vsel %vm1369_vm4, %v18271_v61, %v18417_v19  ;;  %v7611_v61 = vsel %vm1552_vm5, %v18176_v55, %v18242_v27  ;;  %v7619_v55 = vsel %vm1552_vm5, %v18288_v63, %v18438_v8  ;;  %v13432_v8 = vld [vmem:[%s21373_s2 + $0x60] sm:$0xff] }
 0x702   : > { %7855 = vrot.lane.b32.xlu0 %v18419_v50, %s14743_s18  ;;  %v7060_v27 = vsel %vm664_vm1, %v7026_v15, %v18433_v18  ;;  %v7059_v63 = vsel %vm664_vm1, %v18240_v23, %v7026_v15  ;;  %v7744_v23 = vsel %vm1735_vm6, %v18455_v41, %v18502_v42  ;;  %v7194_v14 = vsel %vm859_vm2, %v18507_v0, %v18449_v20 }
 0x703   : > { %v18516_v28 = vpop.permute.xlu0 %7847  ;;  %v7860_v26 = vsel %vm1918_vm7, %v18262_v17, %v18394_v38 }
 0x704   : > { %v18521_v58 = vpop.permute.xlu1 %7293  ;;  %8254 = vmatpush1.bf16.msra.mxu0 %v7487_v40 }
 0x705   : > { %6899 = vrot.lane.b32.xlu1 %v18211_v33, %s14736_s23  ;;  %8255 = vmatprep.subr.bf16.mxu0 %v7496_v56 }
 0x706   : > { %6919 = vrot.lane.b32.xlu0 %v18419_v50, %s14736_s23 }
 0x707   : > { %v18530_v25 = vpop.permute.xlu0 %6913 }
 0x708   : > { %v18535_v60 = vpop.permute.xlu1 %7459  ;;  %8256 = vmatpush1.bf16.msra.mxu0 %v7495_v48  ;;  %v7868_v48 = vsel %vm1918_vm7, %v18474_v10, %v18516_v28 }
 0x709   : > { %7033 = vrot.lane.b32.xlu1 %v18211_v33, %s14737_s24  ;;  %8257 = vmatprep.subr.bf16.mxu0 %v7612_v2 }
 0x70a   : > { %7053 = vrot.lane.b32.xlu0 %v18419_v50, %s14737_s24 }
 0x70b   : > { %v18544_v19 = vpop.permute.xlu0 %7047 }
 0x70c   : > { %v6912_v51 = vpop.permute.xlu1 %6911  ;;  %8258 = vmatpush1.bf16.msra.mxu0 %v7611_v61 }
 0x70d   : > { %v6934_v59 = vsel %vm468_vm0, %v18349_v16, %v6912_v51  ;;  %v6935_v7 = vsel %vm468_vm0, %v6912_v51, %v18530_v25  ;;  %7167 = vrot.lane.b32.xlu1 %v18211_v33, %s14738_s25  ;;  %8259 = vmatprep.subr.bf16.mxu0 %v7620_v31  ;;  %v7736_v16 = vsel %vm1735_vm6, %v18251_v53, %v18371_v29 }
 0x70e   : > { %7187 = vrot.lane.b32.xlu0 %v18419_v50, %s14738_s25  ;;  %8341 = vmatprep.subr.bf16.mxu1 %v6935_v7  ;;  %v7743_v53 = vsel %vm1735_vm6, %v18302_v44, %v18455_v41  ;;  %v7193_v44 = vsel %vm859_vm2, %v18249_v35, %v18507_v0  ;;  %v7859_v41 = vsel %vm1918_vm7, %v18207_v57, %v18262_v17  ;;  %v7382_v7 = vld [vmem:[#allocation2 + $0x30] sm:$0xff] }
 0x70f   : > { %v18562_v47 = vpop.permute.xlu0 %7181  ;;  %8342 = vmatpush1.bf16.msra.mxu1 %v6934_v59  ;;  %v7867_v35 = vsel %vm1918_vm7, %v18330_v1, %v18474_v10  ;;  %v7328_v17 = vsel %vm1054_vm3, %v18521_v58, %v18469_v21  ;;  %v7327_v51 = vsel %vm1054_vm3, %v18260_v39, %v18521_v58 }
 0x710   : > { %v18567_v34 = vpop.permute.xlu1 %7583  ;;  %8260 = vmatpush1.bf16.msra.mxu0 %v7619_v55  ;;  %8343 = vmatprep.subr.bf16.mxu1 %v7060_v27 }
 0x711   : > { %7301 = vrot.lane.b32.xlu1 %v18211_v33, %s14739_s26  ;;  %8261 = vmatprep.subr.bf16.mxu0 %v7736_v16  ;;  %v13433_v33 = vld [vmem:[%s21373_s2 + $0x68] sm:$0xff] }
 0x712   : > { %7321 = vrot.lane.b32.xlu0 %v18419_v50, %s14739_s26  ;;  %v7381_v16 = vld [vmem:[#allocation2 + $0x28] sm:$0xff] }
 0x713   : > { %v18581_v32 = vpop.permute.xlu0 %7315  ;;  %8344 = vmatpush1.bf16.msra.mxu1 %v7059_v63  ;;  %v7391_v63 = vld [vmem:[#allocation2 + $0x80] sm:$0xff] }
 0x714   : > { %v7046_v50 = vpop.permute.xlu1 %7045  ;;  %8262 = vmatpush1.bf16.msra.mxu0 %v7735_v24  ;;  %v7390_v24 = vld [vmem:[#allocation2 + $0x78] sm:$0xff] }
 0x715   : > { %v7068_v62 = vsel %vm664_vm1, %v18376_v36, %v7046_v50  ;;  %v7069_v15 = vsel %vm664_vm1, %v7046_v50, %v18544_v19  ;;  %8073 = vperm.xlu1 %14426, %v13432_v8   ;;  %8263 = vmatprep.subr.bf16.mxu0 %v7744_v23  ;;  %v7489_v50 = vsel %vm1369_vm4, %v18328_v52, %v18535_v60 }
 0x716   : > { %8078 = vperm.xlu0 %14425, %v13433_v33   ;;  %8345 = vmatprep.subr.bf16.mxu1 %v7069_v15 }
 0x717   : > { %v18602_v36 = vpop.permute.xlu0 %7461  ;;  %8346 = vmatpush1.bf16.msra.mxu1 %v7068_v62 }
 0x718   : > { %v7180_v40 = vpop.permute.xlu1 %7179  ;;  %8264 = vmatpush1.bf16.msra.mxu0 %v7743_v53  ;;  %8347 = vmatprep.subr.bf16.mxu1 %v7194_v14  ;;  %v18674_v53 = vld [vmem:[%s21372_s1 + $0x94] ss:$12 sps:$4 sm:$0xff]  }
 0x719   : > { %8083 = vperm.xlu1 %14426, %v13434_v3   ;;  %8286 = vmatprep.subr.bf16.mxu0 %v7860_v26  ;;  %v7203_v56 = vsel %vm859_vm2, %v7180_v40, %v18562_v47  ;;  %v7202_v57 = vsel %vm859_vm2, %v18399_v30, %v7180_v40 }
 0x71a   : > { %8088 = vperm.xlu0 %14425, %v13435_v46  }
 0x71b   : > { %8266 = vmatmul.mubr.bf16.vlgmr.msra.gmra.mrb[68].mxu0 %v18342_v6  ;;  %8348 = vmatpush1.bf16.msra.mxu1 %v7193_v44  ;;  %v18622_v2 = vpop.permute.xlu0 %7585 }
 0x71c   : > { %v7314_v61 = vpop.permute.xlu1 %7313  ;;  %8287 = vmatpush1.bf16.msra.mxu0 %v7859_v41  ;;  %8349 = vmatprep.subr.bf16.mxu1 %v7203_v56  ;;  %v7614_v46 = vsel %vm1552_vm5, %v18567_v34, %v18622_v2 }
 0x71d   : > { %8288 = vmatprep.subr.bf16.mxu0 %v7868_v48  ;;  %8275 = vmatprep.mubr.bf16.mxu0 %v18364_v9  ;;  %v7337_v30 = vsel %vm1054_vm3, %v7314_v61, %v18581_v32  ;;  %v7336_v59 = vsel %vm1054_vm3, %v18314_v45, %v7314_v61 }
 0x71f   : > { %8350 = vmatpush1.bf16.msra.mxu1 %v7202_v57  ;;  %v18633_v0 = vpop.permute.xlu0 %6897 }
 0x720   : > { %v7478_v31 = vpop.permute.xlu1 %7477  ;;  %8289 = vmatpush1.bf16.msra.mxu0 %v7867_v35  ;;  %8351 = vmatprep.subr.bf16.mxu1 %v7328_v17 }
 0x721   : > { %v7497_v14 = vsel %vm1369_vm4, %v18485_v5, %v7478_v31 }
 0x723   : > { %8276 = vmatmul.mubr.bf16.gmra.mrb[72].mxu0 %v18389_v11  ;;  %8352 = vmatpush1.bf16.msra.mxu1 %v7327_v51  ;;  %v18641_v1 = vpop.permute.xlu0 %7031 }
 0x724   : > { %v7602_v10 = vpop.permute.xlu1 %7601  ;;  %8353 = vmatprep.subr.bf16.mxu1 %v7337_v30  ;;  %8318 = vmatprep.mubr.bf16.mxu0 %v18411_v22 }
 0x727   : > { %8354 = vmatpush1.bf16.msra.mxu1 %v7336_v59  ;;  %v18646_v55 = vpop.permute.xlu0 %7165 }
 0x728   : > { %v6896_v39 = vpop.permute.xlu1 %6895  ;;  %8355 = vmatprep.subr.bf16.mxu1 %v7382_v7 }
 0x729   : > { %v6927_v58 = vsel %vm468_vm0, %v18409_v54, %v6896_v39  ;;  %v6928_v27 = vsel %vm468_vm0, %v6896_v39, %v18633_v0  ;;  %v7490_v54 = vsel %vm1369_vm4, %v18535_v60, %v18602_v36 }
 0x72a   : > { %8445 = vmatprep.subr.bf16.mxu0 %v6928_v27 }
 0x72b   : > { %13444 = vmatmul.mubr.msk.bf16.vlgmr.msra.gmra.mrb[68].mxu0 %vm2183_vm8, %v18428_v13  ;;  %8356 = vmatpush1.bf16.msra.mxu1 %v7381_v16 }
 0x72c   : > { %v18654_v45 = vpop.permute.xlu0 %7479  ;;  %v7030_v8 = vpop.permute.xlu1 %7029  ;;  %8446 = vmatpush1.bf16.msra.mxu0 %v6927_v58  ;;  %8357 = vmatprep.subr.bf16.mxu1 %v7391_v63  ;;  %v7384_v63 = vld [vmem:[#allocation2 + $0x40] sm:$0xff] }
 0x72d   : > { %8328 = vmatprep.mubr.bf16.mxu0 %v18411_v22  ;;  %v7498_v62 = vsel %vm1369_vm4, %v7478_v31, %v18654_v45  ;;  %v7062_v26 = vsel %vm664_vm1, %v7030_v8, %v18641_v1  ;;  %v7061_v5 = vsel %vm664_vm1, %v18433_v18, %v7030_v8  ;;  %v14492_v31 = vpack.i.bf16 %v18411_v22, %v18411_v22 }
 0x72f   : > { %8358 = vmatpush1.bf16.msra.mxu1 %v7390_v24  ;;  %14493 = vrot.lane.b32.xlu0 %v14492_v31, %s14737_s24 }
 0x730   : > { %v18660_v33 = vpop.permute.xlu0 %7603  ;;  %v7164_v23 = vpop.permute.xlu1 %7163  ;;  %8359 = vmatprep.subr.bf16.mxu1 %v7490_v54  ;;  %14488 = vrot.lane.b32.xlu1 %v14492_v31, %s14736_s23 }
 0x731   : > { %v7622_v41 = vsel %vm1552_vm5, %v7602_v10, %v18660_v33  ;;  %v7196_v18 = vsel %vm859_vm2, %v7164_v23, %v18646_v55 }
 0x733   : > { %13445 = vmatmul.mubr.msk.bf16.gmra.mrb[72].mxu0 %vm2183_vm8, %v18464_v4  ;;  %8360 = vmatpush1.bf16.msra.mxu1 %v7489_v50  ;;  %v7393_v50 = vld [vmem:[#allocation2 + $0x90] sm:$0xff] }
 0x734   : > { %v18669_v15 = vpop.permute.xlu0 %6917  ;;  %v6916_v3 = vpop.permute.xlu1 %6915  ;;  %8361 = vmatprep.subr.bf16.mxu1 %v7498_v62  ;;  %8477 = vmatprep.mubr.bf16.mxu0 %v18674_v53 }
 0x735   : > { %v6936_v52 = vsel %vm468_vm0, %v18530_v25, %v6916_v3  ;;  %v6937_v60 = vsel %vm468_vm0, %v6916_v3, %v18669_v15  ;;  %v7613_v25 = vsel %vm1552_vm5, %v18347_v12, %v18567_v34  ;;  %v7621_v12 = vsel %vm1552_vm5, %v18496_v37, %v7602_v10  ;;  %14503 = vrot.lane.b32.xlu0 %v14492_v31, %s14739_s26 }
 0x736   : > { %8447 = vmatprep.subr.bf16.mxu0 %v6937_v60  ;;  %14498 = vrot.lane.b32.xlu1 %v14492_v31, %s14738_s25  ;;  %v7392_v60 = vld [vmem:[#allocation2 + $0x88] sm:$0xff] }
 0x737   : > { %8362 = vmatpush1.bf16.msra.mxu1 %v7497_v14  ;;  %8448 = vmatpush1.bf16.msra.mxu0 %v6936_v52  ;;  %v7989_v14 = vld [vmem:[#allocation4 + $0x280] sm:$0xff] }
 0x738   : > { %v18688_v40 = vpop.permute.xlu0 %7709  ;;  %v7708_v44 = vpop.permute.xlu1 %7707  ;;  %8449 = vmatprep.subr.bf16.mxu0 %v7062_v26  ;;  %8363 = vmatprep.subr.bf16.mxu1 %v7614_v46 }
 0x739   : > { %v7738_v34 = vsel %vm1735_vm6, %v7708_v44, %v18688_v40  ;;  %v7737_v37 = vsel %vm1735_vm6, %v18371_v29, %v7708_v44 }
 0x73b   : > { %8364 = vmatpush1.bf16.msra.mxu1 %v7613_v25  ;;  %8450 = vmatpush1.bf16.msra.mxu0 %v7061_v5 }
 0x73c   : > { %v18697_v56 = vpop.permute.xlu0 %7051  ;;  %v7050_v48 = vpop.permute.xlu1 %7049  ;;  %8365 = vmatprep.subr.bf16.mxu1 %v7622_v41 }
 0x73d   : > { %v7070_v61 = vsel %vm664_vm1, %v18544_v19, %v7050_v48  ;;  %v7071_v57 = vsel %vm664_vm1, %v7050_v48, %v18697_v56  ;;  %v7195_v19 = vsel %vm859_vm2, %v18449_v20, %v7164_v23 }
 0x73e   : > { %8451 = vmatprep.subr.bf16.mxu0 %v7071_v57 }
 0x73f   : > { %8366 = vmatpush1.bf16.msra.mxu1 %v7621_v12  ;;  %8452 = vmatpush1.bf16.msra.mxu0 %v7070_v61 }
 0x740   : > { %v18709_v35 = vpop.permute.xlu0 %7727  ;;  %v7184_v17 = vpop.permute.xlu1 %7183  ;;  %8453 = vmatprep.subr.bf16.mxu0 %v7196_v18  ;;  %8367 = vmatprep.subr.bf16.mxu1 %v7738_v34 }
 0x741   : > { %v7204_v29 = vsel %vm859_vm2, %v18562_v47, %v7184_v17 }
 0x743   : > { %8368 = vmatpush1.bf16.msra.mxu1 %v7737_v37  ;;  %8454 = vmatpush1.bf16.msra.mxu0 %v7195_v19 }
 0x744   : > { %v18717_v51 = vpop.permute.xlu0 %7185  ;;  %v7726_v30 = vpop.permute.xlu1 %7725 }
 0x745   : > { %v7205_v10 = vsel %vm859_vm2, %v7184_v17, %v18717_v51  ;;  %v7745_v59 = vsel %vm1735_vm6, %v18502_v42, %v7726_v30  ;;  %v7746_v20 = vsel %vm1735_vm6, %v7726_v30, %v18709_v35 }
 0x746   : > { %8369 = vmatprep.subr.bf16.mxu1 %v7746_v20  ;;  %8455 = vmatprep.subr.bf16.mxu0 %v7205_v10 }
 0x747   : > { %8370 = vmatpush1.bf16.msra.mxu1 %v7745_v59  ;;  %8456 = vmatpush1.bf16.msra.mxu0 %v7204_v29 }
 0x748   : > { %v18728_v7 = vpop.permute.xlu0 %7299  ;;  %v7298_v39 = vpop.permute.xlu1 %7297 }
 0x749   : > { %v7329_v42 = vsel %vm1054_vm3, %v18469_v21, %v7298_v39  ;;  %v7330_v58 = vsel %vm1054_vm3, %v7298_v39, %v18728_v7 }
 0x74a   : > { %8372 = vmatmul.mubr.bf16.vlgmr.msra.gmra.mrb[72].mxu1 %v18342_v6  ;;  %8457 = vmatprep.subr.bf16.mxu0 %v7330_v58 }
 0x74b   : > { %8458 = vmatpush1.bf16.msra.mxu0 %v7329_v42  ;;  %8381 = vmatprep.mubr.bf16.mxu1 %v18364_v9 }
 0x74c   : > { %v18738_v47 = vpop.permute.xlu0 %7319  ;;  %v7318_v27 = vpop.permute.xlu1 %7317 }
 0x74d   : > { %v7338_v16 = vsel %vm1054_vm3, %v18581_v32, %v7318_v27  ;;  %v7339_v21 = vsel %vm1054_vm3, %v7318_v27, %v18738_v47  ;;  %v7383_v32 = vld [vmem:[#allocation2 + $0x38] sm:$0xff] }
 0x74e   : > { %8459 = vmatprep.subr.bf16.mxu0 %v7339_v21 }
 0x74f   : > { %8460 = vmatpush1.bf16.msra.mxu0 %v7338_v16 }
 0x750   : > { %v18745_v8 = vpop.permute.xlu0 %7833  ;;  %v7832_v24 = vpop.permute.xlu1 %7831  ;;  %8461 = vmatprep.subr.bf16.mxu0 %v7384_v63 }
 0x751   : > { %v7861_v54 = vsel %vm1918_vm7, %v18394_v38, %v7832_v24  ;;  %v7862_v23 = vsel %vm1918_vm7, %v7832_v24, %v18745_v8 }
 0x752   : > { %8382 = vmatmul.mubr.bf16.gmra.mrb[76].mxu1 %v18389_v11  ;;  %8392 = vmatprep.subr.bf16.mxu1 %v7862_v23 }
 0x753   : > { %8393 = vmatpush1.bf16.msra.mxu1 %v7861_v54  ;;  %8462 = vmatpush1.bf16.msra.mxu0 %v7383_v32 }
 0x754   : > { %v18752_v62 = vpop.permute.xlu0 %7851  ;;  %v7850_v3 = vpop.permute.xlu1 %7849  ;;  %8463 = vmatprep.subr.bf16.mxu0 %v7393_v50  ;;  %8424 = vmatprep.mubr.bf16.mxu1 %v18411_v22 }
 0x755   : > { %v7869_v52 = vsel %vm1918_vm7, %v18516_v28, %v7850_v3  ;;  %v7870_v38 = vsel %vm1918_vm7, %v7850_v3, %v18752_v62 }
 0x756   : > { %8394 = vmatprep.subr.bf16.mxu1 %v7870_v38 }
 0x757   : > { %8395 = vmatpush1.bf16.msra.mxu1 %v7869_v52  ;;  %8464 = vmatpush1.bf16.msra.mxu0 %v7392_v60 }
 0x758   : > { %v7466_v46 = vpop.permute.xlu0 %7465  ;;  %v7464_v26 = vpop.permute.xlu1 %7463  ;;  %13590 = vmatprep.subr.bf16.mxu1 %v7989_v14 }
 0x759   : > { %7527 = vst.msk [vmem:[#allocation4 + $0x310] sm:$0xff] %vm513_vm9, %v7466_v46  ;;  %v7491_v44 = vsel %vm1369_vm4, %v18602_v36, %v7464_v26  ;;  %v7492_v25 = vsel %vm1369_vm4, %v7464_v26, %v7466_v46 }
 0x75a   : > { %13446 = vmatmul.mubr.msk.bf16.vlgmr.msra.gmra.mrb[72].mxu1 %vm2183_vm8, %v18428_v13  ;;  %8465 = vmatprep.subr.bf16.mxu0 %v7492_v25 }
 0x75b   : > { %8466 = vmatpush1.bf16.msra.mxu0 %v7491_v44  ;;  %8434 = vmatprep.mubr.bf16.mxu1 %v18411_v22 }
 0x75c   : > { %v7484_v28 = vpop.permute.xlu0 %7483  ;;  %v7482_v5 = vpop.permute.xlu1 %7481 }
 0x75d   : > { %7536 = vst.msk [vmem:[#allocation4 + $0x358] sm:$0xff] %vm513_vm9, %v7484_v28  ;;  %v7499_v41 = vsel %vm1369_vm4, %v18654_v45, %v7482_v5  ;;  %v7500_v48 = vsel %vm1369_vm4, %v7482_v5, %v7484_v28 }
 0x75e   : > { %8467 = vmatprep.subr.bf16.mxu0 %v7500_v48 }
 0x75f   : > { %8468 = vmatpush1.bf16.msra.mxu0 %v7499_v41 }
 0x760   : > { %v7590_v36 = vpop.permute.xlu0 %7589  ;;  %v7588_v61 = vpop.permute.xlu1 %7587  ;;  %v8007_v14 = vld [vmem:[#allocation4 + $0x310] sm:$0xff] }
 0x761   : > { %7651 = vst.msk [vmem:[#allocation4 + $0x3a0] sm:$0xff] %vm513_vm9, %v7590_v36  ;;  %v7615_v57 = vsel %vm1552_vm5, %v18622_v2, %v7588_v61  ;;  %v7616_v12 = vsel %vm1552_vm5, %v7588_v61, %v7590_v36  ;;  %v18842_v36 = vld [vmem:[%s21378_s7] sm:$0xff] }
 0x762   : > { %13447 = vmatmul.mubr.msk.bf16.gmra.mrb[76].mxu1 %vm2183_vm8, %v18464_v4  ;;  %8469 = vmatprep.subr.bf16.mxu0 %v7616_v12 }
 0x763   : > { %8470 = vmatpush1.bf16.msra.mxu0 %v7615_v57  ;;  %8583 = vmatprep.mubr.bf16.mxu1 %v18674_v53 }
 0x764   : > { %v7608_v45 = vpop.permute.xlu0 %7607  ;;  %v7606_v18 = vpop.permute.xlu1 %7605  ;;  %v8016_v26 = vld [vmem:[#allocation4 + $0x358] sm:$0xff] }
 0x765   : > { %7660 = vst.msk [vmem:[#allocation4 + $0x3e8] sm:$0xff] %vm513_vm9, %v7608_v45  ;;  %v7623_v34 = vsel %vm1552_vm5, %v18660_v33, %v7606_v18  ;;  %v7624_v17 = vsel %vm1552_vm5, %v7606_v18, %v7608_v45 }
 0x766   : > { %8471 = vmatprep.subr.bf16.mxu0 %v7624_v17 }
 0x767   : > { %8472 = vmatpush1.bf16.msra.mxu0 %v7623_v34 }
 0x768   : > { %v7714_v2 = vpop.permute.xlu0 %7713  ;;  %v7712_v19 = vpop.permute.xlu1 %7711 }
 0x769   : > { %7775 = vst.msk [vmem:[#allocation4 + $0x430] sm:$0xff] %vm513_vm9, %v7714_v2  ;;  %v7739_v37 = vsel %vm1735_vm6, %v18688_v40, %v7712_v19  ;;  %v7740_v53 = vsel %vm1735_vm6, %v7712_v19, %v7714_v2  ;;  %v8696_v2 = vrot.slane %v18842_v36, %v21421_v49 }
 0x76a   : > { %8473 = vmatprep.subr.bf16.mxu0 %v7740_v53 }
 0x76b   : > { %8474 = vmatpush1.bf16.msra.mxu0 %v7739_v37 }
 0x76c   : > { %v7732_v31 = vpop.permute.xlu0 %7731  ;;  %v7730_v30 = vpop.permute.xlu1 %7729  ;;  %v8034_v44 = vld [vmem:[#allocation4 + $0x3e8] sm:$0xff] }
 0x76d   : > { %7784 = vst.msk [vmem:[#allocation4 + $0x478] sm:$0xff] %vm513_vm9, %v7732_v31  ;;  %v7747_v33 = vsel %vm1735_vm6, %v18709_v35, %v7730_v30  ;;  %v7748_v10 = vsel %vm1735_vm6, %v7730_v30, %v7732_v31 }
 0x76e   : > { %8475 = vmatprep.subr.bf16.mxu0 %v7748_v10 }
 0x76f   : > { %8476 = vmatpush1.bf16.msra.mxu0 %v7747_v33 }
 0x770   : > { %v7838_v59 = vpop.permute.xlu0 %7837  ;;  %v7836_v20 = vpop.permute.xlu1 %7835  ;;  %v8043_v28 = vld [vmem:[#allocation4 + $0x430] sm:$0xff] }
 0x771   : > { %7899 = vst.msk [vmem:[#allocation4 + $0x4c0] sm:$0xff] %vm513_vm9, %v7838_v59  ;;  %v7863_v40 = vsel %vm1918_vm7, %v18745_v8, %v7836_v20  ;;  %v7864_v29 = vsel %vm1918_vm7, %v7836_v20, %v7838_v59 }
 0x772   : > { %8478 = vmatmul.mubr.bf16.vlgmr.msra.gmra.mrb[76].mxu0 %v18342_v6  ;;  %8498 = vmatprep.subr.bf16.mxu0 %v7864_v29 }
 0x773   : > { %8499 = vmatpush1.bf16.msra.mxu0 %v7863_v40  ;;  %8487 = vmatprep.mubr.bf16.mxu0 %v18364_v9 }
 0x774   : > { %v7856_v35 = vpop.permute.xlu0 %7855  ;;  %v7854_v39 = vpop.permute.xlu1 %7853  ;;  %v8052_v41 = vld [vmem:[#allocation4 + $0x478] sm:$0xff] }
 0x775   : > { %7908 = vst.msk [vmem:[#allocation4 + $0x508] sm:$0xff] %vm513_vm9, %v7856_v35  ;;  %v7871_v42 = vsel %vm1918_vm7, %v18752_v62, %v7854_v39  ;;  %v7872_v58 = vsel %vm1918_vm7, %v7854_v39, %v7856_v35 }
 0x776   : > { %8500 = vmatprep.subr.bf16.mxu0 %v7872_v58 }
 0x777   : > { %8501 = vmatpush1.bf16.msra.mxu0 %v7871_v42 }
 0x778   : > { %v6920_v27 = vpop.permute.xlu0 %6919  ;;  %v6900_v16 = vpop.permute.xlu1 %6899  ;;  %v8061_v21 = vld [vmem:[#allocation4 + $0x4c0] sm:$0xff] }
 0x779   : > { %v6938_v63 = vsel %vm468_vm0, %v18669_v15, %v6920_v27  ;;  %v6929_v8 = vsel %vm468_vm0, %v18633_v0, %v6900_v16  ;;  %13852 = vmatprep.subr.bf16.mxu0 %v8061_v21 }
 0x77a   : > { %6974 = vst.msk [vmem:[#allocation4 + $0x88] sm:$0xff] %vm513_vm9, %v6938_v63  ;;  %6965 = vst.msk [vmem:[#allocation4 + $0x40] sm:$0xff] %vm513_vm9, %v6929_v8  ;;  %8488 = vmatmul.mubr.bf16.gmra.mrb[80].mxu0 %v18389_v11 }
 0x77b   : > { %8530 = vmatprep.mubr.bf16.mxu0 %v18411_v22 }
 0x77c   : > { %v7054_v24 = vpop.permute.xlu0 %7053  ;;  %v7034_v54 = vpop.permute.xlu1 %7033 }
 0x77d   : > { %v7072_v23 = vsel %vm664_vm1, %v18697_v56, %v7054_v24  ;;  %v7063_v15 = vsel %vm664_vm1, %v18641_v1, %v7034_v54  ;;  %v7998_v56 = vld [vmem:[#allocation4 + $0x2c8] sm:$0xff] }
 0x77e   : > { %7108 = vst.msk [vmem:[#allocation4 + $0x118] sm:$0xff] %vm513_vm9, %v7072_v23  ;;  %7099 = vst.msk [vmem:[#allocation4 + $0xd0] sm:$0xff] %vm513_vm9, %v7063_v15  ;;  %v8070_v1 = vld [vmem:[#allocation4 + $0x508] sm:$0xff] }
 0x780   : > { %v7188_v0 = vpop.permute.xlu0 %7187  ;;  %v7168_v32 = vpop.permute.xlu1 %7167 }
 0x781   : > { %v7206_v50 = vsel %vm859_vm2, %v18717_v51, %v7188_v0  ;;  %v7197_v62 = vsel %vm859_vm2, %v18646_v55, %v7168_v32  ;;  %v7917_v3 = vld [vmem:[#allocation4 + $0x40] sm:$0xff]  ;;  %v7926_v60 = vld [vmem:[#allocation4 + $0x88] sm:$0xff] }
 0x782   : > { %7242 = vst.msk [vmem:[#allocation4 + $0x1a8] sm:$0xff] %vm513_vm9, %v7206_v50  ;;  %7233 = vst.msk [vmem:[#allocation4 + $0x160] sm:$0xff] %vm513_vm9, %v7197_v62  ;;  %13591 = vmatpush3.bf16.msra.mxu1 %v7917_v3  ;;  %13448 = vmatmul.mubr.msk.bf16.vlgmr.msra.gmra.mrb[76].mxu0 %vm2183_vm8, %v18428_v13 }
 0x783   : > { %13592 = vmatprep.subr.bf16.mxu1 %v7998_v56  ;;  %13853 = vmatpush3.bf16.msra.mxu0 %v8061_v21 }
 0x784   : > { %v7322_v52 = vpop.permute.xlu0 %7321  ;;  %v7302_v38 = vpop.permute.xlu1 %7301  ;;  %13854 = vmatprep.subr.bf16.mxu0 %v8070_v1  ;;  %8540 = vmatprep.mubr.bf16.mxu0 %v18411_v22 }
 0x785   : > { %v7340_v55 = vsel %vm1054_vm3, %v18738_v47, %v7322_v52  ;;  %v7331_v51 = vsel %vm1054_vm3, %v18728_v7, %v7302_v38  ;;  %v7935_v46 = vld [vmem:[#allocation4 + $0xd0] sm:$0xff]  ;;  %v7944_v22 = vld [vmem:[#allocation4 + $0x118] sm:$0xff]  ;;  %v8025_v7 = vld [vmem:[#allocation4 + $0x3a0] sm:$0xff] }
 0x786   : > { %7376 = vst.msk [vmem:[#allocation4 + $0x238] sm:$0xff] %vm513_vm9, %v7340_v55  ;;  %7367 = vst.msk [vmem:[#allocation4 + $0x1f0] sm:$0xff] %vm513_vm9, %v7331_v51  ;;  %13593 = vmatpush3.bf16.msra.mxu1 %v7926_v60  ;;  %v21428_v60 = vld [vmem:[#allocation12_spill] sm:$0xff] }
 0x787   : > { %13594 = vmatprep.subr.bf16.mxu1 %v8007_v14  ;;  %13855 = vmatpush3.bf16.msra.mxu0 %v8070_v1  ;;  %v8700_v14 = vrot.slane %v18842_v36, %v21428_v60 }
 0x789   : > { %v7953_v47 = vld [vmem:[#allocation4 + $0x160] sm:$0xff]  ;;  %v7962_v25 = vld [vmem:[#allocation4 + $0x1a8] sm:$0xff] }
 0x78a   : > { %13595 = vmatpush3.bf16.msra.mxu1 %v7935_v46  ;;  %13449 = vmatmul.mubr.msk.bf16.gmra.mrb[80].mxu0 %vm2183_vm8, %v18464_v4 }
 0x78b   : > { %13596 = vmatprep.subr.bf16.mxu1 %v8016_v26  ;;  %13856 = vmatprep.mubr.msk.bf16.mxu0 %vm2183_vm8, %v18428_v13 }
 0x78d   : > { %v7971_v5 = vld [vmem:[#allocation4 + $0x1f0] sm:$0xff]  ;;  %v7980_v13 = vld [vmem:[#allocation4 + $0x238] sm:$0xff] }
 0x78e   : > { %13597 = vmatpush3.bf16.msra.mxu1 %v7944_v22 }
 0x78f   : > { %13598 = vmatprep.subr.bf16.mxu1 %v8025_v7  ;;  %v21429_v7 = vld [vmem:[#allocation13_spill] sm:$0xff] }
 0x792   : > { %13599 = vmatpush3.bf16.msra.mxu1 %v7953_v47  ;;  %13857 = vmatmul.mubr.msk.bf16.vlgmr.msra.gmra.mrb[84].mxu0 %vm2183_vm8, %v18464_v4  ;;  %v8704_v47 = vrot.slane %v18842_v36, %v21429_v7 }
 0x793   : > { %13600 = vmatprep.subr.bf16.mxu1 %v8034_v44 }
 0x794   : > { %v18837_v48 = vpop.permute.xlu1 %8073 }
 0x795   : > { %v18845_v12 = vpop.permute.xlu0 %8078 }
 0x796   : > { %13601 = vmatpush3.bf16.msra.mxu1 %v7962_v25 }
 0x797   : > { %13602 = vmatprep.subr.bf16.mxu1 %v8043_v28 }
 0x798   : > { %v18854_v33 = vpop.permute.xlu1 %8083 }
 0x799   : > { %v18857_v39 = vpop.permute.xlu0 %8088 }
 0x79a   : > { %13603 = vmatpush3.bf16.msra.mxu1 %v7971_v5 }
 0x79b   : > { %13604 = vmatprep.subr.bf16.mxu1 %v8052_v41 }
 0x79e   : > { %13605 = vmatpush3.bf16.msra.mxu1 %v7980_v13 }
 0x7a1   : > { %8584 = vmatmul.mubr.bf16.vlgmr.msra.gmra.mrb[80].mxu1 %v18342_v6 }
 0x7a2   : > { %8591 = vmatprep.mubr.bf16.mxu1 %v18364_v9  ;;  %v8692_v9 = vrot.slane %v18842_v36, %v15686_v43 }
 0x7a9   : > { %8592 = vmatmul.mubr.bf16.gmra.mrb[84].mxu1 %v18389_v11 }
 0x7c1   : > { %v8214_v4 = vpop.f32.mrb[64].mxu1 }
 0x7c2   : > { %v14131_v61 = vadd.f32 %v8214_v4, %v18837_v48  ;;  %v8216_v57 = vpop.f32.mrb[65].mxu1 }
 0x7c3   : > { %v14132_v45 = vadd.f32 %v8216_v57, %v18837_v48  ;;  %v8218_v6 = vpop.f32.mrb[66].mxu1 }
 0x7c4   : > { %v8649_v18 = vmax.f32 %v14131_v61, 0.0  ;;  %v14133_v11 = vadd.f32 %v8218_v6, %v18845_v12  ;;  %v8220_v34 = vpop.f32.mrb[67].mxu1 }
 0x7c5   : > { %v8650_v17 = vmax.f32 %v14132_v45, 0.0  ;;  %v14134_v19 = vadd.f32 %v8220_v34, %v18845_v12 }
 0x7c6   : > { %v8658_v37 = vmax.f32 %v14133_v11, 0.0  ;;  %v8734_v31 = vmul.f32 %v8692_v9, %v8649_v18 }
 0x7c7   : > { %v8659_v53 = vmax.f32 %v14134_v19, 0.0  ;;  %v8735_v10 = vmul.f32 %v8696_v2, %v8650_v17 }
 0x7c8   : > { %v8743_v30 = vmul.f32 %v8692_v9, %v8658_v37 }
 0x7c9   : > { %v8744_v59 = vmul.f32 %v8696_v2, %v8659_v53  ;;  %v8224_v20 = vpop.f32.mrb[68].mxu1 }
 0x7ca   : > { %v8770_v40 = vpack.c.bf16 %v8743_v30, %v8734_v31  ;;  %v14135_v29 = vadd.f32 %v8224_v20, %v18854_v33  ;;  %v8226_v35 = vpop.f32.mrb[69].mxu1 }
 0x7cb   : > { %v8771_v42 = vpack.c.bf16 %v8744_v59, %v8735_v10  ;;  %v14136_v58 = vadd.f32 %v8226_v35, %v18854_v33  ;;  %v8228_v27 = vpop.f32.mrb[70].mxu1 }
 0x7cc   : > { %8788 = vst [vmem:[#allocation3 + $0x8] sm:$0xff] %v8770_v40  ;;  %v8667_v16 = vmax.f32 %v14135_v29, 0.0  ;;  %v14137_v21 = vadd.f32 %v8228_v27, %v18857_v39  ;;  %v8230_v63 = vpop.f32.mrb[71].mxu1  ;;  %8996 = vrot.lane.b32.xlu0 %v8770_v40, %s14737_s24  ;;  %8862 = vrot.lane.b32.xlu1 %v8770_v40, %s14736_s23 }
 0x7cd   : > { %8789 = vst [vmem:[#allocation3 + $0x10] sm:$0xff] %v8771_v42  ;;  %v8668_v8 = vmax.f32 %v14136_v58, 0.0  ;;  %v14138_v24 = vadd.f32 %v8230_v63, %v18857_v39  ;;  %v21430_v63 = vld [vmem:[#allocation14_spill] sm:$0xff] }
 0x7ce   : > { %v8676_v54 = vmax.f32 %v14137_v21, 0.0  ;;  %v8752_v15 = vmul.f32 %v8692_v9, %v8667_v16 }
 0x7cf   : > { %v8677_v23 = vmax.f32 %v14138_v24, 0.0  ;;  %v8753_v32 = vmul.f32 %v8696_v2, %v8668_v8  ;;  %v8708_v8 = vrot.slane %v18842_v36, %v21430_v63 }
 0x7d0   : > { %v8761_v0 = vmul.f32 %v8692_v9, %v8676_v54  ;;  %9264 = vrot.lane.b32.xlu0 %v8770_v40, %s14739_s26  ;;  %9130 = vrot.lane.b32.xlu1 %v8770_v40, %s14738_s25 }
 0x7d1   : > { %v8762_v50 = vmul.f32 %v8696_v2, %v8677_v23 }
 0x7d2   : > { %v8779_v62 = vpack.c.bf16 %v8761_v0, %v8752_v15  ;;  %v21431_v15 = vld [vmem:[#allocation15_spill] sm:$0xff] }
 0x7d3   : > { %v8780_v3 = vpack.c.bf16 %v8762_v50, %v8753_v32  ;;  %v8712_v0 = vrot.slane %v18842_v36, %v21431_v15  ;;  %v18944_v50 = vpop.permute.xlu0 %14493 }
 0x7d4   : > { %8797 = vst [vmem:[#allocation3 + $0x58] sm:$0xff] %v8779_v62  ;;  %8864 = vrot.lane.b32.xlu0 %v8771_v42, %s14736_s23  ;;  %9428 = vrot.lane.b32.xlu1 %v8770_v40, %s14740_s27 }
 0x7d5   : > { %8798 = vst [vmem:[#allocation3 + $0x60] sm:$0xff] %v8780_v3 }
 0x7d8   : > { %9132 = vrot.lane.b32.xlu0 %v8771_v42, %s14738_s25  ;;  %9552 = vrot.lane.b32.xlu1 %v8770_v40, %s14741_s28 }
 0x7dc   : > { %8882 = vrot.lane.b32.xlu0 %v8779_v62, %s14736_s23  ;;  %9676 = vrot.lane.b32.xlu1 %v8770_v40, %s14742_s11 }
 0x7e0   : > { %9150 = vrot.lane.b32.xlu0 %v8779_v62, %s14738_s25  ;;  %9800 = vrot.lane.b32.xlu1 %v8770_v40, %s14743_s18 }
 0x7e4   : > { %9446 = vrot.lane.b32.xlu0 %v8779_v62, %s14740_s27  ;;  %8998 = vrot.lane.b32.xlu1 %v8771_v42, %s14737_s24 }
 0x7e8   : > { %9570 = vrot.lane.b32.xlu0 %v8779_v62, %s14741_s28  ;;  %9266 = vrot.lane.b32.xlu1 %v8771_v42, %s14739_s26 }
 0x7ec   : > { %9694 = vrot.lane.b32.xlu0 %v8779_v62, %s14742_s11  ;;  %9430 = vrot.lane.b32.xlu1 %v8771_v42, %s14740_s27 }
 0x7f0   : > { %9818 = vrot.lane.b32.xlu0 %v8779_v62, %s14743_s18  ;;  %9554 = vrot.lane.b32.xlu1 %v8771_v42, %s14741_s28 }
 0x7f4   : > { %9018 = vrot.lane.b32.xlu0 %v8780_v3, %s14737_s24  ;;  %9678 = vrot.lane.b32.xlu1 %v8771_v42, %s14742_s11 }
 0x7f8   : > { %9286 = vrot.lane.b32.xlu0 %v8780_v3, %s14739_s26  ;;  %9802 = vrot.lane.b32.xlu1 %v8771_v42, %s14743_s18 }
 0x7fc   : > { %9448 = vrot.lane.b32.xlu0 %v8780_v3, %s14740_s27  ;;  %9016 = vrot.lane.b32.xlu1 %v8779_v62, %s14737_s24 }
 0x7fe   : > { %v8320_v56 = vpop.f32.mrb[68].mxu0 }
 0x7ff   : > { %v14139_v1 = vadd.f32 %v8320_v56, %v18837_v48  ;;  %v8322_v52 = vpop.f32.mrb[69].mxu0  ;;  %v18951_v56 = vld [vmem:[%s21372_s1 + $0xc4] ss:$12 sps:$4 sm:$0xff]  }
 0x800   : > { %v14140_v38 = vadd.f32 %v8322_v52, %v18837_v48  ;;  %v8324_v55 = vpop.f32.mrb[70].mxu0  ;;  %9572 = vrot.lane.b32.xlu0 %v8780_v3, %s14741_s28  ;;  %9284 = vrot.lane.b32.xlu1 %v8779_v62, %s14739_s26 }
 0x801   : > { %v8651_v51 = vmax.f32 %v14139_v1, 0.0  ;;  %v14141_v46 = vadd.f32 %v8324_v55, %v18845_v12  ;;  %v8326_v26 = vpop.f32.mrb[71].mxu0  ;;  %10138 = vmatprep.mubr.bf16.mxu0 %v18951_v56  ;;  %10244 = vmatprep.mubr.bf16.mxu1 %v18951_v56 }
 0x802   : > { %v8652_v22 = vmax.f32 %v14140_v38, 0.0  ;;  %v14142_v44 = vadd.f32 %v8326_v26, %v18845_v12 }
 0x803   : > { %v8660_v25 = vmax.f32 %v14141_v46, 0.0  ;;  %v8736_v5 = vmul.f32 %v8700_v14, %v8651_v51 }
 0x804   : > { %v8661_v28 = vmax.f32 %v14142_v44, 0.0  ;;  %9696 = vrot.lane.b32.xlu0 %v8780_v3, %s14742_s11  ;;  %8884 = vrot.lane.b32.xlu1 %v8780_v3, %s14736_s23  ;;  %v8737_v13 = vmul.f32 %v8704_v47, %v8652_v22 }
 0x805   : > { %v8745_v41 = vmul.f32 %v8700_v14, %v8660_v25 }
 0x806   : > { %v8746_v4 = vmul.f32 %v8704_v47, %v8661_v28  ;;  %v8330_v61 = vpop.f32.mrb[72].mxu0  ;;  %v18965_v28 = vpop.permute.xlu0 %14503 }
 0x807   : > { %v8772_v57 = vpack.c.bf16 %v8745_v41, %v8736_v5  ;;  %v14143_v45 = vadd.f32 %v8330_v61, %v18854_v33  ;;  %v8332_v6 = vpop.f32.mrb[73].mxu0 }
 0x808   : > { %v8773_v18 = vpack.c.bf16 %v8746_v4, %v8737_v13  ;;  %v14144_v9 = vadd.f32 %v8332_v6, %v18854_v33  ;;  %v8334_v11 = vpop.f32.mrb[74].mxu0  ;;  %9820 = vrot.lane.b32.xlu0 %v8780_v3, %s14743_s18  ;;  %9152 = vrot.lane.b32.xlu1 %v8780_v3, %s14738_s25  ;;  %v18946_v3 = vpop.permute.xlu1 %14488 }
 0x809   : > { %8790 = vst [vmem:[#allocation3 + $0x18] sm:$0xff] %v8772_v57  ;;  %v8669_v34 = vmax.f32 %v14143_v45, 0.0  ;;  %v14145_v17 = vadd.f32 %v8334_v11, %v18857_v39  ;;  %v8336_v2 = vpop.f32.mrb[75].mxu0 }
 0x80a   : > { %8791 = vst [vmem:[#allocation3 + $0x20] sm:$0xff] %v8773_v18  ;;  %v8670_v19 = vmax.f32 %v14144_v9, 0.0  ;;  %v14146_v37 = vadd.f32 %v8336_v2, %v18857_v39 }
 0x80b   : > { %v8678_v53 = vmax.f32 %v14145_v17, 0.0  ;;  %v8754_v30 = vmul.f32 %v8700_v14, %v8669_v34 }
 0x80c   : > { %v8679_v31 = vmax.f32 %v14146_v37, 0.0  ;;  %9432 = vrot.lane.b32.xlu0 %v8772_v57, %s14740_s27  ;;  %8866 = vrot.lane.b32.xlu1 %v8772_v57, %s14736_s23  ;;  %v8755_v59 = vmul.f32 %v8704_v47, %v8670_v19  ;;  %v18973_v4 = vpop.permute.xlu1 %14498 }
 0x80d   : > { %v8763_v10 = vmul.f32 %v8700_v14, %v8678_v53 }
 0x80e   : > { %v8764_v20 = vmul.f32 %v8704_v47, %v8679_v31 }
 0x80f   : > { %v18908_v40 = vpack.c.bf16 %v8763_v10, %v8754_v30 }
 0x810   : > { %v18910_v29 = vpack.c.bf16 %v8764_v20, %v8755_v59  ;;  %9000 = vrot.lane.b32.xlu0 %v8772_v57, %s14737_s24  ;;  %9002 = vrot.lane.b32.xlu1 %v8773_v18, %s14737_s24  ;;  %v14490_v59 = vunpack.i.l.bf16 %v18946_v3 }
 0x811   : > { %8799 = vst [vmem:[#allocation3 + $0x68] sm:$0xff] %v18908_v40 }
 0x812   : > { %8800 = vst [vmem:[#allocation3 + $0x70] sm:$0xff] %v18910_v29 }
 0x814   : > { %9556 = vrot.lane.b32.xlu0 %v8772_v57, %s14741_s28  ;;  %9136 = vrot.lane.b32.xlu1 %v8773_v18, %s14738_s25 }
 0x818   : > { %9134 = vrot.lane.b32.xlu0 %v8772_v57, %s14738_s25  ;;  %9270 = vrot.lane.b32.xlu1 %v8773_v18, %s14739_s26 }
 0x81c   : > { %9680 = vrot.lane.b32.xlu0 %v8772_v57, %s14742_s11  ;;  %9558 = vrot.lane.b32.xlu1 %v8773_v18, %s14741_s28 }
 0x820   : > { %9268 = vrot.lane.b32.xlu0 %v8772_v57, %s14739_s26  ;;  %9682 = vrot.lane.b32.xlu1 %v8773_v18, %s14742_s11 }
 0x824   : > { %9804 = vrot.lane.b32.xlu0 %v8772_v57, %s14743_s18  ;;  %9806 = vrot.lane.b32.xlu1 %v8773_v18, %s14743_s18 }
 0x828   : > { %8868 = vrot.lane.b32.xlu0 %v8773_v18, %s14736_s23  ;;  %8886 = vrot.lane.b32.xlu1 %v18908_v40, %s14736_s23 }
 0x82c   : > { %9434 = vrot.lane.b32.xlu0 %v8773_v18, %s14740_s27  ;;  %9450 = vrot.lane.b32.xlu1 %v18908_v40, %s14740_s27 }
 0x82d   : > { %v8426_v35 = vpop.f32.mrb[72].mxu1 }
 0x82e   : > { %v14147_v42 = vadd.f32 %v8426_v35, %v18837_v48  ;;  %v8428_v58 = vpop.f32.mrb[73].mxu1 }
 0x82f   : > { %v14148_v27 = vadd.f32 %v8428_v58, %v18837_v48  ;;  %v8430_v16 = vpop.f32.mrb[74].mxu1 }
 0x830   : > { %v8653_v21 = vmax.f32 %v14147_v42, 0.0  ;;  %v14149_v24 = vadd.f32 %v8430_v16, %v18845_v12  ;;  %v8432_v54 = vpop.f32.mrb[75].mxu1  ;;  %8888 = vrot.lane.b32.xlu0 %v18910_v29, %s14736_s23  ;;  %9020 = vrot.lane.b32.xlu1 %v18908_v40, %s14737_s24 }
 0x831   : > { %v8654_v23 = vmax.f32 %v14148_v27, 0.0  ;;  %v14150_v32 = vadd.f32 %v8432_v54, %v18845_v12 }
 0x832   : > { %v8662_v62 = vmax.f32 %v14149_v24, 0.0  ;;  %v8738_v52 = vmul.f32 %v8708_v8, %v8653_v21 }
 0x833   : > { %v8663_v1 = vmax.f32 %v14150_v32, 0.0  ;;  %v8739_v55 = vmul.f32 %v8712_v0, %v8654_v23 }
 0x834   : > { %v8747_v38 = vmul.f32 %v8708_v8, %v8662_v62  ;;  %9022 = vrot.lane.b32.xlu0 %v18910_v29, %s14737_s24  ;;  %9574 = vrot.lane.b32.xlu1 %v18908_v40, %s14741_s28 }
 0x835   : > { %v8748_v51 = vmul.f32 %v8712_v0, %v8663_v1  ;;  %v8436_v14 = vpop.f32.mrb[76].mxu1 }
 0x836   : > { %v18959_v46 = vpack.c.bf16 %v8747_v38, %v8738_v52  ;;  %v14151_v26 = vadd.f32 %v8436_v14, %v18854_v33  ;;  %v8438_v22 = vpop.f32.mrb[77].mxu1  ;;  %v21432_v52 = vld [vmem:[#allocation16_spill] sm:$0xff]  ;;  %v21433_v14 = vld [vmem:[#allocation17_spill] sm:$0xff] }
 0x837   : > { %v18962_v47 = vpack.c.bf16 %v8748_v51, %v8739_v55  ;;  %v14152_v44 = vadd.f32 %v8438_v22, %v18854_v33  ;;  %v8440_v25 = vpop.f32.mrb[78].mxu1  ;;  %v8716_v38 = vrot.slane %v18842_v36, %v21432_v52 }
 0x838   : > { %8792 = vst [vmem:[#allocation3 + $0x28] sm:$0xff] %v18959_v46  ;;  %v8671_v5 = vmax.f32 %v14151_v26, 0.0  ;;  %v14153_v41 = vadd.f32 %v8440_v25, %v18857_v39  ;;  %v8442_v13 = vpop.f32.mrb[79].mxu1  ;;  %9156 = vrot.lane.b32.xlu0 %v18910_v29, %s14738_s25  ;;  %9154 = vrot.lane.b32.xlu1 %v18908_v40, %s14738_s25  ;;  %v8720_v26 = vrot.slane %v18842_v36, %v21433_v14 }
 0x839   : > { %8793 = vst [vmem:[#allocation3 + $0x30] sm:$0xff] %v18962_v47  ;;  %v8672_v61 = vmax.f32 %v14152_v44, 0.0  ;;  %v14154_v57 = vadd.f32 %v8442_v13, %v18857_v39 }
 0x83a   : > { %v8680_v45 = vmax.f32 %v14153_v41, 0.0  ;;  %v8756_v18 = vmul.f32 %v8708_v8, %v8671_v5 }
 0x83b   : > { %v8681_v6 = vmax.f32 %v14154_v57, 0.0  ;;  %v8757_v11 = vmul.f32 %v8712_v0, %v8672_v61 }
 0x83c   : > { %v8765_v9 = vmul.f32 %v8708_v8, %v8680_v45  ;;  %9290 = vrot.lane.b32.xlu0 %v18910_v29, %s14739_s26  ;;  %9698 = vrot.lane.b32.xlu1 %v18908_v40, %s14742_s11 }
 0x83d   : > { %v8766_v34 = vmul.f32 %v8712_v0, %v8681_v6 }
 0x83e   : > { %v18981_v17 = vpack.c.bf16 %v8765_v9, %v8756_v18  ;;  %v18983_v2 = vpop.permute.xlu0 %8996  ;;  %v8863_v19 = vpop.permute.xlu1 %8862 }
 0x83f   : > { %v18985_v37 = vpack.c.bf16 %v8766_v34, %v8757_v11  ;;  %v8900_v35 = vsel %vm468_vm0, %v14490_v59, %v8863_v19 }
 0x840   : > { %8801 = vst [vmem:[#allocation3 + $0x78] sm:$0xff] %v18981_v17  ;;  %9560 = vrot.lane.b32.xlu0 %v18959_v46, %s14741_s28  ;;  %9288 = vrot.lane.b32.xlu1 %v18908_v40, %s14739_s26 }
 0x841   : > { %8802 = vst [vmem:[#allocation3 + $0x80] sm:$0xff] %v18985_v37 }
 0x842   : > { %v18993_v53 = vpop.permute.xlu0 %9264  ;;  %v18995_v31 = vpop.permute.xlu1 %9130 }
 0x844   : > { %9684 = vrot.lane.b32.xlu0 %v18959_v46, %s14742_s11  ;;  %9822 = vrot.lane.b32.xlu1 %v18908_v40, %s14743_s18 }
 0x846   : > { %v19001_v30 = vpop.permute.xlu0 %8864  ;;  %v19003_v10 = vpop.permute.xlu1 %9428 }
 0x847   : > { %v8901_v20 = vsel %vm468_vm0, %v8863_v19, %v19001_v30 }
 0x848   : > { %9808 = vrot.lane.b32.xlu0 %v18959_v46, %s14743_s18  ;;  %9452 = vrot.lane.b32.xlu1 %v18910_v29, %s14740_s27 }
 0x849   : > { %10106 = vmatprep.subr.bf16.mxu0 %v8901_v20 }
 0x84a   : > { %v19013_v42 = vpop.permute.xlu0 %9132  ;;  %v19015_v40 = vpop.permute.xlu1 %9552  ;;  %10107 = vmatpush1.bf16.msra.mxu0 %v8900_v35 }
 0x84c   : > { %8872 = vrot.lane.b32.xlu0 %v18962_v47, %s14736_s23  ;;  %9576 = vrot.lane.b32.xlu1 %v18910_v29, %s14741_s28 }
 0x84e   : > { %v19021_v58 = vpop.permute.xlu0 %8882  ;;  %v19023_v27 = vpop.permute.xlu1 %9676 }
 0x850   : > { %9006 = vrot.lane.b32.xlu0 %v18962_v47, %s14737_s24  ;;  %9700 = vrot.lane.b32.xlu1 %v18910_v29, %s14742_s11 }
 0x852   : > { %v19029_v16 = vpop.permute.xlu0 %9150  ;;  %v19031_v21 = vpop.permute.xlu1 %9800 }
 0x854   : > { %9140 = vrot.lane.b32.xlu0 %v18962_v47, %s14738_s25  ;;  %9824 = vrot.lane.b32.xlu1 %v18910_v29, %s14743_s18 }
 0x855   : > { %v8532_v8 = vpop.f32.mrb[76].mxu0 }
 0x856   : > { %v14155_v24 = vadd.f32 %v8532_v8, %v18837_v48  ;;  %v8534_v54 = vpop.f32.mrb[77].mxu0  ;;  %v19038_v23 = vpop.permute.xlu0 %9446 }
 0x857   : > { %v14156_v0 = vadd.f32 %v8534_v54, %v18837_v48  ;;  %v8536_v32 = vpop.f32.mrb[78].mxu0  ;;  %v19041_v62 = vpop.permute.xlu1 %8998 }
 0x858   : > { %v8655_v1 = vmax.f32 %v14155_v24, 0.0  ;;  %v14157_v55 = vadd.f32 %v8536_v32, %v18845_v12  ;;  %v8538_v51 = vpop.f32.mrb[79].mxu0  ;;  %9274 = vrot.lane.b32.xlu0 %v18962_v47, %s14739_s26  ;;  %9436 = vrot.lane.b32.xlu1 %v18959_v46, %s14740_s27 }
 0x859   : > { %v8656_v29 = vmax.f32 %v14156_v0, 0.0  ;;  %v14158_v22 = vadd.f32 %v8538_v51, %v18845_v12 }
 0x85a   : > { %v8664_v44 = vmax.f32 %v14157_v55, 0.0  ;;  %v19053_v25 = vpop.permute.xlu0 %9570  ;;  %v8740_v13 = vmul.f32 %v8716_v38, %v8655_v1 }
 0x85b   : > { %v8665_v5 = vmax.f32 %v14158_v22, 0.0  ;;  %v19055_v41 = vpop.permute.xlu1 %9266  ;;  %v8741_v57 = vmul.f32 %v8720_v26, %v8656_v29 }
 0x85c   : > { %v8749_v61 = vmul.f32 %v8716_v38, %v8664_v44  ;;  %9454 = vrot.lane.b32.xlu0 %v18981_v17, %s14740_s27  ;;  %8870 = vrot.lane.b32.xlu1 %v18959_v46, %s14736_s23 }
 0x85d   : > { %v8750_v45 = vmul.f32 %v8720_v26, %v8665_v5  ;;  %v8542_v6 = vpop.f32.mrb[80].mxu0 }
 0x85e   : > { %v19061_v36 = vpack.c.bf16 %v8749_v61, %v8740_v13  ;;  %v14159_v18 = vadd.f32 %v8542_v6, %v18854_v33  ;;  %v8544_v9 = vpop.f32.mrb[81].mxu0  ;;  %v19064_v11 = vpop.permute.xlu0 %9694 }
 0x85f   : > { %v19066_v34 = vpack.c.bf16 %v8750_v45, %v8741_v57  ;;  %v14160_v19 = vadd.f32 %v8544_v9, %v18854_v33  ;;  %v8546_v59 = vpop.f32.mrb[82].mxu0  ;;  %v19069_v20 = vpop.permute.xlu1 %9430 }
 0x860   : > { %8794 = vst [vmem:[#allocation3 + $0x38] sm:$0xff] %v19061_v36  ;;  %v8673_v35 = vmax.f32 %v14159_v18, 0.0  ;;  %v14161_v8 = vadd.f32 %v8546_v59, %v18857_v39  ;;  %v8548_v24 = vpop.f32.mrb[83].mxu0  ;;  %9578 = vrot.lane.b32.xlu0 %v18981_v17, %s14741_s28  ;;  %9004 = vrot.lane.b32.xlu1 %v18959_v46, %s14737_s24 }
 0x861   : > { %8795 = vst [vmem:[#allocation3 + $0x40] sm:$0xff] %v19066_v34  ;;  %v8674_v54 = vmax.f32 %v14160_v19, 0.0  ;;  %v14162_v0 = vadd.f32 %v8548_v24, %v18857_v39 }
 0x862   : > { %v8682_v32 = vmax.f32 %v14161_v8, 0.0  ;;  %v19079_v1 = vpop.permute.xlu0 %9818  ;;  %v8758_v29 = vmul.f32 %v8716_v38, %v8673_v35 }
 0x863   : > { %v8683_v55 = vmax.f32 %v14162_v0, 0.0  ;;  %v19081_v51 = vpop.permute.xlu1 %9554  ;;  %v8759_v44 = vmul.f32 %v8720_v26, %v8674_v54 }
 0x864   : > { %v8767_v22 = vmul.f32 %v8716_v38, %v8682_v32  ;;  %9702 = vrot.lane.b32.xlu0 %v18981_v17, %s14742_s11  ;;  %9138 = vrot.lane.b32.xlu1 %v18959_v46, %s14738_s25 }
 0x865   : > { %v8768_v5 = vmul.f32 %v8720_v26, %v8683_v55  ;;  %v19087_v13 = vpop.f32.mrb[84].mxu0 }
 0x866   : > { %v19089_v61 = vpack.c.bf16 %v8767_v22, %v8758_v29  ;;  %v19091_v57 = vpop.permute.xlu0 %9018  ;;  %v8634_v45 = vpop.f32.mrb[85].mxu0  ;;  %v14491_v29 = vunpack.i.h.bf16 %v18946_v3 }
 0x867   : > { %v19093_v6 = vpack.c.bf16 %v8768_v5, %v8759_v44  ;;  %v19095_v18 = vpop.permute.xlu1 %9678  ;;  %v19097_v38 = vpop.f32.mrb[86].mxu0 }
 0x868   : > { %8803 = vst [vmem:[#allocation3 + $0x88] sm:$0xff] %v19089_v61  ;;  %9826 = vrot.lane.b32.xlu0 %v18981_v17, %s14743_s18  ;;  %9272 = vrot.lane.b32.xlu1 %v18959_v46, %s14739_s26  ;;  %v8637_v26 = vpop.f32.mrb[87].mxu0  ;;  %v8909_v3 = vsel %vm468_vm0, %v14491_v29, %v19021_v58 }
 0x869   : > { %8804 = vst [vmem:[#allocation3 + $0x90] sm:$0xff] %v19093_v6 }
 0x86a   : > { %v19105_v9 = vpop.permute.xlu0 %9286 }
 0x86b   : > { %v19107_v19 = vpop.permute.xlu1 %9802 }
 0x86c   : > { %8892 = vrot.lane.b32.xlu0 %v18985_v37, %s14736_s23  ;;  %9438 = vrot.lane.b32.xlu1 %v18962_v47, %s14740_s27 }
 0x86e   : > { %v19113_v59 = vpop.permute.xlu0 %9448 }
 0x86f   : > { %v9017_v35 = vpop.permute.xlu1 %9016 }
 0x870   : > { %9026 = vrot.lane.b32.xlu0 %v18985_v37, %s14737_s24  ;;  %9562 = vrot.lane.b32.xlu1 %v18962_v47, %s14741_s28 }
 0x872   : > { %v19119_v46 = vpop.permute.xlu0 %9572 }
 0x873   : > { %v19121_v8 = vpop.permute.xlu1 %9284 }
 0x874   : > { %v13606_v24 = vpop.f32.mrb[80].mxu1  ;;  %9160 = vrot.lane.b32.xlu0 %v18985_v37, %s14738_s25  ;;  %8890 = vrot.lane.b32.xlu1 %v18981_v17, %s14736_s23 }
 0x875   : > { %v13607_v54 = vpop.f32.mrb[81].mxu1 }
 0x876   : > { %v13608_v0 = vadd.f32 %v13607_v54, %v13606_v24  ;;  %v13609_v32 = vpop.f32.mrb[82].mxu1  ;;  %v19127_v55 = vpop.permute.xlu0 %9696  ;;  %v14495_v24 = vunpack.i.l.bf16 %v18944_v50 }
 0x877   : > { %v13610_v22 = vpop.f32.mrb[83].mxu1  ;;  %v19130_v44 = vpop.permute.xlu1 %8884 }
 0x878   : > { %v13611_v5 = vadd.f32 %v13610_v22, %v13609_v32  ;;  %v8586_v14 = vadd.f32 %v13608_v0, %v18837_v48  ;;  %v8910_v52 = vsel %vm468_vm0, %v19021_v58, %v19130_v44  ;;  %9294 = vrot.lane.b32.xlu0 %v18985_v37, %s14739_s26  ;;  %9024 = vrot.lane.b32.xlu1 %v18981_v17, %s14737_s24 }
 0x879   : > { %10108 = vmatprep.subr.bf16.mxu0 %v8910_v52  ;;  %v9035_v48 = vsel %vm664_vm1, %v18983_v2, %v19041_v62  ;;  %v9034_v58 = vsel %vm664_vm1, %v14495_v24, %v18983_v2 }
 0x87a   : > { %v8635_v54 = vadd.f32 %v8634_v45, %v8586_v14  ;;  %v8589_v0 = vadd.f32 %v13611_v5, %v18845_v12  ;;  %v19147_v32 = vpop.permute.xlu0 %9820  ;;  %10109 = vmatpush1.bf16.msra.mxu0 %v8909_v3  ;;  %v13452_v12 = vld [vmem:[%s21378_s7 + $0x8] ss:$0 sm:$0xff]  ;;  %v14496_v3 = vunpack.i.h.bf16 %v18944_v50 }
 0x87b   : > { %v19149_v22 = vpop.permute.xlu1 %9152  ;;  %10110 = vmatprep.subr.bf16.mxu0 %v9035_v48 }
 0x87c   : > { %v8657_v15 = vmax.f32 %v8635_v54, 0.0  ;;  %v8638_v63 = vadd.f32 %v8637_v26, %v8589_v0  ;;  %v13612_v7 = vpop.f32.mrb[84].mxu1  ;;  %9440 = vrot.lane.b32.xlu0 %v19061_v36, %s14740_s27  ;;  %9158 = vrot.lane.b32.xlu1 %v18981_v17, %s14738_s25  ;;  %v9044_v26 = vsel %vm664_vm1, %v9017_v35, %v19091_v57 }
 0x87d   : > { %v13613_v52 = vpop.f32.mrb[85].mxu1 }
 0x87e   : > { %v8666_v14 = vmax.f32 %v8638_v63, 0.0  ;;  %v13614_v45 = vadd.f32 %v13613_v52, %v13612_v7  ;;  %v13615_v29 = vpop.f32.mrb[86].mxu1  ;;  %v19162_v5 = vpop.permute.xlu0 %9432  ;;  %10111 = vmatpush1.bf16.msra.mxu0 %v9034_v58  ;;  %v8742_v2 = vmul.f32 %v13452_v12, %v8657_v15  ;;  %v9043_v7 = vsel %vm664_vm1, %v14496_v3, %v9017_v35 }
 0x87f   : > { %v13616_v48 = vpop.f32.mrb[87].mxu1  ;;  %v19165_v54 = vpop.permute.xlu1 %8866  ;;  %10112 = vmatprep.subr.bf16.mxu0 %v9044_v26  ;;  %v9169_v63 = vsel %vm859_vm2, %v18995_v31, %v19013_v42 }
 0x880   : > { %v8751_v24 = vmul.f32 %v13452_v12, %v8666_v14  ;;  %v8594_v0 = vadd.f32 %v13614_v45, %v18854_v33  ;;  %v13617_v60 = vadd.f32 %v13616_v48, %v13615_v29  ;;  %9564 = vrot.lane.b32.xlu0 %v19061_v36, %s14741_s28  ;;  %9292 = vrot.lane.b32.xlu1 %v18981_v17, %s14739_s26  ;;  %v14500_v33 = vunpack.i.l.bf16 %v18973_v4 }
 0x881   : > { %v14501_v29 = vunpack.i.h.bf16 %v18973_v4  ;;  %v9303_v4 = vsel %vm1054_vm3, %v18993_v53, %v19055_v41 }
 0x882   : > { %v8778_v50 = vpack.c.bf16 %v8751_v24, %v8742_v2  ;;  %v8643_v58 = vadd.f32 %v19087_v13, %v8594_v0  ;;  %v8597_v15 = vadd.f32 %v13617_v60, %v18857_v39  ;;  %v19178_v52 = vpop.permute.xlu0 %9000  ;;  %10113 = vmatpush1.bf16.msra.mxu0 %v9043_v7  ;;  %v9168_v13 = vsel %vm859_vm2, %v14500_v33, %v18995_v31  ;;  %v9357_v33 = vld [vmem:[#allocation3 + $0x10] sm:$0xff] }
 0x883   : > { %v19181_v14 = vpop.permute.xlu1 %9002  ;;  %10114 = vmatprep.subr.bf16.mxu0 %v9169_v63  ;;  %v9178_v60 = vsel %vm859_vm2, %v19029_v16, %v19149_v22  ;;  %v14505_v31 = vunpack.i.l.bf16 %v18965_v28  ;;  %v9177_v48 = vsel %vm859_vm2, %v14501_v29, %v19029_v16  ;;  %v9312_v7 = vsel %vm1054_vm3, %v19121_v8, %v19105_v9 }
 0x884   : > { %8796 = vst.msk [vmem:[#allocation3 + $0x48] sm:$0xff] %vm513_vm9, %v8778_v50  ;;  %v8675_v17 = vmax.f32 %v8643_v58, 0.0  ;;  %v8646_v35 = vadd.f32 %v19097_v38, %v8597_v15  ;;  %8876 = vrot.lane.b32.xlu0 %v19066_v34, %s14736_s23  ;;  %9456 = vrot.lane.b32.xlu1 %v18985_v37, %s14740_s27  ;;  %v14506_v50 = vunpack.i.h.bf16 %v18965_v28  ;;  %v9465_v29 = vsel %vm1369_vm4, %v19069_v20, %v19162_v5 }
 0x885   : > { %v9302_v16 = vsel %vm1054_vm3, %v14505_v31, %v18993_v53 }
 0x886   : > { %v8684_v39 = vmax.f32 %v8646_v35, 0.0  ;;  %v19194_v45 = vpop.permute.xlu0 %9556  ;;  %10115 = vmatpush1.bf16.msra.mxu0 %v9168_v13  ;;  %v8760_v26 = vmul.f32 %v13452_v12, %v8675_v17  ;;  %v9311_v53 = vsel %vm1054_vm3, %v14506_v50, %v19121_v8  ;;  %v9356_v8 = vld [vmem:[#allocation3 + $0x8] sm:$0xff]  ;;  %v9366_v13 = vld [vmem:[#allocation3 + $0x60] sm:$0xff] }
 0x887   : > { %v19197_v38 = vpop.permute.xlu1 %9136  ;;  %10116 = vmatprep.subr.bf16.mxu0 %v9178_v60  ;;  %v9365_v60 = vld [vmem:[#allocation3 + $0x58] sm:$0xff] }
 0x888   : > { %v8769_v3 = vmul.f32 %v13452_v12, %v8684_v39  ;;  %9010 = vrot.lane.b32.xlu0 %v19066_v34, %s14737_s24  ;;  %9580 = vrot.lane.b32.xlu1 %v18985_v37, %s14741_s28 }
 0x88a   : > { %v8787_v2 = vpack.c.bf16 %v8769_v3, %v8760_v26  ;;  %v19209_v24 = vpop.permute.xlu0 %9134  ;;  %10117 = vmatpush1.bf16.msra.mxu0 %v9177_v48  ;;  %v8902_v48 = vsel %vm468_vm0, %v19001_v30, %v19165_v54 }
 0x88b   : > { %v19211_v12 = vpop.permute.xlu1 %9270  ;;  %10118 = vmatprep.subr.bf16.mxu0 %v9303_v4  ;;  %v19213_v0 = vld [vmem:[#allocation3 + $0x48] sm:$0xff]  ;;  %v9464_v4 = vsel %vm1369_vm4, %v19003_v10, %v19069_v20  ;;  %v9472_v10 = vsel %vm1369_vm4, %v19038_v23, %v19113_v59  ;;  %v9589_v20 = vsel %vm1552_vm5, %v19081_v51, %v19194_v45  ;;  %v9588_v23 = vsel %vm1552_vm5, %v19015_v40, %v19081_v51 }
 0x88c   : > { %8805 = vst.msk [vmem:[#allocation3 + $0x98] sm:$0xff] %vm513_vm9, %v8787_v2  ;;  %9144 = vrot.lane.b32.xlu0 %v19066_v34, %s14738_s25  ;;  %9382 = vst.msk [vmem:[#allocation4 + $0x280] sm:$0xff] %vm513_vm9, %v19213_v0  ;;  %8874 = vrot.lane.b32.xlu1 %v19061_v36, %s14736_s23  ;;  %v9596_v40 = vsel %vm1552_vm5, %v19053_v25, %v19119_v46  ;;  %v9036_v51 = vsel %vm664_vm1, %v19041_v62, %v19178_v52 }
 0x88d   : > { %v9712_v62 = vsel %vm1735_vm6, %v19023_v27, %v19095_v18 }
 0x88e   : > { %v19227_v63 = vpop.permute.xlu0 %9680  ;;  %10119 = vmatpush1.bf16.msra.mxu0 %v9302_v16 }
 0x88f   : > { %v19230_v58 = vpop.permute.xlu1 %9558  ;;  %10120 = vmatprep.subr.bf16.mxu0 %v9312_v7 }
 0x890   : > { %9458 = vrot.lane.b32.xlu0 %v19089_v61, %s14740_s27  ;;  %9008 = vrot.lane.b32.xlu1 %v19061_v36, %s14737_s24 }
 0x892   : > { %v19238_v15 = vpop.permute.xlu0 %9268  ;;  %10121 = vmatpush1.bf16.msra.mxu0 %v9311_v53 }
 0x893   : > { %v19240_v17 = vpop.permute.xlu1 %9682  ;;  %10122 = vmatprep.subr.bf16.mxu0 %v9357_v33  ;;  %v9373_v28 = vld [vmem:[#allocation3 + $0x98] sm:$0xff] }
 0x894   : > { %9582 = vrot.lane.b32.xlu0 %v19089_v61, %s14741_s28  ;;  %9391 = vst.msk [vmem:[#allocation4 + $0x2c8] sm:$0xff] %vm513_vm9, %v9373_v28  ;;  %9142 = vrot.lane.b32.xlu1 %v19061_v36, %s14738_s25 }
 0x896   : > { %v19247_v35 = vpop.permute.xlu0 %9804  ;;  %10123 = vmatpush1.bf16.msra.mxu0 %v9356_v8  ;;  %v9713_v8 = vsel %vm1735_vm6, %v19095_v18, %v19227_v63  ;;  %v9170_v18 = vsel %vm859_vm2, %v19013_v42, %v19209_v24 }
 0x897   : > { %v19249_v39 = vpop.permute.xlu1 %9806  ;;  %10124 = vmatprep.subr.bf16.mxu0 %v9366_v13 }
 0x898   : > { %8896 = vrot.lane.b32.xlu0 %v19093_v6, %s14736_s23  ;;  %8894 = vrot.lane.b32.xlu1 %v19089_v61, %s14736_s23 }
 0x89a   : > { %v19258_v26 = vpop.permute.xlu0 %8868  ;;  %10125 = vmatpush1.bf16.msra.mxu0 %v9365_v60 }
 0x89b   : > { %v8903_v3 = vsel %vm468_vm0, %v19165_v54, %v19258_v26  ;;  %v8887_v31 = vpop.permute.xlu1 %8886  ;;  %10126 = vmatprep.subr.bf16.mxu0 %v9465_v29 }
 0x89c   : > { %9688 = vrot.lane.b32.xlu0 %v19061_v36, %s14742_s11  ;;  %10212 = vmatprep.subr.bf16.mxu1 %v8903_v3  ;;  %v8911_v53 = vsel %vm468_vm0, %v19130_v44, %v8887_v31 }
 0x89d   : > { %9686 = vrot.lane.b32.xlu1 %v18962_v47, %s14742_s11  ;;  %10213 = vmatpush1.bf16.msra.mxu1 %v8902_v48  ;;  %v9837_v48 = vsel %vm1918_vm7, %v19107_v19, %v19247_v35 }
 0x89e   : > { %v19273_v2 = vpop.permute.xlu0 %9434  ;;  %10127 = vmatpush1.bf16.msra.mxu0 %v9464_v4  ;;  %v9836_v4 = vsel %vm1918_vm7, %v19031_v21, %v19107_v19  ;;  %v9304_v19 = vsel %vm1054_vm3, %v19055_v41, %v19238_v15 }
 0x89f   : > { %v19275_v16 = vpop.permute.xlu1 %9450 }
 0x8a0   : > { %v9473_v30 = vsel %vm1369_vm4, %v19113_v59, %v19275_v16  ;;  %9030 = vrot.lane.b32.xlu0 %v19093_v6, %s14737_s24  ;;  %v9037_v59 = vsel %vm664_vm1, %v19178_v52, %v19181_v14  ;;  %v9171_v52 = vsel %vm859_vm2, %v19209_v24, %v19197_v38  ;;  %v19374_v24 = vld [vmem:[%s21372_s1 + $0xdc] ss:$12 sps:$4 sm:$0xff]  }
 0x8a1   : > { %9028 = vrot.lane.b32.xlu1 %v19089_v61, %s14737_s24  ;;  %10128 = vmatprep.subr.bf16.mxu0 %v9473_v30 }
 0x8a2   : > { %v19290_v54 = vpop.permute.xlu0 %8888  ;;  %10129 = vmatpush1.bf16.msra.mxu0 %v9472_v10  ;;  %v9305_v10 = vsel %vm1054_vm3, %v19238_v15, %v19211_v12  ;;  %v9359_v15 = vld [vmem:[#allocation3 + $0x20] sm:$0xff] }
 0x8a3   : > { %v8912_v7 = vsel %vm468_vm0, %v8887_v31, %v19290_v54  ;;  %v9021_v50 = vpop.permute.xlu1 %9020  ;;  %10130 = vmatprep.subr.bf16.mxu0 %v9589_v20  ;;  %v19362_v31 = vld [vmem:[%s21372_s1 + $0xc0] ss:$12 sps:$4 sm:$0xff]  }
 0x8a4   : > { %9278 = vrot.lane.b32.xlu0 %v19066_v34, %s14739_s26  ;;  %10214 = vmatprep.subr.bf16.mxu1 %v8912_v7 }
 0x8a5   : > { %9162 = vrot.lane.b32.xlu1 %v19089_v61, %s14738_s25  ;;  %10215 = vmatpush1.bf16.msra.mxu1 %v8911_v53 }
 0x8a6   : > { %v19306_v33 = vpop.permute.xlu0 %9022  ;;  %10131 = vmatpush1.bf16.msra.mxu0 %v9588_v23  ;;  %10216 = vmatprep.subr.bf16.mxu1 %v9037_v59  ;;  %v19428_v23 = vld [vmem:[#allocation3 + $0x98] sm:$0xff] }
 0x8a7   : > { %v19308_v44 = vpop.permute.xlu1 %9574  ;;  %v9046_v13 = vsel %vm664_vm1, %v9021_v50, %v19306_v33 }
 0x8a8   : > { %v9597_v28 = vsel %vm1552_vm5, %v19119_v46, %v19308_v44  ;;  %9164 = vrot.lane.b32.xlu0 %v19093_v6, %s14738_s25  ;;  %v9045_v46 = vsel %vm664_vm1, %v19091_v57, %v9021_v50  ;;  %v9720_v57 = vsel %vm1735_vm6, %v19064_v11, %v19127_v55  ;;  %v19425_v50 = vld [vmem:[#allocation2] sm:$0xff] }
 0x8a9   : > { %9276 = vrot.lane.b32.xlu1 %v19061_v36, %s14739_s26  ;;  %10132 = vmatprep.subr.bf16.mxu0 %v9597_v28  ;;  %v9368_v28 = vld [vmem:[#allocation3 + $0x70] sm:$0xff] }
 0x8aa   : > { %v19328_v60 = vpop.permute.xlu0 %9156  ;;  %10133 = vmatpush1.bf16.msra.mxu0 %v9596_v40  ;;  %10217 = vmatpush1.bf16.msra.mxu1 %v9036_v51  ;;  %v9367_v51 = vld [vmem:[#allocation3 + $0x68] sm:$0xff] }
 0x8ab   : > { %v9155_v25 = vpop.permute.xlu1 %9154  ;;  %10134 = vmatprep.subr.bf16.mxu0 %v9713_v8  ;;  %10218 = vmatprep.subr.bf16.mxu1 %v9046_v13 }
 0x8ac   : > { %9706 = vrot.lane.b32.xlu0 %v19089_v61, %s14742_s11  ;;  %v9180_v11 = vsel %vm859_vm2, %v9155_v25, %v19328_v60  ;;  %v9179_v30 = vsel %vm859_vm2, %v19149_v22, %v9155_v25  ;;  %v19410_v22 = vld [vmem:[%s21372_s1 + $0xd8] ss:$12 sps:$4 sm:$0xff]   ;;  %v19461_v25 = vld [vmem:[%s21372_s1 + $0xe0] ss:$12 sps:$4 sm:$0xff]  }
 0x8ad   : > { %9704 = vrot.lane.b32.xlu1 %v18985_v37, %s14742_s11 }
 0x8ae   : > { %v19342_v29 = vpop.permute.xlu0 %9290  ;;  %10135 = vmatpush1.bf16.msra.mxu0 %v9712_v62  ;;  %10219 = vmatpush1.bf16.msra.mxu1 %v9045_v46 }
 0x8af   : > { %v19344_v3 = vpop.permute.xlu1 %9698  ;;  %10220 = vmatprep.subr.bf16.mxu1 %v9171_v52 }
 0x8b0   : > { %v9721_v27 = vsel %vm1735_vm6, %v19127_v55, %v19344_v3  ;;  %9298 = vrot.lane.b32.xlu0 %v19093_v6, %s14739_s26 }
 0x8b1   : > { %9296 = vrot.lane.b32.xlu1 %v19089_v61, %s14739_s26  ;;  %10136 = vmatprep.subr.bf16.mxu0 %v9721_v27  ;;  %v9466_v27 = vsel %vm1369_vm4, %v19162_v5, %v19273_v2 }
 0x8b2   : > { %v19369_v55 = vpop.permute.xlu0 %9560  ;;  %10137 = vmatpush1.bf16.msra.mxu0 %v9720_v57  ;;  %10221 = vmatpush1.bf16.msra.mxu1 %v9170_v18 }
 0x8b3   : > { %v9289_v42 = vpop.permute.xlu1 %9288  ;;  %10159 = vmatprep.subr.bf16.mxu0 %v9837_v48  ;;  %10222 = vmatprep.subr.bf16.mxu1 %v9180_v11 }
 0x8b4   : > { %9812 = vrot.lane.b32.xlu0 %v19061_v36, %s14743_s18  ;;  %v9313_v41 = vsel %vm1054_vm3, %v19105_v9, %v9289_v42  ;;  %v19437_v9 = vld [vmem:[%s21372_s1 + $0xc8] ss:$12 sps:$4 sm:$0xff]  }
 0x8b5   : > { %9810 = vrot.lane.b32.xlu1 %v18962_v47, %s14743_s18  ;;  %10139 = vmatmul.mubr.bf16.vlgmr.msra.gmra.mrb[88].mxu0 %v19362_v31  ;;  %v9844_v47 = vsel %vm1918_vm7, %v19079_v1, %v19147_v32 }
 0x8b6   : > { %v19389_v20 = vpop.permute.xlu0 %9684  ;;  %10160 = vmatpush1.bf16.msra.mxu0 %v9836_v4  ;;  %10223 = vmatpush1.bf16.msra.mxu1 %v9179_v30 }
 0x8b7   : > { %v19391_v36 = vpop.permute.xlu1 %9822  ;;  %10224 = vmatprep.subr.bf16.mxu1 %v9305_v10  ;;  %10148 = vmatprep.mubr.bf16.mxu0 %v19374_v24 }
 0x8b8   : > { %v9845_v21 = vsel %vm1918_vm7, %v19147_v32, %v19391_v36  ;;  %9830 = vrot.lane.b32.xlu0 %v19089_v61, %s14743_s18  ;;  %v9314_v61 = vsel %vm1054_vm3, %v9289_v42, %v19342_v29  ;;  %v19501_v42 = vld [vmem:[#allocation3 + $0x40] sm:$0xff] }
 0x8b9   : > { %9442 = vrot.lane.b32.xlu1 %v19066_v34, %s14740_s27  ;;  %10161 = vmatprep.subr.bf16.mxu0 %v9845_v21 }
 0x8ba   : > { %v19414_v7 = vpop.permute.xlu0 %9808  ;;  %10162 = vmatpush1.bf16.msra.mxu0 %v9844_v47  ;;  %10225 = vmatpush1.bf16.msra.mxu1 %v9304_v19 }
 0x8bb   : > { %v9453_v1 = vpop.permute.xlu1 %9452  ;;  %10226 = vmatprep.subr.bf16.mxu1 %v9314_v61 }
 0x8bc   : > { %9444 = vrot.lane.b32.xlu0 %v19213_v0, %s14740_s27 }
 0x8bd   : > { %9828 = vrot.lane.b32.xlu1 %v18985_v37, %s14743_s18  ;;  %10149 = vmatmul.mubr.bf16.gmra.mrb[92].mxu0 %v19410_v22  ;;  %v9358_v37 = vld [vmem:[#allocation3 + $0x18] sm:$0xff] }
 0x8be   : > { %v19423_v32 = vpop.permute.xlu0 %8872  ;;  %10227 = vmatpush1.bf16.msra.mxu1 %v9313_v41  ;;  %10191 = vmatprep.mubr.bf16.mxu0 %v19425_v50 }
 0x8bf   : > { %v9577_v53 = vpop.permute.xlu1 %9576  ;;  %10228 = vmatprep.subr.bf16.mxu1 %v9359_v15 }
 0x8c0   : > { %9462 = vrot.lane.b32.xlu0 %v19428_v23, %s14740_s27  ;;  %v9598_v21 = vsel %vm1552_vm5, %v19308_v44, %v9577_v53 }
 0x8c1   : > { %9460 = vrot.lane.b32.xlu1 %v19093_v6, %s14740_s27 }
 0x8c2   : > { %v19439_v59 = vpop.permute.xlu0 %9006  ;;  %10229 = vmatpush1.bf16.msra.mxu1 %v9358_v37 }
 0x8c3   : > { %v19441_v40 = vpop.permute.xlu1 %9700  ;;  %10230 = vmatprep.subr.bf16.mxu1 %v9368_v28 }
 0x8c4   : > { %9568 = vrot.lane.b32.xlu0 %v19213_v0, %s14741_s28 }
 0x8c5   : > { %9566 = vrot.lane.b32.xlu1 %v19066_v34, %s14741_s28  ;;  %13471 = vmatmul.mubr.msk.bf16.vlgmr.msra.gmra.mrb[88].mxu0 %vm2183_vm8, %v19437_v9 }
 0x8c6   : > { %v19449_v8 = vpop.permute.xlu0 %9140  ;;  %10231 = vmatpush1.bf16.msra.mxu1 %v9367_v51  ;;  %10201 = vmatprep.mubr.bf16.mxu0 %v19425_v50 }
 0x8c7   : > { %v19452_v13 = vpop.permute.xlu1 %9824 }
 0x8c8   : > { %9586 = vrot.lane.b32.xlu0 %v19428_v23, %s14741_s28 }
 0x8c9   : > { %9584 = vrot.lane.b32.xlu1 %v19093_v6, %s14741_s28 }
 0x8ca   : > { %v19463_v62 = vpop.permute.xlu0 %9274 }
 0x8cb   : > { %v19465_v46 = vpop.permute.xlu1 %9436 }
 0x8cc   : > { %v9467_v52 = vsel %vm1369_vm4, %v19273_v2, %v19465_v46  ;;  %9692 = vrot.lane.b32.xlu0 %v19213_v0, %s14742_s11 }
 0x8cd   : > { %9690 = vrot.lane.b32.xlu1 %v19066_v34, %s14742_s11  ;;  %13472 = vmatmul.mubr.msk.bf16.gmra.mrb[92].mxu0 %vm2183_vm8, %v19461_v25 }
 0x8ce   : > { %v19479_v57 = vpop.permute.xlu0 %9454  ;;  %10232 = vmatprep.subr.bf16.mxu1 %v9467_v52  ;;  %10350 = vmatprep.mubr.bf16.mxu0 %v18951_v56  ;;  %v9474_v56 = vsel %vm1369_vm4, %v19275_v16, %v9453_v1  ;;  %v9590_v16 = vsel %vm1552_vm5, %v19194_v45, %v19230_v58  ;;  %v9715_v45 = vsel %vm1735_vm6, %v19240_v17, %v19389_v20 }
 0x8cf   : > { %v9475_v18 = vsel %vm1369_vm4, %v9453_v1, %v19479_v57  ;;  %v8871_v48 = vpop.permute.xlu1 %8870  ;;  %10233 = vmatpush1.bf16.msra.mxu1 %v9466_v27  ;;  %v9839_v1 = vsel %vm1918_vm7, %v19249_v39, %v19414_v7 }
 0x8d0   : > { %v8904_v34 = vsel %vm468_vm0, %v19258_v26, %v8871_v48  ;;  %v8905_v11 = vsel %vm468_vm0, %v8871_v48, %v19423_v32  ;;  %9710 = vrot.lane.b32.xlu0 %v19428_v23, %s14742_s11  ;;  %10234 = vmatprep.subr.bf16.mxu1 %v9475_v18  ;;  %v9591_v26 = vsel %vm1552_vm5, %v19230_v58, %v19369_v55  ;;  %v13463_v18 = vld [vmem:[%s21373_s2 + $0x90] sm:$0xff] }
 0x8d1   : > { %9708 = vrot.lane.b32.xlu1 %v19093_v6, %s14742_s11  ;;  %10318 = vmatprep.subr.bf16.mxu0 %v8905_v11 }
 0x8d2   : > { %v19494_v5 = vpop.permute.xlu0 %9578  ;;  %10319 = vmatpush1.bf16.msra.mxu0 %v8904_v34 }
 0x8d3   : > { %v9005_v2 = vpop.permute.xlu1 %9004  ;;  %10235 = vmatpush1.bf16.msra.mxu1 %v9474_v56  ;;  %v9599_v30 = vsel %vm1552_vm5, %v9577_v53, %v19494_v5 }
 0x8d4   : > { %9816 = vrot.lane.b32.xlu0 %v19213_v0, %s14743_s18  ;;  %10236 = vmatprep.subr.bf16.mxu1 %v9591_v26  ;;  %v9038_v52 = vsel %vm664_vm1, %v19181_v14, %v9005_v2 }
 0x8d5   : > { %9814 = vrot.lane.b32.xlu1 %v19501_v42, %s14743_s18 }
 0x8d6   : > { %v19508_v4 = vpop.permute.xlu0 %9702 }
 0x8d7   : > { %v19512_v10 = vpop.permute.xlu1 %9138  ;;  %10237 = vmatpush1.bf16.msra.mxu1 %v9590_v16  ;;  %v9723_v19 = vsel %vm1735_vm6, %v19441_v40, %v19508_v4 }
 0x8d8   : > { %9834 = vrot.lane.b32.xlu0 %v19428_v23, %s14743_s18  ;;  %10238 = vmatprep.subr.bf16.mxu1 %v9599_v30  ;;  %v9173_v34 = vsel %vm859_vm2, %v19512_v10, %v19449_v8  ;;  %v9172_v26 = vsel %vm859_vm2, %v19197_v38, %v19512_v10 }
 0x8d9   : > { %9832 = vrot.lane.b32.xlu1 %v19093_v6, %s14743_s18  ;;  %v9714_v6 = vsel %vm1735_vm6, %v19227_v63, %v19240_v17  ;;  %v9722_v63 = vsel %vm1735_vm6, %v19344_v3, %v19441_v40  ;;  %v9838_v3 = vsel %vm1918_vm7, %v19247_v35, %v19249_v39  ;;  %v13462_v35 = vld [vmem:[%s21373_s2 + $0x88] sm:$0xff]  ;;  %v9846_v39 = vsel %vm1918_vm7, %v19391_v36, %v19452_v13  ;;  %v13464_v36 = vld [vmem:[%s21373_s2 + $0x98] sm:$0xff] }
 0x8da   : > { %v19520_v47 = vpop.permute.xlu0 %9826 }
 0x8db   : > { %v19525_v58 = vpop.permute.xlu1 %9272  ;;  %10239 = vmatpush1.bf16.msra.mxu1 %v9598_v21  ;;  %v9847_v53 = vsel %vm1918_vm7, %v19452_v13, %v19520_v47 }
 0x8dc   : > { %8898 = vrot.lane.b32.xlu0 %v19428_v23, %s14736_s23  ;;  %10240 = vmatprep.subr.bf16.mxu1 %v9715_v45  ;;  %v9307_v38 = vsel %vm1054_vm3, %v19525_v58, %v19463_v62  ;;  %v9306_v45 = vsel %vm1054_vm3, %v19211_v12, %v19525_v58 }
 0x8dd   : > { %8878 = vrot.lane.b32.xlu1 %v19213_v0, %s14736_s23 }
 0x8de   : > { %v19534_v44 = vpop.permute.xlu0 %8892 }
 0x8df   : > { %v19539_v61 = vpop.permute.xlu1 %9438  ;;  %10241 = vmatpush1.bf16.msra.mxu1 %v9714_v6 }
 0x8e0   : > { %9032 = vrot.lane.b32.xlu0 %v19428_v23, %s14737_s24  ;;  %10242 = vmatprep.subr.bf16.mxu1 %v9723_v19 }
 0x8e1   : > { %9012 = vrot.lane.b32.xlu1 %v19213_v0, %s14737_s24 }
 0x8e2   : > { %v19548_v17 = vpop.permute.xlu0 %9026 }
 0x8e3   : > { %v19553_v41 = vpop.permute.xlu1 %9562  ;;  %10243 = vmatpush1.bf16.msra.mxu1 %v9722_v63  ;;  %v19642_v63 = vld [vmem:[%s21372_s1 + $0xc4] ss:$12 sps:$4 sm:$0xff]  }
 0x8e4   : > { %9166 = vrot.lane.b32.xlu0 %v19428_v23, %s14738_s25  ;;  %10265 = vmatprep.subr.bf16.mxu1 %v9839_v1 }
 0x8e5   : > { %9146 = vrot.lane.b32.xlu1 %v19213_v0, %s14738_s25 }
 0x8e6   : > { %v19562_v15 = vpop.permute.xlu0 %9160  ;;  %10245 = vmatmul.mubr.bf16.vlgmr.msra.gmra.mrb[88].mxu1 %v19362_v31 }
 0x8e7   : > { %v8891_v37 = vpop.permute.xlu1 %8890  ;;  %10266 = vmatpush1.bf16.msra.mxu1 %v9838_v3  ;;  %10254 = vmatprep.mubr.bf16.mxu1 %v19374_v24 }
 0x8e8   : > { %v8913_v28 = vsel %vm468_vm0, %v19290_v54, %v8891_v37  ;;  %v8914_v40 = vsel %vm468_vm0, %v8891_v37, %v19534_v44  ;;  %9300 = vrot.lane.b32.xlu0 %v19428_v23, %s14739_s26  ;;  %10267 = vmatprep.subr.bf16.mxu1 %v9847_v53  ;;  %v9039_v54 = vsel %vm664_vm1, %v9005_v2, %v19439_v59  ;;  %v13461_v23 = vld [vmem:[%s21373_s2 + $0x80] sm:$0xff]  ;;  %v9361_v53 = vld [vmem:[#allocation3 + $0x30] sm:$0xff] }
 0x8e9   : > { %9280 = vrot.lane.b32.xlu1 %v19213_v0, %s14739_s26  ;;  %10320 = vmatprep.subr.bf16.mxu0 %v8914_v40 }
 0x8ea   : > { %v19585_v51 = vpop.permute.xlu0 %9294  ;;  %10321 = vmatpush1.bf16.msra.mxu0 %v8913_v28  ;;  %v9360_v28 = vld [vmem:[#allocation3 + $0x28] sm:$0xff] }
 0x8eb   : > { %v9025_v0 = vpop.permute.xlu1 %9024  ;;  %10268 = vmatpush1.bf16.msra.mxu1 %v9846_v39  ;;  %10322 = vmatprep.subr.bf16.mxu0 %v9039_v54  ;;  %v9369_v39 = vld [vmem:[#allocation3 + $0x78] sm:$0xff] }
 0x8ec   : > { %10057 = vperm.xlu0 %14425, %v13462_v35   ;;  %v9048_v13 = vsel %vm664_vm1, %v9025_v0, %v19548_v17  ;;  %v9047_v14 = vsel %vm664_vm1, %v19306_v33, %v9025_v0  ;;  %v9370_v35 = vld [vmem:[#allocation3 + $0x80] sm:$0xff] }
 0x8ed   : > { %10052 = vperm.xlu1 %14426, %v13461_v23  }
 0x8ee   : > { %v19597_v27 = vpop.permute.xlu0 %9440  ;;  %10255 = vmatmul.mubr.bf16.gmra.mrb[92].mxu1 %v19410_v22  ;;  %10323 = vmatpush1.bf16.msra.mxu0 %v9038_v52 }
 0x8ef   : > { %v9159_v48 = vpop.permute.xlu1 %9158  ;;  %10324 = vmatprep.subr.bf16.mxu0 %v9048_v13  ;;  %10297 = vmatprep.mubr.bf16.mxu1 %v19425_v50 }
 0x8f0   : > { %10067 = vperm.xlu0 %14425, %v13464_v36   ;;  %v9182_v2 = vsel %vm859_vm2, %v9159_v48, %v19562_v15  ;;  %v9181_v30 = vsel %vm859_vm2, %v19328_v60, %v9159_v48  ;;  %v9468_v36 = vsel %vm1369_vm4, %v19465_v46, %v19539_v61 }
 0x8f1   : > { %10062 = vperm.xlu1 %14426, %v13463_v18  }
 0x8f2   : > { %v19609_v11 = vpop.permute.xlu0 %9564  ;;  %10325 = vmatpush1.bf16.msra.mxu0 %v9047_v14 }
 0x8f3   : > { %v9293_v56 = vpop.permute.xlu1 %9292  ;;  %10326 = vmatprep.subr.bf16.mxu0 %v9173_v34 }
 0x8f4   : > { %v9316_v6 = vsel %vm1054_vm3, %v9293_v56, %v19585_v51  ;;  %v9315_v1 = vsel %vm1054_vm3, %v19342_v29, %v9293_v56  ;;  %v9469_v29 = vsel %vm1369_vm4, %v19539_v61, %v19597_v27  ;;  %v9593_v61 = vsel %vm1552_vm5, %v19553_v41, %v19609_v11 }
 0x8f6   : > { %v19616_v16 = vpop.permute.xlu0 %8876  ;;  %13473 = vmatmul.mubr.msk.bf16.vlgmr.msra.gmra.mrb[88].mxu1 %vm2183_vm8, %v19437_v9  ;;  %10327 = vmatpush1.bf16.msra.mxu0 %v9172_v26 }
 0x8f7   : > { %v9457_v33 = vpop.permute.xlu1 %9456  ;;  %10328 = vmatprep.subr.bf16.mxu0 %v9182_v2  ;;  %10307 = vmatprep.mubr.bf16.mxu1 %v19425_v50 }
 0x8fa   : > { %v19626_v10 = vpop.permute.xlu0 %9010  ;;  %10329 = vmatpush1.bf16.msra.mxu0 %v9181_v30 }
 0x8fb   : > { %v19628_v21 = vpop.permute.xlu1 %9580  ;;  %10330 = vmatprep.subr.bf16.mxu0 %v9307_v38 }
 0x8fc   : > { %v9600_v38 = vsel %vm1552_vm5, %v19494_v5, %v19628_v21 }
 0x8fe   : > { %v19635_v19 = vpop.permute.xlu0 %9144  ;;  %13474 = vmatmul.mubr.msk.bf16.gmra.mrb[92].mxu1 %vm2183_vm8, %v19461_v25  ;;  %10331 = vmatpush1.bf16.msra.mxu0 %v9306_v45 }
 0x8ff   : > { %v8875_v60 = vpop.permute.xlu1 %8874  ;;  %10332 = vmatprep.subr.bf16.mxu0 %v9316_v6  ;;  %10456 = vmatprep.mubr.bf16.mxu1 %v19642_v63  ;;  %v14512_v6 = vpack.i.bf16 %v19425_v50, %v19425_v50 }
 0x900   : > { %v8906_v12 = vsel %vm468_vm0, %v19423_v32, %v8875_v60  ;;  %v8907_v58 = vsel %vm468_vm0, %v8875_v60, %v19616_v16 }
 0x901   : > { %10424 = vmatprep.subr.bf16.mxu1 %v8907_v58  ;;  %14513 = vrot.lane.b32.xlu0 %v14512_v6, %s14737_s24 }
 0x902   : > { %v19651_v3 = vpop.permute.xlu0 %9458  ;;  %10333 = vmatpush1.bf16.msra.mxu0 %v9315_v1  ;;  %10425 = vmatpush1.bf16.msra.mxu1 %v8906_v12 }
 0x903   : > { %v9009_v37 = vpop.permute.xlu1 %9008  ;;  %10334 = vmatprep.subr.bf16.mxu0 %v9361_v53  ;;  %v9477_v13 = vsel %vm1369_vm4, %v9457_v33, %v19651_v3  ;;  %14508 = vrot.lane.b32.xlu1 %v14512_v6, %s14736_s23 }
 0x904   : > { %v9041_v18 = vsel %vm664_vm1, %v9009_v37, %v19626_v10  ;;  %v9040_v46 = vsel %vm664_vm1, %v19439_v59, %v9009_v37  ;;  %v9592_v59 = vsel %vm1552_vm5, %v19369_v55, %v19553_v41 }
 0x905   : > { %14523 = vrot.lane.b32.xlu0 %v14512_v6, %s14739_s26 }
 0x906   : > { %v19653_v40 = vpop.permute.xlu0 %9582  ;;  %10335 = vmatpush1.bf16.msra.mxu0 %v9360_v28 }
 0x907   : > { %v9143_v32 = vpop.permute.xlu1 %9142  ;;  %10336 = vmatprep.subr.bf16.mxu0 %v9370_v35  ;;  %14518 = vrot.lane.b32.xlu1 %v14512_v6, %s14738_s25 }
 0x908   : > { %v9174_v55 = vsel %vm859_vm2, %v19449_v8, %v9143_v32 }
 0x90a   : > { %v19658_v54 = vpop.permute.xlu0 %8896  ;;  %10337 = vmatpush1.bf16.msra.mxu0 %v9369_v39 }
 0x90b   : > { %v8895_v23 = vpop.permute.xlu1 %8894  ;;  %10338 = vmatprep.subr.bf16.mxu0 %v9469_v29  ;;  %v9362_v29 = vld [vmem:[#allocation3 + $0x38] sm:$0xff] }
 0x90c   : > { %v8915_v0 = vsel %vm468_vm0, %v19534_v44, %v8895_v23  ;;  %v8916_v52 = vsel %vm468_vm0, %v8895_v23, %v19658_v54  ;;  %v9476_v44 = vsel %vm1369_vm4, %v19479_v57, %v9457_v33  ;;  %v9601_v57 = vsel %vm1552_vm5, %v19628_v21, %v19653_v40 }
 0x90d   : > { %10426 = vmatprep.subr.bf16.mxu1 %v8916_v52  ;;  %v9175_v33 = vsel %vm859_vm2, %v9143_v32, %v19635_v19 }
 0x90e   : > { %v19671_v48 = vpop.permute.xlu0 %9688  ;;  %10339 = vmatpush1.bf16.msra.mxu0 %v9468_v36  ;;  %10427 = vmatpush1.bf16.msra.mxu1 %v8915_v0  ;;  %v9372_v0 = vld [vmem:[#allocation3 + $0x90] sm:$0xff]  ;;  %v9371_v36 = vld [vmem:[#allocation3 + $0x88] sm:$0xff] }
 0x90f   : > { %v9687_v14 = vpop.permute.xlu1 %9686  ;;  %10340 = vmatprep.subr.bf16.mxu0 %v9477_v13  ;;  %10428 = vmatprep.subr.bf16.mxu1 %v9041_v18 }
 0x910   : > { %v9717_v41 = vsel %vm1735_vm6, %v9687_v14, %v19671_v48  ;;  %v9716_v8 = vsel %vm1735_vm6, %v19389_v20, %v9687_v14 }
 0x912   : > { %v19680_v34 = vpop.permute.xlu0 %9030  ;;  %10341 = vmatpush1.bf16.msra.mxu0 %v9476_v44  ;;  %10429 = vmatpush1.bf16.msra.mxu1 %v9040_v46 }
 0x913   : > { %v9029_v56 = vpop.permute.xlu1 %9028  ;;  %10342 = vmatprep.subr.bf16.mxu0 %v9593_v61  ;;  %v9968_v61 = vld [vmem:[#allocation4 + $0x280] sm:$0xff] }
 0x914   : > { %v9049_v26 = vsel %vm664_vm1, %v19548_v17, %v9029_v56  ;;  %v9050_v2 = vsel %vm664_vm1, %v9029_v56, %v19680_v34 }
 0x915   : > { %10430 = vmatprep.subr.bf16.mxu1 %v9050_v2 }
 0x916   : > { %v19694_v30 = vpop.permute.xlu0 %9278  ;;  %10343 = vmatpush1.bf16.msra.mxu0 %v9592_v59  ;;  %10431 = vmatpush1.bf16.msra.mxu1 %v9049_v26 }
 0x917   : > { %v9163_v17 = vpop.permute.xlu1 %9162  ;;  %10344 = vmatprep.subr.bf16.mxu0 %v9601_v57  ;;  %10432 = vmatprep.subr.bf16.mxu1 %v9175_v33 }
 0x918   : > { %v9183_v5 = vsel %vm859_vm2, %v19562_v15, %v9163_v17 }
 0x91a   : > { %v19703_v45 = vpop.permute.xlu0 %9164  ;;  %10345 = vmatpush1.bf16.msra.mxu0 %v9600_v38  ;;  %10433 = vmatpush1.bf16.msra.mxu1 %v9174_v55 }
 0x91b   : > { %v9184_v60 = vsel %vm859_vm2, %v9163_v17, %v19703_v45  ;;  %v9277_v12 = vpop.permute.xlu1 %9276  ;;  %10346 = vmatprep.subr.bf16.mxu0 %v9717_v41 }
 0x91c   : > { %10434 = vmatprep.subr.bf16.mxu1 %v9184_v60  ;;  %v9309_v21 = vsel %vm1054_vm3, %v9277_v12, %v19694_v30  ;;  %v9308_v15 = vsel %vm1054_vm3, %v19463_v62, %v9277_v12 }
 0x91e   : > { %v19717_v58 = vpop.permute.xlu0 %9706  ;;  %10347 = vmatpush1.bf16.msra.mxu0 %v9716_v8  ;;  %10435 = vmatpush1.bf16.msra.mxu1 %v9183_v5 }
 0x91f   : > { %v9705_v1 = vpop.permute.xlu1 %9704  ;;  %10436 = vmatprep.subr.bf16.mxu1 %v9309_v21 }
 0x920   : > { %v9724_v53 = vsel %vm1735_vm6, %v19508_v4, %v9705_v1  ;;  %v9725_v20 = vsel %vm1735_vm6, %v9705_v1, %v19717_v58 }
 0x921   : > { %10348 = vmatprep.subr.bf16.mxu0 %v9725_v20 }
 0x922   : > { %v19727_v37 = vpop.permute.xlu0 %9298  ;;  %10349 = vmatpush1.bf16.msra.mxu0 %v9724_v53  ;;  %10437 = vmatpush1.bf16.msra.mxu1 %v9308_v15 }
 0x923   : > { %v9297_v28 = vpop.permute.xlu1 %9296 }
 0x924   : > { %v9317_v35 = vsel %vm1054_vm3, %v19585_v51, %v9297_v28  ;;  %v9318_v4 = vsel %vm1054_vm3, %v9297_v28, %v19727_v37 }
 0x925   : > { %10351 = vmatmul.mubr.bf16.vlgmr.msra.gmra.mrb[96].mxu0 %v19362_v31  ;;  %10438 = vmatprep.subr.bf16.mxu1 %v9318_v4 }
 0x926   : > { %v19734_v32 = vpop.permute.xlu0 %9812  ;;  %10439 = vmatpush1.bf16.msra.mxu1 %v9317_v35  ;;  %10360 = vmatprep.mubr.bf16.mxu0 %v19374_v24 }
 0x927   : > { %v9811_v62 = vpop.permute.xlu1 %9810  ;;  %10440 = vmatprep.subr.bf16.mxu1 %v19501_v42 }
 0x928   : > { %v9840_v39 = vsel %vm1918_vm7, %v19414_v7, %v9811_v62  ;;  %v9841_v51 = vsel %vm1918_vm7, %v9811_v62, %v19734_v32 }
 0x929   : > { %10371 = vmatprep.subr.bf16.mxu0 %v9841_v51 }
 0x92a   : > { %v19742_v23 = vpop.permute.xlu0 %9830  ;;  %10372 = vmatpush1.bf16.msra.mxu0 %v9840_v39  ;;  %10441 = vmatpush1.bf16.msra.mxu1 %v9362_v29 }
 0x92b   : > { %v9443_v52 = vpop.permute.xlu1 %9442  ;;  %10442 = vmatprep.subr.bf16.mxu1 %v9372_v0 }
 0x92c   : > { %v9470_v44 = vsel %vm1369_vm4, %v19597_v27, %v9443_v52 }
 0x92d   : > { %10361 = vmatmul.mubr.bf16.gmra.mrb[100].mxu0 %v19410_v22 }
 0x92e   : > { %v9445_v13 = vpop.permute.xlu0 %9444  ;;  %10443 = vmatpush1.bf16.msra.mxu1 %v9371_v36  ;;  %10403 = vmatprep.mubr.bf16.mxu0 %v19425_v50 }
 0x92f   : > { %v9471_v7 = vsel %vm1369_vm4, %v9443_v52, %v9445_v13  ;;  %9506 = vst.msk [vmem:[#allocation4 + $0x310] sm:$0xff] %vm513_vm9, %v9445_v13  ;;  %v9829_v42 = vpop.permute.xlu1 %9828 }
 0x930   : > { %v9848_v18 = vsel %vm1918_vm7, %v19520_v47, %v9829_v42  ;;  %v9849_v14 = vsel %vm1918_vm7, %v9829_v42, %v19742_v23  ;;  %10444 = vmatprep.subr.bf16.mxu1 %v9471_v7 }
 0x931   : > { %10373 = vmatprep.subr.bf16.mxu0 %v9849_v14 }
 0x932   : > { %v9463_v46 = vpop.permute.xlu0 %9462  ;;  %10374 = vmatpush1.bf16.msra.mxu0 %v9848_v18  ;;  %10445 = vmatpush1.bf16.msra.mxu1 %v9470_v44 }
 0x933   : > { %9515 = vst.msk [vmem:[#allocation4 + $0x358] sm:$0xff] %vm513_vm9, %v9463_v46  ;;  %v9461_v56 = vpop.permute.xlu1 %9460  ;;  %13622 = vmatprep.subr.bf16.mxu0 %v9968_v61 }
 0x934   : > { %v9478_v26 = vsel %vm1369_vm4, %v19651_v3, %v9461_v56  ;;  %v9479_v47 = vsel %vm1369_vm4, %v9461_v56, %v9463_v46 }
 0x935   : > { %13475 = vmatmul.mubr.msk.bf16.vlgmr.msra.gmra.mrb[96].mxu0 %vm2183_vm8, %v19437_v9  ;;  %10446 = vmatprep.subr.bf16.mxu1 %v9479_v47 }
 0x936   : > { %v9569_v2 = vpop.permute.xlu0 %9568  ;;  %10447 = vmatpush1.bf16.msra.mxu1 %v9478_v26  ;;  %10413 = vmatprep.mubr.bf16.mxu0 %v19425_v50  ;;  %v9986_v42 = vld [vmem:[#allocation4 + $0x310] sm:$0xff] }
 0x937   : > { %9630 = vst.msk [vmem:[#allocation4 + $0x3a0] sm:$0xff] %vm513_vm9, %v9569_v2  ;;  %v9567_v27 = vpop.permute.xlu1 %9566 }
 0x938   : > { %v9594_v59 = vsel %vm1552_vm5, %v19609_v11, %v9567_v27  ;;  %v9595_v57 = vsel %vm1552_vm5, %v9567_v27, %v9569_v2  ;;  %v19833_v2 = vld [vmem:[%s21378_s7] sm:$0xff] }
 0x939   : > { %10448 = vmatprep.subr.bf16.mxu1 %v9595_v57 }
 0x93a   : > { %v9587_v3 = vpop.permute.xlu0 %9586  ;;  %10449 = vmatpush1.bf16.msra.mxu1 %v9594_v59  ;;  %v9995_v14 = vld [vmem:[#allocation4 + $0x358] sm:$0xff] }
 0x93b   : > { %9639 = vst.msk [vmem:[#allocation4 + $0x3e8] sm:$0xff] %vm513_vm9, %v9587_v3  ;;  %v9585_v33 = vpop.permute.xlu1 %9584 }
 0x93c   : > { %v9602_v17 = vsel %vm1552_vm5, %v19653_v40, %v9585_v33  ;;  %v9603_v38 = vsel %vm1552_vm5, %v9585_v33, %v9587_v3 }
 0x93d   : > { %13476 = vmatmul.mubr.msk.bf16.gmra.mrb[100].mxu0 %vm2183_vm8, %v19461_v25  ;;  %10450 = vmatprep.subr.bf16.mxu1 %v9603_v38 }
 0x93e   : > { %v9693_v55 = vpop.permute.xlu0 %9692  ;;  %10451 = vmatpush1.bf16.msra.mxu1 %v9602_v17  ;;  %10562 = vmatprep.mubr.bf16.mxu0 %v19642_v63 }
 0x93f   : > { %9754 = vst.msk [vmem:[#allocation4 + $0x430] sm:$0xff] %vm513_vm9, %v9693_v55  ;;  %v9691_v11 = vpop.permute.xlu1 %9690 }
 0x940   : > { %v9718_v41 = vsel %vm1735_vm6, %v19671_v48, %v9691_v11  ;;  %v9719_v6 = vsel %vm1735_vm6, %v9691_v11, %v9693_v55  ;;  %v10675_v55 = vrot.slane %v19833_v2, %v21421_v49 }
 0x941   : > { %10452 = vmatprep.subr.bf16.mxu1 %v9719_v6 }
 0x942   : > { %v9711_v40 = vpop.permute.xlu0 %9710  ;;  %10453 = vmatpush1.bf16.msra.mxu1 %v9718_v41  ;;  %v10013_v44 = vld [vmem:[#allocation4 + $0x3e8] sm:$0xff] }
 0x943   : > { %9763 = vst.msk [vmem:[#allocation4 + $0x478] sm:$0xff] %vm513_vm9, %v9711_v40  ;;  %v9709_v60 = vpop.permute.xlu1 %9708 }
 0x944   : > { %v9726_v12 = vsel %vm1735_vm6, %v19717_v58, %v9709_v60  ;;  %v9727_v8 = vsel %vm1735_vm6, %v9709_v60, %v9711_v40 }
 0x945   : > { %10454 = vmatprep.subr.bf16.mxu1 %v9727_v8 }
 0x946   : > { %v9817_v63 = vpop.permute.xlu0 %9816  ;;  %10455 = vmatpush1.bf16.msra.mxu1 %v9726_v12  ;;  %v10022_v61 = vld [vmem:[#allocation4 + $0x430] sm:$0xff] }
 0x947   : > { %9878 = vst.msk [vmem:[#allocation4 + $0x4c0] sm:$0xff] %vm513_vm9, %v9817_v63  ;;  %v9815_v5 = vpop.permute.xlu1 %9814 }
 0x948   : > { %v9842_v48 = vsel %vm1918_vm7, %v19734_v32, %v9815_v5  ;;  %v9843_v21 = vsel %vm1918_vm7, %v9815_v5, %v9817_v63 }
 0x949   : > { %10457 = vmatmul.mubr.bf16.vlgmr.msra.gmra.mrb[96].mxu1 %v19362_v31  ;;  %10477 = vmatprep.subr.bf16.mxu1 %v9843_v21 }
 0x94a   : > { %v9835_v1 = vpop.permute.xlu0 %9834  ;;  %10478 = vmatpush1.bf16.msra.mxu1 %v9842_v48  ;;  %10466 = vmatprep.mubr.bf16.mxu1 %v19374_v24  ;;  %v10031_v26 = vld [vmem:[#allocation4 + $0x478] sm:$0xff] }
 0x94b   : > { %9887 = vst.msk [vmem:[#allocation4 + $0x508] sm:$0xff] %vm513_vm9, %v9835_v1  ;;  %v9833_v58 = vpop.permute.xlu1 %9832 }
 0x94c   : > { %v9850_v53 = vsel %vm1918_vm7, %v19742_v23, %v9833_v58  ;;  %v9851_v20 = vsel %vm1918_vm7, %v9833_v58, %v9835_v1 }
 0x94d   : > { %10479 = vmatprep.subr.bf16.mxu1 %v9851_v20 }
 0x94e   : > { %v8899_v15 = vpop.permute.xlu0 %8898  ;;  %10480 = vmatpush1.bf16.msra.mxu1 %v9850_v53  ;;  %v10040_v28 = vld [vmem:[#allocation4 + $0x4c0] sm:$0xff] }
 0x94f   : > { %v8917_v35 = vsel %vm468_vm0, %v19658_v54, %v8899_v15  ;;  %v8879_v4 = vpop.permute.xlu1 %8878  ;;  %13860 = vmatprep.subr.bf16.mxu1 %v10040_v28 }
 0x950   : > { %8953 = vst.msk [vmem:[#allocation4 + $0x88] sm:$0xff] %vm513_vm9, %v8917_v35  ;;  %v8908_v32 = vsel %vm468_vm0, %v19616_v16, %v8879_v4 }
 0x951   : > { %8944 = vst.msk [vmem:[#allocation4 + $0x40] sm:$0xff] %vm513_vm9, %v8908_v32  ;;  %10467 = vmatmul.mubr.bf16.gmra.mrb[100].mxu1 %v19410_v22 }
 0x952   : > { %v9033_v62 = vpop.permute.xlu0 %9032  ;;  %10509 = vmatprep.mubr.bf16.mxu1 %v19425_v50  ;;  %v10049_v36 = vld [vmem:[#allocation4 + $0x508] sm:$0xff] }
 0x953   : > { %v9051_v39 = vsel %vm664_vm1, %v19680_v34, %v9033_v62  ;;  %v9013_v51 = vpop.permute.xlu1 %9012  ;;  %v9977_v34 = vld [vmem:[#allocation4 + $0x2c8] sm:$0xff] }
 0x954   : > { %9087 = vst.msk [vmem:[#allocation4 + $0x118] sm:$0xff] %vm513_vm9, %v9051_v39  ;;  %v9042_v54 = vsel %vm664_vm1, %v19626_v10, %v9013_v51 }
 0x955   : > { %9078 = vst.msk [vmem:[#allocation4 + $0xd0] sm:$0xff] %vm513_vm9, %v9042_v54 }
 0x956   : > { %v9167_v29 = vpop.permute.xlu0 %9166 }
 0x957   : > { %v9185_v16 = vsel %vm859_vm2, %v19703_v45, %v9167_v29  ;;  %v9147_v23 = vpop.permute.xlu1 %9146  ;;  %v9905_v7 = vld [vmem:[#allocation4 + $0x88] sm:$0xff] }
 0x958   : > { %9221 = vst.msk [vmem:[#allocation4 + $0x1a8] sm:$0xff] %vm513_vm9, %v9185_v16  ;;  %v9176_v0 = vsel %vm859_vm2, %v19635_v19, %v9147_v23  ;;  %v9896_v52 = vld [vmem:[#allocation4 + $0x40] sm:$0xff] }
 0x959   : > { %9212 = vst.msk [vmem:[#allocation4 + $0x160] sm:$0xff] %vm513_vm9, %v9176_v0  ;;  %13623 = vmatpush3.bf16.msra.mxu0 %v9896_v52  ;;  %13477 = vmatmul.mubr.msk.bf16.vlgmr.msra.gmra.mrb[96].mxu1 %vm2183_vm8, %v19437_v9 }
 0x95a   : > { %13624 = vmatprep.subr.bf16.mxu0 %v9977_v34  ;;  %v9301_v10 = vpop.permute.xlu0 %9300  ;;  %13861 = vmatpush3.bf16.msra.mxu1 %v10040_v28 }
 0x95b   : > { %v9319_v45 = vsel %vm1054_vm3, %v19727_v37, %v9301_v10  ;;  %v9281_v13 = vpop.permute.xlu1 %9280  ;;  %13862 = vmatprep.subr.bf16.mxu1 %v10049_v36  ;;  %10519 = vmatprep.mubr.bf16.mxu1 %v19425_v50  ;;  %v9923_v50 = vld [vmem:[#allocation4 + $0x118] sm:$0xff] }
 0x95c   : > { %9355 = vst.msk [vmem:[#allocation4 + $0x238] sm:$0xff] %vm513_vm9, %v9319_v45  ;;  %v9310_v19 = vsel %vm1054_vm3, %v19694_v30, %v9281_v13  ;;  %v9914_v18 = vld [vmem:[#allocation4 + $0xd0] sm:$0xff]  ;;  %v10004_v30 = vld [vmem:[#allocation4 + $0x3a0] sm:$0xff] }
 0x95d   : > { %9346 = vst.msk [vmem:[#allocation4 + $0x1f0] sm:$0xff] %vm513_vm9, %v9310_v19  ;;  %13625 = vmatpush3.bf16.msra.mxu0 %v9905_v7 }
 0x95e   : > { %13626 = vmatprep.subr.bf16.mxu0 %v9986_v42  ;;  %13863 = vmatpush3.bf16.msra.mxu1 %v10049_v36 }
 0x95f   : > { %v9941_v46 = vld [vmem:[#allocation4 + $0x1a8] sm:$0xff] }
 0x960   : > { %v9932_v37 = vld [vmem:[#allocation4 + $0x160] sm:$0xff] }
 0x961   : > { %13627 = vmatpush3.bf16.msra.mxu0 %v9914_v18  ;;  %13478 = vmatmul.mubr.msk.bf16.gmra.mrb[100].mxu1 %vm2183_vm8, %v19461_v25 }
 0x962   : > { %13628 = vmatprep.subr.bf16.mxu0 %v9995_v14  ;;  %13864 = vmatprep.mubr.msk.bf16.mxu1 %vm2183_vm8, %v19437_v9  ;;  %v21434_v14 = vld [vmem:[#allocation12_spill] sm:$0xff] }
 0x963   : > { %v9959_v9 = vld [vmem:[#allocation4 + $0x238] sm:$0xff] }
 0x964   : > { %v9950_v56 = vld [vmem:[#allocation4 + $0x1f0] sm:$0xff] }
 0x965   : > { %13629 = vmatpush3.bf16.msra.mxu0 %v9923_v50  ;;  %v10679_v50 = vrot.slane %v19833_v2, %v21434_v14  ;;  %v21438_v14 = vld [vmem:[#allocation14_spill] sm:$0xff] }
 0x966   : > { %13630 = vmatprep.subr.bf16.mxu0 %v10004_v30 }
 0x969   : > { %13631 = vmatpush3.bf16.msra.mxu0 %v9932_v37  ;;  %13865 = vmatmul.mubr.msk.bf16.vlgmr.msra.gmra.mrb[104].mxu1 %vm2183_vm8, %v19461_v25 }
 0x96a   : > { %13632 = vmatprep.subr.bf16.mxu0 %v10013_v44 }
 0x96b   : > { %v19836_v57 = vpop.permute.xlu0 %10057 }
 0x96c   : > { %v19828_v47 = vpop.permute.xlu1 %10052 }
 0x96d   : > { %13633 = vmatpush3.bf16.msra.mxu0 %v9941_v46  ;;  %v21435_v46 = vld [vmem:[#allocation13_spill] sm:$0xff] }
 0x96e   : > { %13634 = vmatprep.subr.bf16.mxu0 %v10022_v61  ;;  %v10683_v61 = vrot.slane %v19833_v2, %v21435_v46 }
 0x96f   : > { %v19848_v58 = vpop.permute.xlu0 %10067 }
 0x970   : > { %v19845_v12 = vpop.permute.xlu1 %10062 }
 0x971   : > { %13635 = vmatpush3.bf16.msra.mxu0 %v9950_v56 }
 0x972   : > { %13636 = vmatprep.subr.bf16.mxu0 %v10031_v26 }
 0x975   : > { %13637 = vmatpush3.bf16.msra.mxu0 %v9959_v9 }
 0x978   : > { %10563 = vmatmul.mubr.bf16.vlgmr.msra.gmra.mrb[104].mxu0 %v19362_v31 }
 0x979   : > { %10570 = vmatprep.mubr.bf16.mxu0 %v19374_v24  ;;  %v10671_v24 = vrot.slane %v19833_v2, %v15686_v43 }
 0x980   : > { %10571 = vmatmul.mubr.bf16.gmra.mrb[108].mxu0 %v19410_v22 }
 0x998   : > { %v10193_v25 = vpop.f32.mrb[88].mxu0 }
 0x999   : > { %v14163_v27 = vadd.f32 %v10193_v25, %v19828_v47  ;;  %v10195_v59 = vpop.f32.mrb[89].mxu0 }
 0x99a   : > { %v14164_v3 = vadd.f32 %v10195_v59, %v19828_v47  ;;  %v10197_v31 = vpop.f32.mrb[90].mxu0 }
 0x99b   : > { %v10628_v33 = vmax.f32 %v14163_v27, 0.0  ;;  %v14165_v22 = vadd.f32 %v10197_v31, %v19836_v57  ;;  %v10199_v17 = vpop.f32.mrb[91].mxu0 }
 0x99c   : > { %v10629_v38 = vmax.f32 %v14164_v3, 0.0  ;;  %v14166_v11 = vadd.f32 %v10199_v17, %v19836_v57 }
 0x99d   : > { %v10637_v41 = vmax.f32 %v14165_v22, 0.0  ;;  %v10713_v40 = vmul.f32 %v10671_v24, %v10628_v33 }
 0x99e   : > { %v10638_v6 = vmax.f32 %v14166_v11, 0.0  ;;  %v10714_v8 = vmul.f32 %v10675_v55, %v10629_v38 }
 0x99f   : > { %v10722_v60 = vmul.f32 %v10671_v24, %v10637_v41 }
 0x9a0   : > { %v10723_v63 = vmul.f32 %v10675_v55, %v10638_v6  ;;  %v10203_v5 = vpop.f32.mrb[92].mxu0 }
 0x9a1   : > { %v10749_v48 = vpack.c.bf16 %v10722_v60, %v10713_v40  ;;  %v14167_v21 = vadd.f32 %v10203_v5, %v19845_v12  ;;  %v10205_v1 = vpop.f32.mrb[93].mxu0 }
 0x9a2   : > { %v10750_v53 = vpack.c.bf16 %v10723_v63, %v10714_v8  ;;  %v14168_v49 = vadd.f32 %v10205_v1, %v19845_v12  ;;  %v10207_v20 = vpop.f32.mrb[94].mxu0 }
 0x9a3   : > { %10767 = vst [vmem:[#allocation2 + $0x8] sm:$0xff] %v10749_v48  ;;  %v10646_v15 = vmax.f32 %v14167_v21, 0.0  ;;  %v14169_v28 = vadd.f32 %v10207_v20, %v19848_v58  ;;  %v10209_v35 = vpop.f32.mrb[95].mxu0  ;;  %10961 = vrot.lane.b32.xlu0 %v10749_v48, %s14737_s24  ;;  %10827 = vrot.lane.b32.xlu1 %v10749_v48, %s14736_s23 }
 0x9a4   : > { %10768 = vst [vmem:[#allocation2 + $0x10] sm:$0xff] %v10750_v53  ;;  %v10647_v4 = vmax.f32 %v14168_v49, 0.0  ;;  %v14170_v32 = vadd.f32 %v10209_v35, %v19848_v58 }
 0x9a5   : > { %v10655_v62 = vmax.f32 %v14169_v28, 0.0  ;;  %v10731_v51 = vmul.f32 %v10671_v24, %v10646_v15 }
 0x9a6   : > { %v10656_v39 = vmax.f32 %v14170_v32, 0.0  ;;  %v10732_v29 = vmul.f32 %v10675_v55, %v10647_v4  ;;  %v14745_v4 = vmov 1966171168  }
 0x9a7   : > { %v10740_v54 = vmul.f32 %v10671_v24, %v10655_v62  ;;  %11229 = vrot.lane.b32.xlu0 %v10749_v48, %s14739_s26  ;;  %11095 = vrot.lane.b32.xlu1 %v10749_v48, %s14738_s25  ;;  %v12026_v32 = vunpack.c.l.s4 %v14745_v4 }
 0x9a8   : > { %v10741_v16 = vmul.f32 %v10675_v55, %v10656_v39  ;;  %v13482_v39 = vld.sshfl [vmem:[%s21374_s3] sm:$0x13 pattern:$0x75316420] }
 0x9a9   : > { %v19857_v23 = vpack.c.bf16 %v10740_v54, %v10731_v51  ;;  %v12027_v62 = vunpack.c.0.s8 %v12026_v32  ;;  %v19973_v54 = vpop.permute.xlu0 %14513 }
 0x9aa   : > { %v19859_v0 = vpack.c.bf16 %v10741_v16, %v10732_v29  ;;  %v19861_v52 = vld [vmem:[#allocation2 + $0x8] sm:$0xff]  ;;  %v12024_v29 = vcombine.high %v13482_v39, %v13482_v39  ;;  %v21436_v16 = vld [vmem:[#allocation9_spill] sm:$0xff] }
 0x9ab   : > { %10776 = vst [vmem:[#allocation2 + $0x58] sm:$0xff] %v19857_v23  ;;  %10829 = vrot.lane.b32.xlu0 %v10750_v53, %s14736_s23  ;;  %11393 = vrot.lane.b32.xlu1 %v10749_v48, %s14740_s27  ;;  %v19866_v34 = vld [vmem:[#allocation2 + $0x10] sm:$0xff]  ;;  %11339 = vst [vmem:[#allocation4 + $0x240] sm:$0xff] %v19861_v52 }
 0x9ac   : > { %10777 = vst [vmem:[#allocation2 + $0x60] sm:$0xff] %v19859_v0 }
 0x9af   : > { %11097 = vrot.lane.b32.xlu0 %v10750_v53, %s14738_s25  ;;  %11517 = vrot.lane.b32.xlu1 %v10749_v48, %s14741_s28 }
 0x9b2   : > { %v19872_v10 = vld [vmem:[#allocation2 + $0x58] sm:$0xff] }
 0x9b3   : > { %11641 = vrot.lane.b32.xlu1 %v10749_v48, %s14742_s11  ;;  %10847 = vrot.lane.b32.xlu0 %v19857_v23, %s14736_s23  ;;  %v19877_v36 = vld [vmem:[#allocation2 + $0x60] sm:$0xff]  ;;  %11348 = vst [vmem:[#allocation4 + $0x288] sm:$0xff] %v19872_v10 }
 0x9b7   : > { %11765 = vrot.lane.b32.xlu1 %v10749_v48, %s14743_s18  ;;  %11115 = vrot.lane.b32.xlu0 %v19857_v23, %s14738_s25 }
 0x9bb   : > { %10963 = vrot.lane.b32.xlu1 %v10750_v53, %s14737_s24  ;;  %11411 = vrot.lane.b32.xlu0 %v19857_v23, %s14740_s27 }
 0x9bf   : > { %11231 = vrot.lane.b32.xlu1 %v10750_v53, %s14739_s26  ;;  %11535 = vrot.lane.b32.xlu0 %v19857_v23, %s14741_s28 }
 0x9c3   : > { %11395 = vrot.lane.b32.xlu1 %v10750_v53, %s14740_s27  ;;  %11659 = vrot.lane.b32.xlu0 %v19857_v23, %s14742_s11 }
 0x9c7   : > { %11519 = vrot.lane.b32.xlu1 %v10750_v53, %s14741_s28  ;;  %11783 = vrot.lane.b32.xlu0 %v19857_v23, %s14743_s18 }
 0x9c9   : > { %v10299_v45 = vpop.f32.mrb[88].mxu1 }
 0x9ca   : > { %v14171_v13 = vadd.f32 %v10299_v45, %v19828_v47  ;;  %v10301_v19 = vpop.f32.mrb[89].mxu1 }
 0x9cb   : > { %v14172_v7 = vadd.f32 %v10301_v19, %v19828_v47  ;;  %v10303_v42 = vpop.f32.mrb[90].mxu1  ;;  %11643 = vrot.lane.b32.xlu1 %v10750_v53, %s14742_s11  ;;  %10983 = vrot.lane.b32.xlu0 %v19859_v0, %s14737_s24 }
 0x9cc   : > { %v10630_v18 = vmax.f32 %v14171_v13, 0.0  ;;  %v14173_v30 = vadd.f32 %v10303_v42, %v19836_v57  ;;  %v10305_v37 = vpop.f32.mrb[91].mxu1  ;;  %v19977_v13 = vpop.permute.xlu1 %14508 }
 0x9cd   : > { %v10631_v44 = vmax.f32 %v14172_v7, 0.0  ;;  %v14174_v56 = vadd.f32 %v10305_v37, %v19836_v57 }
 0x9ce   : > { %v10639_v26 = vmax.f32 %v14173_v30, 0.0  ;;  %v10715_v25 = vmul.f32 %v10679_v50, %v10630_v18 }
 0x9cf   : > { %v10640_v9 = vmax.f32 %v14174_v56, 0.0  ;;  %11767 = vrot.lane.b32.xlu1 %v10750_v53, %s14743_s18  ;;  %11251 = vrot.lane.b32.xlu0 %v19859_v0, %s14739_s26  ;;  %v10716_v59 = vmul.f32 %v10683_v61, %v10631_v44 }
 0x9d0   : > { %v10724_v27 = vmul.f32 %v10679_v50, %v10639_v26 }
 0x9d1   : > { %v10725_v3 = vmul.f32 %v10683_v61, %v10640_v9  ;;  %v10309_v31 = vpop.f32.mrb[92].mxu1 }
 0x9d2   : > { %v10751_v33 = vpack.c.bf16 %v10724_v27, %v10715_v25  ;;  %v14175_v24 = vadd.f32 %v10309_v31, %v19845_v12  ;;  %v10311_v22 = vpop.f32.mrb[93].mxu1  ;;  %v20002_v31 = vpop.permute.xlu1 %14518 }
 0x9d3   : > { %v19910_v17 = vpack.c.bf16 %v10725_v3, %v10716_v59  ;;  %v14176_v38 = vadd.f32 %v10311_v22, %v19845_v12  ;;  %v10313_v55 = vpop.f32.mrb[94].mxu1  ;;  %10981 = vrot.lane.b32.xlu1 %v19857_v23, %s14737_s24  ;;  %11413 = vrot.lane.b32.xlu0 %v19859_v0, %s14740_s27  ;;  %v20000_v3 = vpop.permute.xlu0 %14523 }
 0x9d4   : > { %10769 = vst [vmem:[#allocation2 + $0x18] sm:$0xff] %v10751_v33  ;;  %v10648_v11 = vmax.f32 %v14175_v24, 0.0  ;;  %v14177_v41 = vadd.f32 %v10313_v55, %v19848_v58  ;;  %v10315_v6 = vpop.f32.mrb[95].mxu1 }
 0x9d5   : > { %10770 = vst [vmem:[#allocation2 + $0x20] sm:$0xff] %v19910_v17  ;;  %v10649_v40 = vmax.f32 %v14176_v38, 0.0  ;;  %v14178_v60 = vadd.f32 %v10315_v6, %v19848_v58 }
 0x9d6   : > { %v10657_v8 = vmax.f32 %v14177_v41, 0.0  ;;  %v10733_v5 = vmul.f32 %v10679_v50, %v10648_v11 }
 0x9d7   : > { %v10658_v63 = vmax.f32 %v14178_v60, 0.0  ;;  %11249 = vrot.lane.b32.xlu1 %v19857_v23, %s14739_s26  ;;  %11537 = vrot.lane.b32.xlu0 %v19859_v0, %s14741_s28  ;;  %v10734_v21 = vmul.f32 %v10683_v61, %v10649_v40  ;;  %v12030_v23 = vsub.s32 %v12027_v62, %v21436_v16 }
 0x9d8   : > { %v10742_v48 = vmul.f32 %v10679_v50, %v10657_v8  ;;  %v10687_v50 = vrot.slane %v19833_v2, %v21438_v14 }
 0x9d9   : > { %v10743_v1 = vmul.f32 %v10683_v61, %v10658_v63  ;;  %v19980_v42 = vrot.slane %v12024_v29, %v12030_v23  ;;  %v19989_v44 = vrot.slane %v13482_v39, %v12030_v23  ;;  %v21440_v61 = vld [vmem:[#allocation15_spill] sm:$0xff]  ;;  %v14520_v29 = vunpack.i.l.bf16 %v20002_v31 }
 0x9da   : > { %v19924_v53 = vpack.c.bf16 %v10742_v48, %v10733_v5  ;;  %v10691_v56 = vrot.slane %v19833_v2, %v21440_v61  ;;  %v14515_v48 = vunpack.i.l.bf16 %v19973_v54 }
 0x9db   : > { %v19926_v49 = vpack.c.bf16 %v10743_v1, %v10734_v21  ;;  %10849 = vrot.lane.b32.xlu1 %v19859_v0, %s14736_s23  ;;  %11661 = vrot.lane.b32.xlu0 %v19859_v0, %s14742_s11  ;;  %v11323_v20 = vld [vmem:[#allocation2 + $0x18] sm:$0xff]  ;;  %21437 = vst [vmem:[#allocation11_spill] sm:$0xff] %v19980_v42  ;;  %21439 = vst [vmem:[#allocation12_spill] sm:$0xff] %v19989_v44  ;;  %v14510_v21 = vunpack.i.l.bf16 %v19977_v13 }
 0x9dc   : > { %10778 = vst [vmem:[#allocation2 + $0x68] sm:$0xff] %v19924_v53  ;;  %v11324_v15 = vld [vmem:[#allocation2 + $0x20] sm:$0xff]  ;;  %11341 = vst [vmem:[#allocation4 + $0x250] sm:$0xff] %v11323_v20  ;;  %12077 = vmatprep.mubr.bf16.mxu1 %v19980_v42  ;;  %12159 = vmatprep.mubr.bf16.mxu0 %v19980_v42 }
 0x9dd   : > { %10779 = vst [vmem:[#allocation2 + $0x70] sm:$0xff] %v19926_v49  ;;  %11342 = vst [vmem:[#allocation4 + $0x258] sm:$0xff] %v11324_v15 }
 0x9df   : > { %11117 = vrot.lane.b32.xlu1 %v19859_v0, %s14738_s25  ;;  %11785 = vrot.lane.b32.xlu0 %v19859_v0, %s14743_s18 }
 0x9e3   : > { %10831 = vrot.lane.b32.xlu1 %v10751_v33, %s14736_s23  ;;  %10965 = vrot.lane.b32.xlu0 %v10751_v33, %s14737_s24  ;;  %v11332_v28 = vld [vmem:[#allocation2 + $0x68] sm:$0xff] }
 0x9e4   : > { %v11333_v35 = vld [vmem:[#allocation2 + $0x70] sm:$0xff]  ;;  %11350 = vst [vmem:[#allocation4 + $0x298] sm:$0xff] %v11332_v28 }
 0x9e5   : > { %11351 = vst [vmem:[#allocation4 + $0x2a0] sm:$0xff] %v11333_v35 }
 0x9e7   : > { %11099 = vrot.lane.b32.xlu1 %v10751_v33, %s14738_s25  ;;  %11397 = vrot.lane.b32.xlu0 %v10751_v33, %s14740_s27 }
 0x9eb   : > { %11233 = vrot.lane.b32.xlu1 %v10751_v33, %s14739_s26  ;;  %11521 = vrot.lane.b32.xlu0 %v10751_v33, %s14741_s28 }
 0x9ef   : > { %10967 = vrot.lane.b32.xlu1 %v19910_v17, %s14737_s24  ;;  %11645 = vrot.lane.b32.xlu0 %v10751_v33, %s14742_s11 }
 0x9f3   : > { %11771 = vrot.lane.b32.xlu1 %v19910_v17, %s14743_s18  ;;  %11769 = vrot.lane.b32.xlu0 %v10751_v33, %s14743_s18 }
 0x9f7   : > { %10851 = vrot.lane.b32.xlu1 %v19924_v53, %s14736_s23  ;;  %10833 = vrot.lane.b32.xlu0 %v19910_v17, %s14736_s23 }
 0x9fb   : > { %11119 = vrot.lane.b32.xlu1 %v19924_v53, %s14738_s25  ;;  %11101 = vrot.lane.b32.xlu0 %v19910_v17, %s14738_s25 }
 0x9ff   : > { %11253 = vrot.lane.b32.xlu1 %v19924_v53, %s14739_s26  ;;  %11235 = vrot.lane.b32.xlu0 %v19910_v17, %s14739_s26 }
 0xa03   : > { %11415 = vrot.lane.b32.xlu1 %v19924_v53, %s14740_s27  ;;  %11399 = vrot.lane.b32.xlu0 %v19910_v17, %s14740_s27 }
 0xa07   : > { %11539 = vrot.lane.b32.xlu1 %v19924_v53, %s14741_s28  ;;  %11523 = vrot.lane.b32.xlu0 %v19910_v17, %s14741_s28 }
 0xa08   : > { %v10405_v51 = vpop.f32.mrb[96].mxu0 }
 0xa09   : > { %v14179_v0 = vadd.f32 %v10405_v51, %v19828_v47  ;;  %v10407_v45 = vpop.f32.mrb[97].mxu0  ;;  %v14525_v51 = vunpack.i.l.bf16 %v20000_v3 }
 0xa0a   : > { %v14180_v19 = vadd.f32 %v10407_v45, %v19828_v47  ;;  %v10409_v7 = vpop.f32.mrb[98].mxu0 }
 0xa0b   : > { %v10632_v18 = vmax.f32 %v14179_v0, 0.0  ;;  %v14181_v30 = vadd.f32 %v10409_v7, %v19836_v57  ;;  %v10411_v37 = vpop.f32.mrb[99].mxu0  ;;  %11663 = vrot.lane.b32.xlu1 %v19924_v53, %s14742_s11  ;;  %11647 = vrot.lane.b32.xlu0 %v19910_v17, %s14742_s11 }
 0xa0c   : > { %v10633_v46 = vmax.f32 %v14180_v19, 0.0  ;;  %v14182_v26 = vadd.f32 %v10411_v37, %v19836_v57 }
 0xa0d   : > { %v10641_v9 = vmax.f32 %v14181_v30, 0.0  ;;  %v10717_v27 = vmul.f32 %v10687_v50, %v10632_v18 }
 0xa0e   : > { %v10642_v25 = vmax.f32 %v14182_v26, 0.0  ;;  %v10718_v33 = vmul.f32 %v10691_v56, %v10633_v46 }
 0xa0f   : > { %v10726_v59 = vmul.f32 %v10687_v50, %v10641_v9  ;;  %11787 = vrot.lane.b32.xlu1 %v19924_v53, %s14743_s18  ;;  %10985 = vrot.lane.b32.xlu0 %v19924_v53, %s14737_s24 }
 0xa10   : > { %v10727_v24 = vmul.f32 %v10691_v56, %v10642_v25  ;;  %v10415_v22 = vpop.f32.mrb[100].mxu0 }
 0xa11   : > { %v20004_v17 = vpack.c.bf16 %v10726_v59, %v10717_v27  ;;  %v14183_v38 = vadd.f32 %v10415_v22, %v19845_v12  ;;  %v10417_v55 = vpop.f32.mrb[101].mxu0  ;;  %v14511_v27 = vunpack.i.h.bf16 %v19977_v13 }
 0xa12   : > { %v20007_v11 = vpack.c.bf16 %v10727_v24, %v10718_v33  ;;  %v14184_v41 = vadd.f32 %v10417_v55, %v19845_v12  ;;  %v10419_v6 = vpop.f32.mrb[102].mxu0 }
 0xa13   : > { %10771 = vst [vmem:[#allocation2 + $0x28] sm:$0xff] %v20004_v17  ;;  %v10650_v40 = vmax.f32 %v14183_v38, 0.0  ;;  %v14185_v60 = vadd.f32 %v10419_v6, %v19848_v58  ;;  %v10421_v8 = vpop.f32.mrb[103].mxu0  ;;  %10987 = vrot.lane.b32.xlu1 %v19926_v49, %s14737_s24  ;;  %10853 = vrot.lane.b32.xlu0 %v19926_v49, %s14736_s23 }
 0xa14   : > { %10772 = vst [vmem:[#allocation2 + $0x30] sm:$0xff] %v20007_v11  ;;  %v10651_v63 = vmax.f32 %v14184_v41, 0.0  ;;  %v14186_v5 = vadd.f32 %v10421_v8, %v19848_v58 }
 0xa15   : > { %v10659_v1 = vmax.f32 %v14185_v60, 0.0  ;;  %v20020_v53 = vpop.permute.xlu0 %10961  ;;  %v10828_v20 = vpop.permute.xlu1 %10827  ;;  %v10735_v4 = vmul.f32 %v10687_v50, %v10650_v40 }
 0xa16   : > { %v10660_v15 = vmax.f32 %v14186_v5, 0.0  ;;  %v20024_v28 = vsel %vm664_vm1, %v14515_v48, %v20020_v53  ;;  %v10865_v35 = vsel %vm468_vm0, %v14510_v21, %v10828_v20  ;;  %v10736_v62 = vmul.f32 %v10691_v56, %v10651_v63  ;;  %v21443_v5 = vld [vmem:[#allocation16_spill] sm:$0xff] }
 0xa17   : > { %v10744_v32 = vmul.f32 %v10687_v50, %v10659_v1  ;;  %11417 = vrot.lane.b32.xlu1 %v19926_v49, %s14740_s27  ;;  %11121 = vrot.lane.b32.xlu0 %v19926_v49, %s14738_s25  ;;  %v10695_v48 = vrot.slane %v19833_v2, %v21443_v5 }
 0xa18   : > { %v10745_v39 = vmul.f32 %v10691_v56, %v10660_v15 }
 0xa19   : > { %v20033_v23 = vpack.c.bf16 %v10744_v32, %v10735_v4  ;;  %v20035_v0 = vpop.permute.xlu0 %11229  ;;  %v11096_v45 = vpop.permute.xlu1 %11095 }
 0xa1a   : > { %v20037_v19 = vpack.c.bf16 %v10745_v39, %v10736_v62  ;;  %v20041_v7 = vsel %vm1054_vm3, %v14525_v51, %v20035_v0  ;;  %v20044_v18 = vsel %vm859_vm2, %v14520_v29, %v11096_v45  ;;  %v11325_v14 = vld [vmem:[#allocation2 + $0x28] sm:$0xff] }
 0xa1b   : > { %10780 = vst [vmem:[#allocation2 + $0x78] sm:$0xff] %v20033_v23  ;;  %11541 = vrot.lane.b32.xlu1 %v19926_v49, %s14741_s28  ;;  %11255 = vrot.lane.b32.xlu0 %v19926_v49, %s14739_s26  ;;  %v20051_v50 = vld [vmem:[#allocation2 + $0x30] sm:$0xff]  ;;  %11343 = vst [vmem:[#allocation4 + $0x260] sm:$0xff] %v11325_v14 }
 0xa1c   : > { %21441 = vst [vmem:[#allocation13_spill] sm:$0xff] %v20051_v50  ;;  %10781 = vst [vmem:[#allocation2 + $0x80] sm:$0xff] %v20037_v19 }
 0xa1d   : > { %11344 = vst [vmem:[#allocation4 + $0x268] sm:$0xff] %v20051_v50  ;;  %v20055_v30 = vpop.permute.xlu0 %10829  ;;  %v20057_v37 = vpop.permute.xlu1 %11393 }
 0xa1e   : > { %v10866_v46 = vsel %vm468_vm0, %v10828_v20, %v20055_v30 }
 0xa1f   : > { %11665 = vrot.lane.b32.xlu1 %v19926_v49, %s14742_s11  ;;  %11773 = vrot.lane.b32.xlu0 %v20004_v17, %s14743_s18 }
 0xa20   : > { %12045 = vmatprep.subr.bf16.mxu1 %v10866_v46 }
 0xa21   : > { %v20065_v61 = vpop.permute.xlu0 %11097  ;;  %v20067_v56 = vpop.permute.xlu1 %11517  ;;  %12046 = vmatpush1.bf16.msra.mxu1 %v10865_v35  ;;  %v21444_v35 = vld [vmem:[#allocation17_spill] sm:$0xff] }
 0xa22   : > { %v20071_v26 = vsel %vm859_vm2, %v11096_v45, %v20065_v61  ;;  %v11334_v9 = vld [vmem:[#allocation2 + $0x78] sm:$0xff]  ;;  %v10699_v4 = vrot.slane %v19833_v2, %v21444_v35 }
 0xa23   : > { %11789 = vrot.lane.b32.xlu1 %v19926_v49, %s14743_s18  ;;  %10837 = vrot.lane.b32.xlu0 %v20007_v11, %s14736_s23  ;;  %v20077_v25 = vld [vmem:[#allocation2 + $0x80] sm:$0xff]  ;;  %11352 = vst [vmem:[#allocation4 + $0x2a8] sm:$0xff] %v11334_v9  ;;  %v14521_v49 = vunpack.i.h.bf16 %v20002_v31 }
 0xa24   : > { %21442 = vst [vmem:[#allocation14_spill] sm:$0xff] %v20077_v25  ;;  %11353 = vst [vmem:[#allocation4 + $0x2b0] sm:$0xff] %v20077_v25 }
 0xa25   : > { %v20081_v59 = vpop.permute.xlu0 %10847  ;;  %v20083_v33 = vpop.permute.xlu1 %11641 }
 0xa26   : > { %v20087_v24 = vsel %vm468_vm0, %v14511_v27, %v20081_v59 }
 0xa27   : > { %11401 = vrot.lane.b32.xlu1 %v20004_v17, %s14740_s27  ;;  %10971 = vrot.lane.b32.xlu0 %v20007_v11, %s14737_s24 }
 0xa29   : > { %v20094_v22 = vpop.permute.xlu0 %11115  ;;  %v20096_v13 = vpop.permute.xlu1 %11765 }
 0xa2a   : > { %v20100_v38 = vsel %vm859_vm2, %v14521_v49, %v20094_v22 }
 0xa2b   : > { %11525 = vrot.lane.b32.xlu1 %v20004_v17, %s14741_s28  ;;  %11105 = vrot.lane.b32.xlu0 %v20007_v11, %s14738_s25 }
 0xa2c   : > { %v10511_v55 = vpop.f32.mrb[96].mxu1 }
 0xa2d   : > { %v14187_v41 = vadd.f32 %v10511_v55, %v19828_v47  ;;  %v10513_v6 = vpop.f32.mrb[97].mxu1  ;;  %v20107_v40 = vpop.permute.xlu0 %11411 }
 0xa2e   : > { %v14188_v31 = vadd.f32 %v10513_v6, %v19828_v47  ;;  %v10515_v60 = vpop.f32.mrb[98].mxu1  ;;  %v20110_v8 = vpop.permute.xlu1 %10963 }
 0xa2f   : > { %v10634_v63 = vmax.f32 %v14187_v41, 0.0  ;;  %v14189_v21 = vadd.f32 %v10515_v60, %v19836_v57  ;;  %v10517_v1 = vpop.f32.mrb[99].mxu1  ;;  %v20118_v20 = vsel %vm664_vm1, %v20020_v53, %v20110_v8  ;;  %11649 = vrot.lane.b32.xlu1 %v20004_v17, %s14742_s11  ;;  %11239 = vrot.lane.b32.xlu0 %v20007_v11, %s14739_s26 }
 0xa30   : > { %v10635_v15 = vmax.f32 %v14188_v31, 0.0  ;;  %v14190_v32 = vadd.f32 %v10517_v1, %v19836_v57 }
 0xa31   : > { %v10643_v62 = vmax.f32 %v14189_v21, 0.0  ;;  %v20127_v39 = vpop.permute.xlu0 %11535  ;;  %v10719_v53 = vmul.f32 %v10695_v48, %v10634_v63 }
 0xa32   : > { %v10644_v51 = vmax.f32 %v14190_v32, 0.0  ;;  %v20129_v29 = vpop.permute.xlu1 %11231  ;;  %v10720_v2 = vmul.f32 %v10699_v4, %v10635_v15 }
 0xa33   : > { %v10728_v45 = vmul.f32 %v10695_v48, %v10643_v62  ;;  %v20134_v14 = vsel %vm1054_vm3, %v20035_v0, %v20129_v29  ;;  %10835 = vrot.lane.b32.xlu1 %v20004_v17, %s14736_s23  ;;  %11419 = vrot.lane.b32.xlu0 %v20033_v23, %s14740_s27 }
 0xa34   : > { %v10729_v46 = vmul.f32 %v10699_v4, %v10644_v51  ;;  %v10521_v9 = vpop.f32.mrb[100].mxu1 }
 0xa35   : > { %v20140_v27 = vpack.c.bf16 %v10728_v45, %v10719_v53  ;;  %v14191_v49 = vadd.f32 %v10521_v9, %v19845_v12  ;;  %v10523_v55 = vpop.f32.mrb[101].mxu1  ;;  %v20143_v41 = vpop.permute.xlu0 %11659 }
 0xa36   : > { %v20145_v6 = vpack.c.bf16 %v10729_v46, %v10720_v2  ;;  %v14192_v0 = vadd.f32 %v10523_v55, %v19845_v12  ;;  %v10525_v31 = vpop.f32.mrb[102].mxu1  ;;  %v20148_v60 = vpop.permute.xlu1 %11395 }
 0xa37   : > { %10773 = vst [vmem:[#allocation2 + $0x38] sm:$0xff] %v20140_v27  ;;  %v10652_v63 = vmax.f32 %v14191_v49, 0.0  ;;  %v14193_v5 = vadd.f32 %v10525_v31, %v19848_v58  ;;  %v10527_v21 = vpop.f32.mrb[103].mxu1  ;;  %v20155_v1 = vsel %vm1369_vm4, %v20057_v37, %v20148_v60  ;;  %10969 = vrot.lane.b32.xlu1 %v20004_v17, %s14737_s24  ;;  %11543 = vrot.lane.b32.xlu0 %v20033_v23, %s14741_s28 }
 0xa38   : > { %10774 = vst [vmem:[#allocation2 + $0x40] sm:$0xff] %v20145_v6  ;;  %v10653_v15 = vmax.f32 %v14192_v0, 0.0  ;;  %v14194_v35 = vadd.f32 %v10527_v21, %v19848_v58 }
 0xa39   : > { %v10661_v32 = vmax.f32 %v14193_v5, 0.0  ;;  %v20163_v62 = vpop.permute.xlu0 %11783  ;;  %v10737_v45 = vmul.f32 %v10695_v48, %v10652_v63 }
 0xa3a   : > { %v10662_v51 = vmax.f32 %v14194_v35, 0.0  ;;  %v20165_v53 = vpop.permute.xlu1 %11519  ;;  %v10738_v46 = vmul.f32 %v10699_v4, %v10653_v15 }
 0xa3b   : > { %v10746_v37 = vmul.f32 %v10695_v48, %v10661_v32  ;;  %v20170_v2 = vsel %vm1552_vm5, %v20067_v56, %v20165_v53  ;;  %11103 = vrot.lane.b32.xlu1 %v20004_v17, %s14738_s25  ;;  %11667 = vrot.lane.b32.xlu0 %v20033_v23, %s14742_s11 }
 0xa3c   : > { %v10747_v9 = vmul.f32 %v10699_v4, %v10662_v51  ;;  %v20176_v49 = vpop.f32.mrb[104].mxu1 }
 0xa3d   : > { %v20178_v55 = vpack.c.bf16 %v10746_v37, %v10737_v45  ;;  %v20180_v0 = vpop.permute.xlu0 %10983  ;;  %v10613_v48 = vpop.f32.mrb[105].mxu1 }
 0xa3e   : > { %v20182_v31 = vpack.c.bf16 %v10747_v9, %v10738_v46  ;;  %v20184_v63 = vpop.permute.xlu1 %11643  ;;  %v20186_v56 = vpop.f32.mrb[106].mxu1  ;;  %v11327_v5 = vld [vmem:[#allocation2 + $0x38] sm:$0xff] }
 0xa3f   : > { %10782 = vst [vmem:[#allocation2 + $0x88] sm:$0xff] %v20178_v55  ;;  %v20192_v4 = vsel %vm1735_vm6, %v20083_v33, %v20184_v63  ;;  %11237 = vrot.lane.b32.xlu1 %v20004_v17, %s14739_s26  ;;  %11791 = vrot.lane.b32.xlu0 %v20033_v23, %s14743_s18  ;;  %v10616_v21 = vpop.f32.mrb[107].mxu1  ;;  %v20198_v15 = vld [vmem:[#allocation2 + $0x40] sm:$0xff]  ;;  %11345 = vst [vmem:[#allocation4 + $0x270] sm:$0xff] %v11327_v5  ;;  %v14516_v17 = vunpack.i.h.bf16 %v19973_v54 }
 0xa40   : > { %21445 = vst [vmem:[#allocation15_spill] sm:$0xff] %v20198_v15  ;;  %10783 = vst [vmem:[#allocation2 + $0x90] sm:$0xff] %v20182_v31 }
 0xa41   : > { %11346 = vst [vmem:[#allocation4 + $0x278] sm:$0xff] %v20198_v15  ;;  %v20202_v35 = vpop.permute.xlu0 %11251 }
 0xa42   : > { %v20204_v32 = vpop.permute.xlu1 %11767 }
 0xa43   : > { %v20209_v33 = vsel %vm1918_vm7, %v20096_v13, %v20204_v32  ;;  %11403 = vrot.lane.b32.xlu1 %v20007_v11, %s14740_s27  ;;  %10857 = vrot.lane.b32.xlu0 %v20037_v19, %s14736_s23 }
 0xa44   : > { %21446 = vst [vmem:[#allocation16_spill] sm:$0xff] %v20209_v33 }
 0xa45   : > { %v20216_v51 = vpop.permute.xlu0 %11413 }
 0xa46   : > { %v20221_v45 = vsel %vm1369_vm4, %v20107_v40, %v20216_v51  ;;  %v10982_v37 = vpop.permute.xlu1 %10981  ;;  %v11336_v46 = vld [vmem:[#allocation2 + $0x88] sm:$0xff]  ;;  %v14526_v40 = vunpack.i.h.bf16 %v20000_v3 }
 0xa47   : > { %v20224_v13 = vsel %vm664_vm1, %v14516_v17, %v10982_v37  ;;  %v11009_v9 = vsel %vm664_vm1, %v10982_v37, %v20180_v0  ;;  %11527 = vrot.lane.b32.xlu1 %v20007_v11, %s14741_s28  ;;  %10991 = vrot.lane.b32.xlu0 %v20037_v19, %s14737_s24  ;;  %v11337_v54 = vld [vmem:[#allocation2 + $0x90] sm:$0xff]  ;;  %11354 = vst [vmem:[#allocation4 + $0x2b8] sm:$0xff] %v11336_v46 }
 0xa48   : > { %11355 = vst [vmem:[#allocation4 + $0x2c0] sm:$0xff] %v11337_v54 }
 0xa49   : > { %v20233_v5 = vpop.permute.xlu0 %11537 }
 0xa4a   : > { %v20238_v17 = vsel %vm1552_vm5, %v20127_v39, %v20233_v5  ;;  %v11250_v16 = vpop.permute.xlu1 %11249 }
 0xa4b   : > { %v13638_v37 = vpop.f32.mrb[104].mxu0  ;;  %v20241_v43 = vsel %vm1054_vm3, %v14526_v40, %v11250_v16  ;;  %v20245_v15 = vsel %vm1054_vm3, %v11250_v16, %v20202_v35  ;;  %10855 = vrot.lane.b32.xlu1 %v20033_v23, %s14736_s23  ;;  %11125 = vrot.lane.b32.xlu0 %v20037_v19, %s14738_s25 }
 0xa4c   : > { %v13639_v3 = vpop.f32.mrb[105].mxu0 }
 0xa4d   : > { %v13640_v46 = vadd.f32 %v13639_v3, %v13638_v37  ;;  %v13641_v54 = vpop.f32.mrb[106].mxu0  ;;  %v20251_v39 = vpop.permute.xlu0 %11661 }
 0xa4e   : > { %v13642_v25 = vpop.f32.mrb[107].mxu0  ;;  %v20256_v40 = vsel %vm1735_vm6, %v20143_v41, %v20251_v39  ;;  %v20258_v42 = vpop.permute.xlu1 %10849 }
 0xa4f   : > { %v13643_v16 = vadd.f32 %v13642_v25, %v13641_v54  ;;  %v10565_v50 = vadd.f32 %v13640_v46, %v19828_v47  ;;  %v10875_v33 = vsel %vm468_vm0, %v20081_v59, %v20258_v42  ;;  %10989 = vrot.lane.b32.xlu1 %v20033_v23, %s14737_s24  ;;  %11259 = vrot.lane.b32.xlu0 %v20037_v19, %s14739_s26 }
 0xa50   : > { %12047 = vmatprep.subr.bf16.mxu1 %v10875_v33 }
 0xa51   : > { %v10614_v37 = vadd.f32 %v10613_v48, %v10565_v50  ;;  %v10568_v41 = vadd.f32 %v13643_v16, %v19836_v57  ;;  %v20269_v3 = vpop.permute.xlu0 %11785  ;;  %12048 = vmatpush1.bf16.msra.mxu1 %v20087_v24  ;;  %v13481_v50 = vld [vmem:[%s21378_s7 + $0x8] ss:$0 sm:$0xff] }
 0xa52   : > { %v20275_v47 = vsel %vm1918_vm7, %v20163_v62, %v20269_v3  ;;  %v20277_v25 = vpop.permute.xlu1 %11117  ;;  %12049 = vmatprep.subr.bf16.mxu1 %v20118_v20 }
 0xa53   : > { %21447 = vst [vmem:[#allocation17_spill] sm:$0xff] %v20275_v47  ;;  %v10636_v59 = vmax.f32 %v10614_v37, 0.0  ;;  %v10617_v48 = vadd.f32 %v10616_v21, %v10568_v41  ;;  %v13644_v57 = vpop.f32.mrb[108].mxu0  ;;  %v11143_v24 = vsel %vm859_vm2, %v20094_v22, %v20277_v25  ;;  %11123 = vrot.lane.b32.xlu1 %v20033_v23, %s14738_s25  ;;  %11405 = vrot.lane.b32.xlu0 %v20140_v27, %s14740_s27 }
 0xa54   : > { %v13645_v62 = vpop.f32.mrb[109].mxu0 }
 0xa55   : > { %v10645_v33 = vmax.f32 %v10617_v48, 0.0  ;;  %v13646_v20 = vadd.f32 %v13645_v62, %v13644_v57  ;;  %v13647_v46 = vpop.f32.mrb[110].mxu0  ;;  %v10966_v54 = vpop.permute.xlu0 %10965  ;;  %12050 = vmatpush1.bf16.msra.mxu1 %v20024_v28  ;;  %v10721_v16 = vmul.f32 %v13481_v50, %v10636_v59 }
 0xa56   : > { %v13648_v21 = vpop.f32.mrb[111].mxu0  ;;  %v20293_v37 = vsel %vm664_vm1, %v20110_v8, %v10966_v54  ;;  %v10832_v22 = vpop.permute.xlu1 %10831  ;;  %12051 = vmatprep.subr.bf16.mxu1 %v11009_v9 }
 0xa57   : > { %v10730_v41 = vmul.f32 %v13481_v50, %v10645_v33  ;;  %v10573_v47 = vadd.f32 %v13646_v20, %v19845_v12  ;;  %v13649_v44 = vadd.f32 %v13648_v21, %v13647_v46  ;;  %v10867_v48 = vsel %vm468_vm0, %v20055_v30, %v10832_v22  ;;  %11257 = vrot.lane.b32.xlu1 %v20033_v23, %s14739_s26 }
 0xa58   : > { %11529 = vrot.lane.b32.xlu0 %v20140_v27, %s14741_s28 }
 0xa59   : > { %v10757_v28 = vpack.c.bf16 %v10730_v41, %v10721_v16  ;;  %v10622_v59 = vadd.f32 %v20176_v49, %v10573_v47  ;;  %v10576_v8 = vadd.f32 %v13649_v44, %v19848_v58  ;;  %v20304_v57 = vpop.permute.xlu0 %11397  ;;  %12052 = vmatpush1.bf16.msra.mxu1 %v20224_v13 }
 0xa5a   : > { %v20310_v12 = vsel %vm1369_vm4, %v20148_v60, %v20304_v57  ;;  %v11100_v30 = vpop.permute.xlu1 %11099  ;;  %12053 = vmatprep.subr.bf16.mxu1 %v20071_v26 }
 0xa5b   : > { %10775 = vst.msk [vmem:[#allocation2 + $0x48] sm:$0xff] %vm513_vm9, %v10757_v28  ;;  %v10654_v23 = vmax.f32 %v10622_v59, 0.0  ;;  %v10625_v9 = vadd.f32 %v20186_v56, %v10576_v8  ;;  %v20317_v58 = vsel %vm859_vm2, %v20065_v61, %v11100_v30  ;;  %11421 = vrot.lane.b32.xlu1 %v20037_v19, %s14740_s27 }
 0xa5c   : > { %10841 = vrot.lane.b32.xlu0 %v20145_v6, %s14736_s23 }
 0xa5d   : > { %v10663_v44 = vmax.f32 %v10625_v9, 0.0  ;;  %v20323_v60 = vpop.permute.xlu0 %11521  ;;  %12054 = vmatpush1.bf16.msra.mxu1 %v20044_v18  ;;  %v10739_v61 = vmul.f32 %v13481_v50, %v10654_v23 }
 0xa5e   : > { %v20329_v26 = vsel %vm1552_vm5, %v20165_v53, %v20323_v60  ;;  %v11234_v49 = vpop.permute.xlu1 %11233  ;;  %12055 = vmatprep.subr.bf16.mxu1 %v11143_v24 }
 0xa5f   : > { %v10748_v56 = vmul.f32 %v13481_v50, %v10663_v44  ;;  %v20333_v13 = vsel %vm1054_vm3, %v20129_v29, %v11234_v49  ;;  %11545 = vrot.lane.b32.xlu1 %v20037_v19, %s14741_s28  ;;  %v21449_v44 = vld [vmem:[#allocation16_spill] sm:$0xff] }
 0xa60   : > { %10975 = vrot.lane.b32.xlu0 %v20145_v6, %s14737_s24 }
 0xa61   : > { %v10766_v18 = vpack.c.bf16 %v10748_v56, %v10739_v61  ;;  %v20339_v47 = vpop.permute.xlu0 %11645  ;;  %12056 = vmatpush1.bf16.msra.mxu1 %v20100_v38  ;;  %v21450_v61 = vld [vmem:[#allocation17_spill] sm:$0xff] }
 0xa62   : > { %v20345_v53 = vsel %vm1735_vm6, %v20184_v63, %v20339_v47  ;;  %v20347_v50 = vpop.permute.xlu1 %10967  ;;  %12057 = vmatprep.subr.bf16.mxu1 %v20134_v14  ;;  %v20350_v29 = vld [vmem:[#allocation2 + $0x48] sm:$0xff] }
 0xa63   : > { %10784 = vst.msk [vmem:[#allocation2 + $0x98] sm:$0xff] %vm513_vm9, %v10766_v18  ;;  %v20355_v24 = vsel %vm664_vm1, %v10966_v54, %v20347_v50  ;;  %10839 = vrot.lane.b32.xlu1 %v20140_v27, %s14736_s23  ;;  %11347 = vst.msk [vmem:[#allocation4 + $0x280] sm:$0xff] %vm513_vm9, %v20350_v29 }
 0xa64   : > { %11109 = vrot.lane.b32.xlu0 %v20145_v6, %s14738_s25 }
 0xa65   : > { %v11770_v38 = vpop.permute.xlu0 %11769  ;;  %12058 = vmatpush1.bf16.msra.mxu1 %v20041_v7 }
 0xa66   : > { %v20366_v14 = vsel %vm1918_vm7, %v20204_v32, %v11770_v38  ;;  %v20368_v63 = vpop.permute.xlu1 %11771  ;;  %12059 = vmatprep.subr.bf16.mxu1 %v20245_v15 }
 0xa67   : > { %v20373_v62 = vsel %vm1918_vm7, %v11770_v38, %v20368_v63  ;;  %10973 = vrot.lane.b32.xlu1 %v20140_v27, %s14737_s24 }
 0xa68   : > { %11243 = vrot.lane.b32.xlu0 %v20145_v6, %s14739_s26 }
 0xa69   : > { %v20379_v33 = vpop.permute.xlu0 %10833  ;;  %12060 = vmatpush1.bf16.msra.mxu1 %v20241_v43 }
 0xa6a   : > { %v10868_v7 = vsel %vm468_vm0, %v10832_v22, %v20379_v33  ;;  %v10852_v32 = vpop.permute.xlu1 %10851  ;;  %12061 = vmatprep.subr.bf16.mxu1 %v19866_v34  ;;  %v11338_v15 = vld [vmem:[#allocation2 + $0x98] sm:$0xff] }
 0xa6b   : > { %v10876_v20 = vsel %vm468_vm0, %v20258_v42, %v10852_v32  ;;  %11107 = vrot.lane.b32.xlu1 %v20140_v27, %s14738_s25  ;;  %12127 = vmatprep.subr.bf16.mxu0 %v10868_v7  ;;  %11356 = vst.msk [vmem:[#allocation4 + $0x2c8] sm:$0xff] %vm513_vm9, %v11338_v15  ;;  %v20503_v23 = vld [vmem:[#allocation2 + $0x98] sm:$0xff] }
 0xa6c   : > { %11423 = vrot.lane.b32.xlu0 %v20178_v55, %s14740_s27  ;;  %12128 = vmatpush1.bf16.msra.mxu0 %v10867_v48 }
 0xa6d   : > { %v20392_v43 = vpop.permute.xlu0 %11101  ;;  %12062 = vmatpush1.bf16.msra.mxu1 %v19861_v52 }
 0xa6e   : > { %v20397_v34 = vsel %vm859_vm2, %v11100_v30, %v20392_v43  ;;  %v11120_v46 = vpop.permute.xlu1 %11119  ;;  %12063 = vmatprep.subr.bf16.mxu1 %v19877_v36 }
 0xa6f   : > { %v20402_v42 = vsel %vm859_vm2, %v20277_v25, %v11120_v46  ;;  %11241 = vrot.lane.b32.xlu1 %v20140_v27, %s14739_s26 }
 0xa70   : > { %10861 = vrot.lane.b32.xlu0 %v20182_v31, %s14736_s23 }
 0xa71   : > { %v20408_v54 = vpop.permute.xlu0 %11235  ;;  %12064 = vmatpush1.bf16.msra.mxu1 %v19872_v10 }
 0xa72   : > { %v20413_v52 = vsel %vm1054_vm3, %v11234_v49, %v20408_v54  ;;  %v11254_v16 = vpop.permute.xlu1 %11253  ;;  %12065 = vmatprep.subr.bf16.mxu1 %v20310_v12  ;;  %v20524_v49 = vld [vmem:[#allocation2] sm:$0xff] }
 0xa73   : > { %v20418_v36 = vsel %vm1054_vm3, %v20202_v35, %v11254_v16  ;;  %10859 = vrot.lane.b32.xlu1 %v20178_v55, %s14736_s23 }
 0xa74   : > { %11547 = vrot.lane.b32.xlu0 %v20178_v55, %s14741_s28 }
 0xa75   : > { %v20424_v25 = vpop.permute.xlu0 %11399  ;;  %12066 = vmatpush1.bf16.msra.mxu1 %v20155_v1 }
 0xa76   : > { %v20430_v10 = vsel %vm1369_vm4, %v20304_v57, %v20424_v25  ;;  %v11416_v21 = vpop.permute.xlu1 %11415 }
 0xa77   : > { %v11438_v35 = vsel %vm1369_vm4, %v20216_v51, %v11416_v21  ;;  %10993 = vrot.lane.b32.xlu1 %v20178_v55, %s14737_s24 }
 0xa78   : > { %10995 = vrot.lane.b32.xlu0 %v20182_v31, %s14737_s24  ;;  %12067 = vmatprep.subr.bf16.mxu1 %v11438_v35 }
 0xa79   : > { %v20438_v22 = vpop.permute.xlu0 %11523  ;;  %12068 = vmatpush1.bf16.msra.mxu1 %v20221_v45 }
 0xa7a   : > { %v20444_v1 = vsel %vm1552_vm5, %v20323_v60, %v20438_v22  ;;  %v11540_v41 = vpop.permute.xlu1 %11539  ;;  %12069 = vmatprep.subr.bf16.mxu1 %v20329_v26 }
 0xa7b   : > { %v11562_v51 = vsel %vm1552_vm5, %v20233_v5, %v11540_v41  ;;  %11127 = vrot.lane.b32.xlu1 %v20178_v55, %s14738_s25 }
 0xa7c   : > { %11653 = vrot.lane.b32.xlu0 %v20140_v27, %s14742_s11 }
 0xa7d   : > { %v20453_v48 = vpop.permute.xlu0 %11647  ;;  %12070 = vmatpush1.bf16.msra.mxu1 %v20170_v2 }
 0xa7e   : > { %v20459_v45 = vsel %vm1735_vm6, %v20339_v47, %v20453_v48  ;;  %v11664_v28 = vpop.permute.xlu1 %11663  ;;  %12071 = vmatprep.subr.bf16.mxu1 %v11562_v51  ;;  %v14663_v51 = vld [vmem:[#allocation4 + $0x298] sm:$0xff] }
 0xa7f   : > { %v11686_v5 = vsel %vm1735_vm6, %v20251_v39, %v11664_v28  ;;  %11261 = vrot.lane.b32.xlu1 %v20178_v55, %s14739_s26 }
 0xa80   : > { %11129 = vrot.lane.b32.xlu0 %v20182_v31, %s14738_s25 }
 0xa81   : > { %v10986_v59 = vpop.permute.xlu0 %10985  ;;  %12072 = vmatpush1.bf16.msra.mxu1 %v20238_v17 }
 0xa82   : > { %v11010_v2 = vsel %vm664_vm1, %v20180_v0, %v10986_v59  ;;  %v11788_v8 = vpop.permute.xlu1 %11787  ;;  %12073 = vmatprep.subr.bf16.mxu1 %v20345_v53  ;;  %v21451_v53 = vld [vmem:[#allocation13_spill] sm:$0xff] }
 0xa83   : > { %v11810_v57 = vsel %vm1918_vm7, %v20269_v3, %v11788_v8  ;;  %11407 = vrot.lane.b32.xlu1 %v20145_v6, %s14740_s27 }
 0xa84   : > { %11671 = vrot.lane.b32.xlu0 %v20178_v55, %s14742_s11 }
 0xa85   : > { %v20477_v39 = vpop.permute.xlu0 %10853  ;;  %12074 = vmatpush1.bf16.msra.mxu1 %v20192_v4 }
 0xa86   : > { %v10877_v17 = vsel %vm468_vm0, %v10852_v32, %v20477_v39  ;;  %v20482_v0 = vpop.permute.xlu1 %10987  ;;  %12075 = vmatprep.subr.bf16.mxu1 %v11686_v5 }
 0xa87   : > { %v11011_v12 = vsel %vm664_vm1, %v10986_v59, %v20482_v0  ;;  %11651 = vrot.lane.b32.xlu1 %v20007_v11, %s14742_s11  ;;  %12129 = vmatprep.subr.bf16.mxu0 %v10877_v17  ;;  %v21454_v17 = vld [vmem:[#allocation15_spill] sm:$0xff] }
 0xa88   : > { %11263 = vrot.lane.b32.xlu0 %v20182_v31, %s14739_s26  ;;  %12130 = vmatpush1.bf16.msra.mxu0 %v10876_v20 }
 0xa89   : > { %v20490_v3 = vpop.permute.xlu0 %11121  ;;  %12076 = vmatpush1.bf16.msra.mxu1 %v20256_v40  ;;  %12131 = vmatprep.subr.bf16.mxu0 %v20355_v24  ;;  %v21448_v40 = vld [vmem:[#allocation12_spill] sm:$0xff] }
 0xa8a   : > { %v11145_v4 = vsel %vm859_vm2, %v11120_v46, %v20490_v3  ;;  %v20496_v30 = vpop.permute.xlu1 %11417  ;;  %12086 = vmatprep.subr.bf16.mxu1 %v20366_v14  ;;  %v20550_v24 = vcombine.high %v21448_v40, %v21448_v40 }
 0xa8b   : > { %v20501_v11 = vsel %vm1369_vm4, %v11416_v21, %v20496_v30  ;;  %11669 = vrot.lane.b32.xlu1 %v20037_v19, %s14742_s11  ;;  %v14662_v21 = vld [vmem:[#allocation4 + $0x2a0] sm:$0xff] }
 0xa8c   : > { %11427 = vrot.lane.b32.xlu0 %v20503_v23, %s14740_s27  ;;  %12078 = vmatmul.mubr.bf16.vlgmr.msra.gmra.mrb[108].mxu1 %v21448_v40 }
 0xa8d   : > { %v20510_v9 = vpop.permute.xlu0 %11255  ;;  %12087 = vmatpush1.bf16.msra.mxu1 %v21449_v44  ;;  %12132 = vmatpush1.bf16.msra.mxu0 %v20293_v37 }
 0xa8e   : > { %v11279_v60 = vsel %vm1054_vm3, %v11254_v16, %v20510_v9  ;;  %v20516_v26 = vpop.permute.xlu1 %11541  ;;  %12133 = vmatprep.subr.bf16.mxu0 %v11011_v12  ;;  %12088 = vmatprep.subr.bf16.mxu1 %v11810_v57  ;;  %v21453_v16 = vld [vmem:[#allocation14_spill] sm:$0xff] }
 0xa8f   : > { %v20520_v19 = vsel %vm1552_vm5, %v11540_v41, %v20516_v26  ;;  %11531 = vrot.lane.b32.xlu1 %v20145_v6, %s14741_s28  ;;  %12118 = vmatprep.mubr.bf16.mxu1 %v20524_v49 }
 0xa90   : > { %11551 = vrot.lane.b32.xlu0 %v20503_v23, %s14741_s28 }
 0xa91   : > { %v20529_v37 = vpop.permute.xlu0 %11773  ;;  %12089 = vmatpush1.bf16.msra.mxu1 %v21450_v61  ;;  %12134 = vmatpush1.bf16.msra.mxu0 %v11010_v2 }
 0xa92   : > { %v20535_v56 = vsel %vm1918_vm7, %v20368_v63, %v20529_v37  ;;  %v20537_v18 = vpop.permute.xlu1 %11665  ;;  %12135 = vmatprep.subr.bf16.mxu0 %v20397_v34 }
 0xa93   : > { %v20542_v47 = vsel %vm1735_vm6, %v11664_v28, %v20537_v18  ;;  %11775 = vrot.lane.b32.xlu1 %v21451_v53, %s14743_s18  ;;  %v13488_v53 = vld [vmem:[#allocation5] ss:$0 sm:$0xff] }
 0xa94   : > { %11409 = vrot.lane.b32.xlu0 %v20350_v29, %s14740_s27 }
 0xa95   : > { %v20552_v38 = vpop.permute.xlu0 %10837  ;;  %12136 = vmatpush1.bf16.msra.mxu0 %v20317_v58  ;;  %v21452_v58 = vld [vmem:[#allocation11_spill] sm:$0xff] }
 0xa96   : > { %v20555_v14 = vpop.permute.xlu1 %11789  ;;  %12137 = vmatprep.subr.bf16.mxu0 %v11145_v4 }
 0xa97   : > { %v20559_v63 = vsel %vm1918_vm7, %v11788_v8, %v20555_v14  ;;  %11425 = vrot.lane.b32.xlu1 %v20182_v31, %s14740_s27 }
 0xa98   : > { %11777 = vrot.lane.b32.xlu0 %v20140_v27, %s14743_s18  ;;  %13483 = vmatmul.mubr.msk.bf16.vlgmr.msra.gmra.mrb[108].mxu1 %vm2183_vm8, %v20550_v24 }
 0xa99   : > { %v20567_v7 = vpop.permute.xlu0 %10971  ;;  %12138 = vmatpush1.bf16.msra.mxu0 %v20402_v42  ;;  %12241 = vmatprep.mubr.bf16.mxu1 %v21452_v58 }
 0xa9a   : > { %v20571_v32 = vpop.permute.xlu1 %11401  ;;  %12139 = vmatprep.subr.bf16.mxu0 %v20413_v52 }
 0xa9b   : > { %v11432_v15 = vsel %vm1369_vm4, %v20424_v25, %v20571_v32  ;;  %11549 = vrot.lane.b32.xlu1 %v20182_v31, %s14741_s28 }
 0xa9c   : > { %11533 = vrot.lane.b32.xlu0 %v20350_v29, %s14741_s28 }
 0xa9d   : > { %v20581_v27 = vpop.permute.xlu0 %11105  ;;  %12140 = vmatpush1.bf16.msra.mxu0 %v20333_v13  ;;  %v14660_v13 = vld [vmem:[#allocation4 + $0x258] sm:$0xff] }
 0xa9e   : > { %v20584_v20 = vpop.permute.xlu1 %11525  ;;  %12141 = vmatprep.subr.bf16.mxu0 %v11279_v60 }
 0xa9f   : > { %v11556_v34 = vsel %vm1552_vm5, %v20438_v22, %v20584_v20  ;;  %11655 = vrot.lane.b32.xlu1 %v20145_v6, %s14742_s11 }
 0xaa0   : > { %11795 = vrot.lane.b32.xlu0 %v20178_v55, %s14743_s18  ;;  %v14661_v55 = vld [vmem:[#allocation4 + $0x250] sm:$0xff] }
 0xaa1   : > { %v20593_v46 = vpop.permute.xlu0 %11239  ;;  %12142 = vmatpush1.bf16.msra.mxu0 %v20418_v36 }
 0xaa2   : > { %v20596_v42 = vpop.permute.xlu1 %11649  ;;  %12143 = vmatprep.subr.bf16.mxu0 %v14660_v13 }
 0xaa3   : > { %v11680_v52 = vsel %vm1735_vm6, %v20453_v48, %v20596_v42  ;;  %11793 = vrot.lane.b32.xlu1 %v21453_v16, %s14743_s18 }
 0xaa4   : > { %11657 = vrot.lane.b32.xlu0 %v20350_v29, %s14742_s11 }
 0xaa5   : > { %v20605_v6 = vpop.permute.xlu0 %11419  ;;  %12144 = vmatpush1.bf16.msra.mxu0 %v14661_v55 }
 0xaa6   : > { %v11440_v36 = vsel %vm1369_vm4, %v20496_v30, %v20605_v6  ;;  %v10836_v25 = vpop.permute.xlu1 %10835  ;;  %12145 = vmatprep.subr.bf16.mxu0 %v14662_v21 }
 0xaa7   : > { %v10869_v35 = vsel %vm468_vm0, %v20379_v33, %v10836_v25  ;;  %v10870_v22 = vsel %vm468_vm0, %v10836_v25, %v20552_v38  ;;  %11673 = vrot.lane.b32.xlu1 %v20182_v31, %s14742_s11 }
 0xaa8   : > { %11675 = vrot.lane.b32.xlu0 %v20503_v23, %s14742_s11  ;;  %12209 = vmatprep.subr.bf16.mxu1 %v10870_v22  ;;  %s13101_s11 = scalar_lea.sflag [#allocation7], %s298_s14 }
 0xaa9   : > { %v20618_v41 = vpop.permute.xlu0 %11543  ;;  %12146 = vmatpush1.bf16.msra.mxu0 %v14663_v51  ;;  %12210 = vmatpush1.bf16.msra.mxu1 %v10869_v35  ;;  %v14664_v51 = vld [vmem:[#allocation4 + $0x268] sm:$0xff] }
 0xaaa   : > { %v11564_v48 = vsel %vm1552_vm5, %v20516_v26, %v20618_v41  ;;  %v10970_v33 = vpop.permute.xlu1 %10969  ;;  %12147 = vmatprep.subr.bf16.mxu0 %v11432_v15 }
 0xaab   : > { %v11003_v28 = vsel %vm664_vm1, %v20347_v50, %v10970_v33  ;;  %v11004_v5 = vsel %vm664_vm1, %v10970_v33, %v20567_v7  ;;  %10843 = vrot.lane.b32.xlu1 %v20350_v29, %s14736_s23  ;;  %v14665_v33 = vld [vmem:[#allocation4 + $0x260] sm:$0xff] }
 0xaac   : > { %10863 = vrot.lane.b32.xlu0 %v20503_v23, %s14736_s23  ;;  %s13491_s23 = sshll.u32 %s14820_s4, 5  ;;  %s14750_s4 = smov [#allocation6]  }
 0xaad   : > { %v20631_v59 = vpop.permute.xlu0 %11667  ;;  %12148 = vmatpush1.bf16.msra.mxu0 %v20430_v10  ;;  %s21329_s28 = scalar_lea.hbm %s21379_s8, %s13491_s23  ;;  %s14676_s20 = sshll.u32 %s14750_s4, 4  ;;  %s14677_s20 = int_to_ptr.vmem [resolvable:$false] %s14676_s20 }
 0xaae   : > { %v11688_v2 = vsel %vm1735_vm6, %v20537_v18, %v20631_v59  ;;  %v11104_v8 = vpop.permute.xlu1 %11103  ;;  %12149 = vmatprep.subr.bf16.mxu0 %v11440_v36  ;;  %s14678_s21 = scalar_lea.vmem %s14677_s20, 64 }
 0xaaf   : > { %v20639_v50 = vsel %vm859_vm2, %v20392_v43, %v11104_v8  ;;  %v11138_v57 = vsel %vm859_vm2, %v11104_v8, %v20581_v27  ;;  %11779 = vrot.lane.b32.xlu1 %v21454_v17, %s14743_s18 }
 0xab0   : > { %11781 = vrot.lane.b32.xlu0 %v20350_v29, %s14743_s18 }
 0xab1   : > { %v20647_v10 = vpop.permute.xlu0 %11791  ;;  %12150 = vmatpush1.bf16.msra.mxu0 %v20501_v11 }
 0xab2   : > { %v11812_v12 = vsel %vm1918_vm7, %v20555_v14, %v20647_v10  ;;  %v11238_v4 = vpop.permute.xlu1 %11237  ;;  %12151 = vmatprep.subr.bf16.mxu0 %v11556_v34 }
 0xab3   : > { %v20655_v43 = vsel %vm1054_vm3, %v20408_v54, %v11238_v4  ;;  %v20659_v30 = vsel %vm1054_vm3, %v11238_v4, %v20593_v46  ;;  %10977 = vrot.lane.b32.xlu1 %v20350_v29, %s14737_s24 }
 0xab4   : > { %11797 = vrot.lane.b32.xlu0 %v20182_v31, %s14743_s18 }
 0xab5   : > { %v20665_v11 = vpop.permute.xlu0 %10857  ;;  %12152 = vmatpush1.bf16.msra.mxu0 %v20444_v1 }
 0xab6   : > { %v11404_v44 = vpop.permute.xlu1 %11403  ;;  %12153 = vmatprep.subr.bf16.mxu0 %v11564_v48 }
 0xab7   : > { %v20670_v54 = vsel %vm1369_vm4, %v20571_v32, %v11404_v44  ;;  %11799 = vrot.lane.b32.xlu1 %v20503_v23, %s14743_s18 }
 0xab8   : > { %10997 = vrot.lane.b32.xlu0 %v20503_v23, %s14737_s24  ;;  %s300_s24 = scalar_lea.vmem [#allocation6], %s13177_s19 }
 0xab9   : > { %v20676_v60 = vpop.permute.xlu0 %10991  ;;  %12154 = vmatpush1.bf16.msra.mxu0 %v20520_v19 }
 0xaba   : > { %v11528_v31 = vpop.permute.xlu1 %11527  ;;  %12155 = vmatprep.subr.bf16.mxu0 %v11680_v52 }
 0xabb   : > { %v20681_v1 = vsel %vm1552_vm5, %v20584_v20, %v11528_v31  ;;  %11111 = vrot.lane.b32.xlu1 %v20350_v29, %s14738_s25 }
 0xabc   : > { %11131 = vrot.lane.b32.xlu0 %v20503_v23, %s14738_s25  ;;  %s13114_s25 = sshll.u32 %s300_s24, 4  ;;  %s21331_s25 = int_to_ptr.vmem [resolvable:$true] %s13114_s25 }
 0xabd   : > { %v20687_v26 = vpop.permute.xlu0 %11125  ;;  %12156 = vmatpush1.bf16.msra.mxu0 %v20459_v45  ;;  %s14672_s18 = scalar_lea.vmem %s21331_s25, 32  ;;  %p14679_p0 = scmp.lt.s32.totalorder %s21331_s25, %s14677_s20 }
 0xabe   : > { %v10856_v61 = vpop.permute.xlu1 %10855  ;;  %12157 = vmatprep.subr.bf16.mxu0 %v11688_v2  ;;  %p14673_p11 = scmp.ne.s32.totalorder %s21331_s25, %s14672_s18  ;;  %p14680_p1 = scmp.lt.s32.totalorder %s14678_s21, %s14672_s18 }
 0xabf   : > { %v10878_v19 = vsel %vm468_vm0, %v20477_v39, %v10856_v61  ;;  %v10879_v18 = vsel %vm468_vm0, %v10856_v61, %v20665_v11  ;;  %11245 = vrot.lane.b32.xlu1 %v20350_v29, %s14739_s26 }
 0xac0   : > { %11265 = vrot.lane.b32.xlu0 %v20503_v23, %s14739_s26  ;;  %12211 = vmatprep.subr.bf16.mxu1 %v10879_v18  ;;  %p14674_p12 = pnand %p14673_p11, %p14837_p5  ;;  %p14681_p2 = por %p14680_p1, %p14679_p0 }
 0xac1   : > { %v20698_v14 = vpop.permute.xlu0 %11259  ;;  %12158 = vmatpush1.bf16.msra.mxu0 %v20542_v47  ;;  %12212 = vmatpush1.bf16.msra.mxu1 %v10878_v19 }
 0xac2   : > { %v10990_v45 = vpop.permute.xlu1 %10989  ;;  %12168 = vmatprep.subr.bf16.mxu0 %v20535_v56  ;;  %12213 = vmatprep.subr.bf16.mxu1 %v11004_v5  ;;  %v14666_v5 = vld [vmem:[#allocation4 + $0x2b0] sm:$0xff]  ;;  %p14675_p13 = pneg %p14674_p12 }
 0xac3   : > { %v11012_v39 = vsel %vm664_vm1, %v20482_v0, %v10990_v45  ;;  %v11013_v29 = vsel %vm664_vm1, %v10990_v45, %v20676_v60  ;;  %12691 = vperm.xlu1 %14426, %v13488_v53  }
 0xac4   : > { %12160 = vmatmul.mubr.bf16.vlgmr.msra.gmra.mrb[112].mxu0 %v21448_v40  ;;  %p14682_p3 = pnand %p14681_p2, %p14675_p13 }
 0xac5   : > { %v20707_v23 = vpop.permute.xlu0 %11405  ;;  %12169 = vmatpush1.bf16.msra.mxu0 %v20373_v62  ;;  %12214 = vmatpush1.bf16.msra.mxu1 %v11003_v28 }
 0xac6   : > { %v11434_v47 = vsel %vm1369_vm4, %v11404_v44, %v20707_v23  ;;  %v11124_v32 = vpop.permute.xlu1 %11123  ;;  %12170 = vmatprep.subr.bf16.mxu0 %v11812_v12  ;;  %12215 = vmatprep.subr.bf16.mxu1 %v11013_v29 }
 0xac7   : > { %v11146_v0 = vsel %vm859_vm2, %v20490_v3, %v11124_v32  ;;  %v11147_v56 = vsel %vm859_vm2, %v11124_v32, %v20687_v26  ;;  %12200 = vmatprep.mubr.bf16.mxu0 %v20524_v49 }
 0xac9   : > { %12171 = vmatpush1.bf16.msra.mxu0 %v20559_v63  ;;  %12216 = vmatpush1.bf16.msra.mxu1 %v11012_v39 }
 0xaca   : > { %v20718_v15 = vpop.permute.xlu0 %11529  ;;  %v11258_v62 = vpop.permute.xlu1 %11257  ;;  %12217 = vmatprep.subr.bf16.mxu1 %v11138_v57 }
 0xacb   : > { %v11558_v20 = vsel %vm1552_vm5, %v11528_v31, %v20718_v15  ;;  %v11280_v34 = vsel %vm1054_vm3, %v20510_v9, %v11258_v62  ;;  %v11281_v3 = vsel %vm1054_vm3, %v11258_v62, %v20698_v14 }
 0xacd   : > { %12218 = vmatpush1.bf16.msra.mxu1 %v20639_v50 }
 0xace   : > { %v20727_v13 = vpop.permute.xlu0 %10841  ;;  %v11422_v52 = vpop.permute.xlu1 %11421  ;;  %12219 = vmatprep.subr.bf16.mxu1 %v11147_v56 }
 0xacf   : > { %v11441_v63 = vsel %vm1369_vm4, %v20605_v6, %v11422_v52 }
 0xad0   : > { %13484 = vmatmul.mubr.msk.bf16.vlgmr.msra.gmra.mrb[112].mxu0 %vm2183_vm8, %v20550_v24 }
 0xad1   : > { %12220 = vmatpush1.bf16.msra.mxu1 %v11146_v0  ;;  %12323 = vmatprep.mubr.bf16.mxu0 %v21452_v58 }
 0xad2   : > { %v20734_v16 = vpop.permute.xlu0 %10975  ;;  %v11546_v9 = vpop.permute.xlu1 %11545  ;;  %12221 = vmatprep.subr.bf16.mxu1 %v20659_v30 }
 0xad3   : > { %v11565_v55 = vsel %vm1552_vm5, %v20618_v41, %v11546_v9 }
 0xad5   : > { %12222 = vmatpush1.bf16.msra.mxu1 %v20655_v43 }
 0xad6   : > { %v20740_v36 = vpop.permute.xlu0 %11109  ;;  %v10840_v25 = vpop.permute.xlu1 %10839  ;;  %12223 = vmatprep.subr.bf16.mxu1 %v11281_v3 }
 0xad7   : > { %v10871_v6 = vsel %vm468_vm0, %v20552_v38, %v10840_v25  ;;  %v10872_v21 = vsel %vm468_vm0, %v10840_v25, %v20727_v13 }
 0xad8   : > { %12291 = vmatprep.subr.bf16.mxu0 %v10872_v21 }
 0xad9   : > { %12224 = vmatpush1.bf16.msra.mxu1 %v11280_v34  ;;  %12292 = vmatpush1.bf16.msra.mxu0 %v10871_v6  ;;  %v14670_v6 = vld [vmem:[#allocation4 + $0x2c0] sm:$0xff] }
 0xada   : > { %v20746_v35 = vpop.permute.xlu0 %11243  ;;  %v10974_v22 = vpop.permute.xlu1 %10973  ;;  %12225 = vmatprep.subr.bf16.mxu1 %v14664_v51  ;;  %v14671_v51 = vld [vmem:[#allocation4 + $0x2b8] sm:$0xff] }
 0xadb   : > { %v11005_v41 = vsel %vm664_vm1, %v20567_v7, %v10974_v22  ;;  %v11006_v48 = vsel %vm664_vm1, %v10974_v22, %v20734_v16  ;;  %v14667_v7 = vld [vmem:[#allocation4 + $0x2a8] sm:$0xff] }
 0xadd   : > { %12226 = vmatpush1.bf16.msra.mxu1 %v14665_v33 }
 0xade   : > { %v20752_v38 = vpop.permute.xlu0 %11423  ;;  %v11108_v28 = vpop.permute.xlu1 %11107  ;;  %12227 = vmatprep.subr.bf16.mxu1 %v14666_v5 }
 0xadf   : > { %v11442_v2 = vsel %vm1369_vm4, %v11422_v52, %v20752_v38  ;;  %v11139_v8 = vsel %vm859_vm2, %v20581_v27, %v11108_v28  ;;  %v11140_v50 = vsel %vm859_vm2, %v11108_v28, %v20740_v36 }
 0xae1   : > { %12228 = vmatpush1.bf16.msra.mxu1 %v14667_v7 }
 0xae2   : > { %v20760_v57 = vpop.permute.xlu0 %10861  ;;  %v11242_v17 = vpop.permute.xlu1 %11241  ;;  %12229 = vmatprep.subr.bf16.mxu1 %v11434_v47 }
 0xae3   : > { %v11273_v12 = vsel %vm1054_vm3, %v20593_v46, %v11242_v17  ;;  %v11274_v4 = vsel %vm1054_vm3, %v11242_v17, %v20746_v35 }
 0xae5   : > { %12230 = vmatpush1.bf16.msra.mxu1 %v20670_v54 }
 0xae6   : > { %v20767_v43 = vpop.permute.xlu0 %11547  ;;  %v10860_v27 = vpop.permute.xlu1 %10859  ;;  %12231 = vmatprep.subr.bf16.mxu1 %v11442_v2 }
 0xae7   : > { %v11566_v30 = vsel %vm1552_vm5, %v11546_v9, %v20767_v43  ;;  %v10880_v44 = vsel %vm468_vm0, %v20665_v11, %v10860_v27  ;;  %v10881_v31 = vsel %vm468_vm0, %v10860_v27, %v20760_v57 }
 0xae8   : > { %12293 = vmatprep.subr.bf16.mxu0 %v10881_v31 }
 0xae9   : > { %12232 = vmatpush1.bf16.msra.mxu1 %v11441_v63  ;;  %12294 = vmatpush1.bf16.msra.mxu0 %v10880_v44  ;;  %v14668_v63 = vld [vmem:[#allocation4 + $0x278] sm:$0xff]  ;;  %v11934_v44 = vld [vmem:[#allocation4 + $0x280] sm:$0xff] }
 0xaea   : > { %v20775_v46 = vpop.permute.xlu0 %10995  ;;  %v10994_v61 = vpop.permute.xlu1 %10993  ;;  %12295 = vmatprep.subr.bf16.mxu0 %v11006_v48  ;;  %12233 = vmatprep.subr.bf16.mxu1 %v11558_v20 }
 0xaeb   : > { %v11014_v54 = vsel %vm664_vm1, %v20676_v60, %v10994_v61  ;;  %v11015_v19 = vsel %vm664_vm1, %v10994_v61, %v20775_v46 }
 0xaed   : > { %12234 = vmatpush1.bf16.msra.mxu1 %v20681_v1  ;;  %12296 = vmatpush1.bf16.msra.mxu0 %v11005_v41 }
 0xaee   : > { %v20782_v11 = vpop.permute.xlu0 %11653  ;;  %v11128_v18 = vpop.permute.xlu1 %11127  ;;  %12297 = vmatprep.subr.bf16.mxu0 %v11015_v19  ;;  %12235 = vmatprep.subr.bf16.mxu1 %v11566_v30 }
 0xaef   : > { %v11148_v53 = vsel %vm859_vm2, %v20687_v26, %v11128_v18 }
 0xaf1   : > { %12236 = vmatpush1.bf16.msra.mxu1 %v11565_v55  ;;  %12298 = vmatpush1.bf16.msra.mxu0 %v11014_v54  ;;  %v14669_v55 = vld [vmem:[#allocation4 + $0x270] sm:$0xff] }
 0xaf2   : > { %v20786_v45 = vpop.permute.xlu0 %11129  ;;  %v11262_v39 = vpop.permute.xlu1 %11261  ;;  %12299 = vmatprep.subr.bf16.mxu0 %v11140_v50 }
 0xaf3   : > { %v11149_v60 = vsel %vm859_vm2, %v11128_v18, %v20786_v45  ;;  %v11282_v1 = vsel %vm1054_vm3, %v20698_v14, %v11262_v39 }
 0xaf5   : > { %12300 = vmatpush1.bf16.msra.mxu0 %v11139_v8 }
 0xaf6   : > { %v20792_v29 = vpop.permute.xlu0 %11671  ;;  %v11408_v47 = vpop.permute.xlu1 %11407  ;;  %12301 = vmatprep.subr.bf16.mxu0 %v11149_v60 }
 0xaf7   : > { %v11435_v26 = vsel %vm1369_vm4, %v20707_v23, %v11408_v47 }
 0xaf9   : > { %12302 = vmatpush1.bf16.msra.mxu0 %v11148_v53 }
 0xafa   : > { %v20796_v32 = vpop.permute.xlu0 %11263  ;;  %v11652_v0 = vpop.permute.xlu1 %11651  ;;  %12303 = vmatprep.subr.bf16.mxu0 %v11274_v4 }
 0xafb   : > { %v11283_v56 = vsel %vm1054_vm3, %v11262_v39, %v20796_v32  ;;  %v11681_v62 = vsel %vm1735_vm6, %v20596_v42, %v11652_v0  ;;  %v11682_v14 = vsel %vm1735_vm6, %v11652_v0, %v20782_v11  ;;  %v11943_v0 = vld [vmem:[#allocation4 + $0x2c8] sm:$0xff] }
 0xafc   : > { %12237 = vmatprep.subr.bf16.mxu1 %v11682_v14 }
 0xafd   : > { %12238 = vmatpush1.bf16.msra.mxu1 %v11681_v62  ;;  %12304 = vmatpush1.bf16.msra.mxu0 %v11273_v12 }
 0xafe   : > { %v11428_v20 = vpop.permute.xlu0 %11427  ;;  %v11670_v34 = vpop.permute.xlu1 %11669  ;;  %12305 = vmatprep.subr.bf16.mxu0 %v11283_v56 }
 0xaff   : > { %11480 = vst.msk [vmem:[#allocation4 + $0x358] sm:$0xff] %vm513_vm9, %v11428_v20  ;;  %v11689_v23 = vsel %vm1735_vm6, %v20631_v59, %v11670_v34  ;;  %v11690_v3 = vsel %vm1735_vm6, %v11670_v34, %v20792_v29 }
 0xb00   : > { %12239 = vmatprep.subr.bf16.mxu1 %v11690_v3  ;;  %v14746_v3 = vmov 0.0  }
 0xb01   : > { %12240 = vmatpush1.bf16.msra.mxu1 %v11689_v23  ;;  %12306 = vmatpush1.bf16.msra.mxu0 %v11282_v1 }
 0xb02   : > { %v11552_v42 = vpop.permute.xlu0 %11551  ;;  %v11532_v52 = vpop.permute.xlu1 %11531  ;;  %12307 = vmatprep.subr.bf16.mxu0 %v14668_v63  ;;  %v12564_v63 = vld [vmem:[%s21377_s6 + $0x80] sm:$0xff] }
 0xb03   : > { %11604 = vst.msk [vmem:[#allocation4 + $0x3e8] sm:$0xff] %vm513_vm9, %v11552_v42  ;;  %v11559_v9 = vsel %vm1552_vm5, %v20718_v15, %v11532_v52 }
 0xb04   : > { %12242 = vmatmul.mubr.bf16.vlgmr.msra.gmra.mrb[112].mxu1 %v21448_v40 }
 0xb05   : > { %12308 = vmatpush1.bf16.msra.mxu0 %v14669_v55  ;;  %12282 = vmatprep.mubr.bf16.mxu1 %v20524_v49 }
 0xb06   : > { %v11410_v59 = vpop.permute.xlu0 %11409  ;;  %v11776_v25 = vpop.permute.xlu1 %11775  ;;  %12309 = vmatprep.subr.bf16.mxu0 %v14670_v6  ;;  %v11961_v55 = vld [vmem:[#allocation4 + $0x358] sm:$0xff]  ;;  %v12548_v6 = vld [vmem:[%s21377_s6] sm:$0xff] }
 0xb07   : > { %v11436_v21 = vsel %vm1369_vm4, %v11408_v47, %v11410_v59  ;;  %11471 = vst.msk [vmem:[#allocation4 + $0x310] sm:$0xff] %vm513_vm9, %v11410_v59  ;;  %v11805_v22 = vsel %vm1918_vm7, %v20529_v37, %v11776_v25 }
 0xb09   : > { %12310 = vmatpush1.bf16.msra.mxu0 %v14671_v51 }
 0xb0a   : > { %v11778_v15 = vpop.permute.xlu0 %11777  ;;  %v11426_v41 = vpop.permute.xlu1 %11425  ;;  %12311 = vmatprep.subr.bf16.mxu0 %v11436_v21  ;;  %v12549_v21 = vld [vmem:[%s21377_s6 + $0x8] sm:$0xff] }
 0xb0b   : > { %v11806_v48 = vsel %vm1918_vm7, %v11776_v25, %v11778_v15  ;;  %v11443_v33 = vsel %vm1369_vm4, %v20752_v38, %v11426_v41  ;;  %v11444_v28 = vsel %vm1369_vm4, %v11426_v41, %v11428_v20  ;;  %v12566_v41 = vld [vmem:[%s21377_s6 + $0x90] sm:$0xff] }
 0xb0c   : > { %12250 = vmatprep.subr.bf16.mxu1 %v11806_v48  ;;  %v12567_v48 = vld [vmem:[%s21377_s6 + $0x98] sm:$0xff] }
 0xb0d   : > { %12251 = vmatpush1.bf16.msra.mxu1 %v11805_v22  ;;  %12312 = vmatpush1.bf16.msra.mxu0 %v11435_v26 }
 0xb0e   : > { %v11534_v5 = vpop.permute.xlu0 %11533  ;;  %v11550_v2 = vpop.permute.xlu1 %11549  ;;  %12313 = vmatprep.subr.bf16.mxu0 %v11444_v28 }
 0xb0f   : > { %v11560_v37 = vsel %vm1552_vm5, %v11532_v52, %v11534_v5  ;;  %11595 = vst.msk [vmem:[#allocation4 + $0x3a0] sm:$0xff] %vm513_vm9, %v11534_v5  ;;  %v11567_v8 = vsel %vm1552_vm5, %v20767_v43, %v11550_v2  ;;  %v11568_v50 = vsel %vm1552_vm5, %v11550_v2, %v11552_v42  ;;  %v12550_v5 = vld [vmem:[%s21377_s6 + $0x10] sm:$0xff]  ;;  %v12551_v2 = vld [vmem:[%s21377_s6 + $0x18] sm:$0xff] }
 0xb11   : > { %12314 = vmatpush1.bf16.msra.mxu0 %v11443_v33 }
 0xb12   : > { %v11796_v7 = vpop.permute.xlu0 %11795  ;;  %v11656_v38 = vpop.permute.xlu1 %11655  ;;  %12315 = vmatprep.subr.bf16.mxu0 %v11560_v37 }
 0xb13   : > { %v11683_v17 = vsel %vm1735_vm6, %v20782_v11, %v11656_v38 }
 0xb15   : > { %12316 = vmatpush1.bf16.msra.mxu0 %v11559_v9  ;;  %v12565_v9 = vld [vmem:[%s21377_s6 + $0x88] sm:$0xff] }
 0xb16   : > { %v11658_v12 = vpop.permute.xlu0 %11657  ;;  %v11794_v4 = vpop.permute.xlu1 %11793  ;;  %12317 = vmatprep.subr.bf16.mxu0 %v11568_v50  ;;  %v13895_v25 = vpack.c.bf16 %v12565_v9, %v12564_v63  ;;  %v11970_v33 = vld [vmem:[#allocation4 + $0x3a0] sm:$0xff]  ;;  %v12569_v50 = vld [vmem:[%s21377_s6 + $0xa8] sm:$0xff]  ;;  %v12558_v63 = vld [vmem:[%s21377_s6 + $0x50] sm:$0xff] }
 0xb17   : > { %v11684_v27 = vsel %vm1735_vm6, %v11656_v38, %v11658_v12  ;;  %11719 = vst.msk [vmem:[#allocation4 + $0x430] sm:$0xff] %vm513_vm9, %v11658_v12  ;;  %v11813_v43 = vsel %vm1918_vm7, %v20647_v10, %v11794_v4  ;;  %v11814_v30 = vsel %vm1918_vm7, %v11794_v4, %v11796_v7  ;;  %v13901_v38 = vpack.c.bf16 %v12551_v2, %v12550_v5  ;;  %v12552_v12 = vld [vmem:[%s21377_s6 + $0x20] sm:$0xff]  ;;  %v12553_v4 = vld [vmem:[%s21377_s6 + $0x28] sm:$0xff]  ;;  %v12559_v9 = vld [vmem:[%s21377_s6 + $0x58] sm:$0xff] }
 0xb18   : > { %12252 = vmatprep.subr.bf16.mxu1 %v11814_v30  ;;  %v12587_v5 = vld [vmem:[%s21377_s6 + $0x138] sm:$0xff]  ;;  %v12604_v2 = vld [vmem:[%s21377_s6 + $0x1c0] sm:$0xff] }
 0xb19   : > { %12253 = vmatpush1.bf16.msra.mxu1 %v11813_v43  ;;  %12318 = vmatpush1.bf16.msra.mxu0 %v11567_v8  ;;  %v12568_v8 = vld [vmem:[%s21377_s6 + $0xa0] sm:$0xff]  ;;  %v12570_v43 = vld [vmem:[%s21377_s6 + $0xb0] sm:$0xff] }
 0xb1a   : > { %v11676_v31 = vpop.permute.xlu0 %11675  ;;  %v11674_v61 = vpop.permute.xlu1 %11673  ;;  %12319 = vmatprep.subr.bf16.mxu0 %v11684_v27  ;;  %13654 = vmatprep.subr.bf16.mxu1 %v11934_v44  ;;  %v12596_v44 = vld [vmem:[%s21377_s6 + $0x180] sm:$0xff] }
 0xb1b   : > { %11728 = vst.msk [vmem:[#allocation4 + $0x478] sm:$0xff] %vm513_vm9, %v11676_v31  ;;  %v11691_v54 = vsel %vm1735_vm6, %v20792_v29, %v11674_v61  ;;  %v11692_v19 = vsel %vm1735_vm6, %v11674_v61, %v11676_v31  ;;  %v13905_v31 = vpack.c.bf16 %v12553_v4, %v12552_v12  ;;  %v12597_v61 = vld [vmem:[%s21377_s6 + $0x188] sm:$0xff]  ;;  %v12588_v4 = vld [vmem:[%s21377_s6 + $0x140] sm:$0xff] }
 0xb1c   : > { %13485 = vmatmul.mubr.msk.bf16.vlgmr.msra.gmra.mrb[112].mxu1 %vm2183_vm8, %v20550_v24 }
 0xb1d   : > { %12320 = vmatpush1.bf16.msra.mxu0 %v11683_v17  ;;  %12405 = vmatprep.mubr.bf16.mxu1 %v21452_v58  ;;  %v13903_v17 = vpack.c.bf16 %v12569_v50, %v12568_v8  ;;  %v12605_v8 = vld [vmem:[%s21377_s6 + $0x1c8] sm:$0xff] }
 0xb1e   : > { %v10864_v10 = vpop.permute.xlu0 %10863  ;;  %v10844_v11 = vpop.permute.xlu1 %10843  ;;  %12321 = vmatprep.subr.bf16.mxu0 %v11692_v19  ;;  %v11988_v30 = vld [vmem:[#allocation4 + $0x430] sm:$0xff]  ;;  %v13943_v12 = vpack.c.bf16 %v12605_v8, %v12604_v2 }
 0xb1f   : > { %v10882_v18 = vsel %vm468_vm0, %v20760_v57, %v10864_v10  ;;  %v10873_v53 = vsel %vm468_vm0, %v20727_v13, %v10844_v11  ;;  %v12554_v19 = vld [vmem:[%s21377_s6 + $0x30] sm:$0xff]  ;;  %v12555_v10 = vld [vmem:[%s21377_s6 + $0x38] sm:$0xff] }
 0xb20   : > { %10918 = vst.msk [vmem:[#allocation4 + $0x88] sm:$0xff] %vm513_vm9, %v10882_v18  ;;  %10909 = vst.msk [vmem:[#allocation4 + $0x40] sm:$0xff] %vm513_vm9, %v10873_v53  ;;  %v12572_v18 = vld [vmem:[%s21377_s6 + $0xc0] sm:$0xff]  ;;  %v12573_v53 = vld [vmem:[%s21377_s6 + $0xc8] sm:$0xff] }
 0xb21   : > { %12322 = vmatpush1.bf16.msra.mxu0 %v11691_v54  ;;  %v12630_v8 = vld [vmem:[%s21377_s6 + $0x290] sm:$0xff] }
 0xb22   : > { %v11782_v39 = vpop.permute.xlu0 %11781  ;;  %v11780_v60 = vpop.permute.xlu1 %11779 }
 0xb23   : > { %11843 = vst.msk [vmem:[#allocation4 + $0x4c0] sm:$0xff] %vm513_vm9, %v11782_v39  ;;  %v11807_v58 = vsel %vm1918_vm7, %v11778_v15, %v11780_v60  ;;  %v11808_v1 = vsel %vm1918_vm7, %v11780_v60, %v11782_v39  ;;  %v11997_v39 = vld [vmem:[#allocation4 + $0x478] sm:$0xff]  ;;  %v13927_v60 = vpack.c.bf16 %v12597_v61, %v12596_v44  ;;  %v12590_v61 = vld [vmem:[%s21377_s6 + $0x150] sm:$0xff] }
 0xb24   : > { %12324 = vmatmul.mubr.bf16.vlgmr.msra.gmra.mrb[116].mxu0 %v21448_v40  ;;  %12332 = vmatprep.subr.bf16.mxu0 %v11808_v1  ;;  %v12581_v1 = vld [vmem:[%s21377_s6 + $0x108] sm:$0xff] }
 0xb25   : > { %12333 = vmatpush1.bf16.msra.mxu0 %v11807_v58  ;;  %12364 = vmatprep.mubr.bf16.mxu0 %v20524_v49  ;;  %v12580_v58 = vld [vmem:[%s21377_s6 + $0x100] sm:$0xff] }
 0xb26   : > { %v11798_v13 = vpop.permute.xlu0 %11797  ;;  %v10978_v57 = vpop.permute.xlu1 %10977 }
 0xb27   : > { %v11815_v29 = vsel %vm1918_vm7, %v11796_v7, %v11798_v13  ;;  %v11007_v47 = vsel %vm664_vm1, %v20734_v16, %v10978_v57  ;;  %v11862_v26 = vld [vmem:[#allocation4 + $0x40] sm:$0xff]  ;;  %v11871_v20 = vld [vmem:[#allocation4 + $0x88] sm:$0xff]  ;;  %v11952_v16 = vld [vmem:[#allocation4 + $0x310] sm:$0xff]  ;;  %v13909_v57 = vpack.c.bf16 %v12555_v10, %v12554_v19 }
 0xb28   : > { %11043 = vst.msk [vmem:[#allocation4 + $0xd0] sm:$0xff] %vm513_vm9, %v11007_v47  ;;  %13655 = vmatpush3.bf16.msra.mxu1 %v11862_v26  ;;  %v11979_v7 = vld [vmem:[#allocation4 + $0x3e8] sm:$0xff]  ;;  %v13911_v47 = vpack.c.bf16 %v12573_v53, %v12572_v18  ;;  %v12556_v26 = vld [vmem:[%s21377_s6 + $0x40] sm:$0xff] }
 0xb29   : > { %13656 = vmatprep.subr.bf16.mxu1 %v11943_v0  ;;  %v12557_v0 = vld [vmem:[%s21377_s6 + $0x48] sm:$0xff]  ;;  %v12608_v19 = vld [vmem:[%s21377_s6 + $0x1e0] sm:$0xff] }
 0xb2a   : > { %v10998_v56 = vpop.permute.xlu0 %10997  ;;  %v11800_v62 = vpop.permute.xlu1 %11799  ;;  %v12609_v10 = vld [vmem:[%s21377_s6 + $0x1e8] sm:$0xff]  ;;  %v12592_v53 = vld [vmem:[%s21377_s6 + $0x160] sm:$0xff] }
 0xb2b   : > { %v11016_v14 = vsel %vm664_vm1, %v20775_v46, %v10998_v56  ;;  %v11816_v49 = vsel %vm1918_vm7, %v11798_v13, %v11800_v62  ;;  %11852 = vst.msk [vmem:[#allocation4 + $0x508] sm:$0xff] %vm513_vm9, %v11800_v62  ;;  %v12598_v13 = vld [vmem:[%s21377_s6 + $0x190] sm:$0xff]  ;;  %v13951_v18 = vpack.c.bf16 %v12609_v10, %v12608_v19  ;;  %v12633_v19 = vld [vmem:[%s21377_s6 + $0x2a8] sm:$0xff] }
 0xb2c   : > { %11052 = vst.msk [vmem:[#allocation4 + $0x118] sm:$0xff] %vm513_vm9, %v11016_v14  ;;  %13657 = vmatpush3.bf16.msra.mxu1 %v11871_v20  ;;  %12334 = vmatprep.subr.bf16.mxu0 %v11816_v49  ;;  %v12574_v62 = vld [vmem:[%s21377_s6 + $0xd0] sm:$0xff]  ;;  %v12575_v14 = vld [vmem:[%s21377_s6 + $0xd8] sm:$0xff]  ;;  %v13929_v49 = vpack.c.bf16 %v12581_v1, %v12580_v58 }
 0xb2d   : > { %13658 = vmatprep.subr.bf16.mxu1 %v11952_v16  ;;  %12335 = vmatpush1.bf16.msra.mxu0 %v11815_v29  ;;  %v12599_v29 = vld [vmem:[%s21377_s6 + $0x198] sm:$0xff]  ;;  %v12582_v16 = vld [vmem:[%s21377_s6 + $0x110] sm:$0xff] }
 0xb2e   : > { %v11132_v34 = vpop.permute.xlu0 %11131  ;;  %v11112_v23 = vpop.permute.xlu1 %11111  ;;  %13868 = vmatprep.subr.bf16.mxu0 %v14746_v3  ;;  %v13931_v20 = vpack.c.bf16 %v12599_v29, %v12598_v13  ;;  %v12611_v58 = vld [vmem:[%s21377_s6 + $0x1f8] sm:$0xff] }
 0xb2f   : > { %v11150_v46 = vsel %vm859_vm2, %v20786_v45, %v11132_v34  ;;  %v11141_v42 = vsel %vm859_vm2, %v20740_v36, %v11112_v23  ;;  %v11880_v52 = vld [vmem:[#allocation4 + $0xd0] sm:$0xff]  ;;  %v12006_v45 = vld [vmem:[#allocation4 + $0x4c0] sm:$0xff]  ;;  %v12583_v34 = vld [vmem:[%s21377_s6 + $0x118] sm:$0xff] }
 0xb30   : > { %11186 = vst.msk [vmem:[#allocation4 + $0x1a8] sm:$0xff] %vm513_vm9, %v11150_v46  ;;  %11177 = vst.msk [vmem:[#allocation4 + $0x160] sm:$0xff] %vm513_vm9, %v11141_v42  ;;  %13659 = vmatpush3.bf16.msra.mxu1 %v11880_v52  ;;  %13486 = vmatmul.mubr.msk.bf16.vlgmr.msra.gmra.mrb[116].mxu0 %vm2183_vm8, %v20550_v24  ;;  %v12600_v23 = vld [vmem:[%s21377_s6 + $0x1a0] sm:$0xff]  ;;  %v13913_v46 = vpack.c.bf16 %v12557_v0, %v12556_v26  ;;  %v12601_v42 = vld [vmem:[%s21377_s6 + $0x1a8] sm:$0xff]  ;;  %v13915_v52 = vpack.c.bf16 %v12575_v14, %v12574_v62 }
 0xb31   : > { %13660 = vmatprep.subr.bf16.mxu1 %v11961_v55  ;;  %13869 = vmatpush3.bf16.msra.mxu0 %v12006_v45  ;;  %v12576_v55 = vld [vmem:[%s21377_s6 + $0xe0] sm:$0xff]  ;;  %v12577_v45 = vld [vmem:[%s21377_s6 + $0xe8] sm:$0xff]  ;;  %v12595_v29 = vld [vmem:[%s21377_s6 + $0x178] sm:$0xff] }
 0xb32   : > { %v11266_v36 = vpop.permute.xlu0 %11265  ;;  %v11246_v59 = vpop.permute.xlu1 %11245  ;;  %13870 = vmatprep.subr.bf16.mxu0 %v14746_v3  ;;  %13872 = vmatprep.mubr.msk.bf16.mxu0 %vm14747_vm11, %v14746_v3  ;;  %v12015_v28 = vld [vmem:[#allocation4 + $0x508] sm:$0xff]  ;;  %v21455_v0 = vld [vmem:[#allocation10_spill] sm:$0xff] }
 0xb33   : > { %v11284_v22 = vsel %vm1054_vm3, %v20796_v32, %v11266_v36  ;;  %v11275_v51 = vsel %vm1054_vm3, %v20746_v35, %v11246_v59  ;;  %v11889_v15 = vld [vmem:[#allocation4 + $0x118] sm:$0xff]  ;;  %v13897_v32 = vpack.c.bf16 %v12549_v21, %v12548_v6  ;;  %v13899_v35 = vpack.c.bf16 %v12567_v48, %v12566_v41  ;;  %v12602_v6 = vld [vmem:[%s21377_s6 + $0x1b0] sm:$0xff]  ;;  %v12561_v41 = vld [vmem:[%s21377_s6 + $0x68] sm:$0xff] }
 0xb34   : > { %11320 = vst.msk [vmem:[#allocation4 + $0x238] sm:$0xff] %vm513_vm9, %v11284_v22  ;;  %11311 = vst.msk [vmem:[#allocation4 + $0x1f0] sm:$0xff] %vm513_vm9, %v11275_v51  ;;  %13661 = vmatpush3.bf16.msra.mxu1 %v11889_v15  ;;  %v13933_v36 = vpack.c.bf16 %v12583_v34, %v12582_v16  ;;  %v13935_v59 = vpack.c.bf16 %v12601_v42, %v12600_v23  ;;  %v13917_v21 = vpack.c.bf16 %v12559_v9, %v12558_v63  ;;  %v12603_v22 = vld [vmem:[%s21377_s6 + $0x1b8] sm:$0xff]  ;;  %v12560_v15 = vld [vmem:[%s21377_s6 + $0x60] sm:$0xff]  ;;  %v14748_v9 = vmov 1983009808  }
 0xb35   : > { %13662 = vmatprep.subr.bf16.mxu1 %v11970_v33  ;;  %13871 = vmatpush3.bf16.msra.mxu0 %v12015_v28  ;;  %v13919_v51 = vpack.c.bf16 %v12577_v45, %v12576_v55  ;;  %v12578_v48 = vld [vmem:[%s21377_s6 + $0xf0] sm:$0xff]  ;;  %v12579_v33 = vld [vmem:[%s21377_s6 + $0xf8] sm:$0xff]  ;;  %v12628_v34 = vld [vmem:[%s21377_s6 + $0x280] sm:$0xff]  ;;  %v12504_v55 = vunpack.c.l.s4 %v14748_v9 }
 0xb36   : > { %13896 = vmatprep.subr.bf16.mxu0 %v13895_v25  ;;  %v12584_v25 = vld [vmem:[%s21377_s6 + $0x120] sm:$0xff]  ;;  %v13923_v50 = vpack.c.bf16 %v12579_v33, %v12578_v48  ;;  %v12629_v23 = vld [vmem:[%s21377_s6 + $0x288] sm:$0xff]  ;;  %v12650_v9 = vld [vmem:[%s21377_s6 + $0x330] sm:$0xff] }
 0xb37   : > { %v11898_v37 = vld [vmem:[#allocation4 + $0x160] sm:$0xff]  ;;  %v11907_v27 = vld [vmem:[#allocation4 + $0x1a8] sm:$0xff]  ;;  %v12505_v45 = vunpack.c.0.s8 %v12504_v55  ;;  %v12651_v55 = vld [vmem:[%s21377_s6 + $0x338] sm:$0xff] }
 0xb38   : > { %13663 = vmatpush3.bf16.msra.mxu1 %v11898_v37  ;;  %13873 = vmatmul.mubr.msk.bf16.vlgmr.msra.gmra.mrb[120].mxu0 %vm2183_vm8, %v20550_v24  ;;  %v12571_v24 = vld [vmem:[%s21377_s6 + $0xb8] sm:$0xff]  ;;  %v13921_v37 = vpack.c.bf16 %v12561_v41, %v12560_v15  ;;  %v12660_v42 = vld [vmem:[%s21377_s6 + $0x380] sm:$0xff] }
 0xb39   : > { %13664 = vmatprep.subr.bf16.mxu1 %v11979_v7  ;;  %13898 = vmatpush3.bf16.msra.mxu0 %v13897_v32  ;;  %v13907_v54 = vpack.c.bf16 %v12571_v24, %v12570_v43  ;;  %v13939_v32 = vpack.c.bf16 %v12603_v22, %v12602_v6  ;;  %v12562_v7 = vld [vmem:[%s21377_s6 + $0x70] sm:$0xff]  ;;  %v12453_v33 = vld [vmem:[%s21376_s5] sm:$0xff] }
 0xb3a   : > { %13900 = vmatprep.subr.bf16.mxu0 %v13899_v35  ;;  %v12586_v35 = vld [vmem:[%s21377_s6 + $0x130] sm:$0xff] }
 0xb3b   : > { %v11916_v11 = vld [vmem:[#allocation4 + $0x1f0] sm:$0xff]  ;;  %v11925_v56 = vld [vmem:[#allocation4 + $0x238] sm:$0xff] }
 0xb3c   : > { %13665 = vmatpush3.bf16.msra.mxu1 %v11907_v27  ;;  %v12589_v27 = vld [vmem:[%s21377_s6 + $0x148] sm:$0xff]  ;;  %v12606_v24 = vld [vmem:[%s21377_s6 + $0x1d0] sm:$0xff] }
 0xb3d   : > { %13666 = vmatprep.subr.bf16.mxu1 %v11988_v30  ;;  %13902 = vmatpush3.bf16.msra.mxu0 %v13901_v38  ;;  %v12563_v38 = vld [vmem:[%s21377_s6 + $0x78] sm:$0xff]  ;;  %v13945_v44 = vpack.c.bf16 %v12589_v27, %v12588_v4  ;;  %v12662_v27 = vld [vmem:[%s21377_s6 + $0x390] sm:$0xff] }
 0xb3e   : > { %13904 = vmatprep.subr.bf16.mxu0 %v13903_v17  ;;  %v13941_v17 = vpack.c.bf16 %v12587_v5, %v12586_v35  ;;  %v13925_v43 = vpack.c.bf16 %v12563_v38, %v12562_v7  ;;  %v12607_v30 = vld [vmem:[%s21377_s6 + $0x1d8] sm:$0xff]  ;;  %v12612_v35 = vld [vmem:[%s21377_s6 + $0x200] sm:$0xff]  ;;  %v12613_v5 = vld [vmem:[%s21377_s6 + $0x208] sm:$0xff] }
 0xb3f   : > { %v12644_v7 = vld [vmem:[%s21377_s6 + $0x300] sm:$0xff]  ;;  %v12645_v38 = vld [vmem:[%s21377_s6 + $0x308] sm:$0xff]  ;;  %v13961_v4 = vpack.c.bf16 %v12613_v5, %v12612_v35  ;;  %v12671_v35 = vld [vmem:[%s21377_s6 + $0x3d8] sm:$0xff] }
 0xb40   : > { %13667 = vmatpush3.bf16.msra.mxu1 %v11916_v11 }
 0xb41   : > { %13668 = vmatprep.subr.bf16.mxu1 %v11997_v39  ;;  %13906 = vmatpush3.bf16.msra.mxu0 %v13905_v31  ;;  %v13947_v31 = vpack.c.bf16 %v12607_v30, %v12606_v24  ;;  %v12593_v39 = vld [vmem:[%s21377_s6 + $0x168] sm:$0xff]  ;;  %v12614_v30 = vld [vmem:[%s21377_s6 + $0x210] sm:$0xff] }
 0xb42   : > { %13908 = vmatprep.subr.bf16.mxu0 %v13907_v54  ;;  %v12591_v54 = vld [vmem:[%s21377_s6 + $0x158] sm:$0xff]  ;;  %v13953_v1 = vpack.c.bf16 %v12593_v39, %v12592_v53  ;;  %v12664_v39 = vld [vmem:[%s21377_s6 + $0x3a0] sm:$0xff] }
 0xb43   : > { %v13949_v11 = vpack.c.bf16 %v12591_v54, %v12590_v61  ;;  %v13993_v61 = vpack.c.bf16 %v12645_v38, %v12644_v7  ;;  %v12632_v54 = vld [vmem:[%s21377_s6 + $0x2a0] sm:$0xff]  ;;  %v12641_v7 = vld [vmem:[%s21377_s6 + $0x2e8] sm:$0xff] }
 0xb44   : > { %13669 = vmatpush3.bf16.msra.mxu1 %v11925_v56 }
 0xb45   : > { %13928 = vmatprep.subr.bf16.mxu1 %v13927_v60  ;;  %13910 = vmatpush3.bf16.msra.mxu0 %v13909_v57  ;;  %v12610_v60 = vld [vmem:[%s21377_s6 + $0x1f0] sm:$0xff] }
 0xb46   : > { %13912 = vmatprep.subr.bf16.mxu0 %v13911_v47  ;;  %v13955_v13 = vpack.c.bf16 %v12611_v58, %v12610_v60  ;;  %v12594_v57 = vld [vmem:[%s21377_s6 + $0x170] sm:$0xff]  ;;  %v12665_v60 = vld [vmem:[%s21377_s6 + $0x3a8] sm:$0xff]  ;;  %v13967_v58 = vpack.c.bf16 %v12633_v19, %v12632_v54  ;;  %v12643_v54 = vld [vmem:[%s21377_s6 + $0x2f8] sm:$0xff] }
 0xb47   : > { %12406 = vmatmul.mubr.bf16.vlgmr.msra.gmra.mrb[116].mxu1 %v21448_v40  ;;  %v12585_v40 = vld [vmem:[%s21377_s6 + $0x128] sm:$0xff]  ;;  %v13957_v47 = vpack.c.bf16 %v12595_v29, %v12594_v57  ;;  %v12634_v29 = vld [vmem:[%s21377_s6 + $0x2b0] sm:$0xff] }
 0xb48   : > { %13930 = vmatpush3.bf16.msra.mxu1 %v13929_v49  ;;  %v13937_v28 = vpack.c.bf16 %v12585_v40, %v12584_v25 }
 0xb49   : > { %13932 = vmatprep.subr.bf16.mxu1 %v13931_v20  ;;  %13914 = vmatpush3.bf16.msra.mxu0 %v13913_v46  ;;  %v13959_v46 = vpack.c.bf16 %v12629_v23, %v12628_v34  ;;  %v12618_v34 = vld [vmem:[%s21377_s6 + $0x230] sm:$0xff]  ;;  %v12619_v23 = vld [vmem:[%s21377_s6 + $0x238] sm:$0xff] }
 0xb4a   : > { %13916 = vmatprep.subr.bf16.mxu0 %v13915_v52  ;;  %v12661_v52 = vld [vmem:[%s21377_s6 + $0x388] sm:$0xff] }
 0xb4b   : > { %v13991_v63 = vpack.c.bf16 %v12661_v52, %v12660_v42  ;;  %v12636_v42 = vld [vmem:[%s21377_s6 + $0x2c0] sm:$0xff]  ;;  %v12637_v52 = vld [vmem:[%s21377_s6 + $0x2c8] sm:$0xff] }
 0xb4c   : > { %13934 = vmatpush3.bf16.msra.mxu1 %v13933_v36 }
 0xb4d   : > { %13936 = vmatprep.subr.bf16.mxu1 %v13935_v59  ;;  %13918 = vmatpush3.bf16.msra.mxu0 %v13917_v21  ;;  %v21456_v59 = vld [vmem:[#allocation9_spill] sm:$0xff] }
 0xb4e   : > { %13920 = vmatprep.subr.bf16.mxu0 %v13919_v51  ;;  %v21089_v25 = vsub.s32 %v12505_v45, %v21456_v59  ;;  %v13973_v45 = vpack.c.bf16 %v12619_v23, %v12618_v34  ;;  %v12669_v59 = vld [vmem:[%s21377_s6 + $0x3c8] sm:$0xff] }
 0xb50   : > { %13938 = vmatpush3.bf16.msra.mxu1 %v13937_v28 }
 0xb51   : > { %13940 = vmatprep.subr.bf16.mxu1 %v13939_v32  ;;  %13922 = vmatpush3.bf16.msra.mxu0 %v13921_v37 }
 0xb52   : > { %13924 = vmatprep.subr.bf16.mxu0 %v13923_v50  ;;  %v12631_v50 = vld [vmem:[%s21377_s6 + $0x298] sm:$0xff] }
 0xb53   : > { %v13963_v24 = vpack.c.bf16 %v12631_v50, %v12630_v8  ;;  %v12640_v50 = vld [vmem:[%s21377_s6 + $0x2e0] sm:$0xff] }
 0xb54   : > { %13942 = vmatpush3.bf16.msra.mxu1 %v13941_v17 }
 0xb55   : > { %13944 = vmatprep.subr.bf16.mxu1 %v13943_v12  ;;  %13926 = vmatpush3.bf16.msra.mxu0 %v13925_v43  ;;  %v12663_v43 = vld [vmem:[%s21377_s6 + $0x398] sm:$0xff] }
 0xb56   : > { %13960 = vmatprep.subr.bf16.mxu0 %v13959_v46  ;;  %v13995_v10 = vpack.c.bf16 %v12663_v43, %v12662_v27  ;;  %v12672_v27 = vld [vmem:[%s21377_s6 + $0x3e0] sm:$0xff]  ;;  %v12673_v43 = vld [vmem:[%s21377_s6 + $0x3e8] sm:$0xff] }
 0xb57   : > { %v14015_v19 = vpack.c.bf16 %v12673_v43, %v12672_v27  ;;  %v12682_v43 = vld [vmem:[%s21377_s6 + $0x430] sm:$0xff] }
 0xb58   : > { %13946 = vmatpush3.bf16.msra.mxu1 %v13945_v44  ;;  %v12615_v44 = vld [vmem:[%s21377_s6 + $0x218] sm:$0xff] }
 0xb59   : > { %13948 = vmatprep.subr.bf16.mxu1 %v13947_v31  ;;  %v13965_v53 = vpack.c.bf16 %v12615_v44, %v12614_v30  ;;  %v12624_v30 = vld [vmem:[%s21377_s6 + $0x260] sm:$0xff]  ;;  %v12625_v44 = vld [vmem:[%s21377_s6 + $0x268] sm:$0xff] }
 0xb5c   : > { %13950 = vmatpush3.bf16.msra.mxu1 %v13949_v11  ;;  %v12646_v11 = vld [vmem:[%s21377_s6 + $0x310] sm:$0xff] }
 0xb5d   : > { %13952 = vmatprep.subr.bf16.mxu1 %v13951_v18  ;;  %v12647_v18 = vld [vmem:[%s21377_s6 + $0x318] sm:$0xff] }
 0xb5e   : > { %v13997_v57 = vpack.c.bf16 %v12647_v18, %v12646_v11  ;;  %v12657_v11 = vld [vmem:[%s21377_s6 + $0x368] sm:$0xff]  ;;  %v13985_v18 = vpack.c.bf16 %v12625_v44, %v12624_v30 }
 0xb60   : > { %13954 = vmatpush3.bf16.msra.mxu1 %v13953_v1  ;;  %v12616_v1 = vld [vmem:[%s21377_s6 + $0x220] sm:$0xff] }
 0xb61   : > { %13956 = vmatprep.subr.bf16.mxu1 %v13955_v13  ;;  %v12617_v13 = vld [vmem:[%s21377_s6 + $0x228] sm:$0xff] }
 0xb64   : > { %13958 = vmatpush3.bf16.msra.mxu1 %v13957_v47  ;;  %v12635_v47 = vld [vmem:[%s21377_s6 + $0x2b8] sm:$0xff] }
 0xb65   : > { %13992 = vmatprep.subr.bf16.mxu1 %v13991_v63 }
 0xb6b   : > { %v12120_v26 = vpop.f32.mrb[108].mxu1 }
 0xb6c   : > { %v12459_v56 = vrot.slane %v12120_v26, %v21455_v0  ;;  %v12122_v62 = vpop.f32.mrb[109].mxu1  ;;  %v13999_v26 = vpack.c.bf16 %v12665_v60, %v12664_v39  ;;  %v12675_v39 = vld [vmem:[%s21377_s6 + $0x3f8] sm:$0xff] }
 0xb6d   : > { %v12463_v14 = vrot.slane %v12122_v62, %v21455_v0  ;;  %v12124_v49 = vpop.f32.mrb[110].mxu1  ;;  %v12649_v62 = vld [vmem:[%s21377_s6 + $0x328] sm:$0xff] }
 0xb6e   : > { %v12125_v20 = vpop.f32.mrb[111].mxu1  ;;  %v12666_v49 = vld [vmem:[%s21377_s6 + $0x3b0] sm:$0xff] }
 0xb6f   : > { %v12501_v16 = vcombine.low %v12459_v56, %v12463_v14  ;;  %v12648_v56 = vld [vmem:[%s21377_s6 + $0x320] sm:$0xff]  ;;  %v13969_v14 = vpack.c.bf16 %v12617_v13, %v12616_v1  ;;  %v12667_v20 = vld [vmem:[%s21377_s6 + $0x3b8] sm:$0xff] }
 0xb70   : > { %v14001_v46 = vpack.c.bf16 %v12649_v62, %v12648_v56  ;;  %v14003_v63 = vpack.c.bf16 %v12667_v20, %v12666_v49  ;;  %v12627_v1 = vld [vmem:[%s21377_s6 + $0x278] sm:$0xff]  ;;  %v14749_v62 = vmov 0.0|0.0  }
 0xb71   : > { %v12509_v15 = vrot.slane %v12501_v16, %v21089_v25  ;;  %v13971_v16 = vpack.c.bf16 %v12635_v47, %v12634_v29  ;;  %v12658_v29 = vld [vmem:[%s21377_s6 + $0x370] sm:$0xff]  ;;  %v12659_v47 = vld [vmem:[%s21377_s6 + $0x378] sm:$0xff] }
 0xb72   : > { %v14021_v56 = vpack.c.bf16 %v12659_v47, %v12658_v29 }
 0xba3   : > { %v12202_v36 = vpop.f32.mrb[112].mxu0 }
 0xba4   : > { %v12467_v40 = vrot.slane %v12202_v36, %v21455_v0  ;;  %v12204_v6 = vpop.f32.mrb[113].mxu0  ;;  %v12668_v36 = vld [vmem:[%s21377_s6 + $0x3c0] sm:$0xff] }
 0xba5   : > { %v12471_v21 = vrot.slane %v12204_v6, %v21455_v0  ;;  %v12206_v22 = vpop.f32.mrb[114].mxu0  ;;  %v12620_v6 = vld [vmem:[%s21377_s6 + $0x240] sm:$0xff] }
 0xba6   : > { %v12207_v51 = vpop.f32.mrb[115].mxu0  ;;  %v14005_v22 = vpack.c.bf16 %v12651_v55, %v12650_v9 }
 0xba7   : > { %v12502_v41 = vcombine.low %v12467_v40, %v12471_v21  ;;  %v13975_v40 = vpack.c.bf16 %v12637_v52, %v12636_v42  ;;  %v12621_v21 = vld [vmem:[%s21377_s6 + $0x248] sm:$0xff]  ;;  %v12638_v51 = vld [vmem:[%s21377_s6 + $0x2d0] sm:$0xff] }
 0xba9   : > { %v12516_v48 = vrot.slane %v12502_v41, %v21089_v25  ;;  %v14007_v41 = vpack.c.bf16 %v12669_v59, %v12668_v36 }
 0xbab   : > { %v12517_v28 = vcombine.low %v12509_v15, %v12516_v48  ;;  %v12639_v15 = vld [vmem:[%s21377_s6 + $0x2d8] sm:$0xff]  ;;  %v12652_v48 = vld [vmem:[%s21377_s6 + $0x340] sm:$0xff] }
 0xbac   : > { %v13979_v5 = vpack.c.bf16 %v12639_v15, %v12638_v51 }
 0xbad   : > { %v12545_v32 = vmul.f32 %v12517_v28, %v12453_v33  ;;  %v12653_v33 = vld [vmem:[%s21377_s6 + $0x348] sm:$0xff]  ;;  %v13977_v28 = vpack.c.bf16 %v12621_v21, %v12620_v6 }
 0xbae   : > { %v14009_v8 = vpack.c.bf16 %v12653_v33, %v12652_v48  ;;  %v12454_v6 = vld [vmem:[%s21376_s5 + $0x8] sm:$0xff]  ;;  %v12676_v48 = vld [vmem:[%s21377_s6 + $0x400] sm:$0xff] }
 0xbaf   : > { %v12704_v2 = vrot.slane %v12545_v32, %v21089_v25  ;;  %v12697_v37 = vcombine.high %v12545_v32, %v12545_v32  ;;  %v12670_v32 = vld [vmem:[%s21377_s6 + $0x3d0] sm:$0xff]  ;;  %v12677_v33 = vld [vmem:[%s21377_s6 + $0x408] sm:$0xff] }
 0xbb0   : > { %v14011_v38 = vpack.c.bf16 %v12671_v35, %v12670_v32 }
 0xbb1   : > { %v12712_v17 = vcombine.high %v12704_v2, %v12704_v2  ;;  %v12711_v12 = vrot.slane %v12697_v37, %v21089_v25  ;;  %v12623_v37 = vld [vmem:[%s21377_s6 + $0x258] sm:$0xff] }
 0xbb3   : > { %12812 = vmatprep.mubr.f32.mxu0 %v12712_v17  ;;  %v12713_v31 = vcombine.high %v12711_v12, %v12711_v12  ;;  %v12654_v17 = vld [vmem:[%s21377_s6 + $0x350] sm:$0xff] }
 0xbb4   : > { %12813 = vmatmul.mubr.f32.vlgmr.msra.gmra.mrb[124].mxu0 %v12704_v2  ;;  %v12622_v2 = vld [vmem:[%s21377_s6 + $0x250] sm:$0xff] }
 0xbb5   : > { %12882 = vmatprep.mubr.f32.mxu1 %v12713_v31  ;;  %13962 = vmatpush3.bf16.msra.mxu0 %v13961_v4  ;;  %v13981_v4 = vpack.c.bf16 %v12623_v37, %v12622_v2  ;;  %v14024_v2 = vpack.c.bf16 %v12677_v33, %v12676_v48 }
 0xbb6   : > { %12883 = vmatmul.mubr.f32.vlgmr.msra.gmra.mrb[120].mxu1 %v12711_v12  ;;  %13964 = vmatprep.subr.bf16.mxu0 %v13963_v24  ;;  %v12655_v12 = vld [vmem:[%s21377_s6 + $0x358] sm:$0xff]  ;;  %v13983_v24 = vpack.c.bf16 %v12641_v7, %v12640_v50 }
 0xbb7   : > { %13994 = vmatpush3.bf16.msra.mxu1 %v13993_v61  ;;  %v14013_v31 = vpack.c.bf16 %v12655_v12, %v12654_v17  ;;  %v12642_v61 = vld [vmem:[%s21377_s6 + $0x2f0] sm:$0xff]  ;;  %v12679_v50 = vld [vmem:[%s21377_s6 + $0x418] sm:$0xff]  ;;  %v12680_v17 = vld [vmem:[%s21377_s6 + $0x420] sm:$0xff] }
 0xbb8   : > { %13996 = vmatprep.subr.bf16.mxu1 %v13995_v10  ;;  %v12656_v10 = vld [vmem:[%s21377_s6 + $0x360] sm:$0xff]  ;;  %v13987_v60 = vpack.c.bf16 %v12643_v54, %v12642_v61  ;;  %v12681_v12 = vld [vmem:[%s21377_s6 + $0x428] sm:$0xff] }
 0xbb9   : > { %13966 = vmatpush3.bf16.msra.mxu0 %v13965_v53  ;;  %v12674_v53 = vld [vmem:[%s21377_s6 + $0x3f0] sm:$0xff]  ;;  %v14017_v13 = vpack.c.bf16 %v12657_v11, %v12656_v10 }
 0xbba   : > { %13968 = vmatprep.subr.bf16.mxu0 %v13967_v58  ;;  %v12626_v58 = vld [vmem:[%s21377_s6 + $0x270] sm:$0xff] }
 0xbbb   : > { %13998 = vmatpush3.bf16.msra.mxu1 %v13997_v57  ;;  %v14019_v57 = vpack.c.bf16 %v12675_v39, %v12674_v53  ;;  %v12455_v10 = vld [vmem:[%s21376_s5 + $0x10] sm:$0x3] }
 0xbbc   : > { %14000 = vmatprep.subr.bf16.mxu1 %v13999_v26  ;;  %v13989_v26 = vpack.c.bf16 %v12627_v1, %v12626_v58 }
 0xbbd   : > { %13970 = vmatpush3.bf16.msra.mxu0 %v13969_v14 }
 0xbbe   : > { %13972 = vmatprep.subr.bf16.mxu0 %v13971_v16 }
 0xbbf   : > { %14002 = vmatpush3.bf16.msra.mxu1 %v14001_v46 }
 0xbc0   : > { %14004 = vmatprep.subr.bf16.mxu1 %v14003_v63 }
 0xbc1   : > { %13974 = vmatpush3.bf16.msra.mxu0 %v13973_v45 }
 0xbc2   : > { %13976 = vmatprep.subr.bf16.mxu0 %v13975_v40 }
 0xbc3   : > { %14006 = vmatpush3.bf16.msra.mxu1 %v14005_v22 }
 0xbc4   : > { %14008 = vmatprep.subr.bf16.mxu1 %v14007_v41 }
 0xbc5   : > { %13978 = vmatpush3.bf16.msra.mxu0 %v13977_v28 }
 0xbc6   : > { %13980 = vmatprep.subr.bf16.mxu0 %v13979_v5 }
 0xbc7   : > { %14010 = vmatpush3.bf16.msra.mxu1 %v14009_v8  ;;  %v12678_v8 = vld [vmem:[%s21377_s6 + $0x410] sm:$0xff] }
 0xbc8   : > { %14012 = vmatprep.subr.bf16.mxu1 %v14011_v38  ;;  %v14027_v38 = vpack.c.bf16 %v12679_v50, %v12678_v8 }
 0xbc9   : > { %13982 = vmatpush3.bf16.msra.mxu0 %v13981_v4  ;;  %v14030_v4 = vpack.c.bf16 %v12681_v12, %v12680_v17 }
 0xbca   : > { %13984 = vmatprep.subr.bf16.mxu0 %v13983_v24  ;;  %v12683_v24 = vld [vmem:[%s21377_s6 + $0x438] sm:$0xff] }
 0xbcb   : > { %14014 = vmatpush3.bf16.msra.mxu1 %v14013_v31  ;;  %v14033_v54 = vpack.c.bf16 %v12683_v24, %v12682_v43 }
 0xbcc   : > { %14016 = vmatprep.subr.bf16.mxu1 %v14015_v19 }
 0xbcd   : > { %13986 = vmatpush3.bf16.msra.mxu0 %v13985_v18 }
 0xbce   : > { %13988 = vmatprep.subr.bf16.mxu0 %v13987_v60 }
 0xbcf   : > { %14018 = vmatpush3.bf16.msra.mxu1 %v14017_v13  ;;  %v12692_v13 = vpop.permute.xlu1 %12691 }
 0xbd0   : > { %14020 = vmatprep.subr.bf16.mxu1 %v14019_v57 }
 0xbd1   : > { %13990 = vmatpush3.bf16.msra.mxu0 %v13989_v26 }
 0xbd2   : > { %14023 = vmatprep.subr.bf16.mxu0 %v14749_v62 }
 0xbd3   : > { %14022 = vmatpush3.bf16.msra.mxu1 %v14021_v56 }
 0xbef   : > { %v12284_v14 = vpop.f32.mrb[112].mxu1 }
 0xbf0   : > { %v12475_v49 = vrot.slane %v12284_v14, %v21455_v0  ;;  %v12286_v20 = vpop.f32.mrb[113].mxu1 }
 0xbf1   : > { %v12479_v16 = vrot.slane %v12286_v20, %v21455_v0  ;;  %v12288_v34 = vpop.f32.mrb[114].mxu1 }
 0xbf2   : > { %v12289_v23 = vpop.f32.mrb[115].mxu1 }
 0xbf3   : > { %v12518_v46 = vcombine.low %v12475_v49, %v12479_v16 }
 0xbf5   : > { %v12526_v59 = vrot.slane %v12518_v46, %v21089_v25 }
 0xc03   : > { %v12366_v42 = vpop.f32.mrb[116].mxu0 }
 0xc04   : > { %v12483_v52 = vrot.slane %v12366_v42, %v21455_v0  ;;  %v12368_v63 = vpop.f32.mrb[117].mxu0 }
 0xc05   : > { %v12487_v9 = vrot.slane %v12368_v63, %v21455_v0  ;;  %v12370_v55 = vpop.f32.mrb[118].mxu0 }
 0xc06   : > { %v12371_v45 = vpop.f32.mrb[119].mxu0 }
 0xc07   : > { %v12519_v36 = vcombine.low %v12483_v52, %v12487_v9 }
 0xc09   : > { %v12533_v40 = vrot.slane %v12519_v36, %v21089_v25 }
 0xc0b   : > { %v12534_v21 = vcombine.low %v12526_v59, %v12533_v40  ;;  %v12447_v22 = vpop.f32.mrb[120].mxu0 }
 0xc0c   : > { %v13874_v51 = vpop.f32.mrb[121].mxu0 }
 0xc0d   : > { %v12546_v15 = vmul.f32 %v12534_v21, %v12454_v6  ;;  %v12450_v41 = vpop.f32.mrb[122].mxu0 }
 0xc0e   : > { %v13875_v28 = vpop.f32.mrb[123].mxu0 }
 0xc0f   : > { %v12721_v32 = vrot.slane %v12546_v15, %v21089_v25  ;;  %v12714_v35 = vcombine.high %v12546_v15, %v12546_v15 }
 0xc11   : > { %v12729_v5 = vcombine.high %v12721_v32, %v12721_v32  ;;  %v12728_v37 = vrot.slane %v12714_v35, %v21089_v25 }
 0xc13   : > { %12952 = vmatprep.mubr.f32.mxu0 %v12729_v5  ;;  %v12730_v7 = vcombine.high %v12728_v37, %v12728_v37 }
 0xc14   : > { %12953 = vmatmul.mubr.f32.vlgmr.msra.gmra.mrb[126].mxu0 %v12721_v32 }
 0xc15   : > { %14025 = vmatpush3.bf16.msra.mxu0 %v14024_v2  ;;  %13022 = vmatprep.mubr.f32.mxu1 %v12730_v7 }
 0xc16   : > { %13023 = vmatmul.mubr.f32.vlgmr.msra.gmra.mrb[122].mxu1 %v12728_v37  ;;  %14026 = vmatprep.subr.bf16.mxu0 %v14749_v62 }
 0xc17   : > { %13892 = vmatprep.mubr.msk.f32.mxu0 %vm14747_vm11, %v14746_v3 }
 0xc19   : > { %14028 = vmatpush3.bf16.msra.mxu0 %v14027_v38 }
 0xc1a   : > { %v13670_v27 = vpop.f32.mrb[116].mxu1  ;;  %14029 = vmatprep.subr.bf16.mxu0 %v14749_v62 }
 0xc1b   : > { %v13671_v30 = vpop.f32.mrb[117].mxu1 }
 0xc1c   : > { %v13672_v44 = vadd.f32 %v13671_v30, %v13670_v27  ;;  %v13673_v31 = vpop.f32.mrb[118].mxu1 }
 0xc1d   : > { %14031 = vmatpush3.bf16.msra.mxu0 %v14030_v4  ;;  %v13674_v61 = vpop.f32.mrb[119].mxu1 }
 0xc1e   : > { %v12448_v19 = vadd.f32 %v13672_v44, %v12447_v22  ;;  %14032 = vmatprep.subr.bf16.mxu0 %v14749_v62 }
 0xc20   : > { %v12491_v3 = vrot.slane %v12448_v19, %v21455_v0 }
 0xc21   : > { %14034 = vmatpush3.bf16.msra.mxu0 %v14033_v54 }
 0xc22   : > { %v12541_v11 = vrot.slane %v12491_v3, %v21089_v25 }
 0xc24   : > { %v12547_v18 = vmul.f32 %v12541_v11, %v12455_v10 }
 0xc26   : > { %v12737_v53 = vrot.slane %v12547_v18, %v21089_v25 }
 0xc28   : > { %13893 = vmatmul.mubr.msk.f32.vlgmr.msra.gmra.mrb[128].mxu0 %vm513_vm9, %v12737_v53 }
 0xc87   : > { %v13711_v39 = vpop.f32.mrb[124].mxu0 }
 0xc88   : > { %v13712_v60 = vpop.f32.mrb[125].mxu0 }
 0xc89   : > { %v13713_v58 = vadd.f32 %v13712_v60, %v13711_v39  ;;  %v13746_v1 = vpop.f32.mrb[120].mxu1 }
 0xc8a   : > { %v13747_v0 = vpop.f32.mrb[121].mxu1 }
 0xc8b   : > { %v12815_v57 = vadd.f32 %v13713_v58, %v12692_v13  ;;  %v13748_v29 = vadd.f32 %v13747_v0, %v13746_v1 }
 0xc8d   : > { %v12885_v47 = vadd.f32 %v13748_v29, %v12815_v57 }
 0xce7   : > { %v13781_v26 = vpop.f32.mrb[126].mxu0 }
 0xce8   : > { %v13782_v56 = vpop.f32.mrb[127].mxu0 }
 0xce9   : > { %v13783_v62 = vadd.f32 %v13782_v56, %v13781_v26  ;;  %v13816_v14 = vpop.f32.mrb[122].mxu1 }
 0xcea   : > { %v13817_v49 = vpop.f32.mrb[123].mxu1 }
 0xceb   : > { %v12955_v20 = vadd.f32 %v13783_v62, %v12885_v47  ;;  %v13818_v25 = vadd.f32 %v13817_v49, %v13816_v14 }
 0xced   : > { %v13025_v16 = vadd.f32 %v13818_v25, %v12955_v20 }
 0xcfb   : > { %v13094_v34 = vpop.f32.mrb[128].mxu0 }
 0xcfc   : > { %v13095_v23 = vadd.f32 %v13094_v34, %v13025_v16  ;;  %v13894_v46 = vpop.f32.mrb[129].mxu0 }
 0xcfe   : > { %13099 = vst.msk [vmem:[%s300_s24] sm:$0x3] %vm13098_vm12, %v13095_v23 }
 0xcff   : > { %14685 = shalt.err (!%p14682_p3)
}
 0xd00   : > { %s14686_s22 = scalar_lea.hbm %s21329_s28, 32  ;;  %s14690_s19 = scalar_lea.hbm %s21379_s8, 64 }
 0xd01   : > { %p14687_p4 = scmp.ne.s32.totalorder %s21329_s28, %s14686_s22  ;;  %p14691_p9 = scmp.lt.u32.totalorder %s21329_s28, %s21379_s8 }
 0xd02   : > { %p14692_p10 = scmp.lt.u32.totalorder %s14690_s19, %s14686_s22  ;;  %p14694_p12 = scmp.lt.u32.totalorder %s14686_s22, %s21329_s28 }
 0xd03   : > { %p14688_p7 = pnand %p14687_p4, %p14837_p5 }
 0xd04   : > { %p14693_p11 = por %p14692_p10, %p14691_p9 }
 0xd05   : > { %p14689_p8 = pneg %p14688_p7 }
 0xd06   : > { %p14695_p13 = por %p14694_p12, %p14693_p11 }
 0xd08   : > { %p14696_p0 = pnand %p14695_p13, %p14689_p8 }
 0xd0a   : > { %14699 = shalt.err (!%p14696_p0)
}
 0xd0b   : > { %14372 = dma.vmem_to_hbm [thread:$0]  (%p14837_p5), %s21331_s25, 32, %s21329_s28, %s13101_s11  }
 0xd0c PF: > { %p14378_p1 = scmp.ge.s32.totalorder %s14734_s10, 2  ;;  %s13126_s26 = sand.u32 1, %s14722_s29  }
 0xd0d   : > { %s13127_s27 = scalar_lea.sflag [#allocation7], %s13126_s26 }
 0xd0e   : > { %p14375_p2 = pnand %p14378_p1, %p14841_p6 }
 0xd10   : > { %14717 = dma.done.wait (!%p14375_p2), %s13127_s27, 32  }
 0xd11   : > { %14719 = vsyncadd (!%p14375_p2), %s13127_s27, 4294967264  ;;  %p20_p3 = scmp.ge.s32.totalorder %s14824_s12, 4   ;;  %s21457_s29 = smov %s14726_s30 }
 0xd12   : > { %s21458_s30 = smov %s14730_s9  ;;  %s21459_s9 = smov %s14835_s15 }
 0xd13   : > { %s21460_s10 = smov %s14824_s12  ;;  %22 = sbr.rel (!%p20_p3) target bundleno = 6 (0x6), region = 95 }
 0xd1a   :  { %13132 = vsyncpa [#allocation7], 1 }
 0xd1b   :  { %13134 = vsyncpa [#allocation7 + $0x1], 1 }

</bundles_post_ra>
